<compile_context>
chip_gen: v6e
topology: v6e:2x2x1
jax: 0.10.0
libtpu: 0.0.40
codegen_flags: <defaults>
</compile_context>

<pallas_src>
import numpy as np
import jax
import jax.numpy as jnp
from jax.experimental import pallas as pl
from jax.experimental.pallas import tpu as pltpu

f32 = jnp.float32


def _ceil_to(x, m):
    return -(-x // m) * m


def make_atari_repr_net(n, h, w, x_pad, y_pad, latent_depth):
    """Builds a jitted forward for NCHW input of shape (n, 3, h, w)."""
    hin, win = h + y_pad, w + x_pad            # after F.pad (right/bottom)

    def _half(s):                              # kernel=3, stride=2, padding=1
        return (s + 2 - 3) // 2 + 1

    # grid 0 = conv1 input, grids 1..4 = after conv1 / conv2 / av_pool1 / av_pool2
    HW = [(hin, win)]
    for _ in range(4):
        HW.append((_half(HW[-1][0]), _half(HW[-1][1])))
    h4, w4 = HW[4]

    Hp = [a + 2 for (a, _) in HW]              # padded plane height
    Wp = [b + 2 for (_, b) in HW]              # padded plane width
    Ls = [Hp[g] * Wp[g] for g in range(5)]     # flat padded plane length (lanes)
    Gs = [Wp[g] + 1 for g in range(5)]         # end padding for tap-slab slices
    Es = [Ls[g] + 2 * Gs[g] for g in range(5)]  # plane scratch lane extent
    counts = [float(n * HW[g][0] * HW[g][1]) for g in range(5)]  # BN counts

    # ---- baked constants: decimation/extraction matrices + interior masks ----
    def _dec_matrix(gi, go):
        # stride-2 (k=3, pad=1) conv/pool: output (ho, wo) equals the stride-1
        # full-grid result at padded position (2*ho+1, 2*wo+1).  Zero columns
        # rebuild the output grid's zero border and drop garbage border values.
        S = np.zeros((Ls[gi], Ls[go]), np.float32)
        Ho, Wo = HW[go]
        for ho in range(Ho):
            for wo in range(Wo):
                S[(2 * ho + 1) * Wp[gi] + (2 * wo + 1),
                  (ho + 1) * Wp[go] + (wo + 1)] = 1.0
        return S

    def _out_matrix():
        # grid-4 padded flat plane -> dense (h4*w4) interior (final conv output)
        S = np.zeros((Ls[4], h4 * w4), np.float32)
        for ho in range(h4):
            for wo in range(w4):
                S[(ho + 1) * Wp[4] + (wo + 1), ho * w4 + wo] = 1.0
        return S

    def _mask(g):
        m = np.zeros((Ls[g],), np.float32)
        H, W = HW[g]
        for r in range(1, H + 1):
            m[r * Wp[g] + 1:r * Wp[g] + 1 + W] = 1.0
        return m

    S_blocks = [_dec_matrix(0, 1), _dec_matrix(1, 2), _dec_matrix(2, 3),
                _dec_matrix(3, 4), _out_matrix()]
    masks = [_mask(1), _mask(2), _mask(3), _mask(4)]

    lane_w = max([s.shape[1] for s in S_blocks] + [m.shape[0] for m in masks])
    offs, rr = [], 0
    for s in S_blocks:                          # 8-aligned row starts
        offs.append(rr)
        rr += _ceil_to(s.shape[0], 8)
    mask_off = rr
    spk_rows = _ceil_to(rr + 4, 8)
    spack_np = np.zeros((spk_rows, lane_w), np.float32)
    for off, s in zip(offs, S_blocks):
        spack_np[off:off + s.shape[0], :s.shape[1]] = s
    for i, m in enumerate(masks):
        spack_np[mask_off + i, :m.shape[0]] = m
    spack_c = jnp.asarray(spack_np)

    # ---- weight / per-channel-param pack layout (all reshapes in the wrapper) ----
    KMAX = 144                                  # 9 taps * 16-channel groups
    r_w1, r_w2, r_w3 = 0, 16, 32
    r_res = 32 + _ceil_to(latent_depth, 16)
    wpk_rows = r_res + 16 * 8
    CR = max(10, latent_depth)

    # --------------------------------- kernel ---------------------------------
    def kernel(x_ref, wpk_ref, pvec_ref, spk_ref, out_ref,
               colT, P1, P2, P3, P4):
        planes = {1: P1, 2: P2, 3: P3, 4: P4}

        # One-time zeroing: colT's group-padding rows must be finite-zero (their
        # weight columns are zero), and the planes' end-padding lanes are read
        # by border (masked-out) outputs, so they must be finite too.
        colT[...] = jnp.zeros(colT.shape, f32)
        for p_ in (P1, P2, P3, P4):
            p_[...] = jnp.zeros(p_.shape, f32)

        def taps(g):
            wp = Wp[g]
            return [(kh - 1) * wp + (kw - 1) for kh in range(3) for kw in range(3)]

        def conv(src_ref, g, cin, cg, wmat):
            # Stride-1 full-grid 3x3 conv on grid g: 9 aligned slab copies into
            # colT (constant lane shift per tap), then ONE MXU dot per image.
            # Border lanes of the result are garbage; they are removed by the
            # following decimation matmul / interior mask.
            L, G = Ls[g], Gs[g]
            for k, d in enumerate(taps(g)):
                colT[:, cg * k:cg * k + cin, 0:L] = src_ref[:, :, G + d:G + d + L]
            K = 9 * cg
            return [jnp.dot(wmat, colT[ni, 0:K, 0:L], preferred_element_type=f32)
                    for ni in range(n)]

        def pool(g):
            # Full-grid 3x3 average pool (count_include_pad=True -> /9).
            p_, L, G = planes[g], Ls[g], Gs[g]
            acc = None
            for d in taps(g):
                t = p_[:, :, G + d:G + d + L]
                acc = t if acc is None else acc + t
            acc = acc * (1.0 / 9.0)
            return [acc[ni] for ni in range(n)]

        def decimate(ys, s_idx, bias):
            # Stride-2 decimation / final interior extraction as one 0/1
            # selection matmul per image (MXU slot, no strided reads).
            r0 = offs[s_idx]
            rows, cols = S_blocks[s_idx].shape
            S = spk_ref[r0:r0 + rows, 0:cols]
            return [jnp.dot(ys[ni] if bias is None else ys[ni] + bias, S,
                            preferred_element_type=f32) for ni in range(n)]

        def bn(ys, g, gamma, beta, relu):
            # torch BatchNorm2d training forward: batch mean, biased variance,
            # eps=1e-5; two-pass (centered) variance over interior lanes only,
            # fused affine (+ReLU); output re-masked so its zero border is
            # valid padding for the next conv/pool.
            m = spk_ref[mask_off + g - 1:mask_off + g, 0:Ls[g]]
            inv = 1.0 / counts[g]
            mean = sum(jnp.sum(y * m, axis=1, keepdims=True) for y in ys) * inv
            cs = [(y - mean) * m for y in ys]
            var = sum(jnp.sum(c * c, axis=1, keepdims=True) for c in cs) * inv
            scale = gamma * jax.lax.rsqrt(var + 1e-5)
            outs = []
            for c in cs:
                o = c * scale + beta
                if relu:
                    o = jnp.maximum(o, 0.0)
                outs.append(o * m)
            return outs

        def store_plane(g, acts):
            G, L = Gs[g], Ls[g]
            for ni in range(n):
                planes[g][ni, :, G:G + L] = acts[ni]

        def pcol(j, rows=10):
            return pvec_ref[0:rows, j:j + 1]            # (C, 1): channels on sublanes

        def resblock(g, xs, blk):
            p_ = planes[g]
            r0 = r_res + 16 * (2 * blk)
            w1 = wpk_ref[r0:r0 + 10, :]
            w2 = wpk_ref[r0 + 16:r0 + 26, :]
            t = bn(conv(p_, g, 10, 16, w1), g,
                   pcol(5 + 2 * blk), pcol(13 + 2 * blk), relu=True)
            store_plane(g, t)
            t = bn(conv(p_, g, 10, 16, w2), g,
                   pcol(6 + 2 * blk), pcol(14 + 2 * blk), relu=False)
            return [jnp.maximum(t[ni] + xs[ni], 0.0) for ni in range(n)]

        # conv1 (3 -> 10, stride 2) + BN + ReLU
        a = conv(x_ref, 0, 3, 8, wpk_ref[r_w1:r_w1 + 10, 0:72])
        a = decimate(a, 0, pcol(0))                     # +bias, -> grid 1
        a = bn(a, 1, pcol(1), pcol(2), relu=True)

        store_plane(1, a)
        a = resblock(1, a, 0)                           # res1
        store_plane(1, a)

        a = decimate(conv(P1, 1, 10, 16, wpk_ref[r_w2:r_w2 + 10, :]), 1, pcol(3))
        store_plane(2, a)                               # conv2 -> grid 2
        a = resblock(2, a, 1)                           # res2
        store_plane(2, a)

        a = decimate(pool(2), 2, None)                  # av_pool1 -> grid 3
        store_plane(3, a)
        a = resblock(3, a, 2)                           # res3
        store_plane(3, a)

        a = decimate(pool(3), 3, None)                  # av_pool2 -> grid 4
        store_plane(4, a)
        a = resblock(4, a, 3)                           # res4
        store_plane(4, a)

        # conv3 (10 -> latent, stride 1) + bias, interior extraction (NCHW)
        w3 = wpk_ref[r_w3:r_w3 + latent_depth, :]
        a = decimate(conv(P4, 4, 10, 16, w3), 4, pcol(4, rows=latent_depth))
        for ni in range(n):
            out_ref[ni] = a[ni]

    scratch = [
        pltpu.VMEM((n, KMAX, Ls[0]), f32),      # shared im2col buffer (colT)
        pltpu.VMEM((n, 10, Es[1]), f32),        # grid-1..4 activation planes
        pltpu.VMEM((n, 10, Es[2]), f32),
        pltpu.VMEM((n, 10, Es[3]), f32),
        pltpu.VMEM((n, 10, Es[4]), f32),
    ]
    vmem = pl.BlockSpec(memory_space=pltpu.MemorySpace.VMEM)
    call = pl.pallas_call(
        kernel,
        out_shape=jax.ShapeDtypeStruct((n, latent_depth, h4 * w4), f32),
        in_specs=[vmem] * 4,
        out_specs=vmem,
        scratch_shapes=scratch,
    )

    def _pack_conv(w_hwio, cg):
        # (3, 3, Cin, Cout) HWIO -> (Cout, 9*cg) transposed-im2col pack, each
        # tap's channel group zero-padded to cg (so the kernel's aligned colT
        # group-padding rows always multiply exact zeros).
        cin, cout = w_hwio.shape[2], w_hwio.shape[3]
        t = jnp.transpose(w_hwio, (3, 0, 1, 2)).reshape(cout, 9, cin)
        t = jnp.pad(t, ((0, 0), (0, 0), (0, cg - cin)))
        return t.reshape(cout, 9 * cg)

    @jax.jit
    def forward(x_nchw, params):
        # input glue: cast, F.pad (right/bottom) + conv pad-1 border, flatten
        # the plane onto the lane axis, add tap-slab end padding.  No transposes.
        xq = x_nchw.astype(f32)
        xq = jnp.pad(xq, ((0, 0), (0, 0), (1, y_pad + 1), (1, x_pad + 1)))
        xq = jnp.pad(xq.reshape(n, 3, Ls[0]), ((0, 0), (0, 0), (Gs[0], Gs[0])))

        # all conv weights -> one (rows, 144) pack (reshapes hoisted out of kernel)
        wpk = jnp.zeros((wpk_rows, KMAX), f32)
        wpk = wpk.at[r_w1:r_w1 + 10, 0:72].set(_pack_conv(params['c1w'], 8))
        wpk = wpk.at[r_w2:r_w2 + 10, :].set(_pack_conv(params['c2w'], 16))
        wpk = wpk.at[r_w3:r_w3 + latent_depth, :].set(_pack_conv(params['c3w'], 16))
        for i in range(4):
            for j in range(2):
                r0 = r_res + 16 * (2 * i + j)
                wpk = wpk.at[r0:r0 + 10, :].set(_pack_conv(params['res_w'][i, j], 16))

        # all per-channel vectors -> one (C, 21) pack (channels on sublanes)
        pvec = jnp.zeros((CR, 21), f32)
        pvec = pvec.at[0:10, 0].set(params['c1b'])
        pvec = pvec.at[0:10, 1].set(params['bn1_g'])
        pvec = pvec.at[0:10, 2].set(params['bn1_b'])
        pvec = pvec.at[0:10, 3].set(params['c2b'])
        pvec = pvec.at[0:latent_depth, 4].set(params['c3b'])
        for i in range(4):
            for j in range(2):
                pvec = pvec.at[0:10, 5 + 2 * i + j].set(params['res_g'][i, j])
                pvec = pvec.at[0:10, 13 + 2 * i + j].set(params['res_b'][i, j])

        out = call(xq, wpk, pvec, spack_c)
        return out.reshape(n, latent_depth, h4, w4)      # NCHW, no transpose

    return forward


def init_params(key, latent_depth):
    """Deterministic synthetic parameters (shapes from the module __init__)."""
    ks = jax.random.split(key, 11)

    def wconv(k, shape):                        # HWIO conv weights
        fan_in = shape[0] * shape[1] * shape[2]
        return (jax.random.normal(k, shape) / np.sqrt(fan_in)).astype(jnp.float32)

    return {
        'c1w': wconv(ks[0], (3, 3, 3, 10)),
        'c1b': (0.1 * jax.random.normal(ks[1], (10,))).astype(jnp.float32),
        'bn1_g': (1.0 + 0.1 * jax.random.normal(ks[2], (10,))).astype(jnp.float32),
        'bn1_b': (0.1 * jax.random.normal(ks[3], (10,))).astype(jnp.float32),
        # 4 ResBlocks x 2 convs / 2 BNs each (bias-free convs)
        'res_w': (jax.random.normal(ks[4], (4, 2, 3, 3, 10, 10)) /
                  np.sqrt(90.0)).astype(jnp.float32),
        'res_g': (1.0 + 0.1 * jax.random.normal(ks[5], (4, 2, 10))).astype(jnp.float32),
        'res_b': (0.1 * jax.random.normal(ks[6], (4, 2, 10))).astype(jnp.float32),
        'c2w': wconv(ks[7], (3, 3, 10, 10)),
        'c2b': (0.1 * jax.random.normal(ks[8], (10,))).astype(jnp.float32),
        'c3w': wconv(ks[9], (3, 3, 10, latent_depth)),
        'c3b': (0.1 * jax.random.normal(ks[10], (latent_depth,))).astype(jnp.float32),
    }


# ---------------- pure-JAX reference (numerical sanity check) ----------------
def _conv_ref(x, w, b, stride):
    y = jax.lax.conv_general_dilated(
        x, w, window_strides=(stride, stride), padding=((1, 1), (1, 1)),
        dimension_numbers=('NHWC', 'HWIO', 'NHWC'))
    return y if b is None else y + b


def _bn_ref(x, g, b):
    m = jnp.mean(x, axis=(0, 1, 2), keepdims=True)
    v = jnp.mean(jnp.square(x - m), axis=(0, 1, 2), keepdims=True)
    return (x - m) * jax.lax.rsqrt(v + 1e-5) * g + b


def _avgpool_ref(x):
    s = jax.lax.reduce_window(x, 0.0, jax.lax.add, (1, 3, 3, 1), (1, 2, 2, 1),
                              ((0, 0), (1, 1), (1, 1), (0, 0)))
    return s / 9.0


def _resblock_ref(x, w1, g1, b1, w2, g2, b2):
    t = jax.nn.relu(_bn_ref(_conv_ref(x, w1, None, 1), g1, b1))
    t = _bn_ref(_conv_ref(t, w2, None, 1), g2, b2)
    return jax.nn.relu(t + x)


def reference_forward(x_nchw, p, x_pad, y_pad):
    x = jnp.transpose(x_nchw.astype(jnp.float32), (0, 2, 3, 1))
    x = jnp.pad(x, ((0, 0), (0, y_pad), (0, x_pad), (0, 0)))
    a = jax.nn.relu(_bn_ref(_conv_ref(x, p['c1w'], p['c1b'], 2),
                            p['bn1_g'], p['bn1_b']))
    a = _resblock_ref(a, p['res_w'][0, 0], p['res_g'][0, 0], p['res_b'][0, 0],
                      p['res_w'][0, 1], p['res_g'][0, 1], p['res_b'][0, 1])
    a = _conv_ref(a, p['c2w'], p['c2b'], 2)
    a = _resblock_ref(a, p['res_w'][1, 0], p['res_g'][1, 0], p['res_b'][1, 0],
                      p['res_w'][1, 1], p['res_g'][1, 1], p['res_b'][1, 1])
    a = _avgpool_ref(a)
    a = _resblock_ref(a, p['res_w'][2, 0], p['res_g'][2, 0], p['res_b'][2, 0],
                      p['res_w'][2, 1], p['res_g'][2, 1], p['res_b'][2, 1])
    a = _avgpool_ref(a)
    a = _resblock_ref(a, p['res_w'][3, 0], p['res_g'][3, 0], p['res_b'][3, 0],
                      p['res_w'][3, 1], p['res_g'][3, 1], p['res_b'][3, 1])
    a = _conv_ref(a, p['c3w'], p['c3b'], 1)
    return jnp.transpose(a, (0, 3, 1, 2))


if __name__ == "__main__":
    N, H, W = 2, 14, 14              # small Atari-like frame
    X_PAD, Y_PAD, LATENT = 2, 2, 16  # pads to 16x16; latent_depth = 16

    key = jax.random.PRNGKey(0)
    kx, kp = jax.random.split(key)
    x = jax.random.randint(kx, (N, 3, H, W), 0, 256, dtype=jnp.int32).astype(jnp.uint8)
    params = init_params(kp, LATENT)

    fwd = make_atari_repr_net(N, H, W, X_PAD, Y_PAD, LATENT)
    out = jax.block_until_ready(fwd(x, params))          # (N, LATENT, 1, 1)

    ref = jax.block_until_ready(reference_forward(x, params, X_PAD, Y_PAD))
    assert out.shape == ref.shape, (out.shape, ref.shape)
    assert bool(jnp.allclose(out, ref, rtol=2e-2, atol=2e-2)), \
        float(jnp.max(jnp.abs(out - ref)))
    print("KERNEL_OK")
</pallas_src>

<mosaic_0001>
module attributes {stable_mosaic.version = 11 : i64} {
  func.func @kernel(%arg0: memref<2x3x362xf32, #tpu.memory_space<vmem>>, %arg1: memref<176x144xf32, #tpu.memory_space<vmem>>, %arg2: memref<16x21xf32, #tpu.memory_space<vmem>>, %arg3: memref<512x100xf32, #tpu.memory_space<vmem>>, %arg4: memref<2x16x1xf32, #tpu.memory_space<vmem>>, %arg5: memref<2x144x324xf32, #tpu.memory_space<vmem>>, %arg6: memref<2x10x122xf32, #tpu.memory_space<vmem>>, %arg7: memref<2x10x50xf32, #tpu.memory_space<vmem>>, %arg8: memref<2x10x26xf32, #tpu.memory_space<vmem>>, %arg9: memref<2x10x17xf32, #tpu.memory_space<vmem>>) attributes {dimension_semantics = [], scalar_prefetch = 0 : i64, scratch_operands = 5 : i64, tpu.core_type = #tpu.core_type<tc>} {
    %cst = arith.constant 0.000000e+00 : f32
    %0 = vector.broadcast %cst : f32 to vector<2x144x324xf32>
    %c0 = arith.constant 0 : index
    %c0_0 = arith.constant 0 : index
    %c0_1 = arith.constant 0 : index
    %1 = vector.load %arg5[%c0, %c0_0, %c0_1] : memref<2x144x324xf32, #tpu.memory_space<vmem>>, vector<2x144x324xf32>
    tpu.vector_store %arg5[%c0, %c0_0, %c0_1], %0 {strides = array<i32>} : memref<2x144x324xf32, #tpu.memory_space<vmem>>, vector<2x144x324xf32>,
    %cst_2 = arith.constant 0.000000e+00 : f32
    %2 = vector.broadcast %cst_2 : f32 to vector<2x10x122xf32>
    %c0_3 = arith.constant 0 : index
    %c0_4 = arith.constant 0 : index
    %c0_5 = arith.constant 0 : index
    %3 = vector.load %arg6[%c0_3, %c0_4, %c0_5] : memref<2x10x122xf32, #tpu.memory_space<vmem>>, vector<2x10x122xf32>
    tpu.vector_store %arg6[%c0_3, %c0_4, %c0_5], %2 {strides = array<i32>} : memref<2x10x122xf32, #tpu.memory_space<vmem>>, vector<2x10x122xf32>,
    %cst_6 = arith.constant 0.000000e+00 : f32
    %4 = vector.broadcast %cst_6 : f32 to vector<2x10x50xf32>
    %c0_7 = arith.constant 0 : index
    %c0_8 = arith.constant 0 : index
    %c0_9 = arith.constant 0 : index
    %5 = vector.load %arg7[%c0_7, %c0_8, %c0_9] : memref<2x10x50xf32, #tpu.memory_space<vmem>>, vector<2x10x50xf32>
    tpu.vector_store %arg7[%c0_7, %c0_8, %c0_9], %4 {strides = array<i32>} : memref<2x10x50xf32, #tpu.memory_space<vmem>>, vector<2x10x50xf32>,
    %cst_10 = arith.constant 0.000000e+00 : f32
    %6 = vector.broadcast %cst_10 : f32 to vector<2x10x26xf32>
    %c0_11 = arith.constant 0 : index
    %c0_12 = arith.constant 0 : index
    %c0_13 = arith.constant 0 : index
    %7 = vector.load %arg8[%c0_11, %c0_12, %c0_13] : memref<2x10x26xf32, #tpu.memory_space<vmem>>, vector<2x10x26xf32>
    tpu.vector_store %arg8[%c0_11, %c0_12, %c0_13], %6 {strides = array<i32>} : memref<2x10x26xf32, #tpu.memory_space<vmem>>, vector<2x10x26xf32>,
    %cst_14 = arith.constant 0.000000e+00 : f32
    %8 = vector.broadcast %cst_14 : f32 to vector<2x10x17xf32>
    %c0_15 = arith.constant 0 : index
    %c0_16 = arith.constant 0 : index
    %c0_17 = arith.constant 0 : index
    %9 = vector.load %arg9[%c0_15, %c0_16, %c0_17] : memref<2x10x17xf32, #tpu.memory_space<vmem>>, vector<2x10x17xf32>
    tpu.vector_store %arg9[%c0_15, %c0_16, %c0_17], %8 {strides = array<i32>} : memref<2x10x17xf32, #tpu.memory_space<vmem>>, vector<2x10x17xf32>,
    %c0_18 = arith.constant 0 : index
    %c0_19 = arith.constant 0 : index
    %10 = vector.load %arg1[%c0_18, %c0_19] : memref<176x144xf32, #tpu.memory_space<vmem>>, vector<10x72xf32>
    %c0_20 = arith.constant 0 : index
    %c0_21 = arith.constant 0 : index
    %c0_22 = arith.constant 0 : index
    %11 = vector.load %arg0[%c0_20, %c0_21, %c0_22] : memref<2x3x362xf32, #tpu.memory_space<vmem>>, vector<2x3x324xf32>
    %c0_23 = arith.constant 0 : index
    %c0_24 = arith.constant 0 : index
    %c0_25 = arith.constant 0 : index
    %12 = vector.load %arg5[%c0_23, %c0_24, %c0_25] : memref<2x144x324xf32, #tpu.memory_space<vmem>>, vector<2x3x324xf32>
    tpu.vector_store %arg5[%c0_23, %c0_24, %c0_25], %11 {strides = array<i32>} : memref<2x144x324xf32, #tpu.memory_space<vmem>>, vector<2x3x324xf32>,
    %c0_26 = arith.constant 0 : index
    %c0_27 = arith.constant 0 : index
    %c1 = arith.constant 1 : index
    %13 = vector.load %arg0[%c0_26, %c0_27, %c1] : memref<2x3x362xf32, #tpu.memory_space<vmem>>, vector<2x3x324xf32>
    %c0_28 = arith.constant 0 : index
    %c8 = arith.constant 8 : index
    %c0_29 = arith.constant 0 : index
    %14 = vector.load %arg5[%c0_28, %c8, %c0_29] : memref<2x144x324xf32, #tpu.memory_space<vmem>>, vector<2x3x324xf32>
    tpu.vector_store %arg5[%c0_28, %c8, %c0_29], %13 {strides = array<i32>} : memref<2x144x324xf32, #tpu.memory_space<vmem>>, vector<2x3x324xf32>,
    %c0_30 = arith.constant 0 : index
    %c0_31 = arith.constant 0 : index
    %c2 = arith.constant 2 : index
    %15 = vector.load %arg0[%c0_30, %c0_31, %c2] : memref<2x3x362xf32, #tpu.memory_space<vmem>>, vector<2x3x324xf32>
    %c0_32 = arith.constant 0 : index
    %c16 = arith.constant 16 : index
    %c0_33 = arith.constant 0 : index
    %16 = vector.load %arg5[%c0_32, %c16, %c0_33] : memref<2x144x324xf32, #tpu.memory_space<vmem>>, vector<2x3x324xf32>
    tpu.vector_store %arg5[%c0_32, %c16, %c0_33], %15 {strides = array<i32>} : memref<2x144x324xf32, #tpu.memory_space<vmem>>, vector<2x3x324xf32>,
    %c0_34 = arith.constant 0 : index
    %c0_35 = arith.constant 0 : index
    %c18 = arith.constant 18 : index
    %17 = vector.load %arg0[%c0_34, %c0_35, %c18] : memref<2x3x362xf32, #tpu.memory_space<vmem>>, vector<2x3x324xf32>
    %c0_36 = arith.constant 0 : index
    %c24 = arith.constant 24 : index
    %c0_37 = arith.constant 0 : index
    %18 = vector.load %arg5[%c0_36, %c24, %c0_37] : memref<2x144x324xf32, #tpu.memory_space<vmem>>, vector<2x3x324xf32>
    tpu.vector_store %arg5[%c0_36, %c24, %c0_37], %17 {strides = array<i32>} : memref<2x144x324xf32, #tpu.memory_space<vmem>>, vector<2x3x324xf32>,
    %c0_38 = arith.constant 0 : index
    %c0_39 = arith.constant 0 : index
    %c19 = arith.constant 19 : index
    %19 = vector.load %arg0[%c0_38, %c0_39, %c19] : memref<2x3x362xf32, #tpu.memory_space<vmem>>, vector<2x3x324xf32>
    %c0_40 = arith.constant 0 : index
    %c32 = arith.constant 32 : index
    %c0_41 = arith.constant 0 : index
    %20 = vector.load %arg5[%c0_40, %c32, %c0_41] : memref<2x144x324xf32, #tpu.memory_space<vmem>>, vector<2x3x324xf32>
    tpu.vector_store %arg5[%c0_40, %c32, %c0_41], %19 {strides = array<i32>} : memref<2x144x324xf32, #tpu.memory_space<vmem>>, vector<2x3x324xf32>,
    %c0_42 = arith.constant 0 : index
    %c0_43 = arith.constant 0 : index
    %c20 = arith.constant 20 : index
    %21 = vector.load %arg0[%c0_42, %c0_43, %c20] : memref<2x3x362xf32, #tpu.memory_space<vmem>>, vector<2x3x324xf32>
    %c0_44 = arith.constant 0 : index
    %c40 = arith.constant 40 : index
    %c0_45 = arith.constant 0 : index
    %22 = vector.load %arg5[%c0_44, %c40, %c0_45] : memref<2x144x324xf32, #tpu.memory_space<vmem>>, vector<2x3x324xf32>
    tpu.vector_store %arg5[%c0_44, %c40, %c0_45], %21 {strides = array<i32>} : memref<2x144x324xf32, #tpu.memory_space<vmem>>, vector<2x3x324xf32>,
    %c0_46 = arith.constant 0 : index
    %c0_47 = arith.constant 0 : index
    %c36 = arith.constant 36 : index
    %23 = vector.load %arg0[%c0_46, %c0_47, %c36] : memref<2x3x362xf32, #tpu.memory_space<vmem>>, vector<2x3x324xf32>
    %c0_48 = arith.constant 0 : index
    %c48 = arith.constant 48 : index
    %c0_49 = arith.constant 0 : index
    %24 = vector.load %arg5[%c0_48, %c48, %c0_49] : memref<2x144x324xf32, #tpu.memory_space<vmem>>, vector<2x3x324xf32>
    tpu.vector_store %arg5[%c0_48, %c48, %c0_49], %23 {strides = array<i32>} : memref<2x144x324xf32, #tpu.memory_space<vmem>>, vector<2x3x324xf32>,
    %c0_50 = arith.constant 0 : index
    %c0_51 = arith.constant 0 : index
    %c37 = arith.constant 37 : index
    %25 = vector.load %arg0[%c0_50, %c0_51, %c37] : memref<2x3x362xf32, #tpu.memory_space<vmem>>, vector<2x3x324xf32>
    %c0_52 = arith.constant 0 : index
    %c56 = arith.constant 56 : index
    %c0_53 = arith.constant 0 : index
    %26 = vector.load %arg5[%c0_52, %c56, %c0_53] : memref<2x144x324xf32, #tpu.memory_space<vmem>>, vector<2x3x324xf32>
    tpu.vector_store %arg5[%c0_52, %c56, %c0_53], %25 {strides = array<i32>} : memref<2x144x324xf32, #tpu.memory_space<vmem>>, vector<2x3x324xf32>,
    %c0_54 = arith.constant 0 : index
    %c0_55 = arith.constant 0 : index
    %c38 = arith.constant 38 : index
    %27 = vector.load %arg0[%c0_54, %c0_55, %c38] : memref<2x3x362xf32, #tpu.memory_space<vmem>>, vector<2x3x324xf32>
    %c0_56 = arith.constant 0 : index
    %c64 = arith.constant 64 : index
    %c0_57 = arith.constant 0 : index
    %28 = vector.load %arg5[%c0_56, %c64, %c0_57] : memref<2x144x324xf32, #tpu.memory_space<vmem>>, vector<2x3x324xf32>
    tpu.vector_store %arg5[%c0_56, %c64, %c0_57], %27 {strides = array<i32>} : memref<2x144x324xf32, #tpu.memory_space<vmem>>, vector<2x3x324xf32>,
    %c0_58 = arith.constant 0 : index
    %c0_59 = arith.constant 0 : index
    %c0_60 = arith.constant 0 : index
    %29 = vector.load %arg5[%c0_58, %c0_59, %c0_60] : memref<2x144x324xf32, #tpu.memory_space<vmem>>, vector<1x72x324xf32>
    %30 = vector.shape_cast %29 : vector<1x72x324xf32> to vector<72x324xf32>
    %cst_61 = arith.constant dense<0.000000e+00> : vector<10x324xf32>
    %31 = tpu.matmul %10, %30, %cst_61 {dimension_numbers = #tpu.dot_dimension_numbers<[1], [0], [0], [1], [0, 0, 1, 1], [], []>} : vector<10x72xf32>, vector<72x324xf32>, vector<10x324xf32> -> vector<10x324xf32>
    %c1_62 = arith.constant 1 : index
    %c0_63 = arith.constant 0 : index
    %c0_64 = arith.constant 0 : index
    %32 = vector.load %arg5[%c1_62, %c0_63, %c0_64] : memref<2x144x324xf32, #tpu.memory_space<vmem>>, vector<1x72x324xf32>
    %33 = vector.shape_cast %32 : vector<1x72x324xf32> to vector<72x324xf32>
    %cst_65 = arith.constant dense<0.000000e+00> : vector<10x324xf32>
    %34 = tpu.matmul %10, %33, %cst_65 {dimension_numbers = #tpu.dot_dimension_numbers<[1], [0], [0], [1], [0, 0, 1, 1], [], []>} : vector<10x72xf32>, vector<72x324xf32>, vector<10x324xf32> -> vector<10x324xf32>
    %c0_66 = arith.constant 0 : index
    %c0_67 = arith.constant 0 : index
    %35 = vector.load %arg2[%c0_66, %c0_67] : memref<16x21xf32, #tpu.memory_space<vmem>>, vector<10x1xf32>
    %c0_68 = arith.constant 0 : index
    %c0_69 = arith.constant 0 : index
    %36 = vector.load %arg3[%c0_68, %c0_69] : memref<512x100xf32, #tpu.memory_space<vmem>>, vector<324x100xf32>
    %37 = vector.broadcast %35 : vector<10x1xf32> to vector<10x324xf32>
    %38 = arith.addf %31, %37 : vector<10x324xf32>
    %cst_70 = arith.constant dense<0.000000e+00> : vector<10x100xf32>
    %39 = tpu.matmul %38, %36, %cst_70 {dimension_numbers = #tpu.dot_dimension_numbers<[1], [0], [0], [1], [0, 0, 1, 1], [], []>} : vector<10x324xf32>, vector<324x100xf32>, vector<10x100xf32> -> vector<10x100xf32>
    %40 = vector.broadcast %35 : vector<10x1xf32> to vector<10x324xf32>
    %41 = arith.addf %34, %40 : vector<10x324xf32>
    %cst_71 = arith.constant dense<0.000000e+00> : vector<10x100xf32>
    %42 = tpu.matmul %41, %36, %cst_71 {dimension_numbers = #tpu.dot_dimension_numbers<[1], [0], [0], [1], [0, 0, 1, 1], [], []>} : vector<10x324xf32>, vector<324x100xf32>, vector<10x100xf32> -> vector<10x100xf32>
    %c0_72 = arith.constant 0 : index
    %c1_73 = arith.constant 1 : index
    %43 = vector.load %arg2[%c0_72, %c1_73] : memref<16x21xf32, #tpu.memory_space<vmem>>, vector<10x1xf32>
    %c0_74 = arith.constant 0 : index
    %c2_75 = arith.constant 2 : index
    %44 = vector.load %arg2[%c0_74, %c2_75] : memref<16x21xf32, #tpu.memory_space<vmem>>, vector<10x1xf32>
    %c504 = arith.constant 504 : index
    %c0_76 = arith.constant 0 : index
    %45 = vector.load %arg3[%c504, %c0_76] : memref<512x100xf32, #tpu.memory_space<vmem>>, vector<1x100xf32>
    %46 = vector.broadcast %45 : vector<1x100xf32> to vector<10x100xf32>
    %47 = arith.mulf %39, %46 : vector<10x100xf32>
    %cst_77 = arith.constant dense<0.000000e+00> : vector<10xf32>
    %48 = vector.multi_reduction <add>, %47, %cst_77 [1] : vector<10x100xf32> to vector<10xf32>
    %49 = vector.shape_cast %48 : vector<10xf32> to vector<10x1xf32>
    %cst_78 = arith.constant 0.000000e+00 : f32
    %50 = vector.broadcast %cst_78 : f32 to vector<10x1xf32>
    %51 = arith.addf %50, %49 : vector<10x1xf32>
    %52 = vector.broadcast %45 : vector<1x100xf32> to vector<10x100xf32>
    %53 = arith.mulf %42, %52 : vector<10x100xf32>
    %cst_79 = arith.constant dense<0.000000e+00> : vector<10xf32>
    %54 = vector.multi_reduction <add>, %53, %cst_79 [1] : vector<10x100xf32> to vector<10xf32>
    %55 = vector.shape_cast %54 : vector<10xf32> to vector<10x1xf32>
    %56 = arith.addf %51, %55 : vector<10x1xf32>
    %cst_80 = arith.constant 7.812500e-03 : f32
    %57 = vector.broadcast %cst_80 : f32 to vector<10x1xf32>
    %58 = arith.mulf %56, %57 : vector<10x1xf32>
    %59 = vector.broadcast %58 : vector<10x1xf32> to vector<10x100xf32>
    %60 = arith.subf %39, %59 : vector<10x100xf32>
    %61 = vector.broadcast %45 : vector<1x100xf32> to vector<10x100xf32>
    %62 = arith.mulf %60, %61 : vector<10x100xf32>
    %63 = vector.broadcast %58 : vector<10x1xf32> to vector<10x100xf32>
    %64 = arith.subf %42, %63 : vector<10x100xf32>
    %65 = vector.broadcast %45 : vector<1x100xf32> to vector<10x100xf32>
    %66 = arith.mulf %64, %65 : vector<10x100xf32>
    %67 = arith.mulf %62, %62 : vector<10x100xf32>
    %cst_81 = arith.constant dense<0.000000e+00> : vector<10xf32>
    %68 = vector.multi_reduction <add>, %67, %cst_81 [1] : vector<10x100xf32> to vector<10xf32>
    %69 = vector.shape_cast %68 : vector<10xf32> to vector<10x1xf32>
    %cst_82 = arith.constant 0.000000e+00 : f32
    %70 = vector.broadcast %cst_82 : f32 to vector<10x1xf32>
    %71 = arith.addf %70, %69 : vector<10x1xf32>
    %72 = arith.mulf %66, %66 : vector<10x100xf32>
    %cst_83 = arith.constant dense<0.000000e+00> : vector<10xf32>
    %73 = vector.multi_reduction <add>, %72, %cst_83 [1] : vector<10x100xf32> to vector<10xf32>
    %74 = vector.shape_cast %73 : vector<10xf32> to vector<10x1xf32>
    %75 = arith.addf %71, %74 : vector<10x1xf32>
    %cst_84 = arith.constant 7.812500e-03 : f32
    %76 = vector.broadcast %cst_84 : f32 to vector<10x1xf32>
    %77 = arith.mulf %75, %76 : vector<10x1xf32>
    %cst_85 = arith.constant 9.99999974E-6 : f32
    %78 = vector.broadcast %cst_85 : f32 to vector<10x1xf32>
    %79 = arith.addf %77, %78 : vector<10x1xf32>
    %80 = math.rsqrt %79 : vector<10x1xf32>
    %81 = arith.mulf %43, %80 : vector<10x1xf32>
    %82 = vector.broadcast %81 : vector<10x1xf32> to vector<10x100xf32>
    %83 = arith.mulf %62, %82 : vector<10x100xf32>
    %84 = vector.broadcast %44 : vector<10x1xf32> to vector<10x100xf32>
    %85 = arith.addf %83, %84 : vector<10x100xf32>
    %cst_86 = arith.constant 0.000000e+00 : f32
    %86 = vector.broadcast %cst_86 : f32 to vector<10x100xf32>
    %87 = arith.maximumf %85, %86 : vector<10x100xf32>
    %88 = vector.broadcast %45 : vector<1x100xf32> to vector<10x100xf32>
    %89 = arith.mulf %87, %88 : vector<10x100xf32>
    %90 = vector.broadcast %81 : vector<10x1xf32> to vector<10x100xf32>
    %91 = arith.mulf %66, %90 : vector<10x100xf32>
    %92 = vector.broadcast %44 : vector<10x1xf32> to vector<10x100xf32>
    %93 = arith.addf %91, %92 : vector<10x100xf32>
    %cst_87 = arith.constant 0.000000e+00 : f32
    %94 = vector.broadcast %cst_87 : f32 to vector<10x100xf32>
    %95 = arith.maximumf %93, %94 : vector<10x100xf32>
    %96 = vector.broadcast %45 : vector<1x100xf32> to vector<10x100xf32>
    %97 = arith.mulf %95, %96 : vector<10x100xf32>
    %c0_88 = arith.constant 0 : index
    %c0_89 = arith.constant 0 : index
    %c11 = arith.constant 11 : index
    %98 = vector.load %arg6[%c0_88, %c0_89, %c11] : memref<2x10x122xf32, #tpu.memory_space<vmem>>, vector<1x10x100xf32>
    %99 = vector.shape_cast %98 : vector<1x10x100xf32> to vector<10x100xf32>
    %100 = vector.shape_cast %89 : vector<10x100xf32> to vector<1x10x100xf32>
    tpu.vector_store %arg6[%c0_88, %c0_89, %c11], %100 {strides = array<i32>} : memref<2x10x122xf32, #tpu.memory_space<vmem>>, vector<1x10x100xf32>,
    %c1_90 = arith.constant 1 : index
    %c0_91 = arith.constant 0 : index
    %c11_92 = arith.constant 11 : index
    %101 = vector.load %arg6[%c1_90, %c0_91, %c11_92] : memref<2x10x122xf32, #tpu.memory_space<vmem>>, vector<1x10x100xf32>
    %102 = vector.shape_cast %101 : vector<1x10x100xf32> to vector<10x100xf32>
    %103 = vector.shape_cast %97 : vector<10x100xf32> to vector<1x10x100xf32>
    tpu.vector_store %arg6[%c1_90, %c0_91, %c11_92], %103 {strides = array<i32>} : memref<2x10x122xf32, #tpu.memory_space<vmem>>, vector<1x10x100xf32>,
    %c48_93 = arith.constant 48 : index
    %c0_94 = arith.constant 0 : index
    %104 = vector.load %arg1[%c48_93, %c0_94] : memref<176x144xf32, #tpu.memory_space<vmem>>, vector<10x144xf32>
    %c64_95 = arith.constant 64 : index
    %c0_96 = arith.constant 0 : index
    %105 = vector.load %arg1[%c64_95, %c0_96] : memref<176x144xf32, #tpu.memory_space<vmem>>, vector<10x144xf32>
    %c0_97 = arith.constant 0 : index
    %c0_98 = arith.constant 0 : index
    %c0_99 = arith.constant 0 : index
    %106 = vector.load %arg6[%c0_97, %c0_98, %c0_99] : memref<2x10x122xf32, #tpu.memory_space<vmem>>, vector<2x10x100xf32>
    %c0_100 = arith.constant 0 : index
    %c0_101 = arith.constant 0 : index
    %c0_102 = arith.constant 0 : index
    %107 = vector.load %arg5[%c0_100, %c0_101, %c0_102] : memref<2x144x324xf32, #tpu.memory_space<vmem>>, vector<2x10x100xf32>
    tpu.vector_store %arg5[%c0_100, %c0_101, %c0_102], %106 {strides = array<i32>} : memref<2x144x324xf32, #tpu.memory_space<vmem>>, vector<2x10x100xf32>,
    %c0_103 = arith.constant 0 : index
    %c0_104 = arith.constant 0 : index
    %c1_105 = arith.constant 1 : index
    %108 = vector.load %arg6[%c0_103, %c0_104, %c1_105] : memref<2x10x122xf32, #tpu.memory_space<vmem>>, vector<2x10x100xf32>
    %c0_106 = arith.constant 0 : index
    %c16_107 = arith.constant 16 : index
    %c0_108 = arith.constant 0 : index
    %109 = vector.load %arg5[%c0_106, %c16_107, %c0_108] : memref<2x144x324xf32, #tpu.memory_space<vmem>>, vector<2x10x100xf32>
    tpu.vector_store %arg5[%c0_106, %c16_107, %c0_108], %108 {strides = array<i32>} : memref<2x144x324xf32, #tpu.memory_space<vmem>>, vector<2x10x100xf32>,
    %c0_109 = arith.constant 0 : index
    %c0_110 = arith.constant 0 : index
    %c2_111 = arith.constant 2 : index
    %110 = vector.load %arg6[%c0_109, %c0_110, %c2_111] : memref<2x10x122xf32, #tpu.memory_space<vmem>>, vector<2x10x100xf32>
    %c0_112 = arith.constant 0 : index
    %c32_113 = arith.constant 32 : index
    %c0_114 = arith.constant 0 : index
    %111 = vector.load %arg5[%c0_112, %c32_113, %c0_114] : memref<2x144x324xf32, #tpu.memory_space<vmem>>, vector<2x10x100xf32>
    tpu.vector_store %arg5[%c0_112, %c32_113, %c0_114], %110 {strides = array<i32>} : memref<2x144x324xf32, #tpu.memory_space<vmem>>, vector<2x10x100xf32>,
    %c0_115 = arith.constant 0 : index
    %c0_116 = arith.constant 0 : index
    %c10 = arith.constant 10 : index
    %112 = vector.load %arg6[%c0_115, %c0_116, %c10] : memref<2x10x122xf32, #tpu.memory_space<vmem>>, vector<2x10x100xf32>
    %c0_117 = arith.constant 0 : index
    %c48_118 = arith.constant 48 : index
    %c0_119 = arith.constant 0 : index
    %113 = vector.load %arg5[%c0_117, %c48_118, %c0_119] : memref<2x144x324xf32, #tpu.memory_space<vmem>>, vector<2x10x100xf32>
    tpu.vector_store %arg5[%c0_117, %c48_118, %c0_119], %112 {strides = array<i32>} : memref<2x144x324xf32, #tpu.memory_space<vmem>>, vector<2x10x100xf32>,
    %c0_120 = arith.constant 0 : index
    %c0_121 = arith.constant 0 : index
    %c11_122 = arith.constant 11 : index
    %114 = vector.load %arg6[%c0_120, %c0_121, %c11_122] : memref<2x10x122xf32, #tpu.memory_space<vmem>>, vector<2x10x100xf32>
    %c0_123 = arith.constant 0 : index
    %c64_124 = arith.constant 64 : index
    %c0_125 = arith.constant 0 : index
    %115 = vector.load %arg5[%c0_123, %c64_124, %c0_125] : memref<2x144x324xf32, #tpu.memory_space<vmem>>, vector<2x10x100xf32>
    tpu.vector_store %arg5[%c0_123, %c64_124, %c0_125], %114 {strides = array<i32>} : memref<2x144x324xf32, #tpu.memory_space<vmem>>, vector<2x10x100xf32>,
    %c0_126 = arith.constant 0 : index
    %c0_127 = arith.constant 0 : index
    %c12 = arith.constant 12 : index
    %116 = vector.load %arg6[%c0_126, %c0_127, %c12] : memref<2x10x122xf32, #tpu.memory_space<vmem>>, vector<2x10x100xf32>
    %c0_128 = arith.constant 0 : index
    %c80 = arith.constant 80 : index
    %c0_129 = arith.constant 0 : index
    %117 = vector.load %arg5[%c0_128, %c80, %c0_129] : memref<2x144x324xf32, #tpu.memory_space<vmem>>, vector<2x10x100xf32>
    tpu.vector_store %arg5[%c0_128, %c80, %c0_129], %116 {strides = array<i32>} : memref<2x144x324xf32, #tpu.memory_space<vmem>>, vector<2x10x100xf32>,
    %c0_130 = arith.constant 0 : index
    %c0_131 = arith.constant 0 : index
    %c20_132 = arith.constant 20 : index
    %118 = vector.load %arg6[%c0_130, %c0_131, %c20_132] : memref<2x10x122xf32, #tpu.memory_space<vmem>>, vector<2x10x100xf32>
    %c0_133 = arith.constant 0 : index
    %c96 = arith.constant 96 : index
    %c0_134 = arith.constant 0 : index
    %119 = vector.load %arg5[%c0_133, %c96, %c0_134] : memref<2x144x324xf32, #tpu.memory_space<vmem>>, vector<2x10x100xf32>
    tpu.vector_store %arg5[%c0_133, %c96, %c0_134], %118 {strides = array<i32>} : memref<2x144x324xf32, #tpu.memory_space<vmem>>, vector<2x10x100xf32>,
    %c0_135 = arith.constant 0 : index
    %c0_136 = arith.constant 0 : index
    %c21 = arith.constant 21 : index
    %120 = vector.load %arg6[%c0_135, %c0_136, %c21] : memref<2x10x122xf32, #tpu.memory_space<vmem>>, vector<2x10x100xf32>
    %c0_137 = arith.constant 0 : index
    %c112 = arith.constant 112 : index
    %c0_138 = arith.constant 0 : index
    %121 = vector.load %arg5[%c0_137, %c112, %c0_138] : memref<2x144x324xf32, #tpu.memory_space<vmem>>, vector<2x10x100xf32>
    tpu.vector_store %arg5[%c0_137, %c112, %c0_138], %120 {strides = array<i32>} : memref<2x144x324xf32, #tpu.memory_space<vmem>>, vector<2x10x100xf32>,
    %c0_139 = arith.constant 0 : index
    %c0_140 = arith.constant 0 : index
    %c22 = arith.constant 22 : index
    %122 = vector.load %arg6[%c0_139, %c0_140, %c22] : memref<2x10x122xf32, #tpu.memory_space<vmem>>, vector<2x10x100xf32>
    %c0_141 = arith.constant 0 : index
    %c128 = arith.constant 128 : index
    %c0_142 = arith.constant 0 : index
    %123 = vector.load %arg5[%c0_141, %c128, %c0_142] : memref<2x144x324xf32, #tpu.memory_space<vmem>>, vector<2x10x100xf32>
    tpu.vector_store %arg5[%c0_141, %c128, %c0_142], %122 {strides = array<i32>} : memref<2x144x324xf32, #tpu.memory_space<vmem>>, vector<2x10x100xf32>,
    %c0_143 = arith.constant 0 : index
    %c0_144 = arith.constant 0 : index
    %c0_145 = arith.constant 0 : index
    %124 = vector.load %arg5[%c0_143, %c0_144, %c0_145] : memref<2x144x324xf32, #tpu.memory_space<vmem>>, vector<1x144x100xf32>
    %125 = vector.shape_cast %124 : vector<1x144x100xf32> to vector<144x100xf32>
    %cst_146 = arith.constant dense<0.000000e+00> : vector<10x100xf32>
    %126 = tpu.matmul %104, %125, %cst_146 {dimension_numbers = #tpu.dot_dimension_numbers<[1], [0], [0], [1], [0, 0, 1, 1], [], []>} : vector<10x144xf32>, vector<144x100xf32>, vector<10x100xf32> -> vector<10x100xf32>
    %c1_147 = arith.constant 1 : index
    %c0_148 = arith.constant 0 : index
    %c0_149 = arith.constant 0 : index
    %127 = vector.load %arg5[%c1_147, %c0_148, %c0_149] : memref<2x144x324xf32, #tpu.memory_space<vmem>>, vector<1x144x100xf32>
    %128 = vector.shape_cast %127 : vector<1x144x100xf32> to vector<144x100xf32>
    %cst_150 = arith.constant dense<0.000000e+00> : vector<10x100xf32>
    %129 = tpu.matmul %104, %128, %cst_150 {dimension_numbers = #tpu.dot_dimension_numbers<[1], [0], [0], [1], [0, 0, 1, 1], [], []>} : vector<10x144xf32>, vector<144x100xf32>, vector<10x100xf32> -> vector<10x100xf32>
    %c0_151 = arith.constant 0 : index
    %c5 = arith.constant 5 : index
    %130 = vector.load %arg2[%c0_151, %c5] : memref<16x21xf32, #tpu.memory_space<vmem>>, vector<10x1xf32>
    %c0_152 = arith.constant 0 : index
    %c13 = arith.constant 13 : index
    %131 = vector.load %arg2[%c0_152, %c13] : memref<16x21xf32, #tpu.memory_space<vmem>>, vector<10x1xf32>
    %c504_153 = arith.constant 504 : index
    %c0_154 = arith.constant 0 : index
    %132 = vector.load %arg3[%c504_153, %c0_154] : memref<512x100xf32, #tpu.memory_space<vmem>>, vector<1x100xf32>
    %133 = vector.broadcast %132 : vector<1x100xf32> to vector<10x100xf32>
    %134 = arith.mulf %126, %133 : vector<10x100xf32>
    %cst_155 = arith.constant dense<0.000000e+00> : vector<10xf32>
    %135 = vector.multi_reduction <add>, %134, %cst_155 [1] : vector<10x100xf32> to vector<10xf32>
    %136 = vector.shape_cast %135 : vector<10xf32> to vector<10x1xf32>
    %cst_156 = arith.constant 0.000000e+00 : f32
    %137 = vector.broadcast %cst_156 : f32 to vector<10x1xf32>
    %138 = arith.addf %137, %136 : vector<10x1xf32>
    %139 = vector.broadcast %132 : vector<1x100xf32> to vector<10x100xf32>
    %140 = arith.mulf %129, %139 : vector<10x100xf32>
    %cst_157 = arith.constant dense<0.000000e+00> : vector<10xf32>
    %141 = vector.multi_reduction <add>, %140, %cst_157 [1] : vector<10x100xf32> to vector<10xf32>
    %142 = vector.shape_cast %141 : vector<10xf32> to vector<10x1xf32>
    %143 = arith.addf %138, %142 : vector<10x1xf32>
    %cst_158 = arith.constant 7.812500e-03 : f32
    %144 = vector.broadcast %cst_158 : f32 to vector<10x1xf32>
    %145 = arith.mulf %143, %144 : vector<10x1xf32>
    %146 = vector.broadcast %145 : vector<10x1xf32> to vector<10x100xf32>
    %147 = arith.subf %126, %146 : vector<10x100xf32>
    %148 = vector.broadcast %132 : vector<1x100xf32> to vector<10x100xf32>
    %149 = arith.mulf %147, %148 : vector<10x100xf32>
    %150 = vector.broadcast %145 : vector<10x1xf32> to vector<10x100xf32>
    %151 = arith.subf %129, %150 : vector<10x100xf32>
    %152 = vector.broadcast %132 : vector<1x100xf32> to vector<10x100xf32>
    %153 = arith.mulf %151, %152 : vector<10x100xf32>
    %154 = arith.mulf %149, %149 : vector<10x100xf32>
    %cst_159 = arith.constant dense<0.000000e+00> : vector<10xf32>
    %155 = vector.multi_reduction <add>, %154, %cst_159 [1] : vector<10x100xf32> to vector<10xf32>
    %156 = vector.shape_cast %155 : vector<10xf32> to vector<10x1xf32>
    %cst_160 = arith.constant 0.000000e+00 : f32
    %157 = vector.broadcast %cst_160 : f32 to vector<10x1xf32>
    %158 = arith.addf %157, %156 : vector<10x1xf32>
    %159 = arith.mulf %153, %153 : vector<10x100xf32>
    %cst_161 = arith.constant dense<0.000000e+00> : vector<10xf32>
    %160 = vector.multi_reduction <add>, %159, %cst_161 [1] : vector<10x100xf32> to vector<10xf32>
    %161 = vector.shape_cast %160 : vector<10xf32> to vector<10x1xf32>
    %162 = arith.addf %158, %161 : vector<10x1xf32>
    %cst_162 = arith.constant 7.812500e-03 : f32
    %163 = vector.broadcast %cst_162 : f32 to vector<10x1xf32>
    %164 = arith.mulf %162, %163 : vector<10x1xf32>
    %cst_163 = arith.constant 9.99999974E-6 : f32
    %165 = vector.broadcast %cst_163 : f32 to vector<10x1xf32>
    %166 = arith.addf %164, %165 : vector<10x1xf32>
    %167 = math.rsqrt %166 : vector<10x1xf32>
    %168 = arith.mulf %130, %167 : vector<10x1xf32>
    %169 = vector.broadcast %168 : vector<10x1xf32> to vector<10x100xf32>
    %170 = arith.mulf %149, %169 : vector<10x100xf32>
    %171 = vector.broadcast %131 : vector<10x1xf32> to vector<10x100xf32>
    %172 = arith.addf %170, %171 : vector<10x100xf32>
    %cst_164 = arith.constant 0.000000e+00 : f32
    %173 = vector.broadcast %cst_164 : f32 to vector<10x100xf32>
    %174 = arith.maximumf %172, %173 : vector<10x100xf32>
    %175 = vector.broadcast %132 : vector<1x100xf32> to vector<10x100xf32>
    %176 = arith.mulf %174, %175 : vector<10x100xf32>
    %177 = vector.broadcast %168 : vector<10x1xf32> to vector<10x100xf32>
    %178 = arith.mulf %153, %177 : vector<10x100xf32>
    %179 = vector.broadcast %131 : vector<10x1xf32> to vector<10x100xf32>
    %180 = arith.addf %178, %179 : vector<10x100xf32>
    %cst_165 = arith.constant 0.000000e+00 : f32
    %181 = vector.broadcast %cst_165 : f32 to vector<10x100xf32>
    %182 = arith.maximumf %180, %181 : vector<10x100xf32>
    %183 = vector.broadcast %132 : vector<1x100xf32> to vector<10x100xf32>
    %184 = arith.mulf %182, %183 : vector<10x100xf32>
    %c0_166 = arith.constant 0 : index
    %c0_167 = arith.constant 0 : index
    %c11_168 = arith.constant 11 : index
    %185 = vector.load %arg6[%c0_166, %c0_167, %c11_168] : memref<2x10x122xf32, #tpu.memory_space<vmem>>, vector<1x10x100xf32>
    %186 = vector.shape_cast %185 : vector<1x10x100xf32> to vector<10x100xf32>
    %187 = vector.shape_cast %176 : vector<10x100xf32> to vector<1x10x100xf32>
    tpu.vector_store %arg6[%c0_166, %c0_167, %c11_168], %187 {strides = array<i32>} : memref<2x10x122xf32, #tpu.memory_space<vmem>>, vector<1x10x100xf32>,
    %c1_169 = arith.constant 1 : index
    %c0_170 = arith.constant 0 : index
    %c11_171 = arith.constant 11 : index
    %188 = vector.load %arg6[%c1_169, %c0_170, %c11_171] : memref<2x10x122xf32, #tpu.memory_space<vmem>>, vector<1x10x100xf32>
    %189 = vector.shape_cast %188 : vector<1x10x100xf32> to vector<10x100xf32>
    %190 = vector.shape_cast %184 : vector<10x100xf32> to vector<1x10x100xf32>
    tpu.vector_store %arg6[%c1_169, %c0_170, %c11_171], %190 {strides = array<i32>} : memref<2x10x122xf32, #tpu.memory_space<vmem>>, vector<1x10x100xf32>,
    %c0_172 = arith.constant 0 : index
    %c0_173 = arith.constant 0 : index
    %c0_174 = arith.constant 0 : index
    %191 = vector.load %arg6[%c0_172, %c0_173, %c0_174] : memref<2x10x122xf32, #tpu.memory_space<vmem>>, vector<2x10x100xf32>
    %c0_175 = arith.constant 0 : index
    %c0_176 = arith.constant 0 : index
    %c0_177 = arith.constant 0 : index
    %192 = vector.load %arg5[%c0_175, %c0_176, %c0_177] : memref<2x144x324xf32, #tpu.memory_space<vmem>>, vector<2x10x100xf32>
    tpu.vector_store %arg5[%c0_175, %c0_176, %c0_177], %191 {strides = array<i32>} : memref<2x144x324xf32, #tpu.memory_space<vmem>>, vector<2x10x100xf32>,
    %c0_178 = arith.constant 0 : index
    %c0_179 = arith.constant 0 : index
    %c1_180 = arith.constant 1 : index
    %193 = vector.load %arg6[%c0_178, %c0_179, %c1_180] : memref<2x10x122xf32, #tpu.memory_space<vmem>>, vector<2x10x100xf32>
    %c0_181 = arith.constant 0 : index
    %c16_182 = arith.constant 16 : index
    %c0_183 = arith.constant 0 : index
    %194 = vector.load %arg5[%c0_181, %c16_182, %c0_183] : memref<2x144x324xf32, #tpu.memory_space<vmem>>, vector<2x10x100xf32>
    tpu.vector_store %arg5[%c0_181, %c16_182, %c0_183], %193 {strides = array<i32>} : memref<2x144x324xf32, #tpu.memory_space<vmem>>, vector<2x10x100xf32>,
    %c0_184 = arith.constant 0 : index
    %c0_185 = arith.constant 0 : index
    %c2_186 = arith.constant 2 : index
    %195 = vector.load %arg6[%c0_184, %c0_185, %c2_186] : memref<2x10x122xf32, #tpu.memory_space<vmem>>, vector<2x10x100xf32>
    %c0_187 = arith.constant 0 : index
    %c32_188 = arith.constant 32 : index
    %c0_189 = arith.constant 0 : index
    %196 = vector.load %arg5[%c0_187, %c32_188, %c0_189] : memref<2x144x324xf32, #tpu.memory_space<vmem>>, vector<2x10x100xf32>
    tpu.vector_store %arg5[%c0_187, %c32_188, %c0_189], %195 {strides = array<i32>} : memref<2x144x324xf32, #tpu.memory_space<vmem>>, vector<2x10x100xf32>,
    %c0_190 = arith.constant 0 : index
    %c0_191 = arith.constant 0 : index
    %c10_192 = arith.constant 10 : index
    %197 = vector.load %arg6[%c0_190, %c0_191, %c10_192] : memref<2x10x122xf32, #tpu.memory_space<vmem>>, vector<2x10x100xf32>
    %c0_193 = arith.constant 0 : index
    %c48_194 = arith.constant 48 : index
    %c0_195 = arith.constant 0 : index
    %198 = vector.load %arg5[%c0_193, %c48_194, %c0_195] : memref<2x144x324xf32, #tpu.memory_space<vmem>>, vector<2x10x100xf32>
    tpu.vector_store %arg5[%c0_193, %c48_194, %c0_195], %197 {strides = array<i32>} : memref<2x144x324xf32, #tpu.memory_space<vmem>>, vector<2x10x100xf32>,
    %c0_196 = arith.constant 0 : index
    %c0_197 = arith.constant 0 : index
    %c11_198 = arith.constant 11 : index
    %199 = vector.load %arg6[%c0_196, %c0_197, %c11_198] : memref<2x10x122xf32, #tpu.memory_space<vmem>>, vector<2x10x100xf32>
    %c0_199 = arith.constant 0 : index
    %c64_200 = arith.constant 64 : index
    %c0_201 = arith.constant 0 : index
    %200 = vector.load %arg5[%c0_199, %c64_200, %c0_201] : memref<2x144x324xf32, #tpu.memory_space<vmem>>, vector<2x10x100xf32>
    tpu.vector_store %arg5[%c0_199, %c64_200, %c0_201], %199 {strides = array<i32>} : memref<2x144x324xf32, #tpu.memory_space<vmem>>, vector<2x10x100xf32>,
    %c0_202 = arith.constant 0 : index
    %c0_203 = arith.constant 0 : index
    %c12_204 = arith.constant 12 : index
    %201 = vector.load %arg6[%c0_202, %c0_203, %c12_204] : memref<2x10x122xf32, #tpu.memory_space<vmem>>, vector<2x10x100xf32>
    %c0_205 = arith.constant 0 : index
    %c80_206 = arith.constant 80 : index
    %c0_207 = arith.constant 0 : index
    %202 = vector.load %arg5[%c0_205, %c80_206, %c0_207] : memref<2x144x324xf32, #tpu.memory_space<vmem>>, vector<2x10x100xf32>
    tpu.vector_store %arg5[%c0_205, %c80_206, %c0_207], %201 {strides = array<i32>} : memref<2x144x324xf32, #tpu.memory_space<vmem>>, vector<2x10x100xf32>,
    %c0_208 = arith.constant 0 : index
    %c0_209 = arith.constant 0 : index
    %c20_210 = arith.constant 20 : index
    %203 = vector.load %arg6[%c0_208, %c0_209, %c20_210] : memref<2x10x122xf32, #tpu.memory_space<vmem>>, vector<2x10x100xf32>
    %c0_211 = arith.constant 0 : index
    %c96_212 = arith.constant 96 : index
    %c0_213 = arith.constant 0 : index
    %204 = vector.load %arg5[%c0_211, %c96_212, %c0_213] : memref<2x144x324xf32, #tpu.memory_space<vmem>>, vector<2x10x100xf32>
    tpu.vector_store %arg5[%c0_211, %c96_212, %c0_213], %203 {strides = array<i32>} : memref<2x144x324xf32, #tpu.memory_space<vmem>>, vector<2x10x100xf32>,
    %c0_214 = arith.constant 0 : index
    %c0_215 = arith.constant 0 : index
    %c21_216 = arith.constant 21 : index
    %205 = vector.load %arg6[%c0_214, %c0_215, %c21_216] : memref<2x10x122xf32, #tpu.memory_space<vmem>>, vector<2x10x100xf32>
    %c0_217 = arith.constant 0 : index
    %c112_218 = arith.constant 112 : index
    %c0_219 = arith.constant 0 : index
    %206 = vector.load %arg5[%c0_217, %c112_218, %c0_219] : memref<2x144x324xf32, #tpu.memory_space<vmem>>, vector<2x10x100xf32>
    tpu.vector_store %arg5[%c0_217, %c112_218, %c0_219], %205 {strides = array<i32>} : memref<2x144x324xf32, #tpu.memory_space<vmem>>, vector<2x10x100xf32>,
    %c0_220 = arith.constant 0 : index
    %c0_221 = arith.constant 0 : index
    %c22_222 = arith.constant 22 : index
    %207 = vector.load %arg6[%c0_220, %c0_221, %c22_222] : memref<2x10x122xf32, #tpu.memory_space<vmem>>, vector<2x10x100xf32>
    %c0_223 = arith.constant 0 : index
    %c128_224 = arith.constant 128 : index
    %c0_225 = arith.constant 0 : index
    %208 = vector.load %arg5[%c0_223, %c128_224, %c0_225] : memref<2x144x324xf32, #tpu.memory_space<vmem>>, vector<2x10x100xf32>
    tpu.vector_store %arg5[%c0_223, %c128_224, %c0_225], %207 {strides = array<i32>} : memref<2x144x324xf32, #tpu.memory_space<vmem>>, vector<2x10x100xf32>,
    %c0_226 = arith.constant 0 : index
    %c0_227 = arith.constant 0 : index
    %c0_228 = arith.constant 0 : index
    %209 = vector.load %arg5[%c0_226, %c0_227, %c0_228] : memref<2x144x324xf32, #tpu.memory_space<vmem>>, vector<1x144x100xf32>
    %210 = vector.shape_cast %209 : vector<1x144x100xf32> to vector<144x100xf32>
    %cst_229 = arith.constant dense<0.000000e+00> : vector<10x100xf32>
    %211 = tpu.matmul %105, %210, %cst_229 {dimension_numbers = #tpu.dot_dimension_numbers<[1], [0], [0], [1], [0, 0, 1, 1], [], []>} : vector<10x144xf32>, vector<144x100xf32>, vector<10x100xf32> -> vector<10x100xf32>
    %c1_230 = arith.constant 1 : index
    %c0_231 = arith.constant 0 : index
    %c0_232 = arith.constant 0 : index
    %212 = vector.load %arg5[%c1_230, %c0_231, %c0_232] : memref<2x144x324xf32, #tpu.memory_space<vmem>>, vector<1x144x100xf32>
    %213 = vector.shape_cast %212 : vector<1x144x100xf32> to vector<144x100xf32>
    %cst_233 = arith.constant dense<0.000000e+00> : vector<10x100xf32>
    %214 = tpu.matmul %105, %213, %cst_233 {dimension_numbers = #tpu.dot_dimension_numbers<[1], [0], [0], [1], [0, 0, 1, 1], [], []>} : vector<10x144xf32>, vector<144x100xf32>, vector<10x100xf32> -> vector<10x100xf32>
    %c0_234 = arith.constant 0 : index
    %c6 = arith.constant 6 : index
    %215 = vector.load %arg2[%c0_234, %c6] : memref<16x21xf32, #tpu.memory_space<vmem>>, vector<10x1xf32>
    %c0_235 = arith.constant 0 : index
    %c14 = arith.constant 14 : index
    %216 = vector.load %arg2[%c0_235, %c14] : memref<16x21xf32, #tpu.memory_space<vmem>>, vector<10x1xf32>
    %c504_236 = arith.constant 504 : index
    %c0_237 = arith.constant 0 : index
    %217 = vector.load %arg3[%c504_236, %c0_237] : memref<512x100xf32, #tpu.memory_space<vmem>>, vector<1x100xf32>
    %218 = vector.broadcast %217 : vector<1x100xf32> to vector<10x100xf32>
    %219 = arith.mulf %211, %218 : vector<10x100xf32>
    %cst_238 = arith.constant dense<0.000000e+00> : vector<10xf32>
    %220 = vector.multi_reduction <add>, %219, %cst_238 [1] : vector<10x100xf32> to vector<10xf32>
    %221 = vector.shape_cast %220 : vector<10xf32> to vector<10x1xf32>
    %cst_239 = arith.constant 0.000000e+00 : f32
    %222 = vector.broadcast %cst_239 : f32 to vector<10x1xf32>
    %223 = arith.addf %222, %221 : vector<10x1xf32>
    %224 = vector.broadcast %217 : vector<1x100xf32> to vector<10x100xf32>
    %225 = arith.mulf %214, %224 : vector<10x100xf32>
    %cst_240 = arith.constant dense<0.000000e+00> : vector<10xf32>
    %226 = vector.multi_reduction <add>, %225, %cst_240 [1] : vector<10x100xf32> to vector<10xf32>
    %227 = vector.shape_cast %226 : vector<10xf32> to vector<10x1xf32>
    %228 = arith.addf %223, %227 : vector<10x1xf32>
    %cst_241 = arith.constant 7.812500e-03 : f32
    %229 = vector.broadcast %cst_241 : f32 to vector<10x1xf32>
    %230 = arith.mulf %228, %229 : vector<10x1xf32>
    %231 = vector.broadcast %230 : vector<10x1xf32> to vector<10x100xf32>
    %232 = arith.subf %211, %231 : vector<10x100xf32>
    %233 = vector.broadcast %217 : vector<1x100xf32> to vector<10x100xf32>
    %234 = arith.mulf %232, %233 : vector<10x100xf32>
    %235 = vector.broadcast %230 : vector<10x1xf32> to vector<10x100xf32>
    %236 = arith.subf %214, %235 : vector<10x100xf32>
    %237 = vector.broadcast %217 : vector<1x100xf32> to vector<10x100xf32>
    %238 = arith.mulf %236, %237 : vector<10x100xf32>
    %239 = arith.mulf %234, %234 : vector<10x100xf32>
    %cst_242 = arith.constant dense<0.000000e+00> : vector<10xf32>
    %240 = vector.multi_reduction <add>, %239, %cst_242 [1] : vector<10x100xf32> to vector<10xf32>
    %241 = vector.shape_cast %240 : vector<10xf32> to vector<10x1xf32>
    %cst_243 = arith.constant 0.000000e+00 : f32
    %242 = vector.broadcast %cst_243 : f32 to vector<10x1xf32>
    %243 = arith.addf %242, %241 : vector<10x1xf32>
    %244 = arith.mulf %238, %238 : vector<10x100xf32>
    %cst_244 = arith.constant dense<0.000000e+00> : vector<10xf32>
    %245 = vector.multi_reduction <add>, %244, %cst_244 [1] : vector<10x100xf32> to vector<10xf32>
    %246 = vector.shape_cast %245 : vector<10xf32> to vector<10x1xf32>
    %247 = arith.addf %243, %246 : vector<10x1xf32>
    %cst_245 = arith.constant 7.812500e-03 : f32
    %248 = vector.broadcast %cst_245 : f32 to vector<10x1xf32>
    %249 = arith.mulf %247, %248 : vector<10x1xf32>
    %cst_246 = arith.constant 9.99999974E-6 : f32
    %250 = vector.broadcast %cst_246 : f32 to vector<10x1xf32>
    %251 = arith.addf %249, %250 : vector<10x1xf32>
    %252 = math.rsqrt %251 : vector<10x1xf32>
    %253 = arith.mulf %215, %252 : vector<10x1xf32>
    %254 = vector.broadcast %253 : vector<10x1xf32> to vector<10x100xf32>
    %255 = arith.mulf %234, %254 : vector<10x100xf32>
    %256 = vector.broadcast %216 : vector<10x1xf32> to vector<10x100xf32>
    %257 = arith.addf %255, %256 : vector<10x100xf32>
    %258 = vector.broadcast %217 : vector<1x100xf32> to vector<10x100xf32>
    %259 = arith.mulf %257, %258 : vector<10x100xf32>
    %260 = vector.broadcast %253 : vector<10x1xf32> to vector<10x100xf32>
    %261 = arith.mulf %238, %260 : vector<10x100xf32>
    %262 = vector.broadcast %216 : vector<10x1xf32> to vector<10x100xf32>
    %263 = arith.addf %261, %262 : vector<10x100xf32>
    %264 = vector.broadcast %217 : vector<1x100xf32> to vector<10x100xf32>
    %265 = arith.mulf %263, %264 : vector<10x100xf32>
    %266 = arith.addf %259, %89 : vector<10x100xf32>
    %cst_247 = arith.constant 0.000000e+00 : f32
    %267 = vector.broadcast %cst_247 : f32 to vector<10x100xf32>
    %268 = arith.maximumf %266, %267 : vector<10x100xf32>
    %269 = arith.addf %265, %97 : vector<10x100xf32>
    %cst_248 = arith.constant 0.000000e+00 : f32
    %270 = vector.broadcast %cst_248 : f32 to vector<10x100xf32>
    %271 = arith.maximumf %269, %270 : vector<10x100xf32>
    %c0_249 = arith.constant 0 : index
    %c0_250 = arith.constant 0 : index
    %c11_251 = arith.constant 11 : index
    %272 = vector.load %arg6[%c0_249, %c0_250, %c11_251] : memref<2x10x122xf32, #tpu.memory_space<vmem>>, vector<1x10x100xf32>
    %273 = vector.shape_cast %272 : vector<1x10x100xf32> to vector<10x100xf32>
    %274 = vector.shape_cast %268 : vector<10x100xf32> to vector<1x10x100xf32>
    tpu.vector_store %arg6[%c0_249, %c0_250, %c11_251], %274 {strides = array<i32>} : memref<2x10x122xf32, #tpu.memory_space<vmem>>, vector<1x10x100xf32>,
    %c1_252 = arith.constant 1 : index
    %c0_253 = arith.constant 0 : index
    %c11_254 = arith.constant 11 : index
    %275 = vector.load %arg6[%c1_252, %c0_253, %c11_254] : memref<2x10x122xf32, #tpu.memory_space<vmem>>, vector<1x10x100xf32>
    %276 = vector.shape_cast %275 : vector<1x10x100xf32> to vector<10x100xf32>
    %277 = vector.shape_cast %271 : vector<10x100xf32> to vector<1x10x100xf32>
    tpu.vector_store %arg6[%c1_252, %c0_253, %c11_254], %277 {strides = array<i32>} : memref<2x10x122xf32, #tpu.memory_space<vmem>>, vector<1x10x100xf32>,
    %c16_255 = arith.constant 16 : index
    %c0_256 = arith.constant 0 : index
    %278 = vector.load %arg1[%c16_255, %c0_256] : memref<176x144xf32, #tpu.memory_space<vmem>>, vector<10x144xf32>
    %c0_257 = arith.constant 0 : index
    %c0_258 = arith.constant 0 : index
    %c0_259 = arith.constant 0 : index
    %279 = vector.load %arg6[%c0_257, %c0_258, %c0_259] : memref<2x10x122xf32, #tpu.memory_space<vmem>>, vector<2x10x100xf32>
    %c0_260 = arith.constant 0 : index
    %c0_261 = arith.constant 0 : index
    %c0_262 = arith.constant 0 : index
    %280 = vector.load %arg5[%c0_260, %c0_261, %c0_262] : memref<2x144x324xf32, #tpu.memory_space<vmem>>, vector<2x10x100xf32>
    tpu.vector_store %arg5[%c0_260, %c0_261, %c0_262], %279 {strides = array<i32>} : memref<2x144x324xf32, #tpu.memory_space<vmem>>, vector<2x10x100xf32>,
    %c0_263 = arith.constant 0 : index
    %c0_264 = arith.constant 0 : index
    %c1_265 = arith.constant 1 : index
    %281 = vector.load %arg6[%c0_263, %c0_264, %c1_265] : memref<2x10x122xf32, #tpu.memory_space<vmem>>, vector<2x10x100xf32>
    %c0_266 = arith.constant 0 : index
    %c16_267 = arith.constant 16 : index
    %c0_268 = arith.constant 0 : index
    %282 = vector.load %arg5[%c0_266, %c16_267, %c0_268] : memref<2x144x324xf32, #tpu.memory_space<vmem>>, vector<2x10x100xf32>
    tpu.vector_store %arg5[%c0_266, %c16_267, %c0_268], %281 {strides = array<i32>} : memref<2x144x324xf32, #tpu.memory_space<vmem>>, vector<2x10x100xf32>,
    %c0_269 = arith.constant 0 : index
    %c0_270 = arith.constant 0 : index
    %c2_271 = arith.constant 2 : index
    %283 = vector.load %arg6[%c0_269, %c0_270, %c2_271] : memref<2x10x122xf32, #tpu.memory_space<vmem>>, vector<2x10x100xf32>
    %c0_272 = arith.constant 0 : index
    %c32_273 = arith.constant 32 : index
    %c0_274 = arith.constant 0 : index
    %284 = vector.load %arg5[%c0_272, %c32_273, %c0_274] : memref<2x144x324xf32, #tpu.memory_space<vmem>>, vector<2x10x100xf32>
    tpu.vector_store %arg5[%c0_272, %c32_273, %c0_274], %283 {strides = array<i32>} : memref<2x144x324xf32, #tpu.memory_space<vmem>>, vector<2x10x100xf32>,
    %c0_275 = arith.constant 0 : index
    %c0_276 = arith.constant 0 : index
    %c10_277 = arith.constant 10 : index
    %285 = vector.load %arg6[%c0_275, %c0_276, %c10_277] : memref<2x10x122xf32, #tpu.memory_space<vmem>>, vector<2x10x100xf32>
    %c0_278 = arith.constant 0 : index
    %c48_279 = arith.constant 48 : index
    %c0_280 = arith.constant 0 : index
    %286 = vector.load %arg5[%c0_278, %c48_279, %c0_280] : memref<2x144x324xf32, #tpu.memory_space<vmem>>, vector<2x10x100xf32>
    tpu.vector_store %arg5[%c0_278, %c48_279, %c0_280], %285 {strides = array<i32>} : memref<2x144x324xf32, #tpu.memory_space<vmem>>, vector<2x10x100xf32>,
    %c0_281 = arith.constant 0 : index
    %c0_282 = arith.constant 0 : index
    %c11_283 = arith.constant 11 : index
    %287 = vector.load %arg6[%c0_281, %c0_282, %c11_283] : memref<2x10x122xf32, #tpu.memory_space<vmem>>, vector<2x10x100xf32>
    %c0_284 = arith.constant 0 : index
    %c64_285 = arith.constant 64 : index
    %c0_286 = arith.constant 0 : index
    %288 = vector.load %arg5[%c0_284, %c64_285, %c0_286] : memref<2x144x324xf32, #tpu.memory_space<vmem>>, vector<2x10x100xf32>
    tpu.vector_store %arg5[%c0_284, %c64_285, %c0_286], %287 {strides = array<i32>} : memref<2x144x324xf32, #tpu.memory_space<vmem>>, vector<2x10x100xf32>,
    %c0_287 = arith.constant 0 : index
    %c0_288 = arith.constant 0 : index
    %c12_289 = arith.constant 12 : index
    %289 = vector.load %arg6[%c0_287, %c0_288, %c12_289] : memref<2x10x122xf32, #tpu.memory_space<vmem>>, vector<2x10x100xf32>
    %c0_290 = arith.constant 0 : index
    %c80_291 = arith.constant 80 : index
    %c0_292 = arith.constant 0 : index
    %290 = vector.load %arg5[%c0_290, %c80_291, %c0_292] : memref<2x144x324xf32, #tpu.memory_space<vmem>>, vector<2x10x100xf32>
    tpu.vector_store %arg5[%c0_290, %c80_291, %c0_292], %289 {strides = array<i32>} : memref<2x144x324xf32, #tpu.memory_space<vmem>>, vector<2x10x100xf32>,
    %c0_293 = arith.constant 0 : index
    %c0_294 = arith.constant 0 : index
    %c20_295 = arith.constant 20 : index
    %291 = vector.load %arg6[%c0_293, %c0_294, %c20_295] : memref<2x10x122xf32, #tpu.memory_space<vmem>>, vector<2x10x100xf32>
    %c0_296 = arith.constant 0 : index
    %c96_297 = arith.constant 96 : index
    %c0_298 = arith.constant 0 : index
    %292 = vector.load %arg5[%c0_296, %c96_297, %c0_298] : memref<2x144x324xf32, #tpu.memory_space<vmem>>, vector<2x10x100xf32>
    tpu.vector_store %arg5[%c0_296, %c96_297, %c0_298], %291 {strides = array<i32>} : memref<2x144x324xf32, #tpu.memory_space<vmem>>, vector<2x10x100xf32>,
    %c0_299 = arith.constant 0 : index
    %c0_300 = arith.constant 0 : index
    %c21_301 = arith.constant 21 : index
    %293 = vector.load %arg6[%c0_299, %c0_300, %c21_301] : memref<2x10x122xf32, #tpu.memory_space<vmem>>, vector<2x10x100xf32>
    %c0_302 = arith.constant 0 : index
    %c112_303 = arith.constant 112 : index
    %c0_304 = arith.constant 0 : index
    %294 = vector.load %arg5[%c0_302, %c112_303, %c0_304] : memref<2x144x324xf32, #tpu.memory_space<vmem>>, vector<2x10x100xf32>
    tpu.vector_store %arg5[%c0_302, %c112_303, %c0_304], %293 {strides = array<i32>} : memref<2x144x324xf32, #tpu.memory_space<vmem>>, vector<2x10x100xf32>,
    %c0_305 = arith.constant 0 : index
    %c0_306 = arith.constant 0 : index
    %c22_307 = arith.constant 22 : index
    %295 = vector.load %arg6[%c0_305, %c0_306, %c22_307] : memref<2x10x122xf32, #tpu.memory_space<vmem>>, vector<2x10x100xf32>
    %c0_308 = arith.constant 0 : index
    %c128_309 = arith.constant 128 : index
    %c0_310 = arith.constant 0 : index
    %296 = vector.load %arg5[%c0_308, %c128_309, %c0_310] : memref<2x144x324xf32, #tpu.memory_space<vmem>>, vector<2x10x100xf32>
    tpu.vector_store %arg5[%c0_308, %c128_309, %c0_310], %295 {strides = array<i32>} : memref<2x144x324xf32, #tpu.memory_space<vmem>>, vector<2x10x100xf32>,
    %c0_311 = arith.constant 0 : index
    %c0_312 = arith.constant 0 : index
    %c0_313 = arith.constant 0 : index
    %297 = vector.load %arg5[%c0_311, %c0_312, %c0_313] : memref<2x144x324xf32, #tpu.memory_space<vmem>>, vector<1x144x100xf32>
    %298 = vector.shape_cast %297 : vector<1x144x100xf32> to vector<144x100xf32>
    %cst_314 = arith.constant dense<0.000000e+00> : vector<10x100xf32>
    %299 = tpu.matmul %278, %298, %cst_314 {dimension_numbers = #tpu.dot_dimension_numbers<[1], [0], [0], [1], [0, 0, 1, 1], [], []>} : vector<10x144xf32>, vector<144x100xf32>, vector<10x100xf32> -> vector<10x100xf32>
    %c1_315 = arith.constant 1 : index
    %c0_316 = arith.constant 0 : index
    %c0_317 = arith.constant 0 : index
    %300 = vector.load %arg5[%c1_315, %c0_316, %c0_317] : memref<2x144x324xf32, #tpu.memory_space<vmem>>, vector<1x144x100xf32>
    %301 = vector.shape_cast %300 : vector<1x144x100xf32> to vector<144x100xf32>
    %cst_318 = arith.constant dense<0.000000e+00> : vector<10x100xf32>
    %302 = tpu.matmul %278, %301, %cst_318 {dimension_numbers = #tpu.dot_dimension_numbers<[1], [0], [0], [1], [0, 0, 1, 1], [], []>} : vector<10x144xf32>, vector<144x100xf32>, vector<10x100xf32> -> vector<10x100xf32>
    %c0_319 = arith.constant 0 : index
    %c3 = arith.constant 3 : index
    %303 = vector.load %arg2[%c0_319, %c3] : memref<16x21xf32, #tpu.memory_space<vmem>>, vector<10x1xf32>
    %c328 = arith.constant 328 : index
    %c0_320 = arith.constant 0 : index
    %304 = vector.load %arg3[%c328, %c0_320] : memref<512x100xf32, #tpu.memory_space<vmem>>, vector<100x36xf32>
    %305 = vector.broadcast %303 : vector<10x1xf32> to vector<10x100xf32>
    %306 = arith.addf %299, %305 : vector<10x100xf32>
    %cst_321 = arith.constant dense<0.000000e+00> : vector<10x36xf32>
    %307 = tpu.matmul %306, %304, %cst_321 {dimension_numbers = #tpu.dot_dimension_numbers<[1], [0], [0], [1], [0, 0, 1, 1], [], []>} : vector<10x100xf32>, vector<100x36xf32>, vector<10x36xf32> -> vector<10x36xf32>
    %308 = vector.broadcast %303 : vector<10x1xf32> to vector<10x100xf32>
    %309 = arith.addf %302, %308 : vector<10x100xf32>
    %cst_322 = arith.constant dense<0.000000e+00> : vector<10x36xf32>
    %310 = tpu.matmul %309, %304, %cst_322 {dimension_numbers = #tpu.dot_dimension_numbers<[1], [0], [0], [1], [0, 0, 1, 1], [], []>} : vector<10x100xf32>, vector<100x36xf32>, vector<10x36xf32> -> vector<10x36xf32>
    %c0_323 = arith.constant 0 : index
    %c0_324 = arith.constant 0 : index
    %c7 = arith.constant 7 : index
    %311 = vector.load %arg7[%c0_323, %c0_324, %c7] : memref<2x10x50xf32, #tpu.memory_space<vmem>>, vector<1x10x36xf32>
    %312 = vector.shape_cast %311 : vector<1x10x36xf32> to vector<10x36xf32>
    %313 = vector.shape_cast %307 : vector<10x36xf32> to vector<1x10x36xf32>
    tpu.vector_store %arg7[%c0_323, %c0_324, %c7], %313 {strides = array<i32>} : memref<2x10x50xf32, #tpu.memory_space<vmem>>, vector<1x10x36xf32>,
    %c1_325 = arith.constant 1 : index
    %c0_326 = arith.constant 0 : index
    %c7_327 = arith.constant 7 : index
    %314 = vector.load %arg7[%c1_325, %c0_326, %c7_327] : memref<2x10x50xf32, #tpu.memory_space<vmem>>, vector<1x10x36xf32>
    %315 = vector.shape_cast %314 : vector<1x10x36xf32> to vector<10x36xf32>
    %316 = vector.shape_cast %310 : vector<10x36xf32> to vector<1x10x36xf32>
    tpu.vector_store %arg7[%c1_325, %c0_326, %c7_327], %316 {strides = array<i32>} : memref<2x10x50xf32, #tpu.memory_space<vmem>>, vector<1x10x36xf32>,
    %c80_328 = arith.constant 80 : index
    %c0_329 = arith.constant 0 : index
    %317 = vector.load %arg1[%c80_328, %c0_329] : memref<176x144xf32, #tpu.memory_space<vmem>>, vector<10x144xf32>
    %c96_330 = arith.constant 96 : index
    %c0_331 = arith.constant 0 : index
    %318 = vector.load %arg1[%c96_330, %c0_331] : memref<176x144xf32, #tpu.memory_space<vmem>>, vector<10x144xf32>
    %c0_332 = arith.constant 0 : index
    %c0_333 = arith.constant 0 : index
    %c0_334 = arith.constant 0 : index
    %319 = vector.load %arg7[%c0_332, %c0_333, %c0_334] : memref<2x10x50xf32, #tpu.memory_space<vmem>>, vector<2x10x36xf32>
    %c0_335 = arith.constant 0 : index
    %c0_336 = arith.constant 0 : index
    %c0_337 = arith.constant 0 : index
    %320 = vector.load %arg5[%c0_335, %c0_336, %c0_337] : memref<2x144x324xf32, #tpu.memory_space<vmem>>, vector<2x10x36xf32>
    tpu.vector_store %arg5[%c0_335, %c0_336, %c0_337], %319 {strides = array<i32>} : memref<2x144x324xf32, #tpu.memory_space<vmem>>, vector<2x10x36xf32>,
    %c0_338 = arith.constant 0 : index
    %c0_339 = arith.constant 0 : index
    %c1_340 = arith.constant 1 : index
    %321 = vector.load %arg7[%c0_338, %c0_339, %c1_340] : memref<2x10x50xf32, #tpu.memory_space<vmem>>, vector<2x10x36xf32>
    %c0_341 = arith.constant 0 : index
    %c16_342 = arith.constant 16 : index
    %c0_343 = arith.constant 0 : index
    %322 = vector.load %arg5[%c0_341, %c16_342, %c0_343] : memref<2x144x324xf32, #tpu.memory_space<vmem>>, vector<2x10x36xf32>
    tpu.vector_store %arg5[%c0_341, %c16_342, %c0_343], %321 {strides = array<i32>} : memref<2x144x324xf32, #tpu.memory_space<vmem>>, vector<2x10x36xf32>,
    %c0_344 = arith.constant 0 : index
    %c0_345 = arith.constant 0 : index
    %c2_346 = arith.constant 2 : index
    %323 = vector.load %arg7[%c0_344, %c0_345, %c2_346] : memref<2x10x50xf32, #tpu.memory_space<vmem>>, vector<2x10x36xf32>
    %c0_347 = arith.constant 0 : index
    %c32_348 = arith.constant 32 : index
    %c0_349 = arith.constant 0 : index
    %324 = vector.load %arg5[%c0_347, %c32_348, %c0_349] : memref<2x144x324xf32, #tpu.memory_space<vmem>>, vector<2x10x36xf32>
    tpu.vector_store %arg5[%c0_347, %c32_348, %c0_349], %323 {strides = array<i32>} : memref<2x144x324xf32, #tpu.memory_space<vmem>>, vector<2x10x36xf32>,
    %c0_350 = arith.constant 0 : index
    %c0_351 = arith.constant 0 : index
    %c6_352 = arith.constant 6 : index
    %325 = vector.load %arg7[%c0_350, %c0_351, %c6_352] : memref<2x10x50xf32, #tpu.memory_space<vmem>>, vector<2x10x36xf32>
    %c0_353 = arith.constant 0 : index
    %c48_354 = arith.constant 48 : index
    %c0_355 = arith.constant 0 : index
    %326 = vector.load %arg5[%c0_353, %c48_354, %c0_355] : memref<2x144x324xf32, #tpu.memory_space<vmem>>, vector<2x10x36xf32>
    tpu.vector_store %arg5[%c0_353, %c48_354, %c0_355], %325 {strides = array<i32>} : memref<2x144x324xf32, #tpu.memory_space<vmem>>, vector<2x10x36xf32>,
    %c0_356 = arith.constant 0 : index
    %c0_357 = arith.constant 0 : index
    %c7_358 = arith.constant 7 : index
    %327 = vector.load %arg7[%c0_356, %c0_357, %c7_358] : memref<2x10x50xf32, #tpu.memory_space<vmem>>, vector<2x10x36xf32>
    %c0_359 = arith.constant 0 : index
    %c64_360 = arith.constant 64 : index
    %c0_361 = arith.constant 0 : index
    %328 = vector.load %arg5[%c0_359, %c64_360, %c0_361] : memref<2x144x324xf32, #tpu.memory_space<vmem>>, vector<2x10x36xf32>
    tpu.vector_store %arg5[%c0_359, %c64_360, %c0_361], %327 {strides = array<i32>} : memref<2x144x324xf32, #tpu.memory_space<vmem>>, vector<2x10x36xf32>,
    %c0_362 = arith.constant 0 : index
    %c0_363 = arith.constant 0 : index
    %c8_364 = arith.constant 8 : index
    %329 = vector.load %arg7[%c0_362, %c0_363, %c8_364] : memref<2x10x50xf32, #tpu.memory_space<vmem>>, vector<2x10x36xf32>
    %c0_365 = arith.constant 0 : index
    %c80_366 = arith.constant 80 : index
    %c0_367 = arith.constant 0 : index
    %330 = vector.load %arg5[%c0_365, %c80_366, %c0_367] : memref<2x144x324xf32, #tpu.memory_space<vmem>>, vector<2x10x36xf32>
    tpu.vector_store %arg5[%c0_365, %c80_366, %c0_367], %329 {strides = array<i32>} : memref<2x144x324xf32, #tpu.memory_space<vmem>>, vector<2x10x36xf32>,
    %c0_368 = arith.constant 0 : index
    %c0_369 = arith.constant 0 : index
    %c12_370 = arith.constant 12 : index
    %331 = vector.load %arg7[%c0_368, %c0_369, %c12_370] : memref<2x10x50xf32, #tpu.memory_space<vmem>>, vector<2x10x36xf32>
    %c0_371 = arith.constant 0 : index
    %c96_372 = arith.constant 96 : index
    %c0_373 = arith.constant 0 : index
    %332 = vector.load %arg5[%c0_371, %c96_372, %c0_373] : memref<2x144x324xf32, #tpu.memory_space<vmem>>, vector<2x10x36xf32>
    tpu.vector_store %arg5[%c0_371, %c96_372, %c0_373], %331 {strides = array<i32>} : memref<2x144x324xf32, #tpu.memory_space<vmem>>, vector<2x10x36xf32>,
    %c0_374 = arith.constant 0 : index
    %c0_375 = arith.constant 0 : index
    %c13_376 = arith.constant 13 : index
    %333 = vector.load %arg7[%c0_374, %c0_375, %c13_376] : memref<2x10x50xf32, #tpu.memory_space<vmem>>, vector<2x10x36xf32>
    %c0_377 = arith.constant 0 : index
    %c112_378 = arith.constant 112 : index
    %c0_379 = arith.constant 0 : index
    %334 = vector.load %arg5[%c0_377, %c112_378, %c0_379] : memref<2x144x324xf32, #tpu.memory_space<vmem>>, vector<2x10x36xf32>
    tpu.vector_store %arg5[%c0_377, %c112_378, %c0_379], %333 {strides = array<i32>} : memref<2x144x324xf32, #tpu.memory_space<vmem>>, vector<2x10x36xf32>,
    %c0_380 = arith.constant 0 : index
    %c0_381 = arith.constant 0 : index
    %c14_382 = arith.constant 14 : index
    %335 = vector.load %arg7[%c0_380, %c0_381, %c14_382] : memref<2x10x50xf32, #tpu.memory_space<vmem>>, vector<2x10x36xf32>
    %c0_383 = arith.constant 0 : index
    %c128_384 = arith.constant 128 : index
    %c0_385 = arith.constant 0 : index
    %336 = vector.load %arg5[%c0_383, %c128_384, %c0_385] : memref<2x144x324xf32, #tpu.memory_space<vmem>>, vector<2x10x36xf32>
    tpu.vector_store %arg5[%c0_383, %c128_384, %c0_385], %335 {strides = array<i32>} : memref<2x144x324xf32, #tpu.memory_space<vmem>>, vector<2x10x36xf32>,
    %c0_386 = arith.constant 0 : index
    %c0_387 = arith.constant 0 : index
    %c0_388 = arith.constant 0 : index
    %337 = vector.load %arg5[%c0_386, %c0_387, %c0_388] : memref<2x144x324xf32, #tpu.memory_space<vmem>>, vector<1x144x36xf32>
    %338 = vector.shape_cast %337 : vector<1x144x36xf32> to vector<144x36xf32>
    %cst_389 = arith.constant dense<0.000000e+00> : vector<10x36xf32>
    %339 = tpu.matmul %317, %338, %cst_389 {dimension_numbers = #tpu.dot_dimension_numbers<[1], [0], [0], [1], [0, 0, 1, 1], [], []>} : vector<10x144xf32>, vector<144x36xf32>, vector<10x36xf32> -> vector<10x36xf32>
    %c1_390 = arith.constant 1 : index
    %c0_391 = arith.constant 0 : index
    %c0_392 = arith.constant 0 : index
    %340 = vector.load %arg5[%c1_390, %c0_391, %c0_392] : memref<2x144x324xf32, #tpu.memory_space<vmem>>, vector<1x144x36xf32>
    %341 = vector.shape_cast %340 : vector<1x144x36xf32> to vector<144x36xf32>
    %cst_393 = arith.constant dense<0.000000e+00> : vector<10x36xf32>
    %342 = tpu.matmul %317, %341, %cst_393 {dimension_numbers = #tpu.dot_dimension_numbers<[1], [0], [0], [1], [0, 0, 1, 1], [], []>} : vector<10x144xf32>, vector<144x36xf32>, vector<10x36xf32> -> vector<10x36xf32>
    %c0_394 = arith.constant 0 : index
    %c7_395 = arith.constant 7 : index
    %343 = vector.load %arg2[%c0_394, %c7_395] : memref<16x21xf32, #tpu.memory_space<vmem>>, vector<10x1xf32>
    %c0_396 = arith.constant 0 : index
    %c15 = arith.constant 15 : index
    %344 = vector.load %arg2[%c0_396, %c15] : memref<16x21xf32, #tpu.memory_space<vmem>>, vector<10x1xf32>
    %c505 = arith.constant 505 : index
    %c0_397 = arith.constant 0 : index
    %345 = vector.load %arg3[%c505, %c0_397] : memref<512x100xf32, #tpu.memory_space<vmem>>, vector<1x36xf32>
    %346 = vector.broadcast %345 : vector<1x36xf32> to vector<10x36xf32>
    %347 = arith.mulf %339, %346 : vector<10x36xf32>
    %cst_398 = arith.constant dense<0.000000e+00> : vector<10xf32>
    %348 = vector.multi_reduction <add>, %347, %cst_398 [1] : vector<10x36xf32> to vector<10xf32>
    %349 = vector.shape_cast %348 : vector<10xf32> to vector<10x1xf32>
    %cst_399 = arith.constant 0.000000e+00 : f32
    %350 = vector.broadcast %cst_399 : f32 to vector<10x1xf32>
    %351 = arith.addf %350, %349 : vector<10x1xf32>
    %352 = vector.broadcast %345 : vector<1x36xf32> to vector<10x36xf32>
    %353 = arith.mulf %342, %352 : vector<10x36xf32>
    %cst_400 = arith.constant dense<0.000000e+00> : vector<10xf32>
    %354 = vector.multi_reduction <add>, %353, %cst_400 [1] : vector<10x36xf32> to vector<10xf32>
    %355 = vector.shape_cast %354 : vector<10xf32> to vector<10x1xf32>
    %356 = arith.addf %351, %355 : vector<10x1xf32>
    %cst_401 = arith.constant 3.125000e-02 : f32
    %357 = vector.broadcast %cst_401 : f32 to vector<10x1xf32>
    %358 = arith.mulf %356, %357 : vector<10x1xf32>
    %359 = vector.broadcast %358 : vector<10x1xf32> to vector<10x36xf32>
    %360 = arith.subf %339, %359 : vector<10x36xf32>
    %361 = vector.broadcast %345 : vector<1x36xf32> to vector<10x36xf32>
    %362 = arith.mulf %360, %361 : vector<10x36xf32>
    %363 = vector.broadcast %358 : vector<10x1xf32> to vector<10x36xf32>
    %364 = arith.subf %342, %363 : vector<10x36xf32>
    %365 = vector.broadcast %345 : vector<1x36xf32> to vector<10x36xf32>
    %366 = arith.mulf %364, %365 : vector<10x36xf32>
    %367 = arith.mulf %362, %362 : vector<10x36xf32>
    %cst_402 = arith.constant dense<0.000000e+00> : vector<10xf32>
    %368 = vector.multi_reduction <add>, %367, %cst_402 [1] : vector<10x36xf32> to vector<10xf32>
    %369 = vector.shape_cast %368 : vector<10xf32> to vector<10x1xf32>
    %cst_403 = arith.constant 0.000000e+00 : f32
    %370 = vector.broadcast %cst_403 : f32 to vector<10x1xf32>
    %371 = arith.addf %370, %369 : vector<10x1xf32>
    %372 = arith.mulf %366, %366 : vector<10x36xf32>
    %cst_404 = arith.constant dense<0.000000e+00> : vector<10xf32>
    %373 = vector.multi_reduction <add>, %372, %cst_404 [1] : vector<10x36xf32> to vector<10xf32>
    %374 = vector.shape_cast %373 : vector<10xf32> to vector<10x1xf32>
    %375 = arith.addf %371, %374 : vector<10x1xf32>
    %cst_405 = arith.constant 3.125000e-02 : f32
    %376 = vector.broadcast %cst_405 : f32 to vector<10x1xf32>
    %377 = arith.mulf %375, %376 : vector<10x1xf32>
    %cst_406 = arith.constant 9.99999974E-6 : f32
    %378 = vector.broadcast %cst_406 : f32 to vector<10x1xf32>
    %379 = arith.addf %377, %378 : vector<10x1xf32>
    %380 = math.rsqrt %379 : vector<10x1xf32>
    %381 = arith.mulf %343, %380 : vector<10x1xf32>
    %382 = vector.broadcast %381 : vector<10x1xf32> to vector<10x36xf32>
    %383 = arith.mulf %362, %382 : vector<10x36xf32>
    %384 = vector.broadcast %344 : vector<10x1xf32> to vector<10x36xf32>
    %385 = arith.addf %383, %384 : vector<10x36xf32>
    %cst_407 = arith.constant 0.000000e+00 : f32
    %386 = vector.broadcast %cst_407 : f32 to vector<10x36xf32>
    %387 = arith.maximumf %385, %386 : vector<10x36xf32>
    %388 = vector.broadcast %345 : vector<1x36xf32> to vector<10x36xf32>
    %389 = arith.mulf %387, %388 : vector<10x36xf32>
    %390 = vector.broadcast %381 : vector<10x1xf32> to vector<10x36xf32>
    %391 = arith.mulf %366, %390 : vector<10x36xf32>
    %392 = vector.broadcast %344 : vector<10x1xf32> to vector<10x36xf32>
    %393 = arith.addf %391, %392 : vector<10x36xf32>
    %cst_408 = arith.constant 0.000000e+00 : f32
    %394 = vector.broadcast %cst_408 : f32 to vector<10x36xf32>
    %395 = arith.maximumf %393, %394 : vector<10x36xf32>
    %396 = vector.broadcast %345 : vector<1x36xf32> to vector<10x36xf32>
    %397 = arith.mulf %395, %396 : vector<10x36xf32>
    %c0_409 = arith.constant 0 : index
    %c0_410 = arith.constant 0 : index
    %c7_411 = arith.constant 7 : index
    %398 = vector.load %arg7[%c0_409, %c0_410, %c7_411] : memref<2x10x50xf32, #tpu.memory_space<vmem>>, vector<1x10x36xf32>
    %399 = vector.shape_cast %398 : vector<1x10x36xf32> to vector<10x36xf32>
    %400 = vector.shape_cast %389 : vector<10x36xf32> to vector<1x10x36xf32>
    tpu.vector_store %arg7[%c0_409, %c0_410, %c7_411], %400 {strides = array<i32>} : memref<2x10x50xf32, #tpu.memory_space<vmem>>, vector<1x10x36xf32>,
    %c1_412 = arith.constant 1 : index
    %c0_413 = arith.constant 0 : index
    %c7_414 = arith.constant 7 : index
    %401 = vector.load %arg7[%c1_412, %c0_413, %c7_414] : memref<2x10x50xf32, #tpu.memory_space<vmem>>, vector<1x10x36xf32>
    %402 = vector.shape_cast %401 : vector<1x10x36xf32> to vector<10x36xf32>
    %403 = vector.shape_cast %397 : vector<10x36xf32> to vector<1x10x36xf32>
    tpu.vector_store %arg7[%c1_412, %c0_413, %c7_414], %403 {strides = array<i32>} : memref<2x10x50xf32, #tpu.memory_space<vmem>>, vector<1x10x36xf32>,
    %c0_415 = arith.constant 0 : index
    %c0_416 = arith.constant 0 : index
    %c0_417 = arith.constant 0 : index
    %404 = vector.load %arg7[%c0_415, %c0_416, %c0_417] : memref<2x10x50xf32, #tpu.memory_space<vmem>>, vector<2x10x36xf32>
    %c0_418 = arith.constant 0 : index
    %c0_419 = arith.constant 0 : index
    %c0_420 = arith.constant 0 : index
    %405 = vector.load %arg5[%c0_418, %c0_419, %c0_420] : memref<2x144x324xf32, #tpu.memory_space<vmem>>, vector<2x10x36xf32>
    tpu.vector_store %arg5[%c0_418, %c0_419, %c0_420], %404 {strides = array<i32>} : memref<2x144x324xf32, #tpu.memory_space<vmem>>, vector<2x10x36xf32>,
    %c0_421 = arith.constant 0 : index
    %c0_422 = arith.constant 0 : index
    %c1_423 = arith.constant 1 : index
    %406 = vector.load %arg7[%c0_421, %c0_422, %c1_423] : memref<2x10x50xf32, #tpu.memory_space<vmem>>, vector<2x10x36xf32>
    %c0_424 = arith.constant 0 : index
    %c16_425 = arith.constant 16 : index
    %c0_426 = arith.constant 0 : index
    %407 = vector.load %arg5[%c0_424, %c16_425, %c0_426] : memref<2x144x324xf32, #tpu.memory_space<vmem>>, vector<2x10x36xf32>
    tpu.vector_store %arg5[%c0_424, %c16_425, %c0_426], %406 {strides = array<i32>} : memref<2x144x324xf32, #tpu.memory_space<vmem>>, vector<2x10x36xf32>,
    %c0_427 = arith.constant 0 : index
    %c0_428 = arith.constant 0 : index
    %c2_429 = arith.constant 2 : index
    %408 = vector.load %arg7[%c0_427, %c0_428, %c2_429] : memref<2x10x50xf32, #tpu.memory_space<vmem>>, vector<2x10x36xf32>
    %c0_430 = arith.constant 0 : index
    %c32_431 = arith.constant 32 : index
    %c0_432 = arith.constant 0 : index
    %409 = vector.load %arg5[%c0_430, %c32_431, %c0_432] : memref<2x144x324xf32, #tpu.memory_space<vmem>>, vector<2x10x36xf32>
    tpu.vector_store %arg5[%c0_430, %c32_431, %c0_432], %408 {strides = array<i32>} : memref<2x144x324xf32, #tpu.memory_space<vmem>>, vector<2x10x36xf32>,
    %c0_433 = arith.constant 0 : index
    %c0_434 = arith.constant 0 : index
    %c6_435 = arith.constant 6 : index
    %410 = vector.load %arg7[%c0_433, %c0_434, %c6_435] : memref<2x10x50xf32, #tpu.memory_space<vmem>>, vector<2x10x36xf32>
    %c0_436 = arith.constant 0 : index
    %c48_437 = arith.constant 48 : index
    %c0_438 = arith.constant 0 : index
    %411 = vector.load %arg5[%c0_436, %c48_437, %c0_438] : memref<2x144x324xf32, #tpu.memory_space<vmem>>, vector<2x10x36xf32>
    tpu.vector_store %arg5[%c0_436, %c48_437, %c0_438], %410 {strides = array<i32>} : memref<2x144x324xf32, #tpu.memory_space<vmem>>, vector<2x10x36xf32>,
    %c0_439 = arith.constant 0 : index
    %c0_440 = arith.constant 0 : index
    %c7_441 = arith.constant 7 : index
    %412 = vector.load %arg7[%c0_439, %c0_440, %c7_441] : memref<2x10x50xf32, #tpu.memory_space<vmem>>, vector<2x10x36xf32>
    %c0_442 = arith.constant 0 : index
    %c64_443 = arith.constant 64 : index
    %c0_444 = arith.constant 0 : index
    %413 = vector.load %arg5[%c0_442, %c64_443, %c0_444] : memref<2x144x324xf32, #tpu.memory_space<vmem>>, vector<2x10x36xf32>
    tpu.vector_store %arg5[%c0_442, %c64_443, %c0_444], %412 {strides = array<i32>} : memref<2x144x324xf32, #tpu.memory_space<vmem>>, vector<2x10x36xf32>,
    %c0_445 = arith.constant 0 : index
    %c0_446 = arith.constant 0 : index
    %c8_447 = arith.constant 8 : index
    %414 = vector.load %arg7[%c0_445, %c0_446, %c8_447] : memref<2x10x50xf32, #tpu.memory_space<vmem>>, vector<2x10x36xf32>
    %c0_448 = arith.constant 0 : index
    %c80_449 = arith.constant 80 : index
    %c0_450 = arith.constant 0 : index
    %415 = vector.load %arg5[%c0_448, %c80_449, %c0_450] : memref<2x144x324xf32, #tpu.memory_space<vmem>>, vector<2x10x36xf32>
    tpu.vector_store %arg5[%c0_448, %c80_449, %c0_450], %414 {strides = array<i32>} : memref<2x144x324xf32, #tpu.memory_space<vmem>>, vector<2x10x36xf32>,
    %c0_451 = arith.constant 0 : index
    %c0_452 = arith.constant 0 : index
    %c12_453 = arith.constant 12 : index
    %416 = vector.load %arg7[%c0_451, %c0_452, %c12_453] : memref<2x10x50xf32, #tpu.memory_space<vmem>>, vector<2x10x36xf32>
    %c0_454 = arith.constant 0 : index
    %c96_455 = arith.constant 96 : index
    %c0_456 = arith.constant 0 : index
    %417 = vector.load %arg5[%c0_454, %c96_455, %c0_456] : memref<2x144x324xf32, #tpu.memory_space<vmem>>, vector<2x10x36xf32>
    tpu.vector_store %arg5[%c0_454, %c96_455, %c0_456], %416 {strides = array<i32>} : memref<2x144x324xf32, #tpu.memory_space<vmem>>, vector<2x10x36xf32>,
    %c0_457 = arith.constant 0 : index
    %c0_458 = arith.constant 0 : index
    %c13_459 = arith.constant 13 : index
    %418 = vector.load %arg7[%c0_457, %c0_458, %c13_459] : memref<2x10x50xf32, #tpu.memory_space<vmem>>, vector<2x10x36xf32>
    %c0_460 = arith.constant 0 : index
    %c112_461 = arith.constant 112 : index
    %c0_462 = arith.constant 0 : index
    %419 = vector.load %arg5[%c0_460, %c112_461, %c0_462] : memref<2x144x324xf32, #tpu.memory_space<vmem>>, vector<2x10x36xf32>
    tpu.vector_store %arg5[%c0_460, %c112_461, %c0_462], %418 {strides = array<i32>} : memref<2x144x324xf32, #tpu.memory_space<vmem>>, vector<2x10x36xf32>,
    %c0_463 = arith.constant 0 : index
    %c0_464 = arith.constant 0 : index
    %c14_465 = arith.constant 14 : index
    %420 = vector.load %arg7[%c0_463, %c0_464, %c14_465] : memref<2x10x50xf32, #tpu.memory_space<vmem>>, vector<2x10x36xf32>
    %c0_466 = arith.constant 0 : index
    %c128_467 = arith.constant 128 : index
    %c0_468 = arith.constant 0 : index
    %421 = vector.load %arg5[%c0_466, %c128_467, %c0_468] : memref<2x144x324xf32, #tpu.memory_space<vmem>>, vector<2x10x36xf32>
    tpu.vector_store %arg5[%c0_466, %c128_467, %c0_468], %420 {strides = array<i32>} : memref<2x144x324xf32, #tpu.memory_space<vmem>>, vector<2x10x36xf32>,
    %c0_469 = arith.constant 0 : index
    %c0_470 = arith.constant 0 : index
    %c0_471 = arith.constant 0 : index
    %422 = vector.load %arg5[%c0_469, %c0_470, %c0_471] : memref<2x144x324xf32, #tpu.memory_space<vmem>>, vector<1x144x36xf32>
    %423 = vector.shape_cast %422 : vector<1x144x36xf32> to vector<144x36xf32>
    %cst_472 = arith.constant dense<0.000000e+00> : vector<10x36xf32>
    %424 = tpu.matmul %318, %423, %cst_472 {dimension_numbers = #tpu.dot_dimension_numbers<[1], [0], [0], [1], [0, 0, 1, 1], [], []>} : vector<10x144xf32>, vector<144x36xf32>, vector<10x36xf32> -> vector<10x36xf32>
    %c1_473 = arith.constant 1 : index
    %c0_474 = arith.constant 0 : index
    %c0_475 = arith.constant 0 : index
    %425 = vector.load %arg5[%c1_473, %c0_474, %c0_475] : memref<2x144x324xf32, #tpu.memory_space<vmem>>, vector<1x144x36xf32>
    %426 = vector.shape_cast %425 : vector<1x144x36xf32> to vector<144x36xf32>
    %cst_476 = arith.constant dense<0.000000e+00> : vector<10x36xf32>
    %427 = tpu.matmul %318, %426, %cst_476 {dimension_numbers = #tpu.dot_dimension_numbers<[1], [0], [0], [1], [0, 0, 1, 1], [], []>} : vector<10x144xf32>, vector<144x36xf32>, vector<10x36xf32> -> vector<10x36xf32>
    %c0_477 = arith.constant 0 : index
    %c8_478 = arith.constant 8 : index
    %428 = vector.load %arg2[%c0_477, %c8_478] : memref<16x21xf32, #tpu.memory_space<vmem>>, vector<10x1xf32>
    %c0_479 = arith.constant 0 : index
    %c16_480 = arith.constant 16 : index
    %429 = vector.load %arg2[%c0_479, %c16_480] : memref<16x21xf32, #tpu.memory_space<vmem>>, vector<10x1xf32>
    %c505_481 = arith.constant 505 : index
    %c0_482 = arith.constant 0 : index
    %430 = vector.load %arg3[%c505_481, %c0_482] : memref<512x100xf32, #tpu.memory_space<vmem>>, vector<1x36xf32>
    %431 = vector.broadcast %430 : vector<1x36xf32> to vector<10x36xf32>
    %432 = arith.mulf %424, %431 : vector<10x36xf32>
    %cst_483 = arith.constant dense<0.000000e+00> : vector<10xf32>
    %433 = vector.multi_reduction <add>, %432, %cst_483 [1] : vector<10x36xf32> to vector<10xf32>
    %434 = vector.shape_cast %433 : vector<10xf32> to vector<10x1xf32>
    %cst_484 = arith.constant 0.000000e+00 : f32
    %435 = vector.broadcast %cst_484 : f32 to vector<10x1xf32>
    %436 = arith.addf %435, %434 : vector<10x1xf32>
    %437 = vector.broadcast %430 : vector<1x36xf32> to vector<10x36xf32>
    %438 = arith.mulf %427, %437 : vector<10x36xf32>
    %cst_485 = arith.constant dense<0.000000e+00> : vector<10xf32>
    %439 = vector.multi_reduction <add>, %438, %cst_485 [1] : vector<10x36xf32> to vector<10xf32>
    %440 = vector.shape_cast %439 : vector<10xf32> to vector<10x1xf32>
    %441 = arith.addf %436, %440 : vector<10x1xf32>
    %cst_486 = arith.constant 3.125000e-02 : f32
    %442 = vector.broadcast %cst_486 : f32 to vector<10x1xf32>
    %443 = arith.mulf %441, %442 : vector<10x1xf32>
    %444 = vector.broadcast %443 : vector<10x1xf32> to vector<10x36xf32>
    %445 = arith.subf %424, %444 : vector<10x36xf32>
    %446 = vector.broadcast %430 : vector<1x36xf32> to vector<10x36xf32>
    %447 = arith.mulf %445, %446 : vector<10x36xf32>
    %448 = vector.broadcast %443 : vector<10x1xf32> to vector<10x36xf32>
    %449 = arith.subf %427, %448 : vector<10x36xf32>
    %450 = vector.broadcast %430 : vector<1x36xf32> to vector<10x36xf32>
    %451 = arith.mulf %449, %450 : vector<10x36xf32>
    %452 = arith.mulf %447, %447 : vector<10x36xf32>
    %cst_487 = arith.constant dense<0.000000e+00> : vector<10xf32>
    %453 = vector.multi_reduction <add>, %452, %cst_487 [1] : vector<10x36xf32> to vector<10xf32>
    %454 = vector.shape_cast %453 : vector<10xf32> to vector<10x1xf32>
    %cst_488 = arith.constant 0.000000e+00 : f32
    %455 = vector.broadcast %cst_488 : f32 to vector<10x1xf32>
    %456 = arith.addf %455, %454 : vector<10x1xf32>
    %457 = arith.mulf %451, %451 : vector<10x36xf32>
    %cst_489 = arith.constant dense<0.000000e+00> : vector<10xf32>
    %458 = vector.multi_reduction <add>, %457, %cst_489 [1] : vector<10x36xf32> to vector<10xf32>
    %459 = vector.shape_cast %458 : vector<10xf32> to vector<10x1xf32>
    %460 = arith.addf %456, %459 : vector<10x1xf32>
    %cst_490 = arith.constant 3.125000e-02 : f32
    %461 = vector.broadcast %cst_490 : f32 to vector<10x1xf32>
    %462 = arith.mulf %460, %461 : vector<10x1xf32>
    %cst_491 = arith.constant 9.99999974E-6 : f32
    %463 = vector.broadcast %cst_491 : f32 to vector<10x1xf32>
    %464 = arith.addf %462, %463 : vector<10x1xf32>
    %465 = math.rsqrt %464 : vector<10x1xf32>
    %466 = arith.mulf %428, %465 : vector<10x1xf32>
    %467 = vector.broadcast %466 : vector<10x1xf32> to vector<10x36xf32>
    %468 = arith.mulf %447, %467 : vector<10x36xf32>
    %469 = vector.broadcast %429 : vector<10x1xf32> to vector<10x36xf32>
    %470 = arith.addf %468, %469 : vector<10x36xf32>
    %471 = vector.broadcast %430 : vector<1x36xf32> to vector<10x36xf32>
    %472 = arith.mulf %470, %471 : vector<10x36xf32>
    %473 = vector.broadcast %466 : vector<10x1xf32> to vector<10x36xf32>
    %474 = arith.mulf %451, %473 : vector<10x36xf32>
    %475 = vector.broadcast %429 : vector<10x1xf32> to vector<10x36xf32>
    %476 = arith.addf %474, %475 : vector<10x36xf32>
    %477 = vector.broadcast %430 : vector<1x36xf32> to vector<10x36xf32>
    %478 = arith.mulf %476, %477 : vector<10x36xf32>
    %479 = arith.addf %472, %307 : vector<10x36xf32>
    %cst_492 = arith.constant 0.000000e+00 : f32
    %480 = vector.broadcast %cst_492 : f32 to vector<10x36xf32>
    %481 = arith.maximumf %479, %480 : vector<10x36xf32>
    %482 = arith.addf %478, %310 : vector<10x36xf32>
    %cst_493 = arith.constant 0.000000e+00 : f32
    %483 = vector.broadcast %cst_493 : f32 to vector<10x36xf32>
    %484 = arith.maximumf %482, %483 : vector<10x36xf32>
    %c0_494 = arith.constant 0 : index
    %c0_495 = arith.constant 0 : index
    %c7_496 = arith.constant 7 : index
    %485 = vector.load %arg7[%c0_494, %c0_495, %c7_496] : memref<2x10x50xf32, #tpu.memory_space<vmem>>, vector<1x10x36xf32>
    %486 = vector.shape_cast %485 : vector<1x10x36xf32> to vector<10x36xf32>
    %487 = vector.shape_cast %481 : vector<10x36xf32> to vector<1x10x36xf32>
    tpu.vector_store %arg7[%c0_494, %c0_495, %c7_496], %487 {strides = array<i32>} : memref<2x10x50xf32, #tpu.memory_space<vmem>>, vector<1x10x36xf32>,
    %c1_497 = arith.constant 1 : index
    %c0_498 = arith.constant 0 : index
    %c7_499 = arith.constant 7 : index
    %488 = vector.load %arg7[%c1_497, %c0_498, %c7_499] : memref<2x10x50xf32, #tpu.memory_space<vmem>>, vector<1x10x36xf32>
    %489 = vector.shape_cast %488 : vector<1x10x36xf32> to vector<10x36xf32>
    %490 = vector.shape_cast %484 : vector<10x36xf32> to vector<1x10x36xf32>
    tpu.vector_store %arg7[%c1_497, %c0_498, %c7_499], %490 {strides = array<i32>} : memref<2x10x50xf32, #tpu.memory_space<vmem>>, vector<1x10x36xf32>,
    %c0_500 = arith.constant 0 : index
    %c0_501 = arith.constant 0 : index
    %c0_502 = arith.constant 0 : index
    %491 = vector.load %arg7[%c0_500, %c0_501, %c0_502] : memref<2x10x50xf32, #tpu.memory_space<vmem>>, vector<2x10x36xf32>
    %c0_503 = arith.constant 0 : index
    %c0_504 = arith.constant 0 : index
    %c1_505 = arith.constant 1 : index
    %492 = vector.load %arg7[%c0_503, %c0_504, %c1_505] : memref<2x10x50xf32, #tpu.memory_space<vmem>>, vector<2x10x36xf32>
    %493 = arith.addf %491, %492 : vector<2x10x36xf32>
    %c0_506 = arith.constant 0 : index
    %c0_507 = arith.constant 0 : index
    %c2_508 = arith.constant 2 : index
    %494 = vector.load %arg7[%c0_506, %c0_507, %c2_508] : memref<2x10x50xf32, #tpu.memory_space<vmem>>, vector<2x10x36xf32>
    %495 = arith.addf %493, %494 : vector<2x10x36xf32>
    %c0_509 = arith.constant 0 : index
    %c0_510 = arith.constant 0 : index
    %c6_511 = arith.constant 6 : index
    %496 = vector.load %arg7[%c0_509, %c0_510, %c6_511] : memref<2x10x50xf32, #tpu.memory_space<vmem>>, vector<2x10x36xf32>
    %497 = arith.addf %495, %496 : vector<2x10x36xf32>
    %c0_512 = arith.constant 0 : index
    %c0_513 = arith.constant 0 : index
    %c7_514 = arith.constant 7 : index
    %498 = vector.load %arg7[%c0_512, %c0_513, %c7_514] : memref<2x10x50xf32, #tpu.memory_space<vmem>>, vector<2x10x36xf32>
    %499 = arith.addf %497, %498 : vector<2x10x36xf32>
    %c0_515 = arith.constant 0 : index
    %c0_516 = arith.constant 0 : index
    %c8_517 = arith.constant 8 : index
    %500 = vector.load %arg7[%c0_515, %c0_516, %c8_517] : memref<2x10x50xf32, #tpu.memory_space<vmem>>, vector<2x10x36xf32>
    %501 = arith.addf %499, %500 : vector<2x10x36xf32>
    %c0_518 = arith.constant 0 : index
    %c0_519 = arith.constant 0 : index
    %c12_520 = arith.constant 12 : index
    %502 = vector.load %arg7[%c0_518, %c0_519, %c12_520] : memref<2x10x50xf32, #tpu.memory_space<vmem>>, vector<2x10x36xf32>
    %503 = arith.addf %501, %502 : vector<2x10x36xf32>
    %c0_521 = arith.constant 0 : index
    %c0_522 = arith.constant 0 : index
    %c13_523 = arith.constant 13 : index
    %504 = vector.load %arg7[%c0_521, %c0_522, %c13_523] : memref<2x10x50xf32, #tpu.memory_space<vmem>>, vector<2x10x36xf32>
    %505 = arith.addf %503, %504 : vector<2x10x36xf32>
    %c0_524 = arith.constant 0 : index
    %c0_525 = arith.constant 0 : index
    %c14_526 = arith.constant 14 : index
    %506 = vector.load %arg7[%c0_524, %c0_525, %c14_526] : memref<2x10x50xf32, #tpu.memory_space<vmem>>, vector<2x10x36xf32>
    %507 = arith.addf %505, %506 : vector<2x10x36xf32>
    %cst_527 = arith.constant 0.111111112 : f32
    %508 = vector.broadcast %cst_527 : f32 to vector<2x10x36xf32>
    %509 = arith.mulf %507, %508 : vector<2x10x36xf32>
    %510 = vector.extract_strided_slice %509 {offsets = [0, 0, 0], sizes = [1, 10, 36], strides = [1, 1, 1]} : vector<2x10x36xf32> to vector<1x10x36xf32>
    %511 = vector.shape_cast %510 : vector<1x10x36xf32> to vector<10x36xf32>
    %512 = vector.extract_strided_slice %509 {offsets = [1, 0, 0], sizes = [1, 10, 36], strides = [1, 1, 1]} : vector<2x10x36xf32> to vector<1x10x36xf32>
    %513 = vector.shape_cast %512 : vector<1x10x36xf32> to vector<10x36xf32>
    %c432 = arith.constant 432 : index
    %c0_528 = arith.constant 0 : index
    %514 = vector.load %arg3[%c432, %c0_528] : memref<512x100xf32, #tpu.memory_space<vmem>>, vector<36x16xf32>
    %cst_529 = arith.constant dense<0.000000e+00> : vector<10x16xf32>
    %515 = tpu.matmul %511, %514, %cst_529 {dimension_numbers = #tpu.dot_dimension_numbers<[1], [0], [0], [1], [0, 0, 1, 1], [], []>} : vector<10x36xf32>, vector<36x16xf32>, vector<10x16xf32> -> vector<10x16xf32>
    %cst_530 = arith.constant dense<0.000000e+00> : vector<10x16xf32>
    %516 = tpu.matmul %513, %514, %cst_530 {dimension_numbers = #tpu.dot_dimension_numbers<[1], [0], [0], [1], [0, 0, 1, 1], [], []>} : vector<10x36xf32>, vector<36x16xf32>, vector<10x16xf32> -> vector<10x16xf32>
    %c0_531 = arith.constant 0 : index
    %c0_532 = arith.constant 0 : index
    %c5_533 = arith.constant 5 : index
    %517 = vector.load %arg8[%c0_531, %c0_532, %c5_533] : memref<2x10x26xf32, #tpu.memory_space<vmem>>, vector<1x10x16xf32>
    %518 = vector.shape_cast %517 : vector<1x10x16xf32> to vector<10x16xf32>
    %519 = vector.shape_cast %515 : vector<10x16xf32> to vector<1x10x16xf32>
    tpu.vector_store %arg8[%c0_531, %c0_532, %c5_533], %519 {strides = array<i32>} : memref<2x10x26xf32, #tpu.memory_space<vmem>>, vector<1x10x16xf32>,
    %c1_534 = arith.constant 1 : index
    %c0_535 = arith.constant 0 : index
    %c5_536 = arith.constant 5 : index
    %520 = vector.load %arg8[%c1_534, %c0_535, %c5_536] : memref<2x10x26xf32, #tpu.memory_space<vmem>>, vector<1x10x16xf32>
    %521 = vector.shape_cast %520 : vector<1x10x16xf32> to vector<10x16xf32>
    %522 = vector.shape_cast %516 : vector<10x16xf32> to vector<1x10x16xf32>
    tpu.vector_store %arg8[%c1_534, %c0_535, %c5_536], %522 {strides = array<i32>} : memref<2x10x26xf32, #tpu.memory_space<vmem>>, vector<1x10x16xf32>,
    %c112_537 = arith.constant 112 : index
    %c0_538 = arith.constant 0 : index
    %523 = vector.load %arg1[%c112_537, %c0_538] : memref<176x144xf32, #tpu.memory_space<vmem>>, vector<10x144xf32>
    %c128_539 = arith.constant 128 : index
    %c0_540 = arith.constant 0 : index
    %524 = vector.load %arg1[%c128_539, %c0_540] : memref<176x144xf32, #tpu.memory_space<vmem>>, vector<10x144xf32>
    %c0_541 = arith.constant 0 : index
    %c0_542 = arith.constant 0 : index
    %c0_543 = arith.constant 0 : index
    %525 = vector.load %arg8[%c0_541, %c0_542, %c0_543] : memref<2x10x26xf32, #tpu.memory_space<vmem>>, vector<2x10x16xf32>
    %c0_544 = arith.constant 0 : index
    %c0_545 = arith.constant 0 : index
    %c0_546 = arith.constant 0 : index
    %526 = vector.load %arg5[%c0_544, %c0_545, %c0_546] : memref<2x144x324xf32, #tpu.memory_space<vmem>>, vector<2x10x16xf32>
    tpu.vector_store %arg5[%c0_544, %c0_545, %c0_546], %525 {strides = array<i32>} : memref<2x144x324xf32, #tpu.memory_space<vmem>>, vector<2x10x16xf32>,
    %c0_547 = arith.constant 0 : index
    %c0_548 = arith.constant 0 : index
    %c1_549 = arith.constant 1 : index
    %527 = vector.load %arg8[%c0_547, %c0_548, %c1_549] : memref<2x10x26xf32, #tpu.memory_space<vmem>>, vector<2x10x16xf32>
    %c0_550 = arith.constant 0 : index
    %c16_551 = arith.constant 16 : index
    %c0_552 = arith.constant 0 : index
    %528 = vector.load %arg5[%c0_550, %c16_551, %c0_552] : memref<2x144x324xf32, #tpu.memory_space<vmem>>, vector<2x10x16xf32>
    tpu.vector_store %arg5[%c0_550, %c16_551, %c0_552], %527 {strides = array<i32>} : memref<2x144x324xf32, #tpu.memory_space<vmem>>, vector<2x10x16xf32>,
    %c0_553 = arith.constant 0 : index
    %c0_554 = arith.constant 0 : index
    %c2_555 = arith.constant 2 : index
    %529 = vector.load %arg8[%c0_553, %c0_554, %c2_555] : memref<2x10x26xf32, #tpu.memory_space<vmem>>, vector<2x10x16xf32>
    %c0_556 = arith.constant 0 : index
    %c32_557 = arith.constant 32 : index
    %c0_558 = arith.constant 0 : index
    %530 = vector.load %arg5[%c0_556, %c32_557, %c0_558] : memref<2x144x324xf32, #tpu.memory_space<vmem>>, vector<2x10x16xf32>
    tpu.vector_store %arg5[%c0_556, %c32_557, %c0_558], %529 {strides = array<i32>} : memref<2x144x324xf32, #tpu.memory_space<vmem>>, vector<2x10x16xf32>,
    %c0_559 = arith.constant 0 : index
    %c0_560 = arith.constant 0 : index
    %c4 = arith.constant 4 : index
    %531 = vector.load %arg8[%c0_559, %c0_560, %c4] : memref<2x10x26xf32, #tpu.memory_space<vmem>>, vector<2x10x16xf32>
    %c0_561 = arith.constant 0 : index
    %c48_562 = arith.constant 48 : index
    %c0_563 = arith.constant 0 : index
    %532 = vector.load %arg5[%c0_561, %c48_562, %c0_563] : memref<2x144x324xf32, #tpu.memory_space<vmem>>, vector<2x10x16xf32>
    tpu.vector_store %arg5[%c0_561, %c48_562, %c0_563], %531 {strides = array<i32>} : memref<2x144x324xf32, #tpu.memory_space<vmem>>, vector<2x10x16xf32>,
    %c0_564 = arith.constant 0 : index
    %c0_565 = arith.constant 0 : index
    %c5_566 = arith.constant 5 : index
    %533 = vector.load %arg8[%c0_564, %c0_565, %c5_566] : memref<2x10x26xf32, #tpu.memory_space<vmem>>, vector<2x10x16xf32>
    %c0_567 = arith.constant 0 : index
    %c64_568 = arith.constant 64 : index
    %c0_569 = arith.constant 0 : index
    %534 = vector.load %arg5[%c0_567, %c64_568, %c0_569] : memref<2x144x324xf32, #tpu.memory_space<vmem>>, vector<2x10x16xf32>
    tpu.vector_store %arg5[%c0_567, %c64_568, %c0_569], %533 {strides = array<i32>} : memref<2x144x324xf32, #tpu.memory_space<vmem>>, vector<2x10x16xf32>,
    %c0_570 = arith.constant 0 : index
    %c0_571 = arith.constant 0 : index
    %c6_572 = arith.constant 6 : index
    %535 = vector.load %arg8[%c0_570, %c0_571, %c6_572] : memref<2x10x26xf32, #tpu.memory_space<vmem>>, vector<2x10x16xf32>
    %c0_573 = arith.constant 0 : index
    %c80_574 = arith.constant 80 : index
    %c0_575 = arith.constant 0 : index
    %536 = vector.load %arg5[%c0_573, %c80_574, %c0_575] : memref<2x144x324xf32, #tpu.memory_space<vmem>>, vector<2x10x16xf32>
    tpu.vector_store %arg5[%c0_573, %c80_574, %c0_575], %535 {strides = array<i32>} : memref<2x144x324xf32, #tpu.memory_space<vmem>>, vector<2x10x16xf32>,
    %c0_576 = arith.constant 0 : index
    %c0_577 = arith.constant 0 : index
    %c8_578 = arith.constant 8 : index
    %537 = vector.load %arg8[%c0_576, %c0_577, %c8_578] : memref<2x10x26xf32, #tpu.memory_space<vmem>>, vector<2x10x16xf32>
    %c0_579 = arith.constant 0 : index
    %c96_580 = arith.constant 96 : index
    %c0_581 = arith.constant 0 : index
    %538 = vector.load %arg5[%c0_579, %c96_580, %c0_581] : memref<2x144x324xf32, #tpu.memory_space<vmem>>, vector<2x10x16xf32>
    tpu.vector_store %arg5[%c0_579, %c96_580, %c0_581], %537 {strides = array<i32>} : memref<2x144x324xf32, #tpu.memory_space<vmem>>, vector<2x10x16xf32>,
    %c0_582 = arith.constant 0 : index
    %c0_583 = arith.constant 0 : index
    %c9 = arith.constant 9 : index
    %539 = vector.load %arg8[%c0_582, %c0_583, %c9] : memref<2x10x26xf32, #tpu.memory_space<vmem>>, vector<2x10x16xf32>
    %c0_584 = arith.constant 0 : index
    %c112_585 = arith.constant 112 : index
    %c0_586 = arith.constant 0 : index
    %540 = vector.load %arg5[%c0_584, %c112_585, %c0_586] : memref<2x144x324xf32, #tpu.memory_space<vmem>>, vector<2x10x16xf32>
    tpu.vector_store %arg5[%c0_584, %c112_585, %c0_586], %539 {strides = array<i32>} : memref<2x144x324xf32, #tpu.memory_space<vmem>>, vector<2x10x16xf32>,
    %c0_587 = arith.constant 0 : index
    %c0_588 = arith.constant 0 : index
    %c10_589 = arith.constant 10 : index
    %541 = vector.load %arg8[%c0_587, %c0_588, %c10_589] : memref<2x10x26xf32, #tpu.memory_space<vmem>>, vector<2x10x16xf32>
    %c0_590 = arith.constant 0 : index
    %c128_591 = arith.constant 128 : index
    %c0_592 = arith.constant 0 : index
    %542 = vector.load %arg5[%c0_590, %c128_591, %c0_592] : memref<2x144x324xf32, #tpu.memory_space<vmem>>, vector<2x10x16xf32>
    tpu.vector_store %arg5[%c0_590, %c128_591, %c0_592], %541 {strides = array<i32>} : memref<2x144x324xf32, #tpu.memory_space<vmem>>, vector<2x10x16xf32>,
    %c0_593 = arith.constant 0 : index
    %c0_594 = arith.constant 0 : index
    %c0_595 = arith.constant 0 : index
    %543 = vector.load %arg5[%c0_593, %c0_594, %c0_595] : memref<2x144x324xf32, #tpu.memory_space<vmem>>, vector<1x144x16xf32>
    %544 = vector.shape_cast %543 : vector<1x144x16xf32> to vector<144x16xf32>
    %cst_596 = arith.constant dense<0.000000e+00> : vector<10x16xf32>
    %545 = tpu.matmul %523, %544, %cst_596 {dimension_numbers = #tpu.dot_dimension_numbers<[1], [0], [0], [1], [0, 0, 1, 1], [], []>} : vector<10x144xf32>, vector<144x16xf32>, vector<10x16xf32> -> vector<10x16xf32>
    %c1_597 = arith.constant 1 : index
    %c0_598 = arith.constant 0 : index
    %c0_599 = arith.constant 0 : index
    %546 = vector.load %arg5[%c1_597, %c0_598, %c0_599] : memref<2x144x324xf32, #tpu.memory_space<vmem>>, vector<1x144x16xf32>
    %547 = vector.shape_cast %546 : vector<1x144x16xf32> to vector<144x16xf32>
    %cst_600 = arith.constant dense<0.000000e+00> : vector<10x16xf32>
    %548 = tpu.matmul %523, %547, %cst_600 {dimension_numbers = #tpu.dot_dimension_numbers<[1], [0], [0], [1], [0, 0, 1, 1], [], []>} : vector<10x144xf32>, vector<144x16xf32>, vector<10x16xf32> -> vector<10x16xf32>
    %c0_601 = arith.constant 0 : index
    %c9_602 = arith.constant 9 : index
    %549 = vector.load %arg2[%c0_601, %c9_602] : memref<16x21xf32, #tpu.memory_space<vmem>>, vector<10x1xf32>
    %c0_603 = arith.constant 0 : index
    %c17 = arith.constant 17 : index
    %550 = vector.load %arg2[%c0_603, %c17] : memref<16x21xf32, #tpu.memory_space<vmem>>, vector<10x1xf32>
    %c506 = arith.constant 506 : index
    %c0_604 = arith.constant 0 : index
    %551 = vector.load %arg3[%c506, %c0_604] : memref<512x100xf32, #tpu.memory_space<vmem>>, vector<1x16xf32>
    %552 = vector.broadcast %551 : vector<1x16xf32> to vector<10x16xf32>
    %553 = arith.mulf %545, %552 : vector<10x16xf32>
    %cst_605 = arith.constant dense<0.000000e+00> : vector<10xf32>
    %554 = vector.multi_reduction <add>, %553, %cst_605 [1] : vector<10x16xf32> to vector<10xf32>
    %555 = vector.shape_cast %554 : vector<10xf32> to vector<10x1xf32>
    %cst_606 = arith.constant 0.000000e+00 : f32
    %556 = vector.broadcast %cst_606 : f32 to vector<10x1xf32>
    %557 = arith.addf %556, %555 : vector<10x1xf32>
    %558 = vector.broadcast %551 : vector<1x16xf32> to vector<10x16xf32>
    %559 = arith.mulf %548, %558 : vector<10x16xf32>
    %cst_607 = arith.constant dense<0.000000e+00> : vector<10xf32>
    %560 = vector.multi_reduction <add>, %559, %cst_607 [1] : vector<10x16xf32> to vector<10xf32>
    %561 = vector.shape_cast %560 : vector<10xf32> to vector<10x1xf32>
    %562 = arith.addf %557, %561 : vector<10x1xf32>
    %cst_608 = arith.constant 1.250000e-01 : f32
    %563 = vector.broadcast %cst_608 : f32 to vector<10x1xf32>
    %564 = arith.mulf %562, %563 : vector<10x1xf32>
    %565 = vector.broadcast %564 : vector<10x1xf32> to vector<10x16xf32>
    %566 = arith.subf %545, %565 : vector<10x16xf32>
    %567 = vector.broadcast %551 : vector<1x16xf32> to vector<10x16xf32>
    %568 = arith.mulf %566, %567 : vector<10x16xf32>
    %569 = vector.broadcast %564 : vector<10x1xf32> to vector<10x16xf32>
    %570 = arith.subf %548, %569 : vector<10x16xf32>
    %571 = vector.broadcast %551 : vector<1x16xf32> to vector<10x16xf32>
    %572 = arith.mulf %570, %571 : vector<10x16xf32>
    %573 = arith.mulf %568, %568 : vector<10x16xf32>
    %cst_609 = arith.constant dense<0.000000e+00> : vector<10xf32>
    %574 = vector.multi_reduction <add>, %573, %cst_609 [1] : vector<10x16xf32> to vector<10xf32>
    %575 = vector.shape_cast %574 : vector<10xf32> to vector<10x1xf32>
    %cst_610 = arith.constant 0.000000e+00 : f32
    %576 = vector.broadcast %cst_610 : f32 to vector<10x1xf32>
    %577 = arith.addf %576, %575 : vector<10x1xf32>
    %578 = arith.mulf %572, %572 : vector<10x16xf32>
    %cst_611 = arith.constant dense<0.000000e+00> : vector<10xf32>
    %579 = vector.multi_reduction <add>, %578, %cst_611 [1] : vector<10x16xf32> to vector<10xf32>
    %580 = vector.shape_cast %579 : vector<10xf32> to vector<10x1xf32>
    %581 = arith.addf %577, %580 : vector<10x1xf32>
    %cst_612 = arith.constant 1.250000e-01 : f32
    %582 = vector.broadcast %cst_612 : f32 to vector<10x1xf32>
    %583 = arith.mulf %581, %582 : vector<10x1xf32>
    %cst_613 = arith.constant 9.99999974E-6 : f32
    %584 = vector.broadcast %cst_613 : f32 to vector<10x1xf32>
    %585 = arith.addf %583, %584 : vector<10x1xf32>
    %586 = math.rsqrt %585 : vector<10x1xf32>
    %587 = arith.mulf %549, %586 : vector<10x1xf32>
    %588 = vector.broadcast %587 : vector<10x1xf32> to vector<10x16xf32>
    %589 = arith.mulf %568, %588 : vector<10x16xf32>
    %590 = vector.broadcast %550 : vector<10x1xf32> to vector<10x16xf32>
    %591 = arith.addf %589, %590 : vector<10x16xf32>
    %cst_614 = arith.constant 0.000000e+00 : f32
    %592 = vector.broadcast %cst_614 : f32 to vector<10x16xf32>
    %593 = arith.maximumf %591, %592 : vector<10x16xf32>
    %594 = vector.broadcast %551 : vector<1x16xf32> to vector<10x16xf32>
    %595 = arith.mulf %593, %594 : vector<10x16xf32>
    %596 = vector.broadcast %587 : vector<10x1xf32> to vector<10x16xf32>
    %597 = arith.mulf %572, %596 : vector<10x16xf32>
    %598 = vector.broadcast %550 : vector<10x1xf32> to vector<10x16xf32>
    %599 = arith.addf %597, %598 : vector<10x16xf32>
    %cst_615 = arith.constant 0.000000e+00 : f32
    %600 = vector.broadcast %cst_615 : f32 to vector<10x16xf32>
    %601 = arith.maximumf %599, %600 : vector<10x16xf32>
    %602 = vector.broadcast %551 : vector<1x16xf32> to vector<10x16xf32>
    %603 = arith.mulf %601, %602 : vector<10x16xf32>
    %c0_616 = arith.constant 0 : index
    %c0_617 = arith.constant 0 : index
    %c5_618 = arith.constant 5 : index
    %604 = vector.load %arg8[%c0_616, %c0_617, %c5_618] : memref<2x10x26xf32, #tpu.memory_space<vmem>>, vector<1x10x16xf32>
    %605 = vector.shape_cast %604 : vector<1x10x16xf32> to vector<10x16xf32>
    %606 = vector.shape_cast %595 : vector<10x16xf32> to vector<1x10x16xf32>
    tpu.vector_store %arg8[%c0_616, %c0_617, %c5_618], %606 {strides = array<i32>} : memref<2x10x26xf32, #tpu.memory_space<vmem>>, vector<1x10x16xf32>,
    %c1_619 = arith.constant 1 : index
    %c0_620 = arith.constant 0 : index
    %c5_621 = arith.constant 5 : index
    %607 = vector.load %arg8[%c1_619, %c0_620, %c5_621] : memref<2x10x26xf32, #tpu.memory_space<vmem>>, vector<1x10x16xf32>
    %608 = vector.shape_cast %607 : vector<1x10x16xf32> to vector<10x16xf32>
    %609 = vector.shape_cast %603 : vector<10x16xf32> to vector<1x10x16xf32>
    tpu.vector_store %arg8[%c1_619, %c0_620, %c5_621], %609 {strides = array<i32>} : memref<2x10x26xf32, #tpu.memory_space<vmem>>, vector<1x10x16xf32>,
    %c0_622 = arith.constant 0 : index
    %c0_623 = arith.constant 0 : index
    %c0_624 = arith.constant 0 : index
    %610 = vector.load %arg8[%c0_622, %c0_623, %c0_624] : memref<2x10x26xf32, #tpu.memory_space<vmem>>, vector<2x10x16xf32>
    %c0_625 = arith.constant 0 : index
    %c0_626 = arith.constant 0 : index
    %c0_627 = arith.constant 0 : index
    %611 = vector.load %arg5[%c0_625, %c0_626, %c0_627] : memref<2x144x324xf32, #tpu.memory_space<vmem>>, vector<2x10x16xf32>
    tpu.vector_store %arg5[%c0_625, %c0_626, %c0_627], %610 {strides = array<i32>} : memref<2x144x324xf32, #tpu.memory_space<vmem>>, vector<2x10x16xf32>,
    %c0_628 = arith.constant 0 : index
    %c0_629 = arith.constant 0 : index
    %c1_630 = arith.constant 1 : index
    %612 = vector.load %arg8[%c0_628, %c0_629, %c1_630] : memref<2x10x26xf32, #tpu.memory_space<vmem>>, vector<2x10x16xf32>
    %c0_631 = arith.constant 0 : index
    %c16_632 = arith.constant 16 : index
    %c0_633 = arith.constant 0 : index
    %613 = vector.load %arg5[%c0_631, %c16_632, %c0_633] : memref<2x144x324xf32, #tpu.memory_space<vmem>>, vector<2x10x16xf32>
    tpu.vector_store %arg5[%c0_631, %c16_632, %c0_633], %612 {strides = array<i32>} : memref<2x144x324xf32, #tpu.memory_space<vmem>>, vector<2x10x16xf32>,
    %c0_634 = arith.constant 0 : index
    %c0_635 = arith.constant 0 : index
    %c2_636 = arith.constant 2 : index
    %614 = vector.load %arg8[%c0_634, %c0_635, %c2_636] : memref<2x10x26xf32, #tpu.memory_space<vmem>>, vector<2x10x16xf32>
    %c0_637 = arith.constant 0 : index
    %c32_638 = arith.constant 32 : index
    %c0_639 = arith.constant 0 : index
    %615 = vector.load %arg5[%c0_637, %c32_638, %c0_639] : memref<2x144x324xf32, #tpu.memory_space<vmem>>, vector<2x10x16xf32>
    tpu.vector_store %arg5[%c0_637, %c32_638, %c0_639], %614 {strides = array<i32>} : memref<2x144x324xf32, #tpu.memory_space<vmem>>, vector<2x10x16xf32>,
    %c0_640 = arith.constant 0 : index
    %c0_641 = arith.constant 0 : index
    %c4_642 = arith.constant 4 : index
    %616 = vector.load %arg8[%c0_640, %c0_641, %c4_642] : memref<2x10x26xf32, #tpu.memory_space<vmem>>, vector<2x10x16xf32>
    %c0_643 = arith.constant 0 : index
    %c48_644 = arith.constant 48 : index
    %c0_645 = arith.constant 0 : index
    %617 = vector.load %arg5[%c0_643, %c48_644, %c0_645] : memref<2x144x324xf32, #tpu.memory_space<vmem>>, vector<2x10x16xf32>
    tpu.vector_store %arg5[%c0_643, %c48_644, %c0_645], %616 {strides = array<i32>} : memref<2x144x324xf32, #tpu.memory_space<vmem>>, vector<2x10x16xf32>,
    %c0_646 = arith.constant 0 : index
    %c0_647 = arith.constant 0 : index
    %c5_648 = arith.constant 5 : index
    %618 = vector.load %arg8[%c0_646, %c0_647, %c5_648] : memref<2x10x26xf32, #tpu.memory_space<vmem>>, vector<2x10x16xf32>
    %c0_649 = arith.constant 0 : index
    %c64_650 = arith.constant 64 : index
    %c0_651 = arith.constant 0 : index
    %619 = vector.load %arg5[%c0_649, %c64_650, %c0_651] : memref<2x144x324xf32, #tpu.memory_space<vmem>>, vector<2x10x16xf32>
    tpu.vector_store %arg5[%c0_649, %c64_650, %c0_651], %618 {strides = array<i32>} : memref<2x144x324xf32, #tpu.memory_space<vmem>>, vector<2x10x16xf32>,
    %c0_652 = arith.constant 0 : index
    %c0_653 = arith.constant 0 : index
    %c6_654 = arith.constant 6 : index
    %620 = vector.load %arg8[%c0_652, %c0_653, %c6_654] : memref<2x10x26xf32, #tpu.memory_space<vmem>>, vector<2x10x16xf32>
    %c0_655 = arith.constant 0 : index
    %c80_656 = arith.constant 80 : index
    %c0_657 = arith.constant 0 : index
    %621 = vector.load %arg5[%c0_655, %c80_656, %c0_657] : memref<2x144x324xf32, #tpu.memory_space<vmem>>, vector<2x10x16xf32>
    tpu.vector_store %arg5[%c0_655, %c80_656, %c0_657], %620 {strides = array<i32>} : memref<2x144x324xf32, #tpu.memory_space<vmem>>, vector<2x10x16xf32>,
    %c0_658 = arith.constant 0 : index
    %c0_659 = arith.constant 0 : index
    %c8_660 = arith.constant 8 : index
    %622 = vector.load %arg8[%c0_658, %c0_659, %c8_660] : memref<2x10x26xf32, #tpu.memory_space<vmem>>, vector<2x10x16xf32>
    %c0_661 = arith.constant 0 : index
    %c96_662 = arith.constant 96 : index
    %c0_663 = arith.constant 0 : index
    %623 = vector.load %arg5[%c0_661, %c96_662, %c0_663] : memref<2x144x324xf32, #tpu.memory_space<vmem>>, vector<2x10x16xf32>
    tpu.vector_store %arg5[%c0_661, %c96_662, %c0_663], %622 {strides = array<i32>} : memref<2x144x324xf32, #tpu.memory_space<vmem>>, vector<2x10x16xf32>,
    %c0_664 = arith.constant 0 : index
    %c0_665 = arith.constant 0 : index
    %c9_666 = arith.constant 9 : index
    %624 = vector.load %arg8[%c0_664, %c0_665, %c9_666] : memref<2x10x26xf32, #tpu.memory_space<vmem>>, vector<2x10x16xf32>
    %c0_667 = arith.constant 0 : index
    %c112_668 = arith.constant 112 : index
    %c0_669 = arith.constant 0 : index
    %625 = vector.load %arg5[%c0_667, %c112_668, %c0_669] : memref<2x144x324xf32, #tpu.memory_space<vmem>>, vector<2x10x16xf32>
    tpu.vector_store %arg5[%c0_667, %c112_668, %c0_669], %624 {strides = array<i32>} : memref<2x144x324xf32, #tpu.memory_space<vmem>>, vector<2x10x16xf32>,
    %c0_670 = arith.constant 0 : index
    %c0_671 = arith.constant 0 : index
    %c10_672 = arith.constant 10 : index
    %626 = vector.load %arg8[%c0_670, %c0_671, %c10_672] : memref<2x10x26xf32, #tpu.memory_space<vmem>>, vector<2x10x16xf32>
    %c0_673 = arith.constant 0 : index
    %c128_674 = arith.constant 128 : index
    %c0_675 = arith.constant 0 : index
    %627 = vector.load %arg5[%c0_673, %c128_674, %c0_675] : memref<2x144x324xf32, #tpu.memory_space<vmem>>, vector<2x10x16xf32>
    tpu.vector_store %arg5[%c0_673, %c128_674, %c0_675], %626 {strides = array<i32>} : memref<2x144x324xf32, #tpu.memory_space<vmem>>, vector<2x10x16xf32>,
    %c0_676 = arith.constant 0 : index
    %c0_677 = arith.constant 0 : index
    %c0_678 = arith.constant 0 : index
    %628 = vector.load %arg5[%c0_676, %c0_677, %c0_678] : memref<2x144x324xf32, #tpu.memory_space<vmem>>, vector<1x144x16xf32>
    %629 = vector.shape_cast %628 : vector<1x144x16xf32> to vector<144x16xf32>
    %cst_679 = arith.constant dense<0.000000e+00> : vector<10x16xf32>
    %630 = tpu.matmul %524, %629, %cst_679 {dimension_numbers = #tpu.dot_dimension_numbers<[1], [0], [0], [1], [0, 0, 1, 1], [], []>} : vector<10x144xf32>, vector<144x16xf32>, vector<10x16xf32> -> vector<10x16xf32>
    %c1_680 = arith.constant 1 : index
    %c0_681 = arith.constant 0 : index
    %c0_682 = arith.constant 0 : index
    %631 = vector.load %arg5[%c1_680, %c0_681, %c0_682] : memref<2x144x324xf32, #tpu.memory_space<vmem>>, vector<1x144x16xf32>
    %632 = vector.shape_cast %631 : vector<1x144x16xf32> to vector<144x16xf32>
    %cst_683 = arith.constant dense<0.000000e+00> : vector<10x16xf32>
    %633 = tpu.matmul %524, %632, %cst_683 {dimension_numbers = #tpu.dot_dimension_numbers<[1], [0], [0], [1], [0, 0, 1, 1], [], []>} : vector<10x144xf32>, vector<144x16xf32>, vector<10x16xf32> -> vector<10x16xf32>
    %c0_684 = arith.constant 0 : index
    %c10_685 = arith.constant 10 : index
    %634 = vector.load %arg2[%c0_684, %c10_685] : memref<16x21xf32, #tpu.memory_space<vmem>>, vector<10x1xf32>
    %c0_686 = arith.constant 0 : index
    %c18_687 = arith.constant 18 : index
    %635 = vector.load %arg2[%c0_686, %c18_687] : memref<16x21xf32, #tpu.memory_space<vmem>>, vector<10x1xf32>
    %c506_688 = arith.constant 506 : index
    %c0_689 = arith.constant 0 : index
    %636 = vector.load %arg3[%c506_688, %c0_689] : memref<512x100xf32, #tpu.memory_space<vmem>>, vector<1x16xf32>
    %637 = vector.broadcast %636 : vector<1x16xf32> to vector<10x16xf32>
    %638 = arith.mulf %630, %637 : vector<10x16xf32>
    %cst_690 = arith.constant dense<0.000000e+00> : vector<10xf32>
    %639 = vector.multi_reduction <add>, %638, %cst_690 [1] : vector<10x16xf32> to vector<10xf32>
    %640 = vector.shape_cast %639 : vector<10xf32> to vector<10x1xf32>
    %cst_691 = arith.constant 0.000000e+00 : f32
    %641 = vector.broadcast %cst_691 : f32 to vector<10x1xf32>
    %642 = arith.addf %641, %640 : vector<10x1xf32>
    %643 = vector.broadcast %636 : vector<1x16xf32> to vector<10x16xf32>
    %644 = arith.mulf %633, %643 : vector<10x16xf32>
    %cst_692 = arith.constant dense<0.000000e+00> : vector<10xf32>
    %645 = vector.multi_reduction <add>, %644, %cst_692 [1] : vector<10x16xf32> to vector<10xf32>
    %646 = vector.shape_cast %645 : vector<10xf32> to vector<10x1xf32>
    %647 = arith.addf %642, %646 : vector<10x1xf32>
    %cst_693 = arith.constant 1.250000e-01 : f32
    %648 = vector.broadcast %cst_693 : f32 to vector<10x1xf32>
    %649 = arith.mulf %647, %648 : vector<10x1xf32>
    %650 = vector.broadcast %649 : vector<10x1xf32> to vector<10x16xf32>
    %651 = arith.subf %630, %650 : vector<10x16xf32>
    %652 = vector.broadcast %636 : vector<1x16xf32> to vector<10x16xf32>
    %653 = arith.mulf %651, %652 : vector<10x16xf32>
    %654 = vector.broadcast %649 : vector<10x1xf32> to vector<10x16xf32>
    %655 = arith.subf %633, %654 : vector<10x16xf32>
    %656 = vector.broadcast %636 : vector<1x16xf32> to vector<10x16xf32>
    %657 = arith.mulf %655, %656 : vector<10x16xf32>
    %658 = arith.mulf %653, %653 : vector<10x16xf32>
    %cst_694 = arith.constant dense<0.000000e+00> : vector<10xf32>
    %659 = vector.multi_reduction <add>, %658, %cst_694 [1] : vector<10x16xf32> to vector<10xf32>
    %660 = vector.shape_cast %659 : vector<10xf32> to vector<10x1xf32>
    %cst_695 = arith.constant 0.000000e+00 : f32
    %661 = vector.broadcast %cst_695 : f32 to vector<10x1xf32>
    %662 = arith.addf %661, %660 : vector<10x1xf32>
    %663 = arith.mulf %657, %657 : vector<10x16xf32>
    %cst_696 = arith.constant dense<0.000000e+00> : vector<10xf32>
    %664 = vector.multi_reduction <add>, %663, %cst_696 [1] : vector<10x16xf32> to vector<10xf32>
    %665 = vector.shape_cast %664 : vector<10xf32> to vector<10x1xf32>
    %666 = arith.addf %662, %665 : vector<10x1xf32>
    %cst_697 = arith.constant 1.250000e-01 : f32
    %667 = vector.broadcast %cst_697 : f32 to vector<10x1xf32>
    %668 = arith.mulf %666, %667 : vector<10x1xf32>
    %cst_698 = arith.constant 9.99999974E-6 : f32
    %669 = vector.broadcast %cst_698 : f32 to vector<10x1xf32>
    %670 = arith.addf %668, %669 : vector<10x1xf32>
    %671 = math.rsqrt %670 : vector<10x1xf32>
    %672 = arith.mulf %634, %671 : vector<10x1xf32>
    %673 = vector.broadcast %672 : vector<10x1xf32> to vector<10x16xf32>
    %674 = arith.mulf %653, %673 : vector<10x16xf32>
    %675 = vector.broadcast %635 : vector<10x1xf32> to vector<10x16xf32>
    %676 = arith.addf %674, %675 : vector<10x16xf32>
    %677 = vector.broadcast %636 : vector<1x16xf32> to vector<10x16xf32>
    %678 = arith.mulf %676, %677 : vector<10x16xf32>
    %679 = vector.broadcast %672 : vector<10x1xf32> to vector<10x16xf32>
    %680 = arith.mulf %657, %679 : vector<10x16xf32>
    %681 = vector.broadcast %635 : vector<10x1xf32> to vector<10x16xf32>
    %682 = arith.addf %680, %681 : vector<10x16xf32>
    %683 = vector.broadcast %636 : vector<1x16xf32> to vector<10x16xf32>
    %684 = arith.mulf %682, %683 : vector<10x16xf32>
    %685 = arith.addf %678, %515 : vector<10x16xf32>
    %cst_699 = arith.constant 0.000000e+00 : f32
    %686 = vector.broadcast %cst_699 : f32 to vector<10x16xf32>
    %687 = arith.maximumf %685, %686 : vector<10x16xf32>
    %688 = arith.addf %684, %516 : vector<10x16xf32>
    %cst_700 = arith.constant 0.000000e+00 : f32
    %689 = vector.broadcast %cst_700 : f32 to vector<10x16xf32>
    %690 = arith.maximumf %688, %689 : vector<10x16xf32>
    %c0_701 = arith.constant 0 : index
    %c0_702 = arith.constant 0 : index
    %c5_703 = arith.constant 5 : index
    %691 = vector.load %arg8[%c0_701, %c0_702, %c5_703] : memref<2x10x26xf32, #tpu.memory_space<vmem>>, vector<1x10x16xf32>
    %692 = vector.shape_cast %691 : vector<1x10x16xf32> to vector<10x16xf32>
    %693 = vector.shape_cast %687 : vector<10x16xf32> to vector<1x10x16xf32>
    tpu.vector_store %arg8[%c0_701, %c0_702, %c5_703], %693 {strides = array<i32>} : memref<2x10x26xf32, #tpu.memory_space<vmem>>, vector<1x10x16xf32>,
    %c1_704 = arith.constant 1 : index
    %c0_705 = arith.constant 0 : index
    %c5_706 = arith.constant 5 : index
    %694 = vector.load %arg8[%c1_704, %c0_705, %c5_706] : memref<2x10x26xf32, #tpu.memory_space<vmem>>, vector<1x10x16xf32>
    %695 = vector.shape_cast %694 : vector<1x10x16xf32> to vector<10x16xf32>
    %696 = vector.shape_cast %690 : vector<10x16xf32> to vector<1x10x16xf32>
    tpu.vector_store %arg8[%c1_704, %c0_705, %c5_706], %696 {strides = array<i32>} : memref<2x10x26xf32, #tpu.memory_space<vmem>>, vector<1x10x16xf32>,
    %c0_707 = arith.constant 0 : index
    %c0_708 = arith.constant 0 : index
    %c0_709 = arith.constant 0 : index
    %697 = vector.load %arg8[%c0_707, %c0_708, %c0_709] : memref<2x10x26xf32, #tpu.memory_space<vmem>>, vector<2x10x16xf32>
    %c0_710 = arith.constant 0 : index
    %c0_711 = arith.constant 0 : index
    %c1_712 = arith.constant 1 : index
    %698 = vector.load %arg8[%c0_710, %c0_711, %c1_712] : memref<2x10x26xf32, #tpu.memory_space<vmem>>, vector<2x10x16xf32>
    %699 = arith.addf %697, %698 : vector<2x10x16xf32>
    %c0_713 = arith.constant 0 : index
    %c0_714 = arith.constant 0 : index
    %c2_715 = arith.constant 2 : index
    %700 = vector.load %arg8[%c0_713, %c0_714, %c2_715] : memref<2x10x26xf32, #tpu.memory_space<vmem>>, vector<2x10x16xf32>
    %701 = arith.addf %699, %700 : vector<2x10x16xf32>
    %c0_716 = arith.constant 0 : index
    %c0_717 = arith.constant 0 : index
    %c4_718 = arith.constant 4 : index
    %702 = vector.load %arg8[%c0_716, %c0_717, %c4_718] : memref<2x10x26xf32, #tpu.memory_space<vmem>>, vector<2x10x16xf32>
    %703 = arith.addf %701, %702 : vector<2x10x16xf32>
    %c0_719 = arith.constant 0 : index
    %c0_720 = arith.constant 0 : index
    %c5_721 = arith.constant 5 : index
    %704 = vector.load %arg8[%c0_719, %c0_720, %c5_721] : memref<2x10x26xf32, #tpu.memory_space<vmem>>, vector<2x10x16xf32>
    %705 = arith.addf %703, %704 : vector<2x10x16xf32>
    %c0_722 = arith.constant 0 : index
    %c0_723 = arith.constant 0 : index
    %c6_724 = arith.constant 6 : index
    %706 = vector.load %arg8[%c0_722, %c0_723, %c6_724] : memref<2x10x26xf32, #tpu.memory_space<vmem>>, vector<2x10x16xf32>
    %707 = arith.addf %705, %706 : vector<2x10x16xf32>
    %c0_725 = arith.constant 0 : index
    %c0_726 = arith.constant 0 : index
    %c8_727 = arith.constant 8 : index
    %708 = vector.load %arg8[%c0_725, %c0_726, %c8_727] : memref<2x10x26xf32, #tpu.memory_space<vmem>>, vector<2x10x16xf32>
    %709 = arith.addf %707, %708 : vector<2x10x16xf32>
    %c0_728 = arith.constant 0 : index
    %c0_729 = arith.constant 0 : index
    %c9_730 = arith.constant 9 : index
    %710 = vector.load %arg8[%c0_728, %c0_729, %c9_730] : memref<2x10x26xf32, #tpu.memory_space<vmem>>, vector<2x10x16xf32>
    %711 = arith.addf %709, %710 : vector<2x10x16xf32>
    %c0_731 = arith.constant 0 : index
    %c0_732 = arith.constant 0 : index
    %c10_733 = arith.constant 10 : index
    %712 = vector.load %arg8[%c0_731, %c0_732, %c10_733] : memref<2x10x26xf32, #tpu.memory_space<vmem>>, vector<2x10x16xf32>
    %713 = arith.addf %711, %712 : vector<2x10x16xf32>
    %cst_734 = arith.constant 0.111111112 : f32
    %714 = vector.broadcast %cst_734 : f32 to vector<2x10x16xf32>
    %715 = arith.mulf %713, %714 : vector<2x10x16xf32>
    %716 = vector.extract_strided_slice %715 {offsets = [0, 0, 0], sizes = [1, 10, 16], strides = [1, 1, 1]} : vector<2x10x16xf32> to vector<1x10x16xf32>
    %717 = vector.shape_cast %716 : vector<1x10x16xf32> to vector<10x16xf32>
    %718 = vector.extract_strided_slice %715 {offsets = [1, 0, 0], sizes = [1, 10, 16], strides = [1, 1, 1]} : vector<2x10x16xf32> to vector<1x10x16xf32>
    %719 = vector.shape_cast %718 : vector<1x10x16xf32> to vector<10x16xf32>
    %c472 = arith.constant 472 : index
    %c0_735 = arith.constant 0 : index
    %720 = vector.load %arg3[%c472, %c0_735] : memref<512x100xf32, #tpu.memory_space<vmem>>, vector<16x9xf32>
    %cst_736 = arith.constant dense<0.000000e+00> : vector<10x9xf32>
    %721 = tpu.matmul %717, %720, %cst_736 {dimension_numbers = #tpu.dot_dimension_numbers<[1], [0], [0], [1], [0, 0, 1, 1], [], []>} : vector<10x16xf32>, vector<16x9xf32>, vector<10x9xf32> -> vector<10x9xf32>
    %cst_737 = arith.constant dense<0.000000e+00> : vector<10x9xf32>
    %722 = tpu.matmul %719, %720, %cst_737 {dimension_numbers = #tpu.dot_dimension_numbers<[1], [0], [0], [1], [0, 0, 1, 1], [], []>} : vector<10x16xf32>, vector<16x9xf32>, vector<10x9xf32> -> vector<10x9xf32>
    %c0_738 = arith.constant 0 : index
    %c0_739 = arith.constant 0 : index
    %c4_740 = arith.constant 4 : index
    %723 = vector.load %arg9[%c0_738, %c0_739, %c4_740] : memref<2x10x17xf32, #tpu.memory_space<vmem>>, vector<1x10x9xf32>
    %724 = vector.shape_cast %723 : vector<1x10x9xf32> to vector<10x9xf32>
    %725 = vector.shape_cast %721 : vector<10x9xf32> to vector<1x10x9xf32>
    tpu.vector_store %arg9[%c0_738, %c0_739, %c4_740], %725 {strides = array<i32>} : memref<2x10x17xf32, #tpu.memory_space<vmem>>, vector<1x10x9xf32>,
    %c1_741 = arith.constant 1 : index
    %c0_742 = arith.constant 0 : index
    %c4_743 = arith.constant 4 : index
    %726 = vector.load %arg9[%c1_741, %c0_742, %c4_743] : memref<2x10x17xf32, #tpu.memory_space<vmem>>, vector<1x10x9xf32>
    %727 = vector.shape_cast %726 : vector<1x10x9xf32> to vector<10x9xf32>
    %728 = vector.shape_cast %722 : vector<10x9xf32> to vector<1x10x9xf32>
    tpu.vector_store %arg9[%c1_741, %c0_742, %c4_743], %728 {strides = array<i32>} : memref<2x10x17xf32, #tpu.memory_space<vmem>>, vector<1x10x9xf32>,
    %c144 = arith.constant 144 : index
    %c0_744 = arith.constant 0 : index
    %729 = vector.load %arg1[%c144, %c0_744] : memref<176x144xf32, #tpu.memory_space<vmem>>, vector<10x144xf32>
    %c160 = arith.constant 160 : index
    %c0_745 = arith.constant 0 : index
    %730 = vector.load %arg1[%c160, %c0_745] : memref<176x144xf32, #tpu.memory_space<vmem>>, vector<10x144xf32>
    %c0_746 = arith.constant 0 : index
    %c0_747 = arith.constant 0 : index
    %c0_748 = arith.constant 0 : index
    %731 = vector.load %arg9[%c0_746, %c0_747, %c0_748] : memref<2x10x17xf32, #tpu.memory_space<vmem>>, vector<2x10x9xf32>
    %c0_749 = arith.constant 0 : index
    %c0_750 = arith.constant 0 : index
    %c0_751 = arith.constant 0 : index
    %732 = vector.load %arg5[%c0_749, %c0_750, %c0_751] : memref<2x144x324xf32, #tpu.memory_space<vmem>>, vector<2x10x9xf32>
    tpu.vector_store %arg5[%c0_749, %c0_750, %c0_751], %731 {strides = array<i32>} : memref<2x144x324xf32, #tpu.memory_space<vmem>>, vector<2x10x9xf32>,
    %c0_752 = arith.constant 0 : index
    %c0_753 = arith.constant 0 : index
    %c1_754 = arith.constant 1 : index
    %733 = vector.load %arg9[%c0_752, %c0_753, %c1_754] : memref<2x10x17xf32, #tpu.memory_space<vmem>>, vector<2x10x9xf32>
    %c0_755 = arith.constant 0 : index
    %c16_756 = arith.constant 16 : index
    %c0_757 = arith.constant 0 : index
    %734 = vector.load %arg5[%c0_755, %c16_756, %c0_757] : memref<2x144x324xf32, #tpu.memory_space<vmem>>, vector<2x10x9xf32>
    tpu.vector_store %arg5[%c0_755, %c16_756, %c0_757], %733 {strides = array<i32>} : memref<2x144x324xf32, #tpu.memory_space<vmem>>, vector<2x10x9xf32>,
    %c0_758 = arith.constant 0 : index
    %c0_759 = arith.constant 0 : index
    %c2_760 = arith.constant 2 : index
    %735 = vector.load %arg9[%c0_758, %c0_759, %c2_760] : memref<2x10x17xf32, #tpu.memory_space<vmem>>, vector<2x10x9xf32>
    %c0_761 = arith.constant 0 : index
    %c32_762 = arith.constant 32 : index
    %c0_763 = arith.constant 0 : index
    %736 = vector.load %arg5[%c0_761, %c32_762, %c0_763] : memref<2x144x324xf32, #tpu.memory_space<vmem>>, vector<2x10x9xf32>
    tpu.vector_store %arg5[%c0_761, %c32_762, %c0_763], %735 {strides = array<i32>} : memref<2x144x324xf32, #tpu.memory_space<vmem>>, vector<2x10x9xf32>,
    %c0_764 = arith.constant 0 : index
    %c0_765 = arith.constant 0 : index
    %c3_766 = arith.constant 3 : index
    %737 = vector.load %arg9[%c0_764, %c0_765, %c3_766] : memref<2x10x17xf32, #tpu.memory_space<vmem>>, vector<2x10x9xf32>
    %c0_767 = arith.constant 0 : index
    %c48_768 = arith.constant 48 : index
    %c0_769 = arith.constant 0 : index
    %738 = vector.load %arg5[%c0_767, %c48_768, %c0_769] : memref<2x144x324xf32, #tpu.memory_space<vmem>>, vector<2x10x9xf32>
    tpu.vector_store %arg5[%c0_767, %c48_768, %c0_769], %737 {strides = array<i32>} : memref<2x144x324xf32, #tpu.memory_space<vmem>>, vector<2x10x9xf32>,
    %c0_770 = arith.constant 0 : index
    %c0_771 = arith.constant 0 : index
    %c4_772 = arith.constant 4 : index
    %739 = vector.load %arg9[%c0_770, %c0_771, %c4_772] : memref<2x10x17xf32, #tpu.memory_space<vmem>>, vector<2x10x9xf32>
    %c0_773 = arith.constant 0 : index
    %c64_774 = arith.constant 64 : index
    %c0_775 = arith.constant 0 : index
    %740 = vector.load %arg5[%c0_773, %c64_774, %c0_775] : memref<2x144x324xf32, #tpu.memory_space<vmem>>, vector<2x10x9xf32>
    tpu.vector_store %arg5[%c0_773, %c64_774, %c0_775], %739 {strides = array<i32>} : memref<2x144x324xf32, #tpu.memory_space<vmem>>, vector<2x10x9xf32>,
    %c0_776 = arith.constant 0 : index
    %c0_777 = arith.constant 0 : index
    %c5_778 = arith.constant 5 : index
    %741 = vector.load %arg9[%c0_776, %c0_777, %c5_778] : memref<2x10x17xf32, #tpu.memory_space<vmem>>, vector<2x10x9xf32>
    %c0_779 = arith.constant 0 : index
    %c80_780 = arith.constant 80 : index
    %c0_781 = arith.constant 0 : index
    %742 = vector.load %arg5[%c0_779, %c80_780, %c0_781] : memref<2x144x324xf32, #tpu.memory_space<vmem>>, vector<2x10x9xf32>
    tpu.vector_store %arg5[%c0_779, %c80_780, %c0_781], %741 {strides = array<i32>} : memref<2x144x324xf32, #tpu.memory_space<vmem>>, vector<2x10x9xf32>,
    %c0_782 = arith.constant 0 : index
    %c0_783 = arith.constant 0 : index
    %c6_784 = arith.constant 6 : index
    %743 = vector.load %arg9[%c0_782, %c0_783, %c6_784] : memref<2x10x17xf32, #tpu.memory_space<vmem>>, vector<2x10x9xf32>
    %c0_785 = arith.constant 0 : index
    %c96_786 = arith.constant 96 : index
    %c0_787 = arith.constant 0 : index
    %744 = vector.load %arg5[%c0_785, %c96_786, %c0_787] : memref<2x144x324xf32, #tpu.memory_space<vmem>>, vector<2x10x9xf32>
    tpu.vector_store %arg5[%c0_785, %c96_786, %c0_787], %743 {strides = array<i32>} : memref<2x144x324xf32, #tpu.memory_space<vmem>>, vector<2x10x9xf32>,
    %c0_788 = arith.constant 0 : index
    %c0_789 = arith.constant 0 : index
    %c7_790 = arith.constant 7 : index
    %745 = vector.load %arg9[%c0_788, %c0_789, %c7_790] : memref<2x10x17xf32, #tpu.memory_space<vmem>>, vector<2x10x9xf32>
    %c0_791 = arith.constant 0 : index
    %c112_792 = arith.constant 112 : index
    %c0_793 = arith.constant 0 : index
    %746 = vector.load %arg5[%c0_791, %c112_792, %c0_793] : memref<2x144x324xf32, #tpu.memory_space<vmem>>, vector<2x10x9xf32>
    tpu.vector_store %arg5[%c0_791, %c112_792, %c0_793], %745 {strides = array<i32>} : memref<2x144x324xf32, #tpu.memory_space<vmem>>, vector<2x10x9xf32>,
    %c0_794 = arith.constant 0 : index
    %c0_795 = arith.constant 0 : index
    %c8_796 = arith.constant 8 : index
    %747 = vector.load %arg9[%c0_794, %c0_795, %c8_796] : memref<2x10x17xf32, #tpu.memory_space<vmem>>, vector<2x10x9xf32>
    %c0_797 = arith.constant 0 : index
    %c128_798 = arith.constant 128 : index
    %c0_799 = arith.constant 0 : index
    %748 = vector.load %arg5[%c0_797, %c128_798, %c0_799] : memref<2x144x324xf32, #tpu.memory_space<vmem>>, vector<2x10x9xf32>
    tpu.vector_store %arg5[%c0_797, %c128_798, %c0_799], %747 {strides = array<i32>} : memref<2x144x324xf32, #tpu.memory_space<vmem>>, vector<2x10x9xf32>,
    %c0_800 = arith.constant 0 : index
    %c0_801 = arith.constant 0 : index
    %c0_802 = arith.constant 0 : index
    %749 = vector.load %arg5[%c0_800, %c0_801, %c0_802] : memref<2x144x324xf32, #tpu.memory_space<vmem>>, vector<1x144x9xf32>
    %750 = vector.shape_cast %749 : vector<1x144x9xf32> to vector<144x9xf32>
    %cst_803 = arith.constant dense<0.000000e+00> : vector<10x9xf32>
    %751 = tpu.matmul %729, %750, %cst_803 {dimension_numbers = #tpu.dot_dimension_numbers<[1], [0], [0], [1], [0, 0, 1, 1], [], []>} : vector<10x144xf32>, vector<144x9xf32>, vector<10x9xf32> -> vector<10x9xf32>
    %c1_804 = arith.constant 1 : index
    %c0_805 = arith.constant 0 : index
    %c0_806 = arith.constant 0 : index
    %752 = vector.load %arg5[%c1_804, %c0_805, %c0_806] : memref<2x144x324xf32, #tpu.memory_space<vmem>>, vector<1x144x9xf32>
    %753 = vector.shape_cast %752 : vector<1x144x9xf32> to vector<144x9xf32>
    %cst_807 = arith.constant dense<0.000000e+00> : vector<10x9xf32>
    %754 = tpu.matmul %729, %753, %cst_807 {dimension_numbers = #tpu.dot_dimension_numbers<[1], [0], [0], [1], [0, 0, 1, 1], [], []>} : vector<10x144xf32>, vector<144x9xf32>, vector<10x9xf32> -> vector<10x9xf32>
    %c0_808 = arith.constant 0 : index
    %c11_809 = arith.constant 11 : index
    %755 = vector.load %arg2[%c0_808, %c11_809] : memref<16x21xf32, #tpu.memory_space<vmem>>, vector<10x1xf32>
    %c0_810 = arith.constant 0 : index
    %c19_811 = arith.constant 19 : index
    %756 = vector.load %arg2[%c0_810, %c19_811] : memref<16x21xf32, #tpu.memory_space<vmem>>, vector<10x1xf32>
    %c507 = arith.constant 507 : index
    %c0_812 = arith.constant 0 : index
    %757 = vector.load %arg3[%c507, %c0_812] : memref<512x100xf32, #tpu.memory_space<vmem>>, vector<1x9xf32>
    %758 = vector.broadcast %757 : vector<1x9xf32> to vector<10x9xf32>
    %759 = arith.mulf %751, %758 : vector<10x9xf32>
    %cst_813 = arith.constant dense<0.000000e+00> : vector<10xf32>
    %760 = vector.multi_reduction <add>, %759, %cst_813 [1] : vector<10x9xf32> to vector<10xf32>
    %761 = vector.shape_cast %760 : vector<10xf32> to vector<10x1xf32>
    %cst_814 = arith.constant 0.000000e+00 : f32
    %762 = vector.broadcast %cst_814 : f32 to vector<10x1xf32>
    %763 = arith.addf %762, %761 : vector<10x1xf32>
    %764 = vector.broadcast %757 : vector<1x9xf32> to vector<10x9xf32>
    %765 = arith.mulf %754, %764 : vector<10x9xf32>
    %cst_815 = arith.constant dense<0.000000e+00> : vector<10xf32>
    %766 = vector.multi_reduction <add>, %765, %cst_815 [1] : vector<10x9xf32> to vector<10xf32>
    %767 = vector.shape_cast %766 : vector<10xf32> to vector<10x1xf32>
    %768 = arith.addf %763, %767 : vector<10x1xf32>
    %cst_816 = arith.constant 5.000000e-01 : f32
    %769 = vector.broadcast %cst_816 : f32 to vector<10x1xf32>
    %770 = arith.mulf %768, %769 : vector<10x1xf32>
    %771 = vector.broadcast %770 : vector<10x1xf32> to vector<10x9xf32>
    %772 = arith.subf %751, %771 : vector<10x9xf32>
    %773 = vector.broadcast %757 : vector<1x9xf32> to vector<10x9xf32>
    %774 = arith.mulf %772, %773 : vector<10x9xf32>
    %775 = vector.broadcast %770 : vector<10x1xf32> to vector<10x9xf32>
    %776 = arith.subf %754, %775 : vector<10x9xf32>
    %777 = vector.broadcast %757 : vector<1x9xf32> to vector<10x9xf32>
    %778 = arith.mulf %776, %777 : vector<10x9xf32>
    %779 = arith.mulf %774, %774 : vector<10x9xf32>
    %cst_817 = arith.constant dense<0.000000e+00> : vector<10xf32>
    %780 = vector.multi_reduction <add>, %779, %cst_817 [1] : vector<10x9xf32> to vector<10xf32>
    %781 = vector.shape_cast %780 : vector<10xf32> to vector<10x1xf32>
    %cst_818 = arith.constant 0.000000e+00 : f32
    %782 = vector.broadcast %cst_818 : f32 to vector<10x1xf32>
    %783 = arith.addf %782, %781 : vector<10x1xf32>
    %784 = arith.mulf %778, %778 : vector<10x9xf32>
    %cst_819 = arith.constant dense<0.000000e+00> : vector<10xf32>
    %785 = vector.multi_reduction <add>, %784, %cst_819 [1] : vector<10x9xf32> to vector<10xf32>
    %786 = vector.shape_cast %785 : vector<10xf32> to vector<10x1xf32>
    %787 = arith.addf %783, %786 : vector<10x1xf32>
    %cst_820 = arith.constant 5.000000e-01 : f32
    %788 = vector.broadcast %cst_820 : f32 to vector<10x1xf32>
    %789 = arith.mulf %787, %788 : vector<10x1xf32>
    %cst_821 = arith.constant 9.99999974E-6 : f32
    %790 = vector.broadcast %cst_821 : f32 to vector<10x1xf32>
    %791 = arith.addf %789, %790 : vector<10x1xf32>
    %792 = math.rsqrt %791 : vector<10x1xf32>
    %793 = arith.mulf %755, %792 : vector<10x1xf32>
    %794 = vector.broadcast %793 : vector<10x1xf32> to vector<10x9xf32>
    %795 = arith.mulf %774, %794 : vector<10x9xf32>
    %796 = vector.broadcast %756 : vector<10x1xf32> to vector<10x9xf32>
    %797 = arith.addf %795, %796 : vector<10x9xf32>
    %cst_822 = arith.constant 0.000000e+00 : f32
    %798 = vector.broadcast %cst_822 : f32 to vector<10x9xf32>
    %799 = arith.maximumf %797, %798 : vector<10x9xf32>
    %800 = vector.broadcast %757 : vector<1x9xf32> to vector<10x9xf32>
    %801 = arith.mulf %799, %800 : vector<10x9xf32>
    %802 = vector.broadcast %793 : vector<10x1xf32> to vector<10x9xf32>
    %803 = arith.mulf %778, %802 : vector<10x9xf32>
    %804 = vector.broadcast %756 : vector<10x1xf32> to vector<10x9xf32>
    %805 = arith.addf %803, %804 : vector<10x9xf32>
    %cst_823 = arith.constant 0.000000e+00 : f32
    %806 = vector.broadcast %cst_823 : f32 to vector<10x9xf32>
    %807 = arith.maximumf %805, %806 : vector<10x9xf32>
    %808 = vector.broadcast %757 : vector<1x9xf32> to vector<10x9xf32>
    %809 = arith.mulf %807, %808 : vector<10x9xf32>
    %c0_824 = arith.constant 0 : index
    %c0_825 = arith.constant 0 : index
    %c4_826 = arith.constant 4 : index
    %810 = vector.load %arg9[%c0_824, %c0_825, %c4_826] : memref<2x10x17xf32, #tpu.memory_space<vmem>>, vector<1x10x9xf32>
    %811 = vector.shape_cast %810 : vector<1x10x9xf32> to vector<10x9xf32>
    %812 = vector.shape_cast %801 : vector<10x9xf32> to vector<1x10x9xf32>
    tpu.vector_store %arg9[%c0_824, %c0_825, %c4_826], %812 {strides = array<i32>} : memref<2x10x17xf32, #tpu.memory_space<vmem>>, vector<1x10x9xf32>,
    %c1_827 = arith.constant 1 : index
    %c0_828 = arith.constant 0 : index
    %c4_829 = arith.constant 4 : index
    %813 = vector.load %arg9[%c1_827, %c0_828, %c4_829] : memref<2x10x17xf32, #tpu.memory_space<vmem>>, vector<1x10x9xf32>
    %814 = vector.shape_cast %813 : vector<1x10x9xf32> to vector<10x9xf32>
    %815 = vector.shape_cast %809 : vector<10x9xf32> to vector<1x10x9xf32>
    tpu.vector_store %arg9[%c1_827, %c0_828, %c4_829], %815 {strides = array<i32>} : memref<2x10x17xf32, #tpu.memory_space<vmem>>, vector<1x10x9xf32>,
    %c0_830 = arith.constant 0 : index
    %c0_831 = arith.constant 0 : index
    %c0_832 = arith.constant 0 : index
    %816 = vector.load %arg9[%c0_830, %c0_831, %c0_832] : memref<2x10x17xf32, #tpu.memory_space<vmem>>, vector<2x10x9xf32>
    %c0_833 = arith.constant 0 : index
    %c0_834 = arith.constant 0 : index
    %c0_835 = arith.constant 0 : index
    %817 = vector.load %arg5[%c0_833, %c0_834, %c0_835] : memref<2x144x324xf32, #tpu.memory_space<vmem>>, vector<2x10x9xf32>
    tpu.vector_store %arg5[%c0_833, %c0_834, %c0_835], %816 {strides = array<i32>} : memref<2x144x324xf32, #tpu.memory_space<vmem>>, vector<2x10x9xf32>,
    %c0_836 = arith.constant 0 : index
    %c0_837 = arith.constant 0 : index
    %c1_838 = arith.constant 1 : index
    %818 = vector.load %arg9[%c0_836, %c0_837, %c1_838] : memref<2x10x17xf32, #tpu.memory_space<vmem>>, vector<2x10x9xf32>
    %c0_839 = arith.constant 0 : index
    %c16_840 = arith.constant 16 : index
    %c0_841 = arith.constant 0 : index
    %819 = vector.load %arg5[%c0_839, %c16_840, %c0_841] : memref<2x144x324xf32, #tpu.memory_space<vmem>>, vector<2x10x9xf32>
    tpu.vector_store %arg5[%c0_839, %c16_840, %c0_841], %818 {strides = array<i32>} : memref<2x144x324xf32, #tpu.memory_space<vmem>>, vector<2x10x9xf32>,
    %c0_842 = arith.constant 0 : index
    %c0_843 = arith.constant 0 : index
    %c2_844 = arith.constant 2 : index
    %820 = vector.load %arg9[%c0_842, %c0_843, %c2_844] : memref<2x10x17xf32, #tpu.memory_space<vmem>>, vector<2x10x9xf32>
    %c0_845 = arith.constant 0 : index
    %c32_846 = arith.constant 32 : index
    %c0_847 = arith.constant 0 : index
    %821 = vector.load %arg5[%c0_845, %c32_846, %c0_847] : memref<2x144x324xf32, #tpu.memory_space<vmem>>, vector<2x10x9xf32>
    tpu.vector_store %arg5[%c0_845, %c32_846, %c0_847], %820 {strides = array<i32>} : memref<2x144x324xf32, #tpu.memory_space<vmem>>, vector<2x10x9xf32>,
    %c0_848 = arith.constant 0 : index
    %c0_849 = arith.constant 0 : index
    %c3_850 = arith.constant 3 : index
    %822 = vector.load %arg9[%c0_848, %c0_849, %c3_850] : memref<2x10x17xf32, #tpu.memory_space<vmem>>, vector<2x10x9xf32>
    %c0_851 = arith.constant 0 : index
    %c48_852 = arith.constant 48 : index
    %c0_853 = arith.constant 0 : index
    %823 = vector.load %arg5[%c0_851, %c48_852, %c0_853] : memref<2x144x324xf32, #tpu.memory_space<vmem>>, vector<2x10x9xf32>
    tpu.vector_store %arg5[%c0_851, %c48_852, %c0_853], %822 {strides = array<i32>} : memref<2x144x324xf32, #tpu.memory_space<vmem>>, vector<2x10x9xf32>,
    %c0_854 = arith.constant 0 : index
    %c0_855 = arith.constant 0 : index
    %c4_856 = arith.constant 4 : index
    %824 = vector.load %arg9[%c0_854, %c0_855, %c4_856] : memref<2x10x17xf32, #tpu.memory_space<vmem>>, vector<2x10x9xf32>
    %c0_857 = arith.constant 0 : index
    %c64_858 = arith.constant 64 : index
    %c0_859 = arith.constant 0 : index
    %825 = vector.load %arg5[%c0_857, %c64_858, %c0_859] : memref<2x144x324xf32, #tpu.memory_space<vmem>>, vector<2x10x9xf32>
    tpu.vector_store %arg5[%c0_857, %c64_858, %c0_859], %824 {strides = array<i32>} : memref<2x144x324xf32, #tpu.memory_space<vmem>>, vector<2x10x9xf32>,
    %c0_860 = arith.constant 0 : index
    %c0_861 = arith.constant 0 : index
    %c5_862 = arith.constant 5 : index
    %826 = vector.load %arg9[%c0_860, %c0_861, %c5_862] : memref<2x10x17xf32, #tpu.memory_space<vmem>>, vector<2x10x9xf32>
    %c0_863 = arith.constant 0 : index
    %c80_864 = arith.constant 80 : index
    %c0_865 = arith.constant 0 : index
    %827 = vector.load %arg5[%c0_863, %c80_864, %c0_865] : memref<2x144x324xf32, #tpu.memory_space<vmem>>, vector<2x10x9xf32>
    tpu.vector_store %arg5[%c0_863, %c80_864, %c0_865], %826 {strides = array<i32>} : memref<2x144x324xf32, #tpu.memory_space<vmem>>, vector<2x10x9xf32>,
    %c0_866 = arith.constant 0 : index
    %c0_867 = arith.constant 0 : index
    %c6_868 = arith.constant 6 : index
    %828 = vector.load %arg9[%c0_866, %c0_867, %c6_868] : memref<2x10x17xf32, #tpu.memory_space<vmem>>, vector<2x10x9xf32>
    %c0_869 = arith.constant 0 : index
    %c96_870 = arith.constant 96 : index
    %c0_871 = arith.constant 0 : index
    %829 = vector.load %arg5[%c0_869, %c96_870, %c0_871] : memref<2x144x324xf32, #tpu.memory_space<vmem>>, vector<2x10x9xf32>
    tpu.vector_store %arg5[%c0_869, %c96_870, %c0_871], %828 {strides = array<i32>} : memref<2x144x324xf32, #tpu.memory_space<vmem>>, vector<2x10x9xf32>,
    %c0_872 = arith.constant 0 : index
    %c0_873 = arith.constant 0 : index
    %c7_874 = arith.constant 7 : index
    %830 = vector.load %arg9[%c0_872, %c0_873, %c7_874] : memref<2x10x17xf32, #tpu.memory_space<vmem>>, vector<2x10x9xf32>
    %c0_875 = arith.constant 0 : index
    %c112_876 = arith.constant 112 : index
    %c0_877 = arith.constant 0 : index
    %831 = vector.load %arg5[%c0_875, %c112_876, %c0_877] : memref<2x144x324xf32, #tpu.memory_space<vmem>>, vector<2x10x9xf32>
    tpu.vector_store %arg5[%c0_875, %c112_876, %c0_877], %830 {strides = array<i32>} : memref<2x144x324xf32, #tpu.memory_space<vmem>>, vector<2x10x9xf32>,
    %c0_878 = arith.constant 0 : index
    %c0_879 = arith.constant 0 : index
    %c8_880 = arith.constant 8 : index
    %832 = vector.load %arg9[%c0_878, %c0_879, %c8_880] : memref<2x10x17xf32, #tpu.memory_space<vmem>>, vector<2x10x9xf32>
    %c0_881 = arith.constant 0 : index
    %c128_882 = arith.constant 128 : index
    %c0_883 = arith.constant 0 : index
    %833 = vector.load %arg5[%c0_881, %c128_882, %c0_883] : memref<2x144x324xf32, #tpu.memory_space<vmem>>, vector<2x10x9xf32>
    tpu.vector_store %arg5[%c0_881, %c128_882, %c0_883], %832 {strides = array<i32>} : memref<2x144x324xf32, #tpu.memory_space<vmem>>, vector<2x10x9xf32>,
    %c0_884 = arith.constant 0 : index
    %c0_885 = arith.constant 0 : index
    %c0_886 = arith.constant 0 : index
    %834 = vector.load %arg5[%c0_884, %c0_885, %c0_886] : memref<2x144x324xf32, #tpu.memory_space<vmem>>, vector<1x144x9xf32>
    %835 = vector.shape_cast %834 : vector<1x144x9xf32> to vector<144x9xf32>
    %cst_887 = arith.constant dense<0.000000e+00> : vector<10x9xf32>
    %836 = tpu.matmul %730, %835, %cst_887 {dimension_numbers = #tpu.dot_dimension_numbers<[1], [0], [0], [1], [0, 0, 1, 1], [], []>} : vector<10x144xf32>, vector<144x9xf32>, vector<10x9xf32> -> vector<10x9xf32>
    %c1_888 = arith.constant 1 : index
    %c0_889 = arith.constant 0 : index
    %c0_890 = arith.constant 0 : index
    %837 = vector.load %arg5[%c1_888, %c0_889, %c0_890] : memref<2x144x324xf32, #tpu.memory_space<vmem>>, vector<1x144x9xf32>
    %838 = vector.shape_cast %837 : vector<1x144x9xf32> to vector<144x9xf32>
    %cst_891 = arith.constant dense<0.000000e+00> : vector<10x9xf32>
    %839 = tpu.matmul %730, %838, %cst_891 {dimension_numbers = #tpu.dot_dimension_numbers<[1], [0], [0], [1], [0, 0, 1, 1], [], []>} : vector<10x144xf32>, vector<144x9xf32>, vector<10x9xf32> -> vector<10x9xf32>
    %c0_892 = arith.constant 0 : index
    %c12_893 = arith.constant 12 : index
    %840 = vector.load %arg2[%c0_892, %c12_893] : memref<16x21xf32, #tpu.memory_space<vmem>>, vector<10x1xf32>
    %c0_894 = arith.constant 0 : index
    %c20_895 = arith.constant 20 : index
    %841 = vector.load %arg2[%c0_894, %c20_895] : memref<16x21xf32, #tpu.memory_space<vmem>>, vector<10x1xf32>
    %c507_896 = arith.constant 507 : index
    %c0_897 = arith.constant 0 : index
    %842 = vector.load %arg3[%c507_896, %c0_897] : memref<512x100xf32, #tpu.memory_space<vmem>>, vector<1x9xf32>
    %843 = vector.broadcast %842 : vector<1x9xf32> to vector<10x9xf32>
    %844 = arith.mulf %836, %843 : vector<10x9xf32>
    %cst_898 = arith.constant dense<0.000000e+00> : vector<10xf32>
    %845 = vector.multi_reduction <add>, %844, %cst_898 [1] : vector<10x9xf32> to vector<10xf32>
    %846 = vector.shape_cast %845 : vector<10xf32> to vector<10x1xf32>
    %cst_899 = arith.constant 0.000000e+00 : f32
    %847 = vector.broadcast %cst_899 : f32 to vector<10x1xf32>
    %848 = arith.addf %847, %846 : vector<10x1xf32>
    %849 = vector.broadcast %842 : vector<1x9xf32> to vector<10x9xf32>
    %850 = arith.mulf %839, %849 : vector<10x9xf32>
    %cst_900 = arith.constant dense<0.000000e+00> : vector<10xf32>
    %851 = vector.multi_reduction <add>, %850, %cst_900 [1] : vector<10x9xf32> to vector<10xf32>
    %852 = vector.shape_cast %851 : vector<10xf32> to vector<10x1xf32>
    %853 = arith.addf %848, %852 : vector<10x1xf32>
    %cst_901 = arith.constant 5.000000e-01 : f32
    %854 = vector.broadcast %cst_901 : f32 to vector<10x1xf32>
    %855 = arith.mulf %853, %854 : vector<10x1xf32>
    %856 = vector.broadcast %855 : vector<10x1xf32> to vector<10x9xf32>
    %857 = arith.subf %836, %856 : vector<10x9xf32>
    %858 = vector.broadcast %842 : vector<1x9xf32> to vector<10x9xf32>
    %859 = arith.mulf %857, %858 : vector<10x9xf32>
    %860 = vector.broadcast %855 : vector<10x1xf32> to vector<10x9xf32>
    %861 = arith.subf %839, %860 : vector<10x9xf32>
    %862 = vector.broadcast %842 : vector<1x9xf32> to vector<10x9xf32>
    %863 = arith.mulf %861, %862 : vector<10x9xf32>
    %864 = arith.mulf %859, %859 : vector<10x9xf32>
    %cst_902 = arith.constant dense<0.000000e+00> : vector<10xf32>
    %865 = vector.multi_reduction <add>, %864, %cst_902 [1] : vector<10x9xf32> to vector<10xf32>
    %866 = vector.shape_cast %865 : vector<10xf32> to vector<10x1xf32>
    %cst_903 = arith.constant 0.000000e+00 : f32
    %867 = vector.broadcast %cst_903 : f32 to vector<10x1xf32>
    %868 = arith.addf %867, %866 : vector<10x1xf32>
    %869 = arith.mulf %863, %863 : vector<10x9xf32>
    %cst_904 = arith.constant dense<0.000000e+00> : vector<10xf32>
    %870 = vector.multi_reduction <add>, %869, %cst_904 [1] : vector<10x9xf32> to vector<10xf32>
    %871 = vector.shape_cast %870 : vector<10xf32> to vector<10x1xf32>
    %872 = arith.addf %868, %871 : vector<10x1xf32>
    %cst_905 = arith.constant 5.000000e-01 : f32
    %873 = vector.broadcast %cst_905 : f32 to vector<10x1xf32>
    %874 = arith.mulf %872, %873 : vector<10x1xf32>
    %cst_906 = arith.constant 9.99999974E-6 : f32
    %875 = vector.broadcast %cst_906 : f32 to vector<10x1xf32>
    %876 = arith.addf %874, %875 : vector<10x1xf32>
    %877 = math.rsqrt %876 : vector<10x1xf32>
    %878 = arith.mulf %840, %877 : vector<10x1xf32>
    %879 = vector.broadcast %878 : vector<10x1xf32> to vector<10x9xf32>
    %880 = arith.mulf %859, %879 : vector<10x9xf32>
    %881 = vector.broadcast %841 : vector<10x1xf32> to vector<10x9xf32>
    %882 = arith.addf %880, %881 : vector<10x9xf32>
    %883 = vector.broadcast %842 : vector<1x9xf32> to vector<10x9xf32>
    %884 = arith.mulf %882, %883 : vector<10x9xf32>
    %885 = vector.broadcast %878 : vector<10x1xf32> to vector<10x9xf32>
    %886 = arith.mulf %863, %885 : vector<10x9xf32>
    %887 = vector.broadcast %841 : vector<10x1xf32> to vector<10x9xf32>
    %888 = arith.addf %886, %887 : vector<10x9xf32>
    %889 = vector.broadcast %842 : vector<1x9xf32> to vector<10x9xf32>
    %890 = arith.mulf %888, %889 : vector<10x9xf32>
    %891 = arith.addf %884, %721 : vector<10x9xf32>
    %cst_907 = arith.constant 0.000000e+00 : f32
    %892 = vector.broadcast %cst_907 : f32 to vector<10x9xf32>
    %893 = arith.maximumf %891, %892 : vector<10x9xf32>
    %894 = arith.addf %890, %722 : vector<10x9xf32>
    %cst_908 = arith.constant 0.000000e+00 : f32
    %895 = vector.broadcast %cst_908 : f32 to vector<10x9xf32>
    %896 = arith.maximumf %894, %895 : vector<10x9xf32>
    %c0_909 = arith.constant 0 : index
    %c0_910 = arith.constant 0 : index
    %c4_911 = arith.constant 4 : index
    %897 = vector.load %arg9[%c0_909, %c0_910, %c4_911] : memref<2x10x17xf32, #tpu.memory_space<vmem>>, vector<1x10x9xf32>
    %898 = vector.shape_cast %897 : vector<1x10x9xf32> to vector<10x9xf32>
    %899 = vector.shape_cast %893 : vector<10x9xf32> to vector<1x10x9xf32>
    tpu.vector_store %arg9[%c0_909, %c0_910, %c4_911], %899 {strides = array<i32>} : memref<2x10x17xf32, #tpu.memory_space<vmem>>, vector<1x10x9xf32>,
    %c1_912 = arith.constant 1 : index
    %c0_913 = arith.constant 0 : index
    %c4_914 = arith.constant 4 : index
    %900 = vector.load %arg9[%c1_912, %c0_913, %c4_914] : memref<2x10x17xf32, #tpu.memory_space<vmem>>, vector<1x10x9xf32>
    %901 = vector.shape_cast %900 : vector<1x10x9xf32> to vector<10x9xf32>
    %902 = vector.shape_cast %896 : vector<10x9xf32> to vector<1x10x9xf32>
    tpu.vector_store %arg9[%c1_912, %c0_913, %c4_914], %902 {strides = array<i32>} : memref<2x10x17xf32, #tpu.memory_space<vmem>>, vector<1x10x9xf32>,
    %c32_915 = arith.constant 32 : index
    %c0_916 = arith.constant 0 : index
    %903 = vector.load %arg1[%c32_915, %c0_916] : memref<176x144xf32, #tpu.memory_space<vmem>>, vector<16x144xf32>
    %c0_917 = arith.constant 0 : index
    %c0_918 = arith.constant 0 : index
    %c0_919 = arith.constant 0 : index
    %904 = vector.load %arg9[%c0_917, %c0_918, %c0_919] : memref<2x10x17xf32, #tpu.memory_space<vmem>>, vector<2x10x9xf32>
    %c0_920 = arith.constant 0 : index
    %c0_921 = arith.constant 0 : index
    %c0_922 = arith.constant 0 : index
    %905 = vector.load %arg5[%c0_920, %c0_921, %c0_922] : memref<2x144x324xf32, #tpu.memory_space<vmem>>, vector<2x10x9xf32>
    tpu.vector_store %arg5[%c0_920, %c0_921, %c0_922], %904 {strides = array<i32>} : memref<2x144x324xf32, #tpu.memory_space<vmem>>, vector<2x10x9xf32>,
    %c0_923 = arith.constant 0 : index
    %c0_924 = arith.constant 0 : index
    %c1_925 = arith.constant 1 : index
    %906 = vector.load %arg9[%c0_923, %c0_924, %c1_925] : memref<2x10x17xf32, #tpu.memory_space<vmem>>, vector<2x10x9xf32>
    %c0_926 = arith.constant 0 : index
    %c16_927 = arith.constant 16 : index
    %c0_928 = arith.constant 0 : index
    %907 = vector.load %arg5[%c0_926, %c16_927, %c0_928] : memref<2x144x324xf32, #tpu.memory_space<vmem>>, vector<2x10x9xf32>
    tpu.vector_store %arg5[%c0_926, %c16_927, %c0_928], %906 {strides = array<i32>} : memref<2x144x324xf32, #tpu.memory_space<vmem>>, vector<2x10x9xf32>,
    %c0_929 = arith.constant 0 : index
    %c0_930 = arith.constant 0 : index
    %c2_931 = arith.constant 2 : index
    %908 = vector.load %arg9[%c0_929, %c0_930, %c2_931] : memref<2x10x17xf32, #tpu.memory_space<vmem>>, vector<2x10x9xf32>
    %c0_932 = arith.constant 0 : index
    %c32_933 = arith.constant 32 : index
    %c0_934 = arith.constant 0 : index
    %909 = vector.load %arg5[%c0_932, %c32_933, %c0_934] : memref<2x144x324xf32, #tpu.memory_space<vmem>>, vector<2x10x9xf32>
    tpu.vector_store %arg5[%c0_932, %c32_933, %c0_934], %908 {strides = array<i32>} : memref<2x144x324xf32, #tpu.memory_space<vmem>>, vector<2x10x9xf32>,
    %c0_935 = arith.constant 0 : index
    %c0_936 = arith.constant 0 : index
    %c3_937 = arith.constant 3 : index
    %910 = vector.load %arg9[%c0_935, %c0_936, %c3_937] : memref<2x10x17xf32, #tpu.memory_space<vmem>>, vector<2x10x9xf32>
    %c0_938 = arith.constant 0 : index
    %c48_939 = arith.constant 48 : index
    %c0_940 = arith.constant 0 : index
    %911 = vector.load %arg5[%c0_938, %c48_939, %c0_940] : memref<2x144x324xf32, #tpu.memory_space<vmem>>, vector<2x10x9xf32>
    tpu.vector_store %arg5[%c0_938, %c48_939, %c0_940], %910 {strides = array<i32>} : memref<2x144x324xf32, #tpu.memory_space<vmem>>, vector<2x10x9xf32>,
    %c0_941 = arith.constant 0 : index
    %c0_942 = arith.constant 0 : index
    %c4_943 = arith.constant 4 : index
    %912 = vector.load %arg9[%c0_941, %c0_942, %c4_943] : memref<2x10x17xf32, #tpu.memory_space<vmem>>, vector<2x10x9xf32>
    %c0_944 = arith.constant 0 : index
    %c64_945 = arith.constant 64 : index
    %c0_946 = arith.constant 0 : index
    %913 = vector.load %arg5[%c0_944, %c64_945, %c0_946] : memref<2x144x324xf32, #tpu.memory_space<vmem>>, vector<2x10x9xf32>
    tpu.vector_store %arg5[%c0_944, %c64_945, %c0_946], %912 {strides = array<i32>} : memref<2x144x324xf32, #tpu.memory_space<vmem>>, vector<2x10x9xf32>,
    %c0_947 = arith.constant 0 : index
    %c0_948 = arith.constant 0 : index
    %c5_949 = arith.constant 5 : index
    %914 = vector.load %arg9[%c0_947, %c0_948, %c5_949] : memref<2x10x17xf32, #tpu.memory_space<vmem>>, vector<2x10x9xf32>
    %c0_950 = arith.constant 0 : index
    %c80_951 = arith.constant 80 : index
    %c0_952 = arith.constant 0 : index
    %915 = vector.load %arg5[%c0_950, %c80_951, %c0_952] : memref<2x144x324xf32, #tpu.memory_space<vmem>>, vector<2x10x9xf32>
    tpu.vector_store %arg5[%c0_950, %c80_951, %c0_952], %914 {strides = array<i32>} : memref<2x144x324xf32, #tpu.memory_space<vmem>>, vector<2x10x9xf32>,
    %c0_953 = arith.constant 0 : index
    %c0_954 = arith.constant 0 : index
    %c6_955 = arith.constant 6 : index
    %916 = vector.load %arg9[%c0_953, %c0_954, %c6_955] : memref<2x10x17xf32, #tpu.memory_space<vmem>>, vector<2x10x9xf32>
    %c0_956 = arith.constant 0 : index
    %c96_957 = arith.constant 96 : index
    %c0_958 = arith.constant 0 : index
    %917 = vector.load %arg5[%c0_956, %c96_957, %c0_958] : memref<2x144x324xf32, #tpu.memory_space<vmem>>, vector<2x10x9xf32>
    tpu.vector_store %arg5[%c0_956, %c96_957, %c0_958], %916 {strides = array<i32>} : memref<2x144x324xf32, #tpu.memory_space<vmem>>, vector<2x10x9xf32>,
    %c0_959 = arith.constant 0 : index
    %c0_960 = arith.constant 0 : index
    %c7_961 = arith.constant 7 : index
    %918 = vector.load %arg9[%c0_959, %c0_960, %c7_961] : memref<2x10x17xf32, #tpu.memory_space<vmem>>, vector<2x10x9xf32>
    %c0_962 = arith.constant 0 : index
    %c112_963 = arith.constant 112 : index
    %c0_964 = arith.constant 0 : index
    %919 = vector.load %arg5[%c0_962, %c112_963, %c0_964] : memref<2x144x324xf32, #tpu.memory_space<vmem>>, vector<2x10x9xf32>
    tpu.vector_store %arg5[%c0_962, %c112_963, %c0_964], %918 {strides = array<i32>} : memref<2x144x324xf32, #tpu.memory_space<vmem>>, vector<2x10x9xf32>,
    %c0_965 = arith.constant 0 : index
    %c0_966 = arith.constant 0 : index
    %c8_967 = arith.constant 8 : index
    %920 = vector.load %arg9[%c0_965, %c0_966, %c8_967] : memref<2x10x17xf32, #tpu.memory_space<vmem>>, vector<2x10x9xf32>
    %c0_968 = arith.constant 0 : index
    %c128_969 = arith.constant 128 : index
    %c0_970 = arith.constant 0 : index
    %921 = vector.load %arg5[%c0_968, %c128_969, %c0_970] : memref<2x144x324xf32, #tpu.memory_space<vmem>>, vector<2x10x9xf32>
    tpu.vector_store %arg5[%c0_968, %c128_969, %c0_970], %920 {strides = array<i32>} : memref<2x144x324xf32, #tpu.memory_space<vmem>>, vector<2x10x9xf32>,
    %c0_971 = arith.constant 0 : index
    %c0_972 = arith.constant 0 : index
    %c0_973 = arith.constant 0 : index
    %922 = vector.load %arg5[%c0_971, %c0_972, %c0_973] : memref<2x144x324xf32, #tpu.memory_space<vmem>>, vector<1x144x9xf32>
    %923 = vector.shape_cast %922 : vector<1x144x9xf32> to vector<144x9xf32>
    %cst_974 = arith.constant dense<0.000000e+00> : vector<16x9xf32>
    %924 = tpu.matmul %903, %923, %cst_974 {dimension_numbers = #tpu.dot_dimension_numbers<[1], [0], [0], [1], [0, 0, 1, 1], [], []>} : vector<16x144xf32>, vector<144x9xf32>, vector<16x9xf32> -> vector<16x9xf32>
    %c1_975 = arith.constant 1 : index
    %c0_976 = arith.constant 0 : index
    %c0_977 = arith.constant 0 : index
    %925 = vector.load %arg5[%c1_975, %c0_976, %c0_977] : memref<2x144x324xf32, #tpu.memory_space<vmem>>, vector<1x144x9xf32>
    %926 = vector.shape_cast %925 : vector<1x144x9xf32> to vector<144x9xf32>
    %cst_978 = arith.constant dense<0.000000e+00> : vector<16x9xf32>
    %927 = tpu.matmul %903, %926, %cst_978 {dimension_numbers = #tpu.dot_dimension_numbers<[1], [0], [0], [1], [0, 0, 1, 1], [], []>} : vector<16x144xf32>, vector<144x9xf32>, vector<16x9xf32> -> vector<16x9xf32>
    %c0_979 = arith.constant 0 : index
    %c4_980 = arith.constant 4 : index
    %928 = vector.load %arg2[%c0_979, %c4_980] : memref<16x21xf32, #tpu.memory_space<vmem>>, vector<16x1xf32>
    %c488 = arith.constant 488 : index
    %c0_981 = arith.constant 0 : index
    %929 = vector.load %arg3[%c488, %c0_981] : memref<512x100xf32, #tpu.memory_space<vmem>>, vector<9x1xf32>
    %930 = vector.broadcast %928 : vector<16x1xf32> to vector<16x9xf32>
    %931 = arith.addf %924, %930 : vector<16x9xf32>
    %cst_982 = arith.constant dense<0.000000e+00> : vector<16x1xf32>
    %932 = tpu.matmul %931, %929, %cst_982 {dimension_numbers = #tpu.dot_dimension_numbers<[1], [0], [0], [1], [0, 0, 1, 1], [], []>} : vector<16x9xf32>, vector<9x1xf32>, vector<16x1xf32> -> vector<16x1xf32>
    %933 = vector.broadcast %928 : vector<16x1xf32> to vector<16x9xf32>
    %934 = arith.addf %927, %933 : vector<16x9xf32>
    %cst_983 = arith.constant dense<0.000000e+00> : vector<16x1xf32>
    %935 = tpu.matmul %934, %929, %cst_983 {dimension_numbers = #tpu.dot_dimension_numbers<[1], [0], [0], [1], [0, 0, 1, 1], [], []>} : vector<16x9xf32>, vector<9x1xf32>, vector<16x1xf32> -> vector<16x1xf32>
    %c0_984 = arith.constant 0 : index
    %c0_985 = arith.constant 0 : index
    %c0_986 = arith.constant 0 : index
    %936 = vector.load %arg4[%c0_984, %c0_985, %c0_986] : memref<2x16x1xf32, #tpu.memory_space<vmem>>, vector<1x16x1xf32>
    %937 = vector.shape_cast %936 : vector<1x16x1xf32> to vector<16x1xf32>
    %938 = vector.shape_cast %932 : vector<16x1xf32> to vector<1x16x1xf32>
    tpu.vector_store %arg4[%c0_984, %c0_985, %c0_986], %938 {strides = array<i32>} : memref<2x16x1xf32, #tpu.memory_space<vmem>>, vector<1x16x1xf32>,
    %c1_987 = arith.constant 1 : index
    %c0_988 = arith.constant 0 : index
    %c0_989 = arith.constant 0 : index
    %939 = vector.load %arg4[%c1_987, %c0_988, %c0_989] : memref<2x16x1xf32, #tpu.memory_space<vmem>>, vector<1x16x1xf32>
    %940 = vector.shape_cast %939 : vector<1x16x1xf32> to vector<16x1xf32>
    %941 = vector.shape_cast %935 : vector<16x1xf32> to vector<1x16x1xf32>
    tpu.vector_store %arg4[%c1_987, %c0_988, %c0_989], %941 {strides = array<i32>} : memref<2x16x1xf32, #tpu.memory_space<vmem>>, vector<1x16x1xf32>,
    return
  }
}

</mosaic_0001>

<bundles_post_ra>
// kernel: forward.1
= control target key start
LH: loop header
LB: loop body
LE: loop exit
PB: predicated region body
PF: predicated region fallthrough
CT: control target
= control target key end

     0   :  { %vm19_vm0 = vcmask 556032   ;;  %v7963_v2 = vmov 0.0   ;;  %s7964_s19 = smov 90   ;;  %s7965_s20 = smov 92   ;;  %vm164_vm1 = vcmask 550912   ;;  %vm589_vm2 = vcmask 588800   ;;  %s10718_s0 = inlined_call_operand.vmem [shape: f32[2,3,362], index: 0, kind: input, shape index: {}]   ;;  %s10719_s1 = inlined_call_operand.vmem [shape: f32[176,144], index: 1, kind: input, shape index: {}]   ;;  %s10720_s2 = inlined_call_operand.vmem [shape: f32[16,21], index: 2, kind: input, shape index: {}]   ;;  %s10721_s3 = inlined_call_operand.vmem [shape: f32[512,100], index: 3, kind: input, shape index: {}]   ;;  %s10722_s4 = inlined_call_operand.vmem [shape: f32[2,16,1], index: 4, kind: output, shape index: {}]  }
   0x1   :  { %v8039_v0 = vld [vmem:[%s10718_s0 + $0x8] sm:$0x7]  ;;  %44 = vst.msk [vmem:[#allocation2 + $0xd0] sm:$0xff] %vm19_vm0, %v7963_v2  ;;  %17 = vst [vmem:[#allocation2] sm:$0xff] %v7963_v2  ;;  %660 = vmatprep.mubr.f32.mxu0 %v7963_v2  ;;  %v442_v5 = vld [vmem:[%s10718_s0] sm:$0x77] }
   0x2   :  { %v8044_v1 = vld [vmem:[%s10718_s0 + $0x8] sm:$0x7]  ;;  %18 = vst [vmem:[#allocation2 + $0x8] sm:$0xff] %v7963_v2  ;;  %20 = vst.msk [vmem:[#allocation2 + $0x10] sm:$0xff] %vm19_vm0, %v7963_v2  ;;  %456 = vrot.lane.b32.xlu0 %v8039_v0, %s7964_s19  ;;  %s7966_s27 = smov 91   ;;  %s7967_s28 = smov 108   ;;  %v450_v6 = vcombine.high %v442_v5, %v442_v5 }
   0x3   :  { %21 = vst [vmem:[#allocation2 + $0x18] sm:$0xff] %v7963_v2  ;;  %22 = vst [vmem:[#allocation2 + $0x20] sm:$0xff] %v7963_v2  ;;  %378 = vrot.lane.b32.xlu1 %v8044_v1, %s7965_s20  ;;  %v404_v3 = vld [vmem:[%s10718_s0 + $0x8] sm:$0x7]  ;;  %v403_v8 = vld [vmem:[%s10718_s0] sm:$0x77] }
   0x4   :  { %23 = vst.msk [vmem:[#allocation2 + $0x28] sm:$0xff] %vm19_vm0, %v7963_v2  ;;  %24 = vst [vmem:[#allocation2 + $0x30] sm:$0xff] %v7963_v2  ;;  %v326_v4 = vld [vmem:[%s10718_s0 + $0x8] sm:$0x7]  ;;  %s7968_s7 = smov 109   ;;  %v411_v9 = vcombine.high %v403_v8, %v403_v8  ;;  %s7969_s12 = smov 110  }
   0x5   :  { %25 = vst [vmem:[#allocation2 + $0x38] sm:$0xff] %v7963_v2  ;;  %26 = vst.msk [vmem:[#allocation2 + $0x40] sm:$0xff] %vm19_vm0, %v7963_v2  ;;  %v287_v7 = vld [vmem:[%s10718_s0 + $0x8] sm:$0x7]  ;;  %v364_v11 = vld [vmem:[%s10718_s0] sm:$0x77] }
   0x6   :  { %27 = vst [vmem:[#allocation2 + $0x48] sm:$0xff] %v7963_v2  ;;  %28 = vst [vmem:[#allocation2 + $0x50] sm:$0xff] %v7963_v2  ;;  %417 = vrot.lane.b32.xlu0 %v404_v3, %s7966_s27  ;;  %v248_v10 = vld [vmem:[%s10718_s0 + $0x8] sm:$0x7]  ;;  %v372_v12 = vcombine.high %v364_v11, %v364_v11  ;;  %v325_v15 = vld [vmem:[%s10718_s0] sm:$0x77] }
   0x7   :  { %29 = vst.msk [vmem:[#allocation2 + $0x58] sm:$0xff] %vm19_vm0, %v7963_v2  ;;  %30 = vst [vmem:[#allocation2 + $0x60] sm:$0xff] %v7963_v2  ;;  %339 = vrot.lane.b32.xlu1 %v326_v4, %s7967_s28  ;;  %v153_v13 = vld [vmem:[%s10718_s0 + $0x8] sm:$0x7]  ;;  %s7970_s21 = smov 126   ;;  %v333_v16 = vcombine.high %v325_v15, %v325_v15  ;;  %v8194_v19 = vld [vmem:[%s10719_s1] sm:$0xff] }
   0x8   :  { %31 = vst [vmem:[#allocation2 + $0x68] sm:$0xff] %v7963_v2  ;;  %32 = vst.msk [vmem:[#allocation2 + $0x70] sm:$0xff] %vm19_vm0, %v7963_v2  ;;  %v209_v14 = vld [vmem:[%s10718_s0 + $0x8] sm:$0x7]  ;;  %v286_v18 = vld [vmem:[%s10718_s0] sm:$0x77]  ;;  %7636 = vmatprep.mubr.msk.f32.mxu1 %vm589_vm2, %v8194_v19 }
   0x9   :  { %33 = vst [vmem:[#allocation2 + $0x78] sm:$0xff] %v7963_v2  ;;  %34 = vst [vmem:[#allocation2 + $0x80] sm:$0xff] %v7963_v2  ;;  %v170_v17 = vld [vmem:[%s10718_s0 + $0x8] sm:$0x7]  ;;  %s7971_s30 = smov 127   ;;  %v294_v20 = vcombine.high %v286_v18, %v286_v18  ;;  %v7972_v34 = vmov 0  }
   0xa   :  { %35 = vst.msk [vmem:[#allocation2 + $0x88] sm:$0xff] %vm19_vm0, %v7963_v2  ;;  %36 = vst [vmem:[#allocation2 + $0x90] sm:$0xff] %v7963_v2  ;;  %454 = vrot.lane.b32.xlu0 %v450_v6, %s7964_s19  ;;  %v247_v21 = vld [vmem:[%s10718_s0] sm:$0x77]  ;;  %v445_v29 = vld [vmem:[%s10718_s0 + $0x14] sm:$0x7]  ;;  %7862 = vset.pattern.permute.xlu1 %v7972_v34 }
   0xb   :  { %37 = vst [vmem:[#allocation2 + $0x98] sm:$0xff] %v7963_v2  ;;  %38 = vst.msk [vmem:[#allocation2 + $0xa0] sm:$0xff] %vm19_vm0, %v7963_v2  ;;  %300 = vrot.lane.b32.xlu1 %v287_v7, %s7968_s7  ;;  %v152_v22 = vld [vmem:[%s10718_s0] sm:$0x77]  ;;  %v255_v23 = vcombine.high %v247_v21, %v247_v21  ;;  %v444_v30 = vld [vmem:[%s10718_s0 + $0xc] sm:$0x77] }
   0xc   :  { %39 = vst [vmem:[#allocation2 + $0xa8] sm:$0xff] %v7963_v2  ;;  %40 = vst [vmem:[#allocation2 + $0xb0] sm:$0xff] %v7963_v2  ;;  %v158_v24 = vcombine.high %v152_v22, %v152_v22  ;;  %v208_v25 = vld [vmem:[%s10718_s0] sm:$0x77]  ;;  %v405_v31 = vld [vmem:[%s10718_s0 + $0xc] sm:$0x77]  ;;  %v451_v32 = vcombine.high %v444_v30, %v444_v30 }
   0xd   :  { %41 = vst.msk [vmem:[#allocation2 + $0xb8] sm:$0xff] %vm19_vm0, %v7963_v2  ;;  %42 = vst [vmem:[#allocation2 + $0xc0] sm:$0xff] %v7963_v2  ;;  %v216_v26 = vcombine.high %v208_v25, %v208_v25  ;;  %v169_v27 = vld [vmem:[%s10718_s0] sm:$0x77]  ;;  %v412_v33 = vcombine.high %v405_v31, %v405_v31  ;;  %v406_v36 = vld [vmem:[%s10718_s0 + $0x14] sm:$0x7] }
   0xe   :  { %43 = vst [vmem:[#allocation2 + $0xc8] sm:$0xff] %v7963_v2  ;;  %45 = vst [vmem:[#allocation2 + $0xd8] sm:$0xff] %v7963_v2  ;;  %452 = vrot.lane.b32.xlu0 %v442_v5, %s7964_s19  ;;  %v177_v28 = vcombine.high %v169_v27, %v169_v27  ;;  %v536_v35 = vld [vmem:[%s10720_s2] sm:$0xff]  ;;  %v537_v37 = vld [vmem:[%s10720_s2 + $0x8] sm:$0x3]  ;;  %vm464_vm3 = vcmask 736256  }
   0xf   :  { %46 = vst [vmem:[#allocation2 + $0xe0] sm:$0xff] %v7963_v2  ;;  %48 = vst [vmem:[#allocation2 + $0xf0] sm:$0xff] %v7963_v2  ;;  %415 = vrot.lane.b32.xlu1 %v411_v9, %s7966_s27  ;;  %v366_v38 = vld [vmem:[%s10718_s0 + $0xc] sm:$0x77]  ;;  %v367_v39 = vld [vmem:[%s10718_s0 + $0x14] sm:$0x7] }
  0x10   :  { %51 = vst [vmem:[#allocation2 + $0x108] sm:$0xff] %v7963_v2  ;;  %54 = vst [vmem:[#allocation2 + $0x120] sm:$0xff] %v7963_v2  ;;  %v327_v40 = vld [vmem:[%s10718_s0 + $0xc] sm:$0x77]  ;;  %v373_v41 = vcombine.high %v366_v38, %v366_v38  ;;  %v328_v43 = vld [vmem:[%s10718_s0 + $0x14] sm:$0x7] }
  0x11   :  { %57 = vst [vmem:[#allocation2 + $0x138] sm:$0xff] %v7963_v2  ;;  %60 = vst [vmem:[#allocation2 + $0x150] sm:$0xff] %v7963_v2  ;;  %v334_v42 = vcombine.high %v327_v40, %v327_v40  ;;  %v288_v44 = vld [vmem:[%s10718_s0 + $0xc] sm:$0x77]  ;;  %v289_v45 = vld [vmem:[%s10718_s0 + $0x14] sm:$0x7] }
  0x12   :  { %63 = vst [vmem:[#allocation2 + $0x168] sm:$0xff] %v7963_v2  ;;  %66 = vst [vmem:[#allocation2 + $0x180] sm:$0xff] %v7963_v2  ;;  %261 = vrot.lane.b32.xlu0 %v248_v10, %s7969_s12  ;;  %v249_v46 = vld [vmem:[%s10718_s0 + $0xc] sm:$0x77]  ;;  %v295_v47 = vcombine.high %v288_v44, %v288_v44  ;;  %v250_v49 = vld [vmem:[%s10718_s0 + $0x14] sm:$0x7] }
  0x13   :  { %69 = vst [vmem:[#allocation2 + $0x198] sm:$0xff] %v7963_v2  ;;  %72 = vst [vmem:[#allocation2 + $0x1b0] sm:$0xff] %v7963_v2  ;;  %413 = vrot.lane.b32.xlu1 %v403_v8, %s7966_s27  ;;  %v256_v48 = vcombine.high %v249_v46, %v249_v46  ;;  %v210_v50 = vld [vmem:[%s10718_s0 + $0xc] sm:$0x77]  ;;  %v211_v51 = vld [vmem:[%s10718_s0 + $0x14] sm:$0x7] }
  0x14   :  { %73 = vst [vmem:[#allocation2 + $0x1b8] sm:$0xff] %v7963_v2  ;;  %74 = vst.msk [vmem:[#allocation2 + $0x1c0] sm:$0xff] %vm19_vm0, %v7963_v2  ;;  %v171_v52 = vld [vmem:[%s10718_s0 + $0xc] sm:$0x77]  ;;  %v217_v53 = vcombine.high %v210_v50, %v210_v50  ;;  %v172_v55 = vld [vmem:[%s10718_s0 + $0x14] sm:$0x7] }
  0x15   :  { %75 = vst [vmem:[#allocation2 + $0x1c8] sm:$0xff] %v7963_v2  ;;  %76 = vst [vmem:[#allocation2 + $0x1d0] sm:$0xff] %v7963_v2  ;;  %v178_v54 = vcombine.high %v171_v52, %v171_v52  ;;  %vm425_vm4 = vcmask 744448   ;;  %vm386_vm5 = vcmask 752640   ;;  %vm347_vm6 = vcmask 883712   ;;  %s7975_s10 = smov 11  }
  0x16   :  { %77 = vst.msk [vmem:[#allocation2 + $0x1d8] sm:$0xff] %vm19_vm0, %v7963_v2  ;;  %78 = vst [vmem:[#allocation2 + $0x1e0] sm:$0xff] %v7963_v2  ;;  %376 = vrot.lane.b32.xlu0 %v372_v12, %s7965_s20  ;;  %vm308_vm7 = vcmask 891904   ;;  %vm269_vm8 = vcmask 900096   ;;  %vm230_vm9 = vcmask 1031168   ;;  %vm754_vm10 = vcmask 1043456  }
  0x17   :  { %79 = vst [vmem:[#allocation2 + $0x1e8] sm:$0xff] %v7963_v2  ;;  %80 = vst.msk [vmem:[#allocation2 + $0x1f0] sm:$0xff] %vm19_vm0, %v7963_v2  ;;  %222 = vrot.lane.b32.xlu1 %v209_v14, %s7970_s21  ;;  %vm191_vm11 = vcmask 1039360   ;;  %vm1227_vm12 = vcmask 812032   ;;  %vm1223_vm13 = vcmask 818176   ;;  %vm126_vm14 = vcmask 998400  }
  0x18   :  { %81 = vst [vmem:[#allocation2 + $0x1f8] sm:$0xff] %v7963_v2  ;;  %82 = vst [vmem:[#allocation2 + $0x200] sm:$0xff] %v7963_v2  ;;  %vm128_vm15 = vcmask 992256   ;;  %s7976_s11 = smov 107   ;;  %s7978_s13 = smov 117  }
  0x19   :  { %83 = vst.msk [vmem:[#allocation2 + $0x208] sm:$0xff] %vm19_vm0, %v7963_v2  ;;  %84 = vst [vmem:[#allocation2 + $0x210] sm:$0xff] %v7963_v2  ;;  %s7979_s14 = smov 118   ;;  %s7980_s15 = smov 106  }
  0x1a   :  { %85 = vst [vmem:[#allocation2 + $0x218] sm:$0xff] %v7963_v2  ;;  %86 = vst.msk [vmem:[#allocation2 + $0x220] sm:$0xff] %vm19_vm0, %v7963_v2  ;;  %374 = vrot.lane.b32.xlu0 %v364_v11, %s7965_s20  ;;  %s7986_s9 = smov 7   ;;  %s7989_s16 = smov 121  }
  0x1b   :  { %87 = vst [vmem:[#allocation2 + $0x228] sm:$0xff] %v7963_v2  ;;  %88 = vst [vmem:[#allocation2 + $0x230] sm:$0xff] %v7963_v2  ;;  %337 = vrot.lane.b32.xlu1 %v333_v16, %s7967_s28  ;;  %s7990_s17 = smov 122  }
  0x1c   :  { %89 = vst.msk [vmem:[#allocation2 + $0x238] sm:$0xff] %vm19_vm0, %v7963_v2  ;;  %90 = vst [vmem:[#allocation2 + $0x240] sm:$0xff] %v7963_v2 }
  0x1d   :  { %91 = vst [vmem:[#allocation2 + $0x248] sm:$0xff] %v7963_v2  ;;  %92 = vst.msk [vmem:[#allocation2 + $0x250] sm:$0xff] %vm19_vm0, %v7963_v2 }
  0x1e   :  { %93 = vst [vmem:[#allocation2 + $0x258] sm:$0xff] %v7963_v2  ;;  %94 = vst [vmem:[#allocation2 + $0x260] sm:$0xff] %v7963_v2  ;;  %183 = vrot.lane.b32.xlu0 %v170_v17, %s7971_s30 }
  0x1f   :  { %95 = vst.msk [vmem:[#allocation2 + $0x268] sm:$0xff] %vm19_vm0, %v7963_v2  ;;  %96 = vst [vmem:[#allocation2 + $0x270] sm:$0xff] %v7963_v2  ;;  %335 = vrot.lane.b32.xlu1 %v325_v15, %s7967_s28 }
  0x20   :  { %97 = vst [vmem:[#allocation2 + $0x278] sm:$0xff] %v7963_v2  ;;  %98 = vst.msk [vmem:[#allocation2 + $0x280] sm:$0xff] %vm19_vm0, %v7963_v2 }
  0x21   :  { %99 = vst [vmem:[#allocation2 + $0x288] sm:$0xff] %v7963_v2  ;;  %102 = vst [vmem:[#allocation2 + $0x2a0] sm:$0xff] %v7963_v2 }
  0x22   :  { %105 = vst [vmem:[#allocation2 + $0x2b8] sm:$0xff] %v7963_v2  ;;  %108 = vst [vmem:[#allocation2 + $0x2d0] sm:$0xff] %v7963_v2  ;;  %298 = vrot.lane.b32.xlu0 %v294_v20, %s7968_s7 }
  0x23   :  { %111 = vst [vmem:[#allocation2 + $0x2e8] sm:$0xff] %v7963_v2  ;;  %114 = vst [vmem:[#allocation2 + $0x300] sm:$0xff] %v7963_v2  ;;  %296 = vrot.lane.b32.xlu1 %v286_v18, %s7968_s7 }
  0x24   :  { %117 = vst [vmem:[#allocation2 + $0x318] sm:$0xff] %v7963_v2  ;;  %120 = vst [vmem:[#allocation2 + $0x330] sm:$0xff] %v7963_v2 }
  0x25   :  { %123 = vst [vmem:[#allocation2 + $0x348] sm:$0xff] %v7963_v2  ;;  %165 = vst.msk [vmem:[#allocation2 + $0x10] sm:$0x7] %vm164_vm1, %v153_v13 }
  0x26   :  { %162 = vst [vmem:[#allocation2] sm:$0x7] %v152_v22  ;;  %163 = vst [vmem:[#allocation2 + $0x8] sm:$0x7] %v158_v24  ;;  %259 = vrot.lane.b32.xlu0 %v255_v23, %s7969_s12 }
  0x27   :  { %257 = vrot.lane.b32.xlu1 %v247_v21, %s7969_s12 }
  0x2a   :  { %220 = vrot.lane.b32.xlu0 %v216_v26, %s7970_s21 }
  0x2b   :  { %218 = vrot.lane.b32.xlu1 %v208_v25, %s7970_s21 }
  0x2e   :  { %181 = vrot.lane.b32.xlu0 %v177_v28, %s7971_s30 }
  0x2f   :  { %179 = vrot.lane.b32.xlu1 %v169_v27, %s7971_s30 }
  0x32   :  { %460 = vrot.lane.b32.xlu0 %v451_v32, %s7964_s19 }
  0x33   :  { %462 = vrot.lane.b32.xlu1 %v445_v29, %s7964_s19 }
  0x36   :  { %458 = vrot.lane.b32.xlu0 %v444_v30, %s7964_s19  ;;  %s7977_s19 = smov 116  }
  0x37   :  { %421 = vrot.lane.b32.xlu1 %v412_v33, %s7966_s27 }
  0x3a   :  { %423 = vrot.lane.b32.xlu0 %v406_v36, %s7966_s27 }
  0x3b   :  { %581 = vperm.xlu1 %7862, %v536_v35  }
  0x3e   :  { %419 = vrot.lane.b32.xlu0 %v405_v31, %s7966_s27  ;;  %s7991_s27 = smov 114  }
  0x3f   :  { %586 = vperm.xlu1 %7862, %v537_v37  }
  0x42   :  { %382 = vrot.lane.b32.xlu0 %v373_v41, %s7965_s20 }
  0x43   :  { %384 = vrot.lane.b32.xlu1 %v367_v39, %s7965_s20  ;;  %v483_v39 = vld [vmem:[#allocation2 + $0x10] sm:$0xff] }
  0x46   :  { %380 = vrot.lane.b32.xlu0 %v366_v38, %s7965_s20 }
  0x47   :  { %343 = vrot.lane.b32.xlu1 %v334_v42, %s7967_s28 }
  0x4a   :  { %345 = vrot.lane.b32.xlu0 %v328_v43, %s7967_s28  ;;  %v8331_v43 = vld [vmem:[%s10719_s1 + $0x10] sm:$0x3] }
  0x4b   :  { %341 = vrot.lane.b32.xlu1 %v327_v40, %s7967_s28 }
  0x4e   :  { %304 = vrot.lane.b32.xlu0 %v295_v47, %s7968_s7  ;;  %v8341_v47 = vld [vmem:[%s10721_s3 + $0x138] sm:$0xff] }
  0x4f   :  { %306 = vrot.lane.b32.xlu1 %v289_v45, %s7968_s7 }
  0x52   :  { %302 = vrot.lane.b32.xlu0 %v288_v44, %s7968_s7  ;;  %v8336_v44 = vld [vmem:[%s10721_s3 + $0x140] sm:$0xf] }
  0x53   :  { %265 = vrot.lane.b32.xlu1 %v256_v48, %s7969_s12 }
  0x56   :  { %267 = vrot.lane.b32.xlu0 %v250_v49, %s7969_s12 }
  0x57   :  { %263 = vrot.lane.b32.xlu1 %v249_v46, %s7969_s12  ;;  %s7987_s12 = smov 115  }
  0x5a   :  { %226 = vrot.lane.b32.xlu0 %v217_v53, %s7970_s21 }
  0x5b   :  { %228 = vrot.lane.b32.xlu1 %v211_v51, %s7970_s21 }
  0x5e   :  { %224 = vrot.lane.b32.xlu0 %v210_v50, %s7970_s21 }
  0x5f   :  { %187 = vrot.lane.b32.xlu1 %v178_v54, %s7971_s30 }
  0x62   :  { %189 = vrot.lane.b32.xlu0 %v172_v55, %s7971_s30  ;;  %v8362_v55 = vld [vmem:[%s10721_s3 + $0x128] sm:$0xff] }
  0x63   :  { %185 = vrot.lane.b32.xlu1 %v171_v52, %s7971_s30  ;;  %v8355_v52 = vld [vmem:[%s10721_s3 + $0x130] sm:$0xff] }
  0x74   :  { %v457_v56 = vpop.permute.xlu0 %456 }
  0x75   :  { %v379_v57 = vpop.permute.xlu1 %378  ;;  %477 = vst.msk [vmem:[#allocation2 + $0xd0] sm:$0x7] %vm164_vm1, %v457_v56 }
  0x76   :  { %399 = vst.msk [vmem:[#allocation2 + $0xa0] sm:$0x7] %vm164_vm1, %v379_v57 }
  0x78   :  { %v418_v58 = vpop.permute.xlu0 %417 }
  0x79   :  { %v340_v59 = vpop.permute.xlu1 %339  ;;  %438 = vst.msk [vmem:[#allocation2 + $0xb8] sm:$0x7] %vm164_vm1, %v418_v58 }
  0x7a   :  { %360 = vst.msk [vmem:[#allocation2 + $0x88] sm:$0x7] %vm164_vm1, %v340_v59 }
  0x7c   :  { %v455_v60 = vpop.permute.xlu0 %454  ;;  %v507_v62 = vld [vmem:[#allocation2 + $0xd0] sm:$0xff] }
  0x7d   :  { %v8302_v61 = vpop.permute.xlu1 %300  ;;  %v466_v63 = vsel %vm464_vm3, %v455_v60, %v457_v56  ;;  %7618 = vmatprep.subr.mxu1 %v507_v62  ;;  %v501_v6 = vld [vmem:[#allocation2 + $0xa0] sm:$0xff] }
  0x7e   :  { %321 = vst.msk [vmem:[#allocation2 + $0x70] sm:$0x7] %vm164_vm1, %v8302_v61  ;;  %476 = vst [vmem:[#allocation2 + $0xc8] sm:$0x7] %v466_v63  ;;  %7619 = vmatpush3.msra.mxu1 %v507_v62 }
  0x80   :  { %v453_v0 = vpop.permute.xlu0 %452  ;;  %v504_v3 = vld [vmem:[#allocation2 + $0xb8] sm:$0xff] }
  0x81   :  { %v416_v1 = vpop.permute.xlu1 %415  ;;  %v465_v4 = vsel %vm464_vm3, %v453_v0, %v455_v60  ;;  %7620 = vmatprep.subr.mxu1 %v504_v3  ;;  %v498_v9 = vld [vmem:[#allocation2 + $0x88] sm:$0xff]  ;;  %v8372_v60 = vld [vmem:[%s10721_s3 + $0x120] sm:$0xff] }
  0x82   :  { %v427_v5 = vsel %vm425_vm4, %v416_v1, %v418_v58  ;;  %475 = vst [vmem:[#allocation2 + $0xc0] sm:$0x7] %v465_v4  ;;  %7621 = vmatpush3.msra.mxu1 %v504_v3 }
  0x83   :  { %437 = vst [vmem:[#allocation2 + $0xb0] sm:$0x7] %v427_v5  ;;  %7622 = vmatprep.subr.mxu1 %v501_v6  ;;  %v8395_v5 = vld [vmem:[%s10721_s3 + $0x108] sm:$0xff] }
  0x84   :  { %7623 = vmatpush3.msra.mxu1 %v501_v6  ;;  %v262_v8 = vpop.permute.xlu0 %261 }
  0x85   :  { %v414_v7 = vpop.permute.xlu1 %413  ;;  %v495_v10 = vld [vmem:[#allocation2 + $0x70] sm:$0xff]  ;;  %282 = vst.msk [vmem:[#allocation2 + $0x58] sm:$0x7] %vm164_vm1, %v262_v8  ;;  %7624 = vmatprep.subr.mxu1 %v498_v9  ;;  %v506_v12 = vld [vmem:[#allocation2 + $0xc8] sm:$0xff] }
  0x86   :  { %v426_v11 = vsel %vm425_vm4, %v414_v7, %v416_v1  ;;  %610 = vmatprep.subr.mxu0 %v506_v12  ;;  %7625 = vmatpush3.msra.mxu1 %v498_v9  ;;  %v8387_v1 = vld [vmem:[%s10721_s3 + $0x110] sm:$0xff]  ;;  %v481_v9 = vld [vmem:[#allocation2] sm:$0xff] }
  0x87   :  { %436 = vst [vmem:[#allocation2 + $0xa8] sm:$0x7] %v426_v11  ;;  %7626 = vmatprep.subr.mxu1 %v495_v10  ;;  %v8407_v11 = vld [vmem:[%s10721_s3 + $0xf8] sm:$0xff] }
  0x88   :  { %7627 = vmatpush3.msra.mxu1 %v495_v10  ;;  %v377_v13 = vpop.permute.xlu0 %376  ;;  %v8402_v10 = vld [vmem:[%s10721_s3 + $0x100] sm:$0xff] }
  0x89   :  { %v8311_v14 = vpop.permute.xlu1 %222  ;;  %v388_v15 = vsel %vm386_vm5, %v377_v13, %v379_v57  ;;  %v505_v16 = vld [vmem:[#allocation2 + $0xc0] sm:$0xff] }
  0x8a   :  { %243 = vst.msk [vmem:[#allocation2 + $0x40] sm:$0x7] %vm164_vm1, %v8311_v14  ;;  %v503_v17 = vld [vmem:[#allocation2 + $0xb0] sm:$0xff]  ;;  %398 = vst [vmem:[#allocation2 + $0x98] sm:$0x7] %v388_v15  ;;  %611 = vmatpush1.msra.mxu0 %v505_v16 }
  0x8b   :  { %612 = vmatprep.subr.mxu0 %v503_v17  ;;  %v8420_v15 = vld [vmem:[%s10721_s3 + $0xf0] sm:$0xff] }
  0x8c   :  { %v375_v18 = vpop.permute.xlu0 %374  ;;  %v492_v21 = vld [vmem:[#allocation2 + $0x58] sm:$0xff]  ;;  %v8429_v17 = vld [vmem:[%s10721_s3 + $0x70] sm:$0xff] }
  0x8d   :  { %v338_v20 = vpop.permute.xlu1 %337  ;;  %v387_v22 = vsel %vm386_vm5, %v375_v18, %v377_v13  ;;  %7628 = vmatprep.subr.mxu1 %v492_v21  ;;  %v8413_v13 = vld [vmem:[%s10721_s3 + $0x78] sm:$0xff]  ;;  %v8436_v18 = vld [vmem:[%s10721_s3 + $0xe8] sm:$0xff] }
  0x8e   :  { %v349_v23 = vsel %vm347_vm6, %v338_v20, %v340_v59  ;;  %v502_v24 = vld [vmem:[#allocation2 + $0xa8] sm:$0xff]  ;;  %397 = vst [vmem:[#allocation2 + $0x90] sm:$0x7] %v387_v22  ;;  %7629 = vmatpush3.msra.mxu1 %v492_v21 }
  0x8f   :  { %359 = vst [vmem:[#allocation2 + $0x80] sm:$0x7] %v349_v23  ;;  %613 = vmatpush1.msra.mxu0 %v502_v24  ;;  %v8442_v21 = vld [vmem:[%s10721_s3 + $0x68] sm:$0xff]  ;;  %v8451_v23 = vld [vmem:[%s10721_s3 + $0xe0] sm:$0xff] }
  0x90   :  { %v8318_v26 = vpop.permute.xlu0 %183  ;;  %v8459_v24 = vld [vmem:[%s10721_s3 + $0x60] sm:$0xff] }
  0x91   :  { %v336_v25 = vpop.permute.xlu1 %335  ;;  %v489_v27 = vld [vmem:[#allocation2 + $0x40] sm:$0xff]  ;;  %204 = vst.msk [vmem:[#allocation2 + $0x28] sm:$0x7] %vm164_vm1, %v8318_v26  ;;  %v500_v29 = vld [vmem:[#allocation2 + $0x98] sm:$0xff] }
  0x92   :  { %v348_v28 = vsel %vm347_vm6, %v336_v25, %v338_v20  ;;  %7630 = vmatprep.subr.mxu1 %v489_v27  ;;  %614 = vmatprep.subr.mxu0 %v500_v29  ;;  %v8465_v25 = vld [vmem:[%s10721_s3 + $0xd8] sm:$0xff]  ;;  %v8478_v29 = vld [vmem:[%s10721_s3 + $0xd0] sm:$0xff] }
  0x93   :  { %358 = vst [vmem:[#allocation2 + $0x78] sm:$0x7] %v348_v28  ;;  %7631 = vmatpush3.msra.mxu1 %v489_v27  ;;  %v8471_v27 = vld [vmem:[%s10721_s3 + $0x58] sm:$0xff] }
  0x94   :  { %v299_v31 = vpop.permute.xlu0 %298 }
  0x95   :  { %v297_v30 = vpop.permute.xlu1 %296  ;;  %v310_v33 = vsel %vm308_vm7, %v299_v31, %v8302_v61  ;;  %v499_v34 = vld [vmem:[#allocation2 + $0x90] sm:$0xff]  ;;  %v8379_v61 = vld [vmem:[%s10721_s3 + $0x118] sm:$0xff] }
  0x96   :  { %v309_v32 = vsel %vm308_vm7, %v297_v30, %v299_v31  ;;  %v497_v35 = vld [vmem:[#allocation2 + $0x80] sm:$0xff]  ;;  %320 = vst [vmem:[#allocation2 + $0x68] sm:$0x7] %v310_v33  ;;  %615 = vmatpush1.msra.mxu0 %v499_v34  ;;  %v8484_v30 = vld [vmem:[%s10721_s3 + $0x50] sm:$0xff]  ;;  %v8498_v34 = vld [vmem:[%s10721_s3 + $0x48] sm:$0xff] }
  0x97   :  { %319 = vst [vmem:[#allocation2 + $0x60] sm:$0x7] %v309_v32  ;;  %616 = vmatprep.subr.mxu0 %v497_v35  ;;  %v8492_v32 = vld [vmem:[%s10721_s3 + $0xc8] sm:$0xff]  ;;  %v8504_v35 = vld [vmem:[%s10721_s3 + $0xc0] sm:$0xff] }
  0x98   :  { %v260_v37 = vpop.permute.xlu0 %259  ;;  %v486_v38 = vld [vmem:[#allocation2 + $0x28] sm:$0xff] }
  0x99   :  { %v258_v36 = vpop.permute.xlu1 %257  ;;  %v271_v41 = vsel %vm269_vm8, %v260_v37, %v262_v8  ;;  %7632 = vmatprep.subr.mxu1 %v486_v38  ;;  %v482_v8 = vld [vmem:[#allocation2 + $0x8] sm:$0xff] }
  0x9a   :  { %v270_v40 = vsel %vm269_vm8, %v258_v36, %v260_v37  ;;  %v496_v42 = vld [vmem:[#allocation2 + $0x78] sm:$0xff]  ;;  %281 = vst [vmem:[#allocation2 + $0x50] sm:$0x7] %v271_v41  ;;  %7633 = vmatpush3.msra.mxu1 %v486_v38  ;;  %v8510_v36 = vld [vmem:[%s10721_s3 + $0x40] sm:$0xff] }
  0x9b   :  { %280 = vst [vmem:[#allocation2 + $0x48] sm:$0x7] %v270_v40  ;;  %617 = vmatpush1.msra.mxu0 %v496_v42  ;;  %7634 = vmatprep.subr.mxu1 %v483_v39  ;;  %v8518_v38 = vld [vmem:[%s10721_s3 + $0xb8] sm:$0xff]  ;;  %v8531_v42 = vld [vmem:[%s10721_s3 + $0xb0] sm:$0xff] }
  0x9c   :  { %v221_v46 = vpop.permute.xlu0 %220  ;;  %7635 = vmatpush3.msra.mxu1 %v483_v39  ;;  %v8524_v40 = vld [vmem:[%s10721_s3 + $0x38] sm:$0xff] }
  0x9d   :  { %v219_v45 = vpop.permute.xlu1 %218  ;;  %v232_v49 = vsel %vm230_vm9, %v221_v46, %v8311_v14  ;;  %7637 = vmatmul.mubr.msk.f32.vlgmr.msra.gmra.mxu1 %vm589_vm2, %v8331_v43  ;;  %v494_v50 = vld [vmem:[#allocation2 + $0x68] sm:$0xff]  ;;  %7639 = vmatprep.subr.msk.mxu1 %vm754_vm10, %v8336_v44 }
  0x9e   :  { %v231_v48 = vsel %vm230_vm9, %v219_v45, %v221_v46  ;;  %v493_v51 = vld [vmem:[#allocation2 + $0x60] sm:$0xff]  ;;  %242 = vst [vmem:[#allocation2 + $0x38] sm:$0x7] %v232_v49  ;;  %618 = vmatprep.subr.mxu0 %v494_v50  ;;  %7640 = vmatpush3.msk.msra.mxu1 %vm754_vm10, %v8336_v44  ;;  %v8537_v45 = vld [vmem:[%s10721_s3 + $0x30] sm:$0xff] }
  0x9f   :  { %241 = vst [vmem:[#allocation2 + $0x30] sm:$0x7] %v231_v48  ;;  %619 = vmatpush1.msra.mxu0 %v493_v51  ;;  %7641 = vmatprep.subr.mxu1 %v8341_v47  ;;  %v8543_v48 = vld [vmem:[%s10721_s3 + $0xa8] sm:$0xff] }
  0xa0   :  { %v182_v54 = vpop.permute.xlu0 %181  ;;  %7642 = vmatpush3.msra.mxu1 %v8341_v47  ;;  %v8551_v51 = vld [vmem:[%s10721_s3 + $0x28] sm:$0xff] }
  0xa1   :  { %v180_v53 = vpop.permute.xlu1 %179  ;;  %v193_v57 = vsel %vm191_vm11, %v182_v54, %v8318_v26  ;;  %v491_v58 = vld [vmem:[#allocation2 + $0x50] sm:$0xff]  ;;  %7643 = vmatprep.subr.mxu1 %v8355_v52 }
  0xa2   :  { %v192_v56 = vsel %vm191_vm11, %v180_v53, %v182_v54  ;;  %v490_v59 = vld [vmem:[#allocation2 + $0x48] sm:$0xff]  ;;  %203 = vst [vmem:[#allocation2 + $0x20] sm:$0x7] %v193_v57  ;;  %620 = vmatprep.subr.mxu0 %v491_v58  ;;  %7644 = vmatpush3.msra.mxu1 %v8355_v52  ;;  %v8558_v53 = vld [vmem:[%s10721_s3 + $0xa0] sm:$0xff]  ;;  %v8570_v57 = vld [vmem:[%s10721_s3 + $0x98] sm:$0xff] }
  0xa3   :  { %202 = vst [vmem:[#allocation2 + $0x18] sm:$0x7] %v192_v56  ;;  %621 = vmatpush1.msra.mxu0 %v490_v59  ;;  %7645 = vmatprep.subr.mxu1 %v8362_v55  ;;  %v8564_v54 = vld [vmem:[%s10721_s3 + $0x20] sm:$0xff] }
  0xa4   :  { %7646 = vmatpush3.msra.mxu1 %v8362_v55  ;;  %v461_v3 = vpop.permute.xlu0 %460 }
  0xa5   :  { %v488_v62 = vld [vmem:[#allocation2 + $0x38] sm:$0xff]  ;;  %v463_v0 = vpop.permute.xlu1 %462  ;;  %7647 = vmatprep.subr.mxu1 %v8372_v60 }
  0xa6   :  { %v487_v63 = vld [vmem:[#allocation2 + $0x30] sm:$0xff]  ;;  %622 = vmatprep.subr.mxu0 %v488_v62  ;;  %480 = vst.msk [vmem:[#allocation2 + $0x280] sm:$0x7] %vm164_vm1, %v463_v0  ;;  %7648 = vmatpush3.msra.mxu1 %v8372_v60  ;;  %v468_v4 = vsel %vm464_vm3, %v461_v3, %v463_v0  ;;  %v8577_v62 = vld [vmem:[%s10721_s3 + $0x18] sm:$0xff] }
  0xa7   :  { %623 = vmatpush1.msra.mxu0 %v487_v63  ;;  %7649 = vmatprep.subr.mxu1 %v8379_v61  ;;  %479 = vst [vmem:[#allocation2 + $0x278] sm:$0x7] %v468_v4  ;;  %v8583_v63 = vld [vmem:[%s10721_s3 + $0x90] sm:$0xff]  ;;  %v8595_v4 = vld [vmem:[%s10721_s3 + $0x88] sm:$0xff] }
  0xa8   :  { %7650 = vmatpush3.msra.mxu1 %v8379_v61  ;;  %v459_v12 = vpop.permute.xlu0 %458  ;;  %v8589_v0 = vld [vmem:[%s10721_s3 + $0x10] sm:$0xff] }
  0xa9   :  { %v485_v6 = vld [vmem:[#allocation2 + $0x20] sm:$0xff]  ;;  %7651 = vmatprep.subr.mxu1 %v8387_v1  ;;  %v467_v14 = vsel %vm464_vm3, %v459_v12, %v461_v3  ;;  %v422_v16 = vpop.permute.xlu1 %421  ;;  %vm134_vm3 = vcmask 402432  }
  0xaa   :  { %v484_v7 = vld [vmem:[#allocation2 + $0x18] sm:$0xff]  ;;  %624 = vmatprep.subr.mxu0 %v485_v6  ;;  %7652 = vmatpush3.msra.mxu1 %v8387_v1  ;;  %478 = vst [vmem:[#allocation2 + $0x270] sm:$0x7] %v467_v14  ;;  %v8609_v12 = vld [vmem:[%s10721_s3 + $0x80] sm:$0xff] }
  0xab   :  { %625 = vmatpush1.msra.mxu0 %v484_v7  ;;  %7653 = vmatprep.subr.mxu1 %v8395_v5  ;;  %v8615_v14 = vld [vmem:[%s10721_s3] sm:$0xff] }
  0xac   :  { %626 = vmatprep.subr.mxu0 %v482_v8  ;;  %7654 = vmatpush3.msra.mxu1 %v8395_v5  ;;  %v424_v20 = vpop.permute.xlu0 %423  ;;  %v8602_v8 = vld [vmem:[%s10721_s3 + $0x8] sm:$0xff] }
  0xad   :  { %627 = vmatpush1.msra.mxu0 %v481_v9  ;;  %7655 = vmatprep.subr.mxu1 %v8402_v10  ;;  %441 = vst.msk [vmem:[#allocation2 + $0x268] sm:$0x7] %vm164_vm1, %v424_v20  ;;  %v429_v22 = vsel %vm425_vm4, %v422_v16, %v424_v20  ;;  %v8618_v20 = vld [vmem:[#allocation2 + $0x280] sm:$0xff] }
  0xae   :  { %7351 = vmatmul.mubr.msk.f32.vlgmr.msra.gmra.mxu0 %vm589_vm2, %v8194_v19  ;;  %7449 = vmatprep.subr.mxu0 %v8407_v11  ;;  %440 = vst [vmem:[#allocation2 + $0x260] sm:$0x7] %v429_v22 }
  0xaf   :  { %666 = vmatprep.mubr.f32.mxu0 %v7963_v2  ;;  %7450 = vmatpush3.msra.mxu0 %v8413_v13  ;;  %v534_v2 = vld [vmem:[#allocation2 + $0x278] sm:$0xff] }
  0xb0   :  { %7451 = vmatprep.subr.mxu0 %v8420_v15  ;;  %7656 = vmatpush3.msra.mxu1 %v8402_v10  ;;  %v420_v26 = vpop.permute.xlu0 %419 }
  0xb1   :  { %7452 = vmatpush3.msra.mxu0 %v8429_v17  ;;  %922 = vmatprep.subr.mxu1 %v534_v2  ;;  %v428_v28 = vsel %vm425_vm4, %v420_v26, %v422_v16  ;;  %vm132_vm4 = vcmask 408576  }
  0xb2   :  { %7352 = vmatmul.mubr.msk.f32.gmra.mxu0 %vm589_vm2, %v8331_v43  ;;  %7453 = vmatprep.subr.mxu0 %v8436_v18  ;;  %439 = vst [vmem:[#allocation2 + $0x258] sm:$0x7] %v428_v28 }
  0xb3   :  { %7454 = vmatpush3.msra.mxu0 %v8442_v21 }
  0xb4   :  { %7455 = vmatprep.subr.mxu0 %v8451_v23  ;;  %v383_v33 = vpop.permute.xlu0 %382 }
  0xb5   :  { %7456 = vmatpush3.msra.mxu0 %v8459_v24 }
  0xb6   :  { %7457 = vmatprep.subr.mxu0 %v8465_v25  ;;  %v8486_v31 = vpop.permute.xlu1 %581 }
  0xb7   :  { %7458 = vmatpush3.msra.mxu0 %v8471_v27 }
  0xb8   :  { %7459 = vmatprep.subr.mxu0 %v8478_v29  ;;  %v381_v39 = vpop.permute.xlu0 %380 }
  0xb9   :  { %7460 = vmatpush3.msra.mxu0 %v8484_v30  ;;  %v389_v41 = vsel %vm386_vm5, %v381_v39, %v383_v33 }
  0xba   :  { %7461 = vmatprep.subr.mxu0 %v8492_v32  ;;  %v8512_v37 = vpop.permute.xlu1 %586  ;;  %400 = vst [vmem:[#allocation2 + $0x240] sm:$0x7] %v389_v41 }
  0xbb   :  { %7462 = vmatpush3.msra.mxu0 %v8498_v34 }
  0xbc   :  { %7463 = vmatprep.subr.mxu0 %v8504_v35  ;;  %v346_v50 = vpop.permute.xlu0 %345 }
  0xbd   :  { %7464 = vmatpush3.msra.mxu0 %v8510_v36  ;;  %363 = vst.msk [vmem:[#allocation2 + $0x238] sm:$0x7] %vm164_vm1, %v346_v50 }
  0xbe   :  { %7465 = vmatprep.subr.mxu0 %v8518_v38  ;;  %v385_v46 = vpop.permute.xlu1 %384 }
  0xbf   :  { %7466 = vmatpush3.msra.mxu0 %v8524_v40  ;;  %v390_v49 = vsel %vm386_vm5, %v383_v33, %v385_v46  ;;  %402 = vst.msk [vmem:[#allocation2 + $0x250] sm:$0x7] %vm164_vm1, %v385_v46  ;;  %vm2973_vm5 = vcmask 345144  }
  0xc0   :  { %7467 = vmatprep.subr.mxu0 %v8531_v42  ;;  %401 = vst [vmem:[#allocation2 + $0x248] sm:$0x7] %v390_v49  ;;  %v305_v59 = vpop.permute.xlu0 %304 }
  0xc1   :  { %7468 = vmatpush3.msra.mxu0 %v8537_v45 }
  0xc2   :  { %7469 = vmatprep.subr.mxu0 %v8543_v48  ;;  %v344_v56 = vpop.permute.xlu1 %343 }
  0xc3   :  { %7470 = vmatpush3.msra.mxu0 %v8551_v51  ;;  %v351_v58 = vsel %vm347_vm6, %v344_v56, %v346_v50 }
  0xc4   :  { %7471 = vmatprep.subr.mxu0 %v8558_v53  ;;  %362 = vst [vmem:[#allocation2 + $0x230] sm:$0x7] %v351_v58  ;;  %v303_v7 = vpop.permute.xlu0 %302 }
  0xc5   :  { %7472 = vmatpush3.msra.mxu0 %v8564_v54  ;;  %v311_v9 = vsel %vm308_vm7, %v303_v7, %v305_v59 }
  0xc6   :  { %7473 = vmatprep.subr.mxu0 %v8570_v57  ;;  %v342_v3 = vpop.permute.xlu1 %341  ;;  %322 = vst [vmem:[#allocation2 + $0x210] sm:$0x7] %v311_v9  ;;  %v154_v9 = vld [vmem:[%s10718_s0 + $0xc] sm:$0x77] }
  0xc7   :  { %7474 = vmatpush3.msra.mxu0 %v8577_v62  ;;  %v350_v6 = vsel %vm347_vm6, %v342_v3, %v344_v56  ;;  %166 = vst [vmem:[#allocation2 + $0x1b0] sm:$0x7] %v154_v9  ;;  %vm2971_vm6 = vcmask 351288  }
  0xc8   :  { %7475 = vmatprep.subr.mxu0 %v8583_v63  ;;  %361 = vst [vmem:[#allocation2 + $0x228] sm:$0x7] %v350_v6  ;;  %v268_v2 = vpop.permute.xlu0 %267 }
  0xc9   :  { %7476 = vmatpush3.msra.mxu0 %v8589_v0  ;;  %285 = vst.msk [vmem:[#allocation2 + $0x208] sm:$0x7] %vm164_vm1, %v268_v2 }
  0xca   :  { %7477 = vmatprep.subr.mxu0 %v8595_v4  ;;  %v307_v16 = vpop.permute.xlu1 %306 }
  0xcb   :  { %7478 = vmatpush3.msra.mxu0 %v8602_v8  ;;  %v312_v22 = vsel %vm308_vm7, %v305_v59, %v307_v16  ;;  %324 = vst.msk [vmem:[#allocation2 + $0x220] sm:$0x7] %vm164_vm1, %v307_v16  ;;  %v159_v16 = vcombine.high %v154_v9, %v154_v9  ;;  %vm3000_vm7 = vcmask 287744  }
  0xcc   :  { %7479 = vmatprep.subr.mxu0 %v8609_v12  ;;  %323 = vst [vmem:[#allocation2 + $0x218] sm:$0x7] %v312_v22  ;;  %v227_v41 = vpop.permute.xlu0 %226  ;;  %v155_v22 = vld [vmem:[%s10718_s0 + $0x14] sm:$0x7] }
  0xcd   :  { %7480 = vmatpush3.msra.mxu0 %v8615_v14  ;;  %167 = vst [vmem:[#allocation2 + $0x1b8] sm:$0x7] %v159_v16  ;;  %168 = vst.msk [vmem:[#allocation2 + $0x1c0] sm:$0x7] %vm164_vm1, %v155_v22 }
  0xce   :  { %7660 = vmatprep.subr.mxu0 %v8618_v20  ;;  %v266_v26 = vpop.permute.xlu1 %265 }
  0xcf   :  { %v273_v28 = vsel %vm269_vm8, %v266_v26, %v268_v2 }
  0xd0   :  { %284 = vst [vmem:[#allocation2 + $0x200] sm:$0x7] %v273_v28  ;;  %v225_v50 = vpop.permute.xlu0 %224 }
  0xd1   :  { %v233_v58 = vsel %vm230_vm9, %v225_v50, %v227_v41  ;;  %v528_v50 = vld [vmem:[#allocation2 + $0x248] sm:$0xff] }
  0xd2   :  { %v264_v33 = vpop.permute.xlu1 %263  ;;  %244 = vst [vmem:[#allocation2 + $0x1e0] sm:$0x7] %v233_v58  ;;  %v525_v58 = vld [vmem:[#allocation2 + $0x230] sm:$0xff] }
  0xd3   :  { %v272_v39 = vsel %vm269_vm8, %v264_v33, %v266_v26  ;;  %vm2998_vm8 = vcmask 293888  }
  0xd4   :  { %283 = vst [vmem:[#allocation2 + $0x1f8] sm:$0x7] %v272_v39  ;;  %v190_v59 = vpop.permute.xlu0 %189  ;;  %v533_v39 = vld [vmem:[#allocation2 + $0x270] sm:$0xff] }
  0xd5   :  { %207 = vst.msk [vmem:[#allocation2 + $0x1d8] sm:$0x7] %vm164_vm1, %v190_v59 }
  0xd6   :  { %v229_v46 = vpop.permute.xlu1 %228 }
  0xd7   :  { %v234_v49 = vsel %vm230_vm9, %v227_v41, %v229_v46  ;;  %246 = vst.msk [vmem:[#allocation2 + $0x1f0] sm:$0x7] %vm164_vm1, %v229_v46  ;;  %v531_v41 = vld [vmem:[#allocation2 + $0x260] sm:$0xff]  ;;  %v8645_v46 = vld [vmem:[#allocation2 + $0xd8] sm:$0xff]  ;;  %vm1325_vm1 = vcmask 902232   ;;  %vm140_vm9 = vcmask 205824  }
  0xd8   :  { %245 = vst [vmem:[#allocation2 + $0x1e8] sm:$0x7] %v234_v49  ;;  %v530_v49 = vld [vmem:[#allocation2 + $0x258] sm:$0xff]  ;;  %127 = vst.msk [vmem:[#allocation3] sm:$0xff] %vm126_vm14, %v8645_v46 }
  0xd9   :  { %v515_v22 = vld [vmem:[#allocation2 + $0x1e0] sm:$0xff]  ;;  %130 = vst.msk [vmem:[#allocation3 + $0x10] sm:$0xff] %vm126_vm14, %v8645_v46  ;;  %vm146_vm14 = vcmask 132096  }
  0xda   :  { %v188_v56 = vpop.permute.xlu1 %187  ;;  %129 = vst.msk [vmem:[#allocation3 + $0x8] sm:$0x3] %vm128_vm15, %v8645_v46  ;;  %131 = vst.msk [vmem:[#allocation3 + $0x18] sm:$0x3] %vm128_vm15, %v8645_v46  ;;  %vm144_vm15 = vcmask 138240  }
  0xdb   :  { %v195_v3 = vsel %vm191_vm11, %v188_v56, %v190_v59  ;;  %v524_v59 = vld [vmem:[#allocation2 + $0x228] sm:$0xff]  ;;  %v518_v16 = vld [vmem:[#allocation2 + $0x1f8] sm:$0xff] }
  0xdc   :  { %206 = vst [vmem:[#allocation2 + $0x1d0] sm:$0x7] %v195_v3  ;;  %v522_v3 = vld [vmem:[#allocation2 + $0x218] sm:$0xff] }
  0xde   :  { %v186_v6 = vpop.permute.xlu1 %185 }
  0xdf   :  { %v194_v7 = vsel %vm191_vm11, %v186_v6, %v188_v56  ;;  %v527_v56 = vld [vmem:[#allocation2 + $0x240] sm:$0xff]  ;;  %v521_v6 = vld [vmem:[#allocation2 + $0x210] sm:$0xff]  ;;  %v516_v9 = vld [vmem:[#allocation2 + $0x1e8] sm:$0xff]  ;;  %vm4346_vm11 = vcmask 164904  }
  0xe0   :  { %205 = vst [vmem:[#allocation2 + $0x1c8] sm:$0x7] %v194_v7  ;;  %v519_v7 = vld [vmem:[#allocation2 + $0x200] sm:$0xff] }
 0x15d   :  { %v7638_v2 = vpop.f32.mrf.mxu1 }
 0x15e   :  { %v745_v33 = vadd.f32 %v7638_v2, %v8512_v37 }
 0x15f   :  { %v739_v26 = vpop.f32.mrf.mxu1 }
 0x160   :  { %v740_v28 = vadd.f32 %v739_v26, %v8486_v31  ;;  %v513_v26 = vld [vmem:[#allocation2 + $0x1d0] sm:$0xff] }
 0x162   :  { %7657 = vmatprep.mubr.msk.f32.mxu1 %vm19_vm0, %v740_v28  ;;  %v512_v28 = vld [vmem:[#allocation2 + $0x1c8] sm:$0xff] }
 0x163   :  { %7658 = vmatmul.mubr.msk.f32.vlgmr.msra.gmra.mxu1 %vm19_vm0, %v745_v33 }
 0x164   :  { %923 = vmatpush1.msra.mxu1 %v533_v39  ;;  %972 = vmatprep.mubr.f32.mxu1 %v8645_v46  ;;  %v510_v39 = vld [vmem:[#allocation2 + $0x1b8] sm:$0xff] }
 0x165   :  { %924 = vmatprep.subr.mxu1 %v531_v41 }
 0x166   :  { %925 = vmatpush1.msra.mxu1 %v530_v49  ;;  %v509_v49 = vld [vmem:[#allocation2 + $0x1b0] sm:$0xff] }
 0x167   :  { %926 = vmatprep.subr.mxu1 %v528_v50 }
 0x168   :  { %927 = vmatpush1.msra.mxu1 %v527_v56 }
 0x169   :  { %928 = vmatprep.subr.mxu1 %v525_v58 }
 0x16a   :  { %929 = vmatpush1.msra.mxu1 %v524_v59 }
 0x16b   :  { %930 = vmatprep.subr.mxu1 %v522_v3  ;;  %v532_v3 = vld [vmem:[#allocation2 + $0x268] sm:$0xff] }
 0x16c   :  { %931 = vmatpush1.msra.mxu1 %v521_v6 }
 0x16d   :  { %932 = vmatprep.subr.mxu1 %v519_v7  ;;  %v529_v7 = vld [vmem:[#allocation2 + $0x250] sm:$0xff] }
 0x16e   :  { %933 = vmatpush1.msra.mxu1 %v518_v16  ;;  %v662_v2 = vpop.f32.mrf.mxu0  ;;  %v520_v16 = vld [vmem:[#allocation2 + $0x208] sm:$0xff] }
 0x16f   :  { %934 = vmatprep.subr.mxu1 %v516_v9  ;;  %v663_v50 = vadd.f32 %v662_v2, %v8486_v31  ;;  %v526_v9 = vld [vmem:[#allocation2 + $0x238] sm:$0xff] }
 0x170   :  { %935 = vmatpush1.msra.mxu1 %v515_v22  ;;  %v664_v33 = vpop.f32.mrf.mxu0  ;;  %v517_v22 = vld [vmem:[#allocation2 + $0x1f0] sm:$0xff] }
 0x171   :  { %v665_v41 = vadd.f32 %v664_v33, %v8486_v31  ;;  %936 = vmatprep.subr.mxu1 %v513_v26 }
 0x172   :  { %937 = vmatpush1.msra.mxu1 %v512_v28  ;;  %v668_v56 = vpop.f32.mrf.mxu0 }
 0x173   :  { %938 = vmatprep.subr.mxu1 %v510_v39  ;;  %822 = vmatprep.mubr.f32.mxu0 %v665_v41  ;;  %v669_v6 = vadd.f32 %v668_v56, %v8512_v37 }
 0x174   :  { %939 = vmatpush1.msra.mxu1 %v509_v49  ;;  %v670_v58 = vpop.f32.mrf.mxu0  ;;  %823 = vmatmul.mubr.f32.vlgmr.msra.gmra.mxu0 %v663_v50 }
 0x175   :  { %v671_v59 = vadd.f32 %v670_v58, %v8512_v37  ;;  %7358 = vmatmul.mubr.msk.f32.vlgmr.msra.gmra.mxu1 %vm589_vm2, %v8194_v19  ;;  %7661 = vmatpush3.msra.mxu0 %v8618_v20  ;;  %v523_v20 = vld [vmem:[#allocation2 + $0x220] sm:$0xff] }
 0x176   :  { %7662 = vmatprep.subr.mxu0 %v532_v3  ;;  %978 = vmatprep.mubr.f32.mxu1 %v8645_v46 }
 0x177   :  { %7663 = vmatpush3.msra.mxu0 %v532_v3  ;;  %827 = vmatprep.mubr.f32.mxu0 %v671_v59 }
 0x178   :  { %7664 = vmatprep.subr.mxu0 %v529_v7  ;;  %828 = vmatmul.mubr.f32.gmra.mxu0 %v669_v6 }
 0x179   :  { %7359 = vmatmul.mubr.msk.f32.gmra.mxu1 %vm589_vm2, %v8331_v43  ;;  %7665 = vmatpush3.msra.mxu0 %v529_v7 }
 0x17a   :  { %7666 = vmatprep.subr.mxu0 %v526_v9  ;;  %7678 = vmatprep.mubr.msk.f32.mxu0 %vm589_vm2, %v8194_v19  ;;  %v514_v19 = vld [vmem:[#allocation2 + $0x1d8] sm:$0xff] }
 0x17b   :  { %7667 = vmatpush3.msra.mxu0 %v526_v9  ;;  %7509 = vmatprep.subr.mxu1 %v8407_v11  ;;  %v511_v11 = vld [vmem:[#allocation2 + $0x1c0] sm:$0xff] }
 0x17c   :  { %7668 = vmatprep.subr.mxu0 %v523_v20  ;;  %7510 = vmatpush3.msra.mxu1 %v8413_v13 }
 0x17d   :  { %7669 = vmatpush3.msra.mxu0 %v523_v20  ;;  %7511 = vmatprep.subr.mxu1 %v8420_v15 }
 0x17e   :  { %7670 = vmatprep.subr.mxu0 %v520_v16  ;;  %7512 = vmatpush3.msra.mxu1 %v8429_v17 }
 0x17f   :  { %7671 = vmatpush3.msra.mxu0 %v520_v16  ;;  %7513 = vmatprep.subr.mxu1 %v8436_v18 }
 0x180   :  { %7672 = vmatprep.subr.mxu0 %v517_v22  ;;  %7514 = vmatpush3.msra.mxu1 %v8442_v21 }
 0x181   :  { %7673 = vmatpush3.msra.mxu0 %v517_v22  ;;  %7515 = vmatprep.subr.mxu1 %v8451_v23 }
 0x182   :  { %7674 = vmatprep.subr.mxu0 %v514_v19  ;;  %7516 = vmatpush3.msra.mxu1 %v8459_v24 }
 0x183   :  { %7675 = vmatpush3.msra.mxu0 %v514_v19  ;;  %7517 = vmatprep.subr.mxu1 %v8465_v25 }
 0x184   :  { %7676 = vmatprep.subr.mxu0 %v511_v11  ;;  %7518 = vmatpush3.msra.mxu1 %v8471_v27  ;;  %v8723_v27 = vld [vmem:[%s10721_s3 + $0x1f8] ss:$0 sm:$0xff] }
 0x185   :  { %7677 = vmatpush3.msra.mxu0 %v511_v11  ;;  %7519 = vmatprep.subr.mxu1 %v8478_v29 }
 0x186   :  { %7679 = vmatmul.mubr.msk.f32.vlgmr.msra.gmra.mxu0 %vm589_vm2, %v8331_v43  ;;  %7520 = vmatpush3.msra.mxu1 %v8484_v30  ;;  %vm1564_vm2 = vcmask 130048  }
 0x187   :  { %7521 = vmatprep.subr.mxu1 %v8492_v32  ;;  %7681 = vmatprep.subr.msk.mxu0 %vm754_vm10, %v8336_v44 }
 0x188   :  { %7522 = vmatpush3.msra.mxu1 %v8498_v34  ;;  %7682 = vmatpush3.msk.msra.mxu0 %vm754_vm10, %v8336_v44 }
 0x189   :  { %7523 = vmatprep.subr.mxu1 %v8504_v35  ;;  %7683 = vmatprep.subr.mxu0 %v8341_v47 }
 0x18a   :  { %7524 = vmatpush3.msra.mxu1 %v8510_v36  ;;  %7684 = vmatpush3.msra.mxu0 %v8341_v47 }
 0x18b   :  { %7525 = vmatprep.subr.mxu1 %v8518_v38  ;;  %7685 = vmatprep.subr.mxu0 %v8355_v52 }
 0x18c   :  { %7526 = vmatpush3.msra.mxu1 %v8524_v40  ;;  %7686 = vmatpush3.msra.mxu0 %v8355_v52 }
 0x18d   :  { %7527 = vmatprep.subr.mxu1 %v8531_v42  ;;  %7687 = vmatprep.subr.mxu0 %v8362_v55 }
 0x18e   :  { %7528 = vmatpush3.msra.mxu1 %v8537_v45  ;;  %7688 = vmatpush3.msra.mxu0 %v8362_v55 }
 0x18f   :  { %7529 = vmatprep.subr.mxu1 %v8543_v48  ;;  %7689 = vmatprep.subr.mxu0 %v8372_v60 }
 0x190   :  { %7530 = vmatpush3.msra.mxu1 %v8551_v51  ;;  %7690 = vmatpush3.msra.mxu0 %v8372_v60 }
 0x191   :  { %7531 = vmatprep.subr.mxu1 %v8558_v53  ;;  %7691 = vmatprep.subr.mxu0 %v8379_v61 }
 0x192   :  { %7532 = vmatpush3.msra.mxu1 %v8564_v54  ;;  %7692 = vmatpush3.msra.mxu0 %v8379_v61 }
 0x193   :  { %7533 = vmatprep.subr.mxu1 %v8570_v57  ;;  %7693 = vmatprep.subr.mxu0 %v8387_v1 }
 0x194   :  { %7534 = vmatpush3.msra.mxu1 %v8577_v62  ;;  %7694 = vmatpush3.msra.mxu0 %v8387_v1 }
 0x195   :  { %7535 = vmatprep.subr.mxu1 %v8583_v63  ;;  %7695 = vmatprep.subr.mxu0 %v8395_v5 }
 0x196   :  { %7536 = vmatpush3.msra.mxu1 %v8589_v0  ;;  %7696 = vmatpush3.msra.mxu0 %v8395_v5 }
 0x197   :  { %7537 = vmatprep.subr.mxu1 %v8595_v4  ;;  %7697 = vmatprep.subr.mxu0 %v8402_v10 }
 0x198   :  { %7538 = vmatpush3.msra.mxu1 %v8602_v8  ;;  %7698 = vmatpush3.msra.mxu0 %v8402_v10 }
 0x199   :  { %7539 = vmatprep.subr.mxu1 %v8609_v12  ;;  %1571 = vmatprep.subr.mxu0 %v8645_v46 }
 0x19a   :  { %7540 = vmatpush3.msra.mxu1 %v8615_v14 }
 0x19b   :  { %1664 = vmatprep.subr.mxu1 %v8645_v46 }
 0x223   :  { %v7659_v43 = vpop.f32.mrf.mxu1 }
 0x225   :  { %v899_v44 = vpop.f32.mrf.mxu1 }
 0x234   :  { %v7481_v47 = vpop.f32.mrf.mxu0 }
 0x235   :  { %v974_v52 = vpop.f32.mrf.mxu1 }
 0x236   :  { %v7482_v55 = vpop.f32.mrf.mxu0  ;;  %v975_v5 = vadd.f32 %v974_v52, %v8486_v31  ;;  %v7974_v52 = vmov 1  }
 0x237   :  { %v976_v60 = vpop.f32.mrf.mxu1  ;;  %v7483_v10 = vadd.f32 %v7482_v55, %v7481_v47  ;;  %v7973_v47 = vmov 2   ;;  %7863 = vset.pattern.permute.xlu0 %v7974_v52  ;;  %v7954_v55 = vld [vmem:[%s10720_s2 + $0x8] sm:$0x3] }
 0x238   :  { %v977_v61 = vadd.f32 %v976_v60, %v8486_v31  ;;  %v7484_v1 = vpop.f32.mrf.mxu0  ;;  %7864 = vset.pattern.permute.xlu1 %v7973_v47 }
 0x239   :  { %v980_v13 = vpop.f32.mrf.mxu1  ;;  %v900_v23 = vadd.f32 %v7483_v10, %v899_v44 }
 0x23a   :  { %1130 = vmatprep.mubr.f32.mxu1 %v977_v61  ;;  %v7485_v15 = vpop.f32.mrf.mxu0  ;;  %v981_v24 = vadd.f32 %v980_v13, %v8512_v37 }
 0x23b   :  { %v7486_v17 = vadd.f32 %v7485_v15, %v7484_v1  ;;  %v982_v18 = vpop.f32.mrf.mxu1  ;;  %1131 = vmatmul.mubr.f32.vlgmr.msra.gmra.mxu1 %v975_v5  ;;  %v1221_v32 = vmul.f32 %v8723_v27, %v900_v23 }
 0x23c   :  { %v983_v21 = vadd.f32 %v982_v18, %v8512_v37 }
 0x23d   :  { %v905_v25 = vadd.f32 %v7659_v43, %v7486_v17  ;;  %v1224_v34 = vsel %vm1223_vm13, %v1221_v32, 0.0 }
 0x23e   :  { %1135 = vmatprep.mubr.f32.mxu1 %v983_v21 }
 0x23f   :  { %1136 = vmatmul.mubr.f32.gmra.mxu1 %v981_v24  ;;  %v1222_v29 = vmul.f32 %v8723_v27, %v905_v25 }
 0x241   :  { %v1228_v30 = vsel %vm1227_vm12, %v1222_v29, 0.0  ;;  %v7955_v29 = vld [vmem:[%s10720_s2] sm:$0xff] }
 0x242   :  { %1229 = vadd.xlane.f32.xlu0 %v1228_v30 }
 0x246   :  { %v7680_v35 = vpop.f32.mrf.mxu0  ;;  %1225 = vadd.xlane.f32.xlu0 %v1224_v34 }
 0x247   :  { %v1057_v40 = vadd.f32 %v7680_v35, %v8512_v37 }
 0x248   :  { %v1051_v36 = vpop.f32.mrf.mxu0 }
 0x249   :  { %v1052_v38 = vadd.f32 %v1051_v36, %v8486_v31 }
 0x24b   :  { %7699 = vmatprep.mubr.msk.f32.mxu0 %vm19_vm0, %v1052_v38 }
 0x24c   :  { %7700 = vmatmul.mubr.msk.f32.vlgmr.msra.gmra.mxu0 %vm19_vm0, %v1057_v40  ;;  %vm1323_vm0 = vcmask 908376  }
 0x2cb   :  { %v1230_v12 = vpop.xlane.xlu0 %1229 }
 0x2cf   :  { %v1226_v14 = vpop.xlane.xlu0 %1225 }
 0x2fb   :  { %v7541_v42 = vpop.f32.mrf.mxu1 }
 0x2fd   :  { %v7542_v45 = vpop.f32.mrf.mxu1 }
 0x2fe   :  { %v7543_v57 = vadd.f32 %v7542_v45, %v7541_v42 }
 0x2ff   :  { %v7544_v48 = vpop.f32.mrf.mxu1 }
 0x301   :  { %v7545_v51 = vpop.f32.mrf.mxu1 }
 0x302   :  { %v7546_v53 = vadd.f32 %v7545_v51, %v7544_v48 }
 0x30c   :  { %v7701_v54 = vpop.f32.mrf.mxu0 }
 0x30d   :  { %v1213_v62 = vadd.f32 %v7701_v54, %v7546_v53 }
 0x30e   :  { %v1207_v63 = vpop.f32.mrf.mxu0 }
 0x30f   :  { %v1208_v0 = vadd.f32 %v7543_v57, %v1207_v63  ;;  %v1234_v4 = vmul.f32 %v8723_v27, %v1213_v62 }
 0x311   :  { %v1238_v31 = vsel %vm1227_vm12, %v1234_v4, 0.0  ;;  %v1233_v37 = vmul.f32 %v8723_v27, %v1208_v0 }
 0x312   :  { %1239 = vadd.xlane.f32.xlu1 %v1238_v31 }
 0x313   :  { %v1235_v8 = vsel %vm1223_vm13, %v1233_v37, 0.0 }
 0x314   :  { %1236 = vadd.xlane.f32.xlu0 %v1235_v8 }
 0x39b   :  { %v1240_v2 = vpop.xlane.xlu1 %1239 }
 0x39c   :  { %v1242_v26 = vadd.f32 %v1240_v2, %v1230_v12 }
 0x39d   :  { %v1237_v28 = vpop.xlane.xlu0 %1236 }
 0x39e   :  { %v1244_v33 = vmul.f32 0.0078125, %v1242_v26  ;;  %v1241_v39 = vadd.f32 %v1237_v28, %v1226_v14 }
 0x3a0   :  { %v1246_v41 = vsub.f32 %v905_v25, %v1244_v33  ;;  %v1250_v49 = vsub.f32 %v1213_v62, %v1244_v33  ;;  %v1243_v50 = vmul.f32 0.0078125, %v1241_v39 }
 0x3a2   :  { %v1245_v56 = vsub.f32 %v900_v23, %v1243_v50  ;;  %v1249_v58 = vsub.f32 %v1208_v0, %v1243_v50  ;;  %v1248_v59 = vmul.f32 %v8723_v27, %v1246_v41  ;;  %v1252_v3 = vmul.f32 %v8723_v27, %v1250_v49 }
 0x3a4   :  { %v1254_v6 = vmul.f32 %v1248_v59, %v1248_v59  ;;  %v1264_v7 = vmul.f32 %v1252_v3, %v1252_v3  ;;  %v1251_v9 = vmul.f32 %v8723_v27, %v1249_v58  ;;  %v1247_v20 = vmul.f32 %v8723_v27, %v1245_v56 }
 0x3a6   :  { %v1258_v16 = vsel %vm1227_vm12, %v1254_v6, 0.0  ;;  %v1268_v22 = vsel %vm1227_vm12, %v1264_v7, 0.0  ;;  %v1263_v19 = vmul.f32 %v1251_v9, %v1251_v9  ;;  %v1253_v11 = vmul.f32 %v1247_v20, %v1247_v20 }
 0x3a7   :  { %1259 = vadd.xlane.f32.xlu1 %v1258_v16  ;;  %1269 = vadd.xlane.f32.xlu0 %v1268_v22 }
 0x3a8   :  { %v1265_v43 = vsel %vm1223_vm13, %v1263_v19, 0.0  ;;  %v1255_v44 = vsel %vm1223_vm13, %v1253_v11, 0.0 }
 0x3ab   :  { %1266 = vadd.xlane.f32.xlu0 %v1265_v43  ;;  %1256 = vadd.xlane.f32.xlu1 %v1255_v44  ;;  %v1339_v44 = vld [vmem:[%s10719_s1 + $0x68] sm:$0xff] }
 0x3ac   :  { %7366 = vmatprep.mubr.msk.f32.mxu0 %vm1564_vm2, %v1339_v44  ;;  %7368 = vmatprep.mubr.msk.f32.mxu1 %vm1564_vm2, %v1339_v44 }
 0x3bc   :  { %1298 = vperm.xlu1 %7864, %v7954_v55  }
 0x3c0   :  { %7865 = vset.pattern.permute.xlu1 %v7974_v52 }
 0x430   :  { %v1260_v60 = vpop.xlane.xlu1 %1259  ;;  %v1270_v61 = vpop.xlane.xlu0 %1269 }
 0x431   :  { %v1272_v1 = vadd.f32 %v1270_v61, %v1260_v60 }
 0x433   :  { %v1274_v5 = vmul.f32 0.0078125, %v1272_v1 }
 0x434   :  { %v1257_v10 = vpop.xlane.xlu1 %1256  ;;  %v1267_v13 = vpop.xlane.xlu0 %1266 }
 0x435   :  { %v1276_v15 = vadd.f32 1e-05, %v1274_v5  ;;  %v1271_v17 = vadd.f32 %v1267_v13, %v1257_v10 }
 0x437   :  { %7917 = vrsqrt.f32 %v1276_v15  ;;  %v1273_v18 = vmul.f32 0.0078125, %v1271_v17 }
 0x438   :  { %v1299_v32 = vpop.permute.xlu1 %1298 }
 0x439   :  { %v1275_v21 = vadd.f32 1e-05, %v1273_v18 }
 0x43b   :  { %7919 = vrsqrt.f32 %v1275_v21 }
 0x444   :  { %v7918_v23 = vpop.eup %7917 }
 0x445   :  { %v1280_v24 = vmul.f32 %v7954_v55, %v7918_v23 }
 0x447   :  { %1288 = vperm.xlu1 %7865, %v1280_v24  }
 0x448   :  { %v7920_v25 = vpop.eup %7919 }
 0x449   :  { %v1279_v30 = vmul.f32 %v7955_v29, %v7920_v25 }
 0x44b   :  { %1283 = vperm.xlu0 %7863, %v1279_v30   ;;  %7866 = vset.pattern.permute.xlu1 %v7973_v47 }
 0x44c   :  { %1294 = vperm.xlu1 %7866, %v7955_v29  }
 0x4c2   :  { %v1289_v34 = vpop.permute.xlu1 %1288 }
 0x4c3   :  { %v1292_v35 = vmul.f32 %v1289_v34, %v1248_v59  ;;  %v1308_v45 = vmul.f32 %v1289_v34, %v1252_v3 }
 0x4c5   :  { %v1302_v42 = vadd.f32 %v1299_v32, %v1292_v35  ;;  %v1310_v53 = vadd.f32 %v1308_v45, %v1299_v32 }
 0x4c6   :  { %v1284_v36 = vpop.permute.xlu0 %1283 }
 0x4c7   :  { %v1291_v38 = vmul.f32 %v1284_v36, %v1247_v20  ;;  %v1295_v40 = vpop.permute.xlu1 %1294  ;;  %v1307_v54 = vmul.f32 %v1284_v36, %v1251_v9  ;;  %v1304_v62 = vmax.f32 %v1302_v42, 0.0  ;;  %v1312_v4 = vmax.f32 %v1310_v53, 0.0 }
 0x4c9   :  { %v1301_v48 = vadd.f32 %v1295_v40, %v1291_v38  ;;  %v1309_v63 = vadd.f32 %v1307_v54, %v1295_v40  ;;  %v8761_v0 = vmul.f32 %v8723_v27, %v1304_v62  ;;  %v8766_v37 = vmul.f32 %v8723_v27, %v1312_v4 }
 0x4cb   :  { %v1303_v51 = vmax.f32 %v1301_v48, 0.0  ;;  %v1311_v31 = vmax.f32 %v1309_v63, 0.0 }
 0x4cd   :  { %v8756_v57 = vmul.f32 %v8723_v27, %v1303_v51  ;;  %v8771_v8 = vmul.f32 %v8723_v27, %v1311_v31 }
 0x4cf   :  { %1317 = vrot.lane.b32.xlu1 %v8756_v57, %s7975_s10 }
 0x4d3   :  { %1319 = vrot.lane.b32.xlu1 %v8761_v0, %s7975_s10 }
 0x4d7   :  { %1331 = vrot.lane.b32.xlu1 %v8766_v37, %s7975_s10 }
 0x4db   :  { %1329 = vrot.lane.b32.xlu1 %v8771_v8, %s7975_s10 }
 0x541   :  { %v1318_v12 = vpop.permute.xlu1 %1317 }
 0x542   :  { %1324 = vst.msk [vmem:[#allocation3] sm:$0xff] %vm1323_vm0, %v1318_v12 }
 0x545   :  { %v1320_v14 = vpop.permute.xlu1 %1319 }
 0x546   :  { %1326 = vst.msk [vmem:[#allocation3 + $0x8] sm:$0x3] %vm1325_vm1, %v1320_v14 }
 0x549   :  { %v1346_v2 = vld [vmem:[#allocation3] sm:$0xff]  ;;  %v1332_v26 = vpop.permute.xlu1 %1331 }
 0x54a   :  { %1350 = vst.msk [vmem:[#allocation2] sm:$0xff] %vm1223_vm13, %v1346_v2  ;;  %1506 = vrot.lane.b32.xlu0 %v1346_v2, %s7976_s11 }
 0x54b   :  { %1337 = vst.msk [vmem:[#allocation3 + $0x18] sm:$0x3] %vm1325_vm1, %v1332_v26 }
 0x54d   :  { %v1347_v28 = vld [vmem:[#allocation3 + $0x8] sm:$0x3]  ;;  %v1330_v33 = vpop.permute.xlu1 %1329 }
 0x54e   :  { %1351 = vst.msk [vmem:[#allocation2 + $0x18] sm:$0x3] %vm1227_vm12, %v1347_v28  ;;  %1482 = vrot.lane.b32.xlu0 %v1346_v2, %s7967_s28  ;;  %v1475_v49 = vld [vmem:[#allocation3 + $0x8] sm:$0x3] }
 0x54f   :  { %1336 = vst.msk [vmem:[#allocation3 + $0x10] sm:$0xff] %vm1323_vm0, %v1330_v33  ;;  %v1451_v50 = vld [vmem:[#allocation3 + $0x8] sm:$0x3] }
 0x550   :  { %v1427_v56 = vld [vmem:[#allocation3 + $0x8] sm:$0x3] }
 0x551   :  { %v1403_v58 = vld [vmem:[#allocation3 + $0x8] sm:$0x3] }
 0x552   :  { %v1349_v39 = vld [vmem:[#allocation3 + $0x18] sm:$0x3]  ;;  %1458 = vrot.lane.b32.xlu0 %v1346_v2, %s7977_s19  ;;  %v1499_v59 = vld [vmem:[#allocation3 + $0x8] sm:$0x3] }
 0x553   :  { %1353 = vst.msk [vmem:[#allocation2 + $0x1c8] sm:$0x3] %vm1227_vm12, %v1349_v39  ;;  %v1379_v3 = vld [vmem:[#allocation3 + $0x8] sm:$0x3]  ;;  %v1501_v6 = vld [vmem:[#allocation3 + $0x18] sm:$0x3] }
 0x554   :  { %v1355_v7 = vld [vmem:[#allocation3 + $0x8] sm:$0x3]  ;;  %v1477_v9 = vld [vmem:[#allocation3 + $0x18] sm:$0x3] }
 0x555   :  { %v1453_v20 = vld [vmem:[#allocation3 + $0x18] sm:$0x3]  ;;  %v1523_v16 = vld [vmem:[#allocation3 + $0x8] sm:$0x3] }
 0x556   :  { %v1348_v41 = vld [vmem:[#allocation3 + $0x10] sm:$0xff]  ;;  %1434 = vrot.lane.b32.xlu0 %v1346_v2, %s7978_s13  ;;  %v1429_v22 = vld [vmem:[#allocation3 + $0x18] sm:$0x3] }
 0x557   :  { %1352 = vst.msk [vmem:[#allocation2 + $0x1b0] sm:$0xff] %vm1223_vm13, %v1348_v41  ;;  %1510 = vrot.lane.b32.xlu1 %v1348_v41, %s7976_s11  ;;  %v1405_v19 = vld [vmem:[#allocation3 + $0x18] sm:$0x3] }
 0x558   :  { %v1381_v11 = vld [vmem:[#allocation3 + $0x18] sm:$0x3] }
 0x559   :  { %v1357_v43 = vld [vmem:[#allocation3 + $0x18] sm:$0x3] }
 0x55a   :  { %1410 = vrot.lane.b32.xlu0 %v1346_v2, %s7979_s14  ;;  %v1525_v47 = vld [vmem:[#allocation3 + $0x18] sm:$0x3] }
 0x55b   :  { %1486 = vrot.lane.b32.xlu1 %v1348_v41, %s7967_s28 }
 0x55e   :  { %1386 = vrot.lane.b32.xlu0 %v1346_v2, %s7970_s21 }
 0x55f   :  { %1462 = vrot.lane.b32.xlu1 %v1348_v41, %s7977_s19 }
 0x562   :  { %1484 = vrot.lane.b32.xlu0 %v1475_v49, %s7967_s28 }
 0x563   :  { %1438 = vrot.lane.b32.xlu1 %v1348_v41, %s7978_s13 }
 0x566   :  { %1460 = vrot.lane.b32.xlu0 %v1451_v50, %s7977_s19 }
 0x567   :  { %1414 = vrot.lane.b32.xlu1 %v1348_v41, %s7979_s14 }
 0x56a   :  { %1436 = vrot.lane.b32.xlu0 %v1427_v56, %s7978_s13 }
 0x56b   :  { %1390 = vrot.lane.b32.xlu1 %v1348_v41, %s7970_s21 }
 0x56e   :  { %1412 = vrot.lane.b32.xlu0 %v1403_v58, %s7979_s14 }
 0x56f   :  { %1508 = vrot.lane.b32.xlu1 %v1499_v59, %s7976_s11 }
 0x572   :  { %1388 = vrot.lane.b32.xlu0 %v1379_v3, %s7970_s21 }
 0x573   :  { %1512 = vrot.lane.b32.xlu1 %v1501_v6, %s7976_s11 }
 0x576   :  { %1364 = vrot.lane.b32.xlu0 %v1355_v7, %s7971_s30 }
 0x577   :  { %1488 = vrot.lane.b32.xlu1 %v1477_v9, %s7967_s28 }
 0x57a   :  { %1362 = vrot.lane.b32.xlu0 %v1346_v2, %s7971_s30 }
 0x57b   :  { %1464 = vrot.lane.b32.xlu1 %v1453_v20, %s7977_s19 }
 0x57e   :  { %1532 = vrot.lane.b32.xlu0 %v1523_v16, %s7980_s15 }
 0x57f   :  { %1440 = vrot.lane.b32.xlu1 %v1429_v22, %s7978_s13 }
 0x582   :  { %1530 = vrot.lane.b32.xlu0 %v1346_v2, %s7980_s15 }
 0x583   :  { %1416 = vrot.lane.b32.xlu1 %v1405_v19, %s7979_s14 }
 0x587   :  { %1392 = vrot.lane.b32.xlu1 %v1381_v11, %s7970_s21 }
 0x58b   :  { %1368 = vrot.lane.b32.xlu1 %v1357_v43, %s7971_s30 }
 0x58f   :  { %1366 = vrot.lane.b32.xlu1 %v1348_v41, %s7971_s30 }
 0x593   :  { %1536 = vrot.lane.b32.xlu1 %v1525_v47, %s7980_s15  ;;  %v1547_v47 = vld [vmem:[#allocation2 + $0x18] sm:$0xff] }
 0x597   :  { %1534 = vrot.lane.b32.xlu1 %v1348_v41, %s7980_s15 }
 0x5bc   :  { %v1507_v52 = vpop.permute.xlu0 %1506 }
 0x5bd   :  { %1518 = vst.msk [vmem:[#allocation2 + $0x150] sm:$0xff] %vm1223_vm13, %v1507_v52 }
 0x5c0   :  { %v1483_v55 = vpop.permute.xlu0 %1482 }
 0x5c1   :  { %1494 = vst.msk [vmem:[#allocation2 + $0x120] sm:$0xff] %vm1223_vm13, %v1483_v55  ;;  %v1546_v55 = vld [vmem:[#allocation2] sm:$0xff] }
 0x5c4   :  { %v1459_v60 = vpop.permute.xlu0 %1458  ;;  %v1560_v40 = vld [vmem:[#allocation2 + $0x150] sm:$0xff] }
 0x5c5   :  { %1470 = vst.msk [vmem:[#allocation2 + $0xf0] sm:$0xff] %vm1223_vm13, %v1459_v60 }
 0x5c8   :  { %v1435_v61 = vpop.permute.xlu0 %1434  ;;  %v1558_v53 = vld [vmem:[#allocation2 + $0x120] sm:$0xff] }
 0x5c9   :  { %v1511_v1 = vpop.permute.xlu1 %1510  ;;  %1446 = vst.msk [vmem:[#allocation2 + $0xc0] sm:$0xff] %vm1223_vm13, %v1435_v61 }
 0x5ca   :  { %1520 = vst.msk [vmem:[#allocation2 + $0x300] sm:$0xff] %vm1223_vm13, %v1511_v1 }
 0x5cc   :  { %v1411_v5 = vpop.permute.xlu0 %1410  ;;  %v1556_v12 = vld [vmem:[#allocation2 + $0xf0] sm:$0xff] }
 0x5cd   :  { %v1487_v10 = vpop.permute.xlu1 %1486  ;;  %1422 = vst.msk [vmem:[#allocation2 + $0x90] sm:$0xff] %vm1223_vm13, %v1411_v5  ;;  %v1338_v5 = vld [vmem:[%s10719_s1 + $0x60] sm:$0xff] }
 0x5ce   :  { %1496 = vst.msk [vmem:[#allocation2 + $0x2d0] sm:$0xff] %vm1223_vm13, %v1487_v10 }
 0x5d0   :  { %v1387_v13 = vpop.permute.xlu0 %1386  ;;  %v1554_v39 = vld [vmem:[#allocation2 + $0xc0] sm:$0xff] }
 0x5d1   :  { %v1463_v15 = vpop.permute.xlu1 %1462  ;;  %1398 = vst.msk [vmem:[#allocation2 + $0x60] sm:$0xff] %vm1223_vm13, %v1387_v13  ;;  %v1660_v54 = vld [vmem:[#allocation2 + $0x300] sm:$0xff]  ;;  %v1647_v13 = vld [vmem:[#allocation2 + $0x1c8] sm:$0xff] }
 0x5d2   :  { %1472 = vst.msk [vmem:[#allocation2 + $0x2a0] sm:$0xff] %vm1223_vm13, %v1463_v15  ;;  %v1341_v15 = vld [vmem:[%s10719_s1 + $0x78] sm:$0x3] }
 0x5d4   :  { %v1485_v17 = vpop.permute.xlu0 %1484  ;;  %v1552_v58 = vld [vmem:[#allocation2 + $0x90] sm:$0xff] }
 0x5d5   :  { %v1439_v18 = vpop.permute.xlu1 %1438  ;;  %1495 = vst.msk [vmem:[#allocation2 + $0x138] sm:$0x3] %vm1227_vm12, %v1485_v17  ;;  %v1658_v14 = vld [vmem:[#allocation2 + $0x2d0] sm:$0xff] }
 0x5d6   :  { %1448 = vst.msk [vmem:[#allocation2 + $0x270] sm:$0xff] %vm1223_vm13, %v1439_v18  ;;  %v1646_v17 = vld [vmem:[#allocation2 + $0x1b0] sm:$0xff] }
 0x5d7   :  { %v1340_v18 = vld [vmem:[%s10719_s1 + $0x70] sm:$0x3] }
 0x5d8   :  { %v1461_v21 = vpop.permute.xlu0 %1460  ;;  %v1550_v9 = vld [vmem:[#allocation2 + $0x60] sm:$0xff] }
 0x5d9   :  { %v1415_v23 = vpop.permute.xlu1 %1414  ;;  %1471 = vst.msk [vmem:[#allocation2 + $0x108] sm:$0x3] %vm1227_vm12, %v1461_v21  ;;  %v1656_v41 = vld [vmem:[#allocation2 + $0x2a0] sm:$0xff] }
 0x5da   :  { %1424 = vst.msk [vmem:[#allocation2 + $0x240] sm:$0xff] %vm1223_vm13, %v1415_v23  ;;  %v8896_v23 = vld [vmem:[#allocation2 + $0xe0] sm:$0xff] }
 0x5dc   :  { %v1437_v24 = vpop.permute.xlu0 %1436  ;;  %v1559_v48 = vld [vmem:[#allocation2 + $0x138] sm:$0xff] }
 0x5dd   :  { %v1391_v25 = vpop.permute.xlu1 %1390  ;;  %1447 = vst.msk [vmem:[#allocation2 + $0xd8] sm:$0x3] %vm1227_vm12, %v1437_v24  ;;  %v1654_v59 = vld [vmem:[#allocation2 + $0x270] sm:$0xff] }
 0x5de   :  { %1400 = vst.msk [vmem:[#allocation2 + $0x210] sm:$0xff] %vm1223_vm13, %v1391_v25 }
 0x5e0   :  { %v1413_v29 = vpop.permute.xlu0 %1412  ;;  %v1557_v4 = vld [vmem:[#allocation2 + $0x108] sm:$0xff] }
 0x5e1   :  { %v1509_v30 = vpop.permute.xlu1 %1508  ;;  %1423 = vst.msk [vmem:[#allocation2 + $0xa8] sm:$0x3] %vm1227_vm12, %v1413_v29  ;;  %v1652_v20 = vld [vmem:[#allocation2 + $0x240] sm:$0xff] }
 0x5e2   :  { %1519 = vst.msk [vmem:[#allocation2 + $0x168] sm:$0x3] %vm1227_vm12, %v1509_v30 }
 0x5e4   :  { %v1389_v32 = vpop.permute.xlu0 %1388  ;;  %v1555_v28 = vld [vmem:[#allocation2 + $0xd8] sm:$0xff] }
 0x5e5   :  { %v1513_v34 = vpop.permute.xlu1 %1512  ;;  %1399 = vst.msk [vmem:[#allocation2 + $0x78] sm:$0x3] %vm1227_vm12, %v1389_v32  ;;  %v1650_v43 = vld [vmem:[#allocation2 + $0x210] sm:$0xff] }
 0x5e6   :  { %1521 = vst.msk [vmem:[#allocation2 + $0x318] sm:$0x3] %vm1227_vm12, %v1513_v34 }
 0x5e8   :  { %v1365_v35 = vpop.permute.xlu0 %1364  ;;  %v1553_v50 = vld [vmem:[#allocation2 + $0xa8] sm:$0xff] }
 0x5e9   :  { %v1489_v36 = vpop.permute.xlu1 %1488  ;;  %v1561_v38 = vld [vmem:[#allocation2 + $0x168] sm:$0xff]  ;;  %1375 = vst.msk [vmem:[#allocation2 + $0x48] sm:$0x3] %vm1227_vm12, %v1365_v35 }
 0x5ea   :  { %1497 = vst.msk [vmem:[#allocation2 + $0x2e8] sm:$0x3] %vm1227_vm12, %v1489_v36  ;;  %1572 = vmatpush1.msra.mxu0 %v1561_v38 }
 0x5eb   :  { %1573 = vmatprep.subr.mxu0 %v8645_v46 }
 0x5ec   :  { %1574 = vmatpush1.msra.mxu0 %v1560_v40  ;;  %v1363_v42 = vpop.permute.xlu0 %1362  ;;  %v1551_v6 = vld [vmem:[#allocation2 + $0x78] sm:$0xff] }
 0x5ed   :  { %1575 = vmatprep.subr.mxu0 %v8645_v46  ;;  %v1465_v45 = vpop.permute.xlu1 %1464  ;;  %v1661_v51 = vld [vmem:[#allocation2 + $0x318] sm:$0xff]  ;;  %1374 = vst.msk [vmem:[#allocation2 + $0x30] sm:$0xff] %vm1223_vm13, %v1363_v42 }
 0x5ee   :  { %1473 = vst.msk [vmem:[#allocation2 + $0x2b8] sm:$0x3] %vm1227_vm12, %v1465_v45  ;;  %1576 = vmatpush1.msra.mxu0 %v1559_v48  ;;  %1665 = vmatpush1.msra.mxu1 %v1661_v51 }
 0x5ef   :  { %1577 = vmatprep.subr.mxu0 %v8645_v46  ;;  %1666 = vmatprep.subr.mxu1 %v8645_v46 }
 0x5f0   :  { %1578 = vmatpush1.msra.mxu0 %v1558_v53  ;;  %1667 = vmatpush1.msra.mxu1 %v1660_v54  ;;  %v1533_v62 = vpop.permute.xlu0 %1532  ;;  %v1549_v22 = vld [vmem:[#allocation2 + $0x48] sm:$0xff] }
 0x5f1   :  { %1579 = vmatprep.subr.mxu0 %v8645_v46  ;;  %1668 = vmatprep.subr.mxu1 %v8645_v46  ;;  %v1441_v63 = vpop.permute.xlu1 %1440  ;;  %v1659_v31 = vld [vmem:[#allocation2 + $0x2e8] sm:$0xff]  ;;  %1543 = vst.msk [vmem:[#allocation2 + $0x198] sm:$0x3] %vm1227_vm12, %v1533_v62 }
 0x5f2   :  { %1449 = vst.msk [vmem:[#allocation2 + $0x288] sm:$0x3] %vm1227_vm12, %v1441_v63  ;;  %1580 = vmatpush1.msra.mxu0 %v1557_v4  ;;  %1669 = vmatpush1.msra.mxu1 %v1659_v31 }
 0x5f3   :  { %1581 = vmatprep.subr.mxu0 %v8645_v46  ;;  %1670 = vmatprep.subr.mxu1 %v8645_v46 }
 0x5f4   :  { %1582 = vmatpush1.msra.mxu0 %v1556_v12  ;;  %1671 = vmatpush1.msra.mxu1 %v1658_v14  ;;  %v1531_v2 = vpop.permute.xlu0 %1530  ;;  %v1548_v11 = vld [vmem:[#allocation2 + $0x30] sm:$0xff] }
 0x5f5   :  { %1583 = vmatprep.subr.mxu0 %v8645_v46  ;;  %1672 = vmatprep.subr.mxu1 %v8645_v46  ;;  %v1417_v26 = vpop.permute.xlu1 %1416  ;;  %v1657_v33 = vld [vmem:[#allocation2 + $0x2b8] sm:$0xff]  ;;  %1542 = vst.msk [vmem:[#allocation2 + $0x180] sm:$0xff] %vm1223_vm13, %v1531_v2 }
 0x5f6   :  { %1425 = vst.msk [vmem:[#allocation2 + $0x258] sm:$0x3] %vm1227_vm12, %v1417_v26  ;;  %1584 = vmatpush1.msra.mxu0 %v1555_v28  ;;  %1673 = vmatpush1.msra.mxu1 %v1657_v33 }
 0x5f7   :  { %1585 = vmatprep.subr.mxu0 %v8645_v46  ;;  %1674 = vmatprep.subr.mxu1 %v8645_v46 }
 0x5f8   :  { %1586 = vmatpush1.msra.mxu0 %v1554_v39  ;;  %1675 = vmatpush1.msra.mxu1 %v1656_v41  ;;  %v1563_v61 = vld [vmem:[#allocation2 + $0x198] sm:$0xff] }
 0x5f9   :  { %1587 = vmatprep.subr.mxu0 %v8645_v46  ;;  %1676 = vmatprep.subr.mxu1 %v8645_v46  ;;  %v1393_v49 = vpop.permute.xlu1 %1392  ;;  %v1655_v56 = vld [vmem:[#allocation2 + $0x288] sm:$0xff] }
 0x5fa   :  { %1401 = vst.msk [vmem:[#allocation2 + $0x228] sm:$0x3] %vm1227_vm12, %v1393_v49  ;;  %1588 = vmatpush1.msra.mxu0 %v1553_v50  ;;  %1677 = vmatpush1.msra.mxu1 %v1655_v56 }
 0x5fb   :  { %1589 = vmatprep.subr.mxu0 %v8645_v46  ;;  %1678 = vmatprep.subr.mxu1 %v8645_v46 }
 0x5fc   :  { %1590 = vmatpush1.msra.mxu0 %v1552_v58  ;;  %1679 = vmatpush1.msra.mxu1 %v1654_v59  ;;  %v1562_v10 = vld [vmem:[#allocation2 + $0x180] sm:$0xff] }
 0x5fd   :  { %1591 = vmatprep.subr.mxu0 %v8645_v46  ;;  %1680 = vmatprep.subr.mxu1 %v8645_v46  ;;  %v1369_v3 = vpop.permute.xlu1 %1368  ;;  %v1653_v7 = vld [vmem:[#allocation2 + $0x258] sm:$0xff] }
 0x5fe   :  { %1377 = vst.msk [vmem:[#allocation2 + $0x1f8] sm:$0x3] %vm1227_vm12, %v1369_v3  ;;  %1592 = vmatpush1.msra.mxu0 %v1551_v6  ;;  %1681 = vmatpush1.msra.mxu1 %v1653_v7 }
 0x5ff   :  { %1593 = vmatprep.subr.mxu0 %v8645_v46  ;;  %1682 = vmatprep.subr.mxu1 %v8645_v46 }
 0x600   :  { %1594 = vmatpush1.msra.mxu0 %v1550_v9  ;;  %1683 = vmatpush1.msra.mxu1 %v1652_v20 }
 0x601   :  { %1595 = vmatprep.subr.mxu0 %v8645_v46  ;;  %1684 = vmatprep.subr.mxu1 %v8645_v46  ;;  %v1367_v16 = vpop.permute.xlu1 %1366  ;;  %v1651_v19 = vld [vmem:[#allocation2 + $0x228] sm:$0xff] }
 0x602   :  { %1376 = vst.msk [vmem:[#allocation2 + $0x1e0] sm:$0xff] %vm1223_vm13, %v1367_v16  ;;  %1596 = vmatpush1.msra.mxu0 %v1549_v22  ;;  %1685 = vmatpush1.msra.mxu1 %v1651_v19  ;;  %v1740_v19 = vld [vmem:[%s10720_s2 + $0x8] sm:$0x3] }
 0x603   :  { %1597 = vmatprep.subr.mxu0 %v8645_v46  ;;  %1686 = vmatprep.subr.mxu1 %v8645_v46 }
 0x604   :  { %1598 = vmatpush1.msra.mxu0 %v1548_v11  ;;  %1687 = vmatpush1.msra.mxu1 %v1650_v43  ;;  %v7981_v11 = vmov 13   ;;  %v7982_v43 = vmov 5  }
 0x605   :  { %1599 = vmatprep.subr.mxu0 %v8645_v46  ;;  %1688 = vmatprep.subr.mxu1 %v8645_v46  ;;  %v1537_v44 = vpop.permute.xlu1 %1536  ;;  %v1649_v52 = vld [vmem:[#allocation2 + $0x1f8] sm:$0xff] }
 0x606   :  { %1545 = vst.msk [vmem:[#allocation2 + $0x348] sm:$0x3] %vm1227_vm12, %v1537_v44  ;;  %1600 = vmatpush1.msra.mxu0 %v1547_v47  ;;  %1689 = vmatpush1.msra.mxu1 %v1649_v52 }
 0x607   :  { %1601 = vmatprep.subr.mxu0 %v8645_v46  ;;  %1690 = vmatprep.subr.mxu1 %v8645_v46 }
 0x608   :  { %1602 = vmatpush1.msra.mxu0 %v1546_v55  ;;  %7868 = vset.pattern.permute.xlu1 %v7981_v11 }
 0x609   :  { %1631 = vmatprep.subr.mxu0 %v8645_v46  ;;  %v1535_v60 = vpop.permute.xlu1 %1534  ;;  %v1648_v1 = vld [vmem:[#allocation2 + $0x1e0] sm:$0xff]  ;;  %7867 = vset.pattern.permute.xlu0 %v7982_v43 }
 0x60a   :  { %1544 = vst.msk [vmem:[#allocation2 + $0x330] sm:$0xff] %vm1223_vm13, %v1535_v60  ;;  %1632 = vmatpush2.msra.mxu0 %v1563_v61  ;;  %1691 = vmatpush1.msra.mxu1 %v1648_v1 }
 0x60b   :  { %1633 = vmatprep.subr.mxu0 %v8645_v46  ;;  %1692 = vmatprep.subr.mxu1 %v8645_v46 }
 0x60c   :  { %1634 = vmatpush2.msra.mxu0 %v1562_v10  ;;  %1693 = vmatpush1.msra.mxu1 %v1647_v13 }
 0x60d   :  { %1636 = vmatmul.mubr.f32.vlgmr.msra.gmra.mxu0 %v1338_v5  ;;  %1694 = vmatprep.subr.mxu1 %v8645_v46  ;;  %v1663_v21 = vld [vmem:[#allocation2 + $0x348] sm:$0xff] }
 0x60e   :  { %1695 = vmatpush1.msra.mxu1 %v1646_v17  ;;  %7367 = vmatprep.mubr.msk.f32.mxu0 %vm1564_vm2, %v1341_v15 }
 0x60f   :  { %1724 = vmatprep.subr.mxu1 %v8645_v46  ;;  %2084 = vmatprep.subr.mxu0 %v8645_v46 }
 0x610   :  { %1725 = vmatpush2.msra.mxu1 %v1663_v21 }
 0x611   :  { %1641 = vmatmul.mubr.f32.gmra.mxu0 %v1340_v18  ;;  %1726 = vmatprep.subr.mxu1 %v8896_v23  ;;  %v1662_v24 = vld [vmem:[#allocation2 + $0x330] sm:$0xff] }
 0x612   :  { %1727 = vmatpush2.msra.mxu1 %v1662_v24 }
 0x613   :  { %1729 = vmatmul.mubr.f32.vlgmr.msra.gmra.mxu1 %v1338_v5  ;;  %2177 = vmatprep.subr.mxu1 %v8896_v23 }
 0x614   :  { %7369 = vmatprep.mubr.msk.f32.mxu1 %vm1564_vm2, %v1341_v15 }
 0x617   :  { %1734 = vmatmul.mubr.f32.gmra.mxu1 %v1340_v18  ;;  %v8923_v18 = vld [vmem:[%s10720_s2] sm:$0xff] }
 0x6cd   :  { %v1637_v25 = vpop.f32.mrf.mxu0 }
 0x6ce   :  { %v1746_v35 = vmul.f32 %v8723_v27, %v1637_v25 }
 0x6cf   :  { %v1639_v29 = vpop.f32.mrf.mxu0 }
 0x6d0   :  { %v1748_v48 = vsel %vm1223_vm13, %v1746_v35, 0.0 }
 0x6d1   :  { %v1642_v30 = vpop.f32.mrf.mxu0 }
 0x6d2   :  { %v1747_v32 = vmul.f32 %v8723_v27, %v1642_v30 }
 0x6d3   :  { %v1644_v46 = vpop.f32.mrf.mxu0  ;;  %v1730_v34 = vpop.f32.mrf.mxu1 }
 0x6d4   :  { %v1751_v36 = vsel %vm1227_vm12, %v1747_v32, 0.0  ;;  %v1756_v42 = vmul.f32 %v8723_v27, %v1730_v34 }
 0x6d5   :  { %1752 = vadd.xlane.f32.xlu0 %v1751_v36  ;;  %v1732_v38 = vpop.f32.mrf.mxu1 }
 0x6d6   :  { %v1758_v54 = vsel %vm1223_vm13, %v1756_v42, 0.0 }
 0x6d7   :  { %v1735_v40 = vpop.f32.mrf.mxu1 }
 0x6d8   :  { %v1757_v45 = vmul.f32 %v8723_v27, %v1735_v40 }
 0x6d9   :  { %1749 = vadd.xlane.f32.xlu0 %v1748_v48  ;;  %v1737_v51 = vpop.f32.mrf.mxu1 }
 0x6da   :  { %v1761_v53 = vsel %vm1227_vm12, %v1757_v45, 0.0 }
 0x6db   :  { %1762 = vadd.xlane.f32.xlu1 %v1761_v53 }
 0x6dd   :  { %1759 = vadd.xlane.f32.xlu0 %v1758_v54 }
 0x75e   :  { %v1753_v62 = vpop.xlane.xlu0 %1752 }
 0x762   :  { %v1750_v63 = vpop.xlane.xlu0 %1749 }
 0x764   :  { %v1763_v4 = vpop.xlane.xlu1 %1762 }
 0x765   :  { %v1765_v31 = vadd.f32 %v1763_v4, %v1753_v62 }
 0x766   :  { %v1760_v12 = vpop.xlane.xlu0 %1759 }
 0x767   :  { %v1767_v14 = vmul.f32 0.0078125, %v1765_v31  ;;  %v1764_v2 = vadd.f32 %v1760_v12, %v1750_v63 }
 0x769   :  { %v1769_v26 = vsub.f32 %v1642_v30, %v1767_v14  ;;  %v1773_v28 = vsub.f32 %v1735_v40, %v1767_v14  ;;  %v1766_v33 = vmul.f32 0.0078125, %v1764_v2 }
 0x76b   :  { %v1768_v39 = vsub.f32 %v1637_v25, %v1766_v33  ;;  %v1772_v41 = vsub.f32 %v1730_v34, %v1766_v33  ;;  %v1775_v49 = vmul.f32 %v8723_v27, %v1773_v28  ;;  %v1771_v50 = vmul.f32 %v8723_v27, %v1769_v26 }
 0x76d   :  { %v1787_v56 = vmul.f32 %v1775_v49, %v1775_v49  ;;  %v1777_v58 = vmul.f32 %v1771_v50, %v1771_v50  ;;  %v1774_v59 = vmul.f32 %v8723_v27, %v1772_v41  ;;  %v1770_v3 = vmul.f32 %v8723_v27, %v1768_v39 }
 0x76f   :  { %v1791_v6 = vsel %vm1227_vm12, %v1787_v56, 0.0  ;;  %v1781_v7 = vsel %vm1227_vm12, %v1777_v58, 0.0  ;;  %v1786_v9 = vmul.f32 %v1774_v59, %v1774_v59  ;;  %v1776_v20 = vmul.f32 %v1770_v3, %v1770_v3 }
 0x770   :  { %1792 = vadd.xlane.f32.xlu0 %v1791_v6  ;;  %1782 = vadd.xlane.f32.xlu1 %v1781_v7 }
 0x771   :  { %v1788_v16 = vsel %vm1223_vm13, %v1786_v9, 0.0  ;;  %v1778_v22 = vsel %vm1223_vm13, %v1776_v20, 0.0 }
 0x774   :  { %1789 = vadd.xlane.f32.xlu0 %v1788_v16  ;;  %1779 = vadd.xlane.f32.xlu1 %v1778_v22 }
 0x785   :  { %1823 = vperm.xlu1 %7868, %v1740_v19  }
 0x789   :  { %7869 = vset.pattern.permute.xlu1 %v7982_v43  ;;  %v1343_v43 = vld [vmem:[%s10719_s1 + $0x88] sm:$0xff] }
 0x78a   :  { %7371 = vmatprep.mubr.msk.f32.mxu0 %vm1564_vm2, %v1343_v43  ;;  %7373 = vmatprep.mubr.msk.f32.mxu1 %vm1564_vm2, %v1343_v43 }
 0x7f9   :  { %v1793_v44 = vpop.xlane.xlu0 %1792  ;;  %v1783_v47 = vpop.xlane.xlu1 %1782 }
 0x7fa   :  { %v1795_v52 = vadd.f32 %v1793_v44, %v1783_v47 }
 0x7fc   :  { %v1797_v55 = vmul.f32 0.0078125, %v1795_v52 }
 0x7fd   :  { %v1790_v60 = vpop.xlane.xlu0 %1789  ;;  %v1780_v61 = vpop.xlane.xlu1 %1779 }
 0x7fe   :  { %v1799_v1 = vadd.f32 1e-05, %v1797_v55  ;;  %v1794_v5 = vadd.f32 %v1790_v60, %v1780_v61 }
 0x800   :  { %7921 = vrsqrt.f32 %v1799_v1  ;;  %v1796_v10 = vmul.f32 0.0078125, %v1794_v5 }
 0x801   :  { %v1824_v25 = vpop.permute.xlu1 %1823 }
 0x802   :  { %v1798_v13 = vadd.f32 1e-05, %v1796_v10 }
 0x804   :  { %7923 = vrsqrt.f32 %v1798_v13 }
 0x80d   :  { %v7922_v15 = vpop.eup %7921 }
 0x80e   :  { %v1803_v17 = vmul.f32 %v7922_v15, %v1740_v19 }
 0x810   :  { %1811 = vperm.xlu1 %7869, %v1803_v17  }
 0x811   :  { %v7924_v21 = vpop.eup %7923 }
 0x812   :  { %v1802_v24 = vmul.f32 %v7924_v21, %v8923_v18 }
 0x814   :  { %1806 = vperm.xlu0 %7867, %v1802_v24   ;;  %7870 = vset.pattern.permute.xlu1 %v7981_v11 }
 0x815   :  { %1818 = vperm.xlu1 %7870, %v8923_v18  }
 0x88b   :  { %v1812_v29 = vpop.permute.xlu1 %1811 }
 0x88c   :  { %v1815_v30 = vmul.f32 %v1812_v29, %v1771_v50  ;;  %v1833_v36 = vmul.f32 %v1812_v29, %v1775_v49 }
 0x88e   :  { %v1827_v35 = vadd.f32 %v1824_v25, %v1815_v30  ;;  %v1835_v45 = vadd.f32 %v1833_v36, %v1824_v25 }
 0x88f   :  { %v1807_v32 = vpop.permute.xlu0 %1806 }
 0x890   :  { %v1814_v46 = vmul.f32 %v1807_v32, %v1770_v3  ;;  %v1819_v34 = vpop.permute.xlu1 %1818  ;;  %v1829_v42 = vmax.f32 %v1827_v35, 0.0  ;;  %v1832_v48 = vmul.f32 %v1807_v32, %v1774_v59  ;;  %v1837_v53 = vmax.f32 %v1835_v45, 0.0 }
 0x892   :  { %v1826_v38 = vadd.f32 %v1819_v34, %v1814_v46  ;;  %v1834_v54 = vadd.f32 %v1832_v48, %v1819_v34  ;;  %v1831_v62 = vmul.f32 %v8723_v27, %v1829_v42  ;;  %v1839_v4 = vmul.f32 %v8723_v27, %v1837_v53 }
 0x894   :  { %v1828_v40 = vmax.f32 %v1826_v38, 0.0  ;;  %v1836_v63 = vmax.f32 %v1834_v54, 0.0 }
 0x896   :  { %v1830_v51 = vmul.f32 %v8723_v27, %v1828_v40  ;;  %v1838_v31 = vmul.f32 %v8723_v27, %v1836_v63 }
 0x898   :  { %1842 = vrot.lane.b32.xlu1 %v1830_v51, %s7975_s10 }
 0x89c   :  { %1844 = vrot.lane.b32.xlu1 %v1831_v62, %s7975_s10 }
 0x8a0   :  { %1854 = vrot.lane.b32.xlu1 %v1839_v4, %s7975_s10 }
 0x8a4   :  { %1852 = vrot.lane.b32.xlu1 %v1838_v31, %s7975_s10 }
 0x90a   :  { %v1843_v12 = vpop.permute.xlu1 %1842 }
 0x90b   :  { %1848 = vst.msk [vmem:[#allocation3] sm:$0xff] %vm1323_vm0, %v1843_v12 }
 0x90e   :  { %v1845_v14 = vpop.permute.xlu1 %1844 }
 0x90f   :  { %1849 = vst.msk [vmem:[#allocation3 + $0x8] sm:$0x3] %vm1325_vm1, %v1845_v14 }
 0x912   :  { %v1855_v2 = vpop.permute.xlu1 %1854  ;;  %v2012_v26 = vld [vmem:[#allocation3] sm:$0xff] }
 0x913   :  { %1859 = vst.msk [vmem:[#allocation3 + $0x18] sm:$0x3] %vm1325_vm1, %v1855_v2  ;;  %2020 = vrot.lane.b32.xlu1 %v2012_v26, %s7976_s11 }
 0x914   :  { %1864 = vst.msk [vmem:[#allocation2] sm:$0xff] %vm1223_vm13, %v2012_v26 }
 0x916   :  { %v1853_v28 = vpop.permute.xlu1 %1852  ;;  %v1861_v27 = vld [vmem:[#allocation3 + $0x8] sm:$0x3] }
 0x917   :  { %1858 = vst.msk [vmem:[#allocation3 + $0x10] sm:$0xff] %vm1323_vm0, %v1853_v28  ;;  %1996 = vrot.lane.b32.xlu1 %v2012_v26, %s7967_s28  ;;  %v2013_v41 = vld [vmem:[#allocation3 + $0x8] sm:$0x3] }
 0x918   :  { %1865 = vst.msk [vmem:[#allocation2 + $0x18] sm:$0x3] %vm1227_vm12, %v1861_v27  ;;  %v1989_v49 = vld [vmem:[#allocation3 + $0x8] sm:$0x3] }
 0x919   :  { %v1965_v50 = vld [vmem:[#allocation3 + $0x8] sm:$0x3] }
 0x91a   :  { %v1863_v33 = vld [vmem:[#allocation3 + $0x18] sm:$0x3]  ;;  %v1941_v56 = vld [vmem:[#allocation3 + $0x8] sm:$0x3] }
 0x91b   :  { %1972 = vrot.lane.b32.xlu1 %v2012_v26, %s7977_s19  ;;  %1867 = vst.msk [vmem:[#allocation2 + $0x1c8] sm:$0x3] %vm1227_vm12, %v1863_v33  ;;  %v2015_v58 = vld [vmem:[#allocation3 + $0x18] sm:$0x3]  ;;  %v1917_v59 = vld [vmem:[#allocation3 + $0x8] sm:$0x3] }
 0x91c   :  { %v1991_v3 = vld [vmem:[#allocation3 + $0x18] sm:$0x3]  ;;  %v1893_v6 = vld [vmem:[#allocation3 + $0x8] sm:$0x3] }
 0x91d   :  { %v1967_v7 = vld [vmem:[#allocation3 + $0x18] sm:$0x3]  ;;  %v1869_v9 = vld [vmem:[#allocation3 + $0x8] sm:$0x3] }
 0x91e   :  { %v2014_v39 = vld [vmem:[#allocation3 + $0x10] sm:$0xff]  ;;  %v1943_v20 = vld [vmem:[#allocation3 + $0x18] sm:$0x3]  ;;  %v2037_v22 = vld [vmem:[#allocation3 + $0x8] sm:$0x3] }
 0x91f   :  { %1948 = vrot.lane.b32.xlu1 %v2012_v26, %s7978_s13  ;;  %2024 = vrot.lane.b32.xlu0 %v2014_v39, %s7976_s11  ;;  %1866 = vst.msk [vmem:[#allocation2 + $0x1b0] sm:$0xff] %vm1223_vm13, %v2014_v39  ;;  %v1919_v16 = vld [vmem:[#allocation3 + $0x18] sm:$0x3] }
 0x920   :  { %v1895_v19 = vld [vmem:[#allocation3 + $0x18] sm:$0x3] }
 0x921   :  { %v1871_v11 = vld [vmem:[#allocation3 + $0x18] sm:$0x3] }
 0x922   :  { %v2039_v44 = vld [vmem:[#allocation3 + $0x18] sm:$0x3] }
 0x923   :  { %1924 = vrot.lane.b32.xlu1 %v2012_v26, %s7979_s14  ;;  %2000 = vrot.lane.b32.xlu0 %v2014_v39, %s7967_s28 }
 0x927   :  { %1900 = vrot.lane.b32.xlu1 %v2012_v26, %s7970_s21  ;;  %1976 = vrot.lane.b32.xlu0 %v2014_v39, %s7977_s19 }
 0x92b   :  { %2022 = vrot.lane.b32.xlu1 %v2013_v41, %s7976_s11  ;;  %1952 = vrot.lane.b32.xlu0 %v2014_v39, %s7978_s13 }
 0x92f   :  { %1998 = vrot.lane.b32.xlu1 %v1989_v49, %s7967_s28  ;;  %1928 = vrot.lane.b32.xlu0 %v2014_v39, %s7979_s14 }
 0x933   :  { %1974 = vrot.lane.b32.xlu1 %v1965_v50, %s7977_s19  ;;  %1904 = vrot.lane.b32.xlu0 %v2014_v39, %s7970_s21 }
 0x937   :  { %1950 = vrot.lane.b32.xlu1 %v1941_v56, %s7978_s13  ;;  %2026 = vrot.lane.b32.xlu0 %v2015_v58, %s7976_s11 }
 0x93b   :  { %1926 = vrot.lane.b32.xlu1 %v1917_v59, %s7979_s14  ;;  %2002 = vrot.lane.b32.xlu0 %v1991_v3, %s7967_s28 }
 0x93f   :  { %1902 = vrot.lane.b32.xlu1 %v1893_v6, %s7970_s21  ;;  %1978 = vrot.lane.b32.xlu0 %v1967_v7, %s7977_s19 }
 0x943   :  { %1878 = vrot.lane.b32.xlu1 %v1869_v9, %s7971_s30  ;;  %1954 = vrot.lane.b32.xlu0 %v1943_v20, %s7978_s13 }
 0x947   :  { %1876 = vrot.lane.b32.xlu1 %v2012_v26, %s7971_s30  ;;  %1930 = vrot.lane.b32.xlu0 %v1919_v16, %s7979_s14  ;;  %v2061_v16 = vld [vmem:[#allocation2 + $0x18] sm:$0xff] }
 0x94b   :  { %2046 = vrot.lane.b32.xlu1 %v2037_v22, %s7980_s15  ;;  %1906 = vrot.lane.b32.xlu0 %v1895_v19, %s7970_s21 }
 0x94f   :  { %2044 = vrot.lane.b32.xlu1 %v2012_v26, %s7980_s15  ;;  %1882 = vrot.lane.b32.xlu0 %v1871_v11, %s7971_s30  ;;  %v2060_v11 = vld [vmem:[#allocation2] sm:$0xff] }
 0x953   :  { %1880 = vrot.lane.b32.xlu0 %v2014_v39, %s7971_s30 }
 0x957   :  { %2050 = vrot.lane.b32.xlu0 %v2039_v44, %s7980_s15 }
 0x95b   :  { %2048 = vrot.lane.b32.xlu0 %v2014_v39, %s7980_s15 }
 0x985   :  { %v2021_v47 = vpop.permute.xlu1 %2020 }
 0x986   :  { %2032 = vst.msk [vmem:[#allocation2 + $0x150] sm:$0xff] %vm1223_vm13, %v2021_v47 }
 0x989   :  { %v1997_v52 = vpop.permute.xlu1 %1996 }
 0x98a   :  { %2008 = vst.msk [vmem:[#allocation2 + $0x120] sm:$0xff] %vm1223_vm13, %v1997_v52  ;;  %v1342_v52 = vld [vmem:[%s10719_s1 + $0x80] sm:$0xff] }
 0x98d   :  { %v1973_v55 = vpop.permute.xlu1 %1972  ;;  %v2074_v32 = vld [vmem:[#allocation2 + $0x150] sm:$0xff] }
 0x98e   :  { %1984 = vst.msk [vmem:[#allocation2 + $0xf0] sm:$0xff] %vm1223_vm13, %v1973_v55 }
 0x991   :  { %v2025_v60 = vpop.permute.xlu0 %2024  ;;  %v1949_v61 = vpop.permute.xlu1 %1948  ;;  %v2072_v36 = vld [vmem:[#allocation2 + $0x120] sm:$0xff] }
 0x992   :  { %2034 = vst.msk [vmem:[#allocation2 + $0x300] sm:$0xff] %vm1223_vm13, %v2025_v60  ;;  %1960 = vst.msk [vmem:[#allocation2 + $0xc0] sm:$0xff] %vm1223_vm13, %v1949_v61 }
 0x995   :  { %v2001_v1 = vpop.permute.xlu0 %2000  ;;  %v1925_v5 = vpop.permute.xlu1 %1924  ;;  %v2070_v45 = vld [vmem:[#allocation2 + $0xf0] sm:$0xff] }
 0x996   :  { %2010 = vst.msk [vmem:[#allocation2 + $0x2d0] sm:$0xff] %vm1223_vm13, %v2001_v1  ;;  %1936 = vst.msk [vmem:[#allocation2 + $0x90] sm:$0xff] %vm1223_vm13, %v1925_v5  ;;  %v1345_v1 = vld [vmem:[%s10719_s1 + $0x98] sm:$0x3]  ;;  %v1344_v5 = vld [vmem:[%s10719_s1 + $0x90] sm:$0x3] }
 0x999   :  { %v1977_v10 = vpop.permute.xlu0 %1976  ;;  %v1901_v13 = vpop.permute.xlu1 %1900  ;;  %v2068_v62 = vld [vmem:[#allocation2 + $0xc0] sm:$0xff] }
 0x99a   :  { %1986 = vst.msk [vmem:[#allocation2 + $0x2a0] sm:$0xff] %vm1223_vm13, %v1977_v10  ;;  %1912 = vst.msk [vmem:[#allocation2 + $0x60] sm:$0xff] %vm1223_vm13, %v1901_v13  ;;  %v2173_v63 = vld [vmem:[#allocation2 + $0x300] sm:$0xff] }
 0x99d   :  { %v1953_v15 = vpop.permute.xlu0 %1952  ;;  %v2023_v17 = vpop.permute.xlu1 %2022  ;;  %v2066_v2 = vld [vmem:[#allocation2 + $0x90] sm:$0xff] }
 0x99e   :  { %1962 = vst.msk [vmem:[#allocation2 + $0x270] sm:$0xff] %vm1223_vm13, %v1953_v15  ;;  %v2171_v26 = vld [vmem:[#allocation2 + $0x2d0] sm:$0xff]  ;;  %v2160_v15 = vld [vmem:[#allocation2 + $0x1c8] sm:$0xff] }
 0x99f   :  { %2033 = vst.msk [vmem:[#allocation2 + $0x168] sm:$0x3] %vm1227_vm12, %v2023_v17  ;;  %v2159_v17 = vld [vmem:[#allocation2 + $0x1b0] sm:$0xff] }
 0x9a1   :  { %v1929_v21 = vpop.permute.xlu0 %1928  ;;  %v1999_v24 = vpop.permute.xlu1 %1998  ;;  %v2064_v41 = vld [vmem:[#allocation2 + $0x60] sm:$0xff] }
 0x9a2   :  { %1938 = vst.msk [vmem:[#allocation2 + $0x240] sm:$0xff] %vm1223_vm13, %v1929_v21  ;;  %v2169_v49 = vld [vmem:[#allocation2 + $0x2a0] sm:$0xff] }
 0x9a3   :  { %2009 = vst.msk [vmem:[#allocation2 + $0x138] sm:$0x3] %vm1227_vm12, %v1999_v24 }
 0x9a5   :  { %v1905_v25 = vpop.permute.xlu0 %1904  ;;  %v1975_v29 = vpop.permute.xlu1 %1974  ;;  %v2167_v3 = vld [vmem:[#allocation2 + $0x270] sm:$0xff] }
 0x9a6   :  { %v2075_v30 = vld [vmem:[#allocation2 + $0x168] sm:$0xff]  ;;  %1914 = vst.msk [vmem:[#allocation2 + $0x210] sm:$0xff] %vm1223_vm13, %v1905_v25 }
 0x9a7   :  { %1985 = vst.msk [vmem:[#allocation2 + $0x108] sm:$0x3] %vm1227_vm12, %v1975_v29  ;;  %2085 = vmatpush1.msra.mxu0 %v2075_v30  ;;  %v9061_v29 = vld [vmem:[%s10721_s3 + $0x1f8] ss:$0 sm:$0xff] }
 0x9a8   :  { %2086 = vmatprep.subr.mxu0 %v8896_v23 }
 0x9a9   :  { %2087 = vmatpush1.msra.mxu0 %v2074_v32  ;;  %v2027_v46 = vpop.permute.xlu0 %2026  ;;  %v1951_v34 = vpop.permute.xlu1 %1950  ;;  %v2165_v22 = vld [vmem:[#allocation2 + $0x240] sm:$0xff] }
 0x9aa   :  { %2088 = vmatprep.subr.mxu0 %v8896_v23  ;;  %v2073_v35 = vld [vmem:[#allocation2 + $0x138] sm:$0xff]  ;;  %2035 = vst.msk [vmem:[#allocation2 + $0x318] sm:$0x3] %vm1227_vm12, %v2027_v46  ;;  %1961 = vst.msk [vmem:[#allocation2 + $0xd8] sm:$0x3] %vm1227_vm12, %v1951_v34 }
 0x9ab   :  { %2089 = vmatpush1.msra.mxu0 %v2073_v35 }
 0x9ac   :  { %2090 = vmatprep.subr.mxu0 %v8896_v23 }
 0x9ad   :  { %2091 = vmatpush1.msra.mxu0 %v2072_v36  ;;  %v2003_v38 = vpop.permute.xlu0 %2002  ;;  %v1927_v40 = vpop.permute.xlu1 %1926  ;;  %v2163_v47 = vld [vmem:[#allocation2 + $0x210] sm:$0xff] }
 0x9ae   :  { %2092 = vmatprep.subr.mxu0 %v8896_v23  ;;  %v2071_v42 = vld [vmem:[#allocation2 + $0x108] sm:$0xff]  ;;  %2011 = vst.msk [vmem:[#allocation2 + $0x2e8] sm:$0x3] %vm1227_vm12, %v2003_v38  ;;  %1937 = vst.msk [vmem:[#allocation2 + $0xa8] sm:$0x3] %vm1227_vm12, %v1927_v40 }
 0x9af   :  { %2093 = vmatpush1.msra.mxu0 %v2071_v42 }
 0x9b0   :  { %2094 = vmatprep.subr.mxu0 %v8896_v23 }
 0x9b1   :  { %2095 = vmatpush1.msra.mxu0 %v2070_v45  ;;  %v1979_v48 = vpop.permute.xlu0 %1978  ;;  %v1903_v51 = vpop.permute.xlu1 %1902  ;;  %v2069_v53 = vld [vmem:[#allocation2 + $0xd8] sm:$0xff] }
 0x9b2   :  { %2096 = vmatprep.subr.mxu0 %v8896_v23  ;;  %v2174_v54 = vld [vmem:[#allocation2 + $0x318] sm:$0xff]  ;;  %1987 = vst.msk [vmem:[#allocation2 + $0x2b8] sm:$0x3] %vm1227_vm12, %v1979_v48  ;;  %1913 = vst.msk [vmem:[#allocation2 + $0x78] sm:$0x3] %vm1227_vm12, %v1903_v51 }
 0x9b3   :  { %2097 = vmatpush1.msra.mxu0 %v2069_v53  ;;  %2178 = vmatpush1.msra.mxu1 %v2174_v54 }
 0x9b4   :  { %2098 = vmatprep.subr.mxu0 %v8896_v23  ;;  %2179 = vmatprep.subr.mxu1 %v8896_v23 }
 0x9b5   :  { %2099 = vmatpush1.msra.mxu0 %v2068_v62  ;;  %2180 = vmatpush1.msra.mxu1 %v2173_v63  ;;  %v1955_v4 = vpop.permute.xlu0 %1954  ;;  %v1879_v31 = vpop.permute.xlu1 %1878  ;;  %v2067_v12 = vld [vmem:[#allocation2 + $0xa8] sm:$0xff] }
 0x9b6   :  { %2181 = vmatprep.subr.mxu1 %v8896_v23  ;;  %2100 = vmatprep.subr.mxu0 %v8896_v23  ;;  %v2172_v14 = vld [vmem:[#allocation2 + $0x2e8] sm:$0xff]  ;;  %1963 = vst.msk [vmem:[#allocation2 + $0x288] sm:$0x3] %vm1227_vm12, %v1955_v4  ;;  %1889 = vst.msk [vmem:[#allocation2 + $0x48] sm:$0x3] %vm1227_vm12, %v1879_v31 }
 0x9b7   :  { %2101 = vmatpush1.msra.mxu0 %v2067_v12  ;;  %2182 = vmatpush1.msra.mxu1 %v2172_v14 }
 0x9b8   :  { %2102 = vmatprep.subr.mxu0 %v8896_v23  ;;  %2183 = vmatprep.subr.mxu1 %v8896_v23 }
 0x9b9   :  { %2103 = vmatpush1.msra.mxu0 %v2066_v2  ;;  %2184 = vmatpush1.msra.mxu1 %v2171_v26  ;;  %v1931_v28 = vpop.permute.xlu0 %1930  ;;  %v1877_v27 = vpop.permute.xlu1 %1876  ;;  %v2065_v33 = vld [vmem:[#allocation2 + $0x78] sm:$0xff] }
 0x9ba   :  { %2185 = vmatprep.subr.mxu1 %v8896_v23  ;;  %2104 = vmatprep.subr.mxu0 %v8896_v23  ;;  %v2170_v39 = vld [vmem:[#allocation2 + $0x2b8] sm:$0xff]  ;;  %1939 = vst.msk [vmem:[#allocation2 + $0x258] sm:$0x3] %vm1227_vm12, %v1931_v28 }
 0x9bb   :  { %1888 = vst.msk [vmem:[#allocation2 + $0x30] sm:$0xff] %vm1223_vm13, %v1877_v27  ;;  %2105 = vmatpush1.msra.mxu0 %v2065_v33  ;;  %2186 = vmatpush1.msra.mxu1 %v2170_v39 }
 0x9bc   :  { %2106 = vmatprep.subr.mxu0 %v8896_v23  ;;  %2187 = vmatprep.subr.mxu1 %v8896_v23 }
 0x9bd   :  { %2107 = vmatpush1.msra.mxu0 %v2064_v41  ;;  %2188 = vmatpush1.msra.mxu1 %v2169_v49  ;;  %v1907_v50 = vpop.permute.xlu0 %1906  ;;  %v2047_v56 = vpop.permute.xlu1 %2046  ;;  %v2063_v58 = vld [vmem:[#allocation2 + $0x48] sm:$0xff] }
 0x9be   :  { %2189 = vmatprep.subr.mxu1 %v8896_v23  ;;  %2108 = vmatprep.subr.mxu0 %v8896_v23  ;;  %v2168_v59 = vld [vmem:[#allocation2 + $0x288] sm:$0xff]  ;;  %1915 = vst.msk [vmem:[#allocation2 + $0x228] sm:$0x3] %vm1227_vm12, %v1907_v50  ;;  %2057 = vst.msk [vmem:[#allocation2 + $0x198] sm:$0x3] %vm1227_vm12, %v2047_v56 }
 0x9bf   :  { %2109 = vmatpush1.msra.mxu0 %v2063_v58  ;;  %2190 = vmatpush1.msra.mxu1 %v2168_v59 }
 0x9c0   :  { %2191 = vmatprep.subr.mxu1 %v8896_v23  ;;  %2110 = vmatprep.subr.mxu0 %v8896_v23 }
 0x9c1   :  { %2192 = vmatpush1.msra.mxu1 %v2167_v3  ;;  %v1883_v6 = vpop.permute.xlu0 %1882  ;;  %v2045_v7 = vpop.permute.xlu1 %2044  ;;  %v2166_v20 = vld [vmem:[#allocation2 + $0x258] sm:$0xff] }
 0x9c2   :  { %2193 = vmatprep.subr.mxu1 %v8896_v23  ;;  %v2062_v9 = vld [vmem:[#allocation2 + $0x30] sm:$0xff]  ;;  %1891 = vst.msk [vmem:[#allocation2 + $0x1f8] sm:$0x3] %vm1227_vm12, %v1883_v6 }
 0x9c3   :  { %2056 = vst.msk [vmem:[#allocation2 + $0x180] sm:$0xff] %vm1223_vm13, %v2045_v7  ;;  %2111 = vmatpush1.msra.mxu0 %v2062_v9  ;;  %2194 = vmatpush1.msra.mxu1 %v2166_v20 }
 0x9c4   :  { %2112 = vmatprep.subr.mxu0 %v8896_v23  ;;  %2195 = vmatprep.subr.mxu1 %v8896_v23 }
 0x9c5   :  { %2113 = vmatpush1.msra.mxu0 %v2061_v16  ;;  %2196 = vmatpush1.msra.mxu1 %v2165_v22  ;;  %v1881_v19 = vpop.permute.xlu0 %1880  ;;  %v2164_v43 = vld [vmem:[#allocation2 + $0x228] sm:$0xff]  ;;  %v2077_v44 = vld [vmem:[#allocation2 + $0x198] sm:$0xff]  ;;  %v7983_v22 = vmov 6  }
 0x9c6   :  { %2197 = vmatprep.subr.mxu1 %v8896_v23  ;;  %2114 = vmatprep.subr.mxu0 %v8896_v23  ;;  %1890 = vst.msk [vmem:[#allocation2 + $0x1e0] sm:$0xff] %vm1223_vm13, %v1881_v19 }
 0x9c7   :  { %2115 = vmatpush1.msra.mxu0 %v2060_v11  ;;  %2198 = vmatpush1.msra.mxu1 %v2164_v43 }
 0x9c8   :  { %2144 = vmatprep.subr.mxu0 %v8896_v23  ;;  %2199 = vmatprep.subr.mxu1 %v8896_v23 }
 0x9c9   :  { %2145 = vmatpush2.msra.mxu0 %v2077_v44  ;;  %2200 = vmatpush1.msra.mxu1 %v2163_v47  ;;  %v2051_v55 = vpop.permute.xlu0 %2050  ;;  %v2162_v61 = vld [vmem:[#allocation2 + $0x1f8] sm:$0xff] }
 0x9ca   :  { %2201 = vmatprep.subr.mxu1 %v8896_v23  ;;  %2146 = vmatprep.subr.mxu0 %v8896_v23  ;;  %v2076_v60 = vld [vmem:[#allocation2 + $0x180] sm:$0xff]  ;;  %2059 = vst.msk [vmem:[#allocation2 + $0x348] sm:$0x3] %vm1227_vm12, %v2051_v55 }
 0x9cb   :  { %2147 = vmatpush2.msra.mxu0 %v2076_v60  ;;  %2202 = vmatpush1.msra.mxu1 %v2162_v61 }
 0x9cc   :  { %2203 = vmatprep.subr.mxu1 %v8896_v23  ;;  %2149 = vmatmul.mubr.f32.vlgmr.msra.gmra.mxu0 %v1342_v52 }
 0x9cd   :  { %7372 = vmatprep.mubr.msk.f32.mxu0 %vm1564_vm2, %v1345_v1  ;;  %2648 = vmatprep.subr.mxu0 %v8896_v23  ;;  %v2049_v10 = vpop.permute.xlu0 %2048  ;;  %v2161_v13 = vld [vmem:[#allocation2 + $0x1e0] sm:$0xff] }
 0x9ce   :  { %2058 = vst.msk [vmem:[#allocation2 + $0x330] sm:$0xff] %vm1223_vm13, %v2049_v10  ;;  %2204 = vmatpush1.msra.mxu1 %v2161_v13  ;;  %7871 = vset.pattern.permute.xlu0 %v7983_v22 }
 0x9cf   :  { %2205 = vmatprep.subr.mxu1 %v8896_v23  ;;  %7872 = vset.pattern.permute.xlu1 %v7983_v22 }
 0x9d0   :  { %2154 = vmatmul.mubr.f32.gmra.mxu0 %v1344_v5  ;;  %2206 = vmatpush1.msra.mxu1 %v2160_v15 }
 0x9d1   :  { %2207 = vmatprep.subr.mxu1 %v8896_v23  ;;  %v2176_v21 = vld [vmem:[#allocation2 + $0x348] sm:$0xff] }
 0x9d2   :  { %2208 = vmatpush1.msra.mxu1 %v2159_v17 }
 0x9d3   :  { %2237 = vmatprep.subr.mxu1 %v8896_v23 }
 0x9d4   :  { %2238 = vmatpush2.msra.mxu1 %v2176_v21  ;;  %v7984_v21 = vmov 14  }
 0x9d5   :  { %2239 = vmatprep.subr.mxu1 %v8896_v23  ;;  %v2175_v24 = vld [vmem:[#allocation2 + $0x330] sm:$0xff] }
 0x9d6   :  { %2240 = vmatpush2.msra.mxu1 %v2175_v24 }
 0x9d7   :  { %2242 = vmatmul.mubr.f32.vlgmr.msra.gmra.mxu1 %v1342_v52 }
 0x9d8   :  { %7374 = vmatprep.mubr.msk.f32.mxu1 %vm1564_vm2, %v1345_v1 }
 0x9db   :  { %2247 = vmatmul.mubr.f32.gmra.mxu1 %v1344_v5  ;;  %v2253_v5 = vld [vmem:[%s10720_s2 + $0x8] sm:$0x3] }
 0xa8c   :  { %v2150_v25 = vpop.f32.mrf.mxu0 }
 0xa8d   :  { %v2259_v51 = vmul.f32 %v9061_v29, %v2150_v25 }
 0xa8e   :  { %v2152_v30 = vpop.f32.mrf.mxu0 }
 0xa8f   :  { %v2261_v54 = vsel %vm1223_vm13, %v2259_v51, 0.0 }
 0xa90   :  { %v2155_v32 = vpop.f32.mrf.mxu0 }
 0xa91   :  { %v2260_v46 = vmul.f32 %v9061_v29, %v2155_v32 }
 0xa92   :  { %v2157_v34 = vpop.f32.mrf.mxu0 }
 0xa93   :  { %v2264_v35 = vsel %vm1227_vm12, %v2260_v46, 0.0 }
 0xa94   :  { %2265 = vadd.xlane.f32.xlu1 %v2264_v35 }
 0xa97   :  { %v2243_v23 = vpop.f32.mrf.mxu1 }
 0xa98   :  { %v2269_v36 = vmul.f32 %v9061_v29, %v2243_v23 }
 0xa99   :  { %v2245_v38 = vpop.f32.mrf.mxu1 }
 0xa9a   :  { %v2271_v40 = vsel %vm1223_vm13, %v2269_v36, 0.0 }
 0xa9b   :  { %2272 = vadd.xlane.f32.xlu1 %v2271_v40  ;;  %v2248_v42 = vpop.f32.mrf.mxu1 }
 0xa9c   :  { %v2270_v45 = vmul.f32 %v9061_v29, %v2248_v42 }
 0xa9d   :  { %v2250_v48 = vpop.f32.mrf.mxu1 }
 0xa9e   :  { %v2274_v53 = vsel %vm1227_vm12, %v2270_v45, 0.0 }
 0xa9f   :  { %2275 = vadd.xlane.f32.xlu0 %v2274_v53 }
 0xaa3   :  { %2262 = vadd.xlane.f32.xlu0 %v2261_v54 }
 0xb1d   :  { %v2266_v62 = vpop.xlane.xlu1 %2265 }
 0xb24   :  { %v2273_v12 = vpop.xlane.xlu1 %2272 }
 0xb28   :  { %v2276_v63 = vpop.xlane.xlu0 %2275 }
 0xb29   :  { %v2278_v4 = vadd.f32 %v2276_v63, %v2266_v62 }
 0xb2b   :  { %v2280_v31 = vmul.f32 0.0078125, %v2278_v4 }
 0xb2c   :  { %v2263_v14 = vpop.xlane.xlu0 %2262 }
 0xb2d   :  { %v2282_v2 = vsub.f32 %v2155_v32, %v2280_v31  ;;  %v2286_v26 = vsub.f32 %v2248_v42, %v2280_v31  ;;  %v2277_v28 = vadd.f32 %v2273_v12, %v2263_v14  ;;  %v7985_v14 = vmov 3  }
 0xb2f   :  { %v2279_v27 = vmul.f32 0.0078125, %v2277_v28  ;;  %v9072_v33 = vmul.f32 %v9061_v29, %v2286_v26  ;;  %v2284_v39 = vmul.f32 %v9061_v29, %v2282_v2 }
 0xb31   :  { %v2281_v41 = vsub.f32 %v2150_v25, %v2279_v27  ;;  %v2285_v49 = vsub.f32 %v2243_v23, %v2279_v27  ;;  %v2300_v50 = vmul.f32 %v9072_v33, %v9072_v33  ;;  %v2290_v56 = vmul.f32 %v2284_v39, %v2284_v39 }
 0xb33   :  { %v2304_v58 = vsel %vm1227_vm12, %v2300_v50, 0.0  ;;  %v2294_v59 = vsel %vm1227_vm12, %v2290_v56, 0.0  ;;  %v9080_v3 = vmul.f32 %v9061_v29, %v2285_v49  ;;  %v2283_v6 = vmul.f32 %v9061_v29, %v2281_v41 }
 0xb34   :  { %2305 = vadd.xlane.f32.xlu1 %v2304_v58  ;;  %2295 = vadd.xlane.f32.xlu0 %v2294_v59  ;;  %v9129_v59 = vld [vmem:[%s10719_s1 + $0x28] sm:$0xff] }
 0xb35   :  { %v2299_v7 = vmul.f32 %v9080_v3, %v9080_v3  ;;  %v2289_v9 = vmul.f32 %v2283_v6, %v2283_v6  ;;  %7376 = vmatprep.mubr.msk.f32.mxu0 %vm1564_vm2, %v9129_v59 }
 0xb37   :  { %v2301_v20 = vsel %vm1223_vm13, %v2299_v7, 0.0  ;;  %v2291_v16 = vsel %vm1223_vm13, %v2289_v9, 0.0 }
 0xb38   :  { %2302 = vadd.xlane.f32.xlu1 %v2301_v20  ;;  %2292 = vadd.xlane.f32.xlu0 %v2291_v16 }
 0xbbd   :  { %v2306_v19 = vpop.xlane.xlu1 %2305  ;;  %v2296_v11 = vpop.xlane.xlu0 %2295 }
 0xbbe   :  { %v2308_v43 = vadd.f32 %v2306_v19, %v2296_v11  ;;  %v9145_v19 = vld [vmem:[#allocation2 + $0xe0] sm:$0xff] }
 0xbbf   :  { %135 = vst.msk [vmem:[#allocation4 + $0x8] sm:$0x3] %vm134_vm3, %v9145_v19  ;;  %137 = vst.msk [vmem:[#allocation4 + $0x18] sm:$0x3] %vm134_vm3, %v9145_v19  ;;  %vm5739_vm3 = vcmask 66560  }
 0xbc0   :  { %v2310_v44 = vmul.f32 0.0078125, %v2308_v43  ;;  %133 = vst.msk [vmem:[#allocation4] sm:$0xff] %vm132_vm4, %v9145_v19  ;;  %136 = vst.msk [vmem:[#allocation4 + $0x10] sm:$0xff] %vm132_vm4, %v9145_v19  ;;  %vm5737_vm4 = vcmask 72704  }
 0xbc1   :  { %v2303_v47 = vpop.xlane.xlu1 %2302  ;;  %v2293_v52 = vpop.xlane.xlu0 %2292 }
 0xbc2   :  { %v2312_v55 = vadd.f32 1e-05, %v2310_v44  ;;  %v2307_v60 = vadd.f32 %v2303_v47, %v2293_v52 }
 0xbc4   :  { %7925 = vrsqrt.f32 %v2312_v55  ;;  %v2309_v61 = vmul.f32 0.0078125, %v2307_v60 }
 0xbc6   :  { %v2311_v1 = vadd.f32 1e-05, %v2309_v61 }
 0xbc8   :  { %7927 = vrsqrt.f32 %v2311_v1 }
 0xbd1   :  { %v7926_v10 = vpop.eup %7925 }
 0xbd2   :  { %v2316_v13 = vmul.f32 %v7926_v10, %v2253_v5 }
 0xbd4   :  { %2324 = vperm.xlu0 %7871, %v2316_v13  }
 0xbd5   :  { %v7928_v15 = vpop.eup %7927 }
 0xbd6   :  { %v2315_v17 = vmul.f32 %v7928_v15, %v8923_v18 }
 0xbd8   :  { %2319 = vperm.xlu1 %7872, %v2315_v17   ;;  %7874 = vset.pattern.permute.xlu0 %v7985_v14 }
 0xbdc   :  { %7873 = vset.pattern.permute.xlu1 %v7984_v21 }
 0xbdd   :  { %2336 = vperm.xlu1 %7873, %v2253_v5  }
 0xbe1   :  { %2331 = vperm.xlu1 %7873, %v8923_v18  }
 0xbe5   :  { %7875 = vset.pattern.permute.xlu1 %v7985_v14  ;;  %v2631_v14 = vld [vmem:[%s10721_s3 + $0x1a8] sm:$0xf] }
 0xbe6   :  { %7702 = vmatprep.subr.msk.mxu1 %vm754_vm10, %v2631_v14 }
 0xbe7   :  { %7703 = vmatpush3.msk.msra.mxu1 %vm754_vm10, %v2631_v14 }
 0xc4f   :  { %v2325_v25 = vpop.permute.xlu0 %2324 }
 0xc50   :  { %v2328_v30 = vmul.f32 %v2325_v25, %v2284_v39  ;;  %v2344_v28 = vmul.f32 %v2325_v25, %v9072_v33 }
 0xc53   :  { %v2320_v24 = vpop.permute.xlu1 %2319 }
 0xc54   :  { %v2327_v34 = vmul.f32 %v2320_v24, %v2283_v6  ;;  %v2343_v4 = vmul.f32 %v2320_v24, %v9080_v3 }
 0xc58   :  { %v2337_v32 = vpop.permute.xlu1 %2336 }
 0xc59   :  { %v2340_v46 = vadd.f32 %v2337_v32, %v2328_v30  ;;  %v2346_v27 = vadd.f32 %v2344_v28, %v2337_v32 }
 0xc5b   :  { %v2342_v35 = vmul.f32 %v9061_v29, %v2340_v46  ;;  %v2348_v49 = vmul.f32 %v9061_v29, %v2346_v27  ;;  %v2628_v27 = vld [vmem:[%s10721_s3 + $0x190] sm:$0xff] }
 0xc5c   :  { %v2332_v23 = vpop.permute.xlu1 %2331 }
 0xc5d   :  { %v2350_v36 = vadd.f32 %v2342_v35, %v8761_v0  ;;  %v2339_v38 = vadd.f32 %v2332_v23, %v2327_v34  ;;  %v2345_v31 = vadd.f32 %v2343_v4, %v2332_v23  ;;  %v2354_v33 = vadd.f32 %v2348_v49, %v8766_v37  ;;  %v2618_v37 = vld [vmem:[%s10720_s2 + $0x8] sm:$0x3]  ;;  %v2625_v49 = vld [vmem:[%s10721_s3 + $0x178] sm:$0xff] }
 0xc5f   :  { %v2341_v40 = vmul.f32 %v9061_v29, %v2339_v38  ;;  %v2352_v42 = vmax.f32 %v2350_v36, 0.0  ;;  %v2347_v2 = vmul.f32 %v9061_v29, %v2345_v31 }
 0xc61   :  { %v2349_v45 = vadd.f32 %v2341_v40, %v8756_v57  ;;  %2361 = vrot.lane.b32.xlu1 %v2352_v42, %s7975_s10  ;;  %v2353_v39 = vadd.f32 %v2347_v2, %v8771_v8  ;;  %v2356_v8 = vmax.f32 %v2354_v33, 0.0  ;;  %v2630_v2 = vld [vmem:[%s10721_s3 + $0x1a0] sm:$0xff] }
 0xc62   :  { %7704 = vmatprep.subr.mxu1 %v2630_v2  ;;  %v2622_v33 = vld [vmem:[%s10721_s3 + $0x160] sm:$0xff] }
 0xc63   :  { %v2351_v48 = vmax.f32 %v2349_v45, 0.0  ;;  %v2355_v50 = vmax.f32 %v2353_v39, 0.0  ;;  %7705 = vmatpush3.msra.mxu1 %v2630_v2  ;;  %v2627_v39 = vld [vmem:[%s10721_s3 + $0x188] sm:$0xff] }
 0xc65   :  { %2359 = vrot.lane.b32.xlu1 %v2351_v48, %s7975_s10 }
 0xcd3   :  { %v2362_v51 = vpop.permute.xlu1 %2361 }
 0xcd4   :  { %2366 = vst.msk [vmem:[#allocation3 + $0x8] sm:$0x3] %vm1325_vm1, %v2362_v51  ;;  %v9182_v51 = vld [vmem:[%s10719_s1 + $0x20] sm:$0xff] }
 0xcd7   :  { %v2360_v53 = vpop.permute.xlu1 %2359 }
 0xcd8   :  { %2365 = vst.msk [vmem:[#allocation3] sm:$0xff] %vm1323_vm0, %v2360_v53 }
 0xcdb   :  { %v2382_v54 = vld [vmem:[#allocation3 + $0x8] sm:$0x3] }
 0xcdc   :  { %2386 = vst.msk [vmem:[#allocation2 + $0x18] sm:$0x3] %vm1227_vm12, %v2382_v54  ;;  %v2534_v57 = vld [vmem:[#allocation3 + $0x8] sm:$0x3] }
 0xcdd   :  { %v2510_v62 = vld [vmem:[#allocation3 + $0x8] sm:$0x3] }
 0xcde   :  { %v2486_v63 = vld [vmem:[#allocation3 + $0x8] sm:$0x3] }
 0xcdf   :  { %v2533_v0 = vld [vmem:[#allocation3] sm:$0xff]  ;;  %v2462_v12 = vld [vmem:[#allocation3 + $0x8] sm:$0x3] }
 0xce0   :  { %2541 = vrot.lane.b32.xlu1 %v2533_v0, %s7976_s11  ;;  %2517 = vrot.lane.b32.xlu0 %v2533_v0, %s7967_s28  ;;  %2385 = vst.msk [vmem:[#allocation2] sm:$0xff] %vm1223_vm13, %v2533_v0  ;;  %v2438_v26 = vld [vmem:[#allocation3 + $0x8] sm:$0x3] }
 0xce1   :  { %v2414_v41 = vld [vmem:[#allocation3 + $0x8] sm:$0x3] }
 0xce2   :  { %v2390_v56 = vld [vmem:[#allocation3 + $0x8] sm:$0x3] }
 0xce3   :  { %v2558_v58 = vld [vmem:[#allocation3 + $0x8] sm:$0x3]  ;;  %v2582_v38 = vld [vmem:[#allocation2 + $0x18] sm:$0xff] }
 0xce4   :  { %2543 = vrot.lane.b32.xlu1 %v2534_v57, %s7976_s11  ;;  %2493 = vrot.lane.b32.xlu0 %v2533_v0, %s7977_s19 }
 0xce7   :  { %v2581_v40 = vld [vmem:[#allocation2] sm:$0xff] }
 0xce8   :  { %2519 = vrot.lane.b32.xlu1 %v2510_v62, %s7967_s28  ;;  %2469 = vrot.lane.b32.xlu0 %v2533_v0, %s7978_s13  ;;  %v9200_v62 = vld [vmem:[%s10719_s1 + $0x30] sm:$0x3] }
 0xcec   :  { %2495 = vrot.lane.b32.xlu1 %v2486_v63, %s7977_s19  ;;  %2445 = vrot.lane.b32.xlu0 %v2533_v0, %s7979_s14 }
 0xcf0   :  { %2471 = vrot.lane.b32.xlu1 %v2462_v12, %s7978_s13  ;;  %2421 = vrot.lane.b32.xlu0 %v2533_v0, %s7970_s21 }
 0xcf4   :  { %2447 = vrot.lane.b32.xlu1 %v2438_v26, %s7979_s14  ;;  %2397 = vrot.lane.b32.xlu0 %v2533_v0, %s7971_s30  ;;  %v2629_v26 = vld [vmem:[%s10721_s3 + $0x198] sm:$0xff] }
 0xcf5   :  { %7706 = vmatprep.subr.mxu1 %v2629_v26 }
 0xcf6   :  { %7707 = vmatpush3.msra.mxu1 %v2629_v26 }
 0xcf7   :  { %7708 = vmatprep.subr.mxu1 %v2628_v27 }
 0xcf8   :  { %2423 = vrot.lane.b32.xlu1 %v2414_v41, %s7970_s21  ;;  %2565 = vrot.lane.b32.xlu0 %v2533_v0, %s7980_s15  ;;  %v9188_v0 = vld [vmem:[%s10719_s1 + $0x38] sm:$0x3]  ;;  %v2626_v41 = vld [vmem:[%s10721_s3 + $0x180] sm:$0xff] }
 0xcf9   :  { %7709 = vmatpush3.msra.mxu1 %v2628_v27 }
 0xcfa   :  { %7710 = vmatprep.subr.mxu1 %v2627_v39 }
 0xcfb   :  { %7711 = vmatpush3.msra.mxu1 %v2627_v39 }
 0xcfc   :  { %2399 = vrot.lane.b32.xlu1 %v2390_v56, %s7971_s30  ;;  %2369 = vrot.lane.b32.xlu0 %v2355_v50, %s7975_s10  ;;  %v2624_v50 = vld [vmem:[%s10721_s3 + $0x170] sm:$0xff]  ;;  %v2623_v56 = vld [vmem:[%s10721_s3 + $0x168] sm:$0xff] }
 0xcfd   :  { %7712 = vmatprep.subr.mxu1 %v2626_v41 }
 0xcfe   :  { %7713 = vmatpush3.msra.mxu1 %v2626_v41 }
 0xcff   :  { %7714 = vmatprep.subr.mxu1 %v2625_v49 }
 0xd00   :  { %2567 = vrot.lane.b32.xlu1 %v2558_v58, %s7980_s15  ;;  %2634 = vperm.xlu0 %7874, %v8923_v18   ;;  %v2621_v58 = vld [vmem:[%s10721_s3 + $0x158] sm:$0xff] }
 0xd01   :  { %7715 = vmatpush3.msra.mxu1 %v2625_v49 }
 0xd02   :  { %7716 = vmatprep.subr.mxu1 %v2624_v50 }
 0xd03   :  { %7717 = vmatpush3.msra.mxu1 %v2624_v50 }
 0xd04   :  { %2371 = vrot.lane.b32.xlu1 %v2356_v8, %s7975_s10  ;;  %7718 = vmatprep.subr.mxu1 %v2623_v56  ;;  %v2620_v8 = vld [vmem:[%s10721_s3 + $0x150] sm:$0xff] }
 0xd05   :  { %7719 = vmatpush3.msra.mxu1 %v2623_v56 }
 0xd06   :  { %7720 = vmatprep.subr.mxu1 %v2622_v33 }
 0xd07   :  { %7721 = vmatpush3.msra.mxu1 %v2622_v33 }
 0xd08   :  { %2639 = vperm.xlu1 %7875, %v2618_v37   ;;  %7722 = vmatprep.subr.mxu1 %v2621_v58  ;;  %v2619_v37 = vld [vmem:[%s10721_s3 + $0x148] sm:$0xff] }
 0xd09   :  { %7723 = vmatpush3.msra.mxu1 %v2621_v58 }
 0xd0a   :  { %7724 = vmatprep.subr.mxu1 %v2620_v8 }
 0xd0b   :  { %7725 = vmatpush3.msra.mxu1 %v2620_v8 }
 0xd0c   :  { %7726 = vmatprep.subr.mxu1 %v2619_v37 }
 0xd0d   :  { %7727 = vmatpush3.msra.mxu1 %v2619_v37 }
 0xd0e   :  { %2807 = vmatprep.subr.mxu1 %v9145_v19 }
 0xd52   :  { %v2542_v29 = vpop.permute.xlu1 %2541  ;;  %v2518_v3 = vpop.permute.xlu0 %2517 }
 0xd53   :  { %2553 = vst.msk [vmem:[#allocation2 + $0x150] sm:$0xff] %vm1223_vm13, %v2542_v29  ;;  %2529 = vst.msk [vmem:[#allocation2 + $0x120] sm:$0xff] %vm1223_vm13, %v2518_v3 }
 0xd56   :  { %v2544_v18 = vpop.permute.xlu1 %2543  ;;  %v2494_v6 = vpop.permute.xlu0 %2493 }
 0xd57   :  { %2554 = vst.msk [vmem:[#allocation2 + $0x168] sm:$0x3] %vm1227_vm12, %v2544_v18 }
 0xd58   :  { %2505 = vst.msk [vmem:[#allocation2 + $0xf0] sm:$0xff] %vm1223_vm13, %v2494_v6 }
 0xd5a   :  { %v2520_v7 = vpop.permute.xlu1 %2519  ;;  %v2470_v9 = vpop.permute.xlu0 %2469  ;;  %v2595_v11 = vld [vmem:[#allocation2 + $0x150] sm:$0xff]  ;;  %v2593_v52 = vld [vmem:[#allocation2 + $0x120] sm:$0xff] }
 0xd5b   :  { %2530 = vst.msk [vmem:[#allocation2 + $0x138] sm:$0x3] %vm1227_vm12, %v2520_v7 }
 0xd5c   :  { %2481 = vst.msk [vmem:[#allocation2 + $0xc0] sm:$0xff] %vm1223_vm13, %v2470_v9 }
 0xd5e   :  { %v2496_v20 = vpop.permute.xlu1 %2495  ;;  %v2446_v16 = vpop.permute.xlu0 %2445  ;;  %v2596_v22 = vld [vmem:[#allocation2 + $0x168] sm:$0xff] }
 0xd5f   :  { %2506 = vst.msk [vmem:[#allocation2 + $0x108] sm:$0x3] %vm1227_vm12, %v2496_v20  ;;  %2649 = vmatpush1.msra.mxu0 %v2596_v22  ;;  %v2591_v1 = vld [vmem:[#allocation2 + $0xf0] sm:$0xff] }
 0xd60   :  { %2457 = vst.msk [vmem:[#allocation2 + $0x90] sm:$0xff] %vm1223_vm13, %v2446_v16  ;;  %2650 = vmatprep.subr.mxu0 %v9145_v19 }
 0xd61   :  { %2651 = vmatpush1.msra.mxu0 %v2595_v11 }
 0xd62   :  { %2652 = vmatprep.subr.mxu0 %v9145_v19  ;;  %v2472_v43 = vpop.permute.xlu1 %2471  ;;  %v2422_v44 = vpop.permute.xlu0 %2421  ;;  %v2594_v47 = vld [vmem:[#allocation2 + $0x138] sm:$0xff] }
 0xd63   :  { %2482 = vst.msk [vmem:[#allocation2 + $0xd8] sm:$0x3] %vm1227_vm12, %v2472_v43  ;;  %2653 = vmatpush1.msra.mxu0 %v2594_v47  ;;  %v2589_v15 = vld [vmem:[#allocation2 + $0xc0] sm:$0xff] }
 0xd64   :  { %2433 = vst.msk [vmem:[#allocation2 + $0x60] sm:$0xff] %vm1223_vm13, %v2422_v44  ;;  %2654 = vmatprep.subr.mxu0 %v9145_v19 }
 0xd65   :  { %2655 = vmatpush1.msra.mxu0 %v2593_v52 }
 0xd66   :  { %v2448_v55 = vpop.permute.xlu1 %2447  ;;  %2656 = vmatprep.subr.mxu0 %v9145_v19  ;;  %v2398_v60 = vpop.permute.xlu0 %2397  ;;  %v2592_v61 = vld [vmem:[#allocation2 + $0x108] sm:$0xff] }
 0xd67   :  { %2458 = vst.msk [vmem:[#allocation2 + $0xa8] sm:$0x3] %vm1227_vm12, %v2448_v55  ;;  %2657 = vmatpush1.msra.mxu0 %v2592_v61  ;;  %v2587_v25 = vld [vmem:[#allocation2 + $0x90] sm:$0xff] }
 0xd68   :  { %2409 = vst.msk [vmem:[#allocation2 + $0x30] sm:$0xff] %vm1223_vm13, %v2398_v60  ;;  %2658 = vmatprep.subr.mxu0 %v9145_v19 }
 0xd69   :  { %2659 = vmatpush1.msra.mxu0 %v2591_v1 }
 0xd6a   :  { %v2424_v5 = vpop.permute.xlu1 %2423  ;;  %2660 = vmatprep.subr.mxu0 %v9145_v19  ;;  %v2566_v10 = vpop.permute.xlu0 %2565  ;;  %v2590_v13 = vld [vmem:[#allocation2 + $0xd8] sm:$0xff] }
 0xd6b   :  { %2434 = vst.msk [vmem:[#allocation2 + $0x78] sm:$0x3] %vm1227_vm12, %v2424_v5  ;;  %2661 = vmatpush1.msra.mxu0 %v2590_v13  ;;  %v2585_v46 = vld [vmem:[#allocation2 + $0x60] sm:$0xff] }
 0xd6c   :  { %2577 = vst.msk [vmem:[#allocation2 + $0x180] sm:$0xff] %vm1223_vm13, %v2566_v10  ;;  %2662 = vmatprep.subr.mxu0 %v9145_v19 }
 0xd6d   :  { %2663 = vmatpush1.msra.mxu0 %v2589_v15 }
 0xd6e   :  { %v2400_v17 = vpop.permute.xlu1 %2399  ;;  %2664 = vmatprep.subr.mxu0 %v9145_v19  ;;  %v2370_v21 = vpop.permute.xlu0 %2369  ;;  %v2588_v24 = vld [vmem:[#allocation2 + $0xa8] sm:$0xff] }
 0xd6f   :  { %2410 = vst.msk [vmem:[#allocation2 + $0x48] sm:$0x3] %vm1227_vm12, %v2400_v17  ;;  %2665 = vmatpush1.msra.mxu0 %v2588_v24  ;;  %v2583_v36 = vld [vmem:[#allocation2 + $0x30] sm:$0xff] }
 0xd70   :  { %2375 = vst.msk [vmem:[#allocation3 + $0x10] sm:$0xff] %vm1323_vm0, %v2370_v21  ;;  %2666 = vmatprep.subr.mxu0 %v9145_v19  ;;  %vm5712_vm0 = vcmask 99360  }
 0xd71   :  { %2667 = vmatpush1.msra.mxu0 %v2587_v25 }
 0xd72   :  { %v2568_v30 = vpop.permute.xlu1 %2567  ;;  %2668 = vmatprep.subr.mxu0 %v9145_v19  ;;  %v2586_v32 = vld [vmem:[#allocation2 + $0x78] sm:$0xff] }
 0xd73   :  { %2578 = vst.msk [vmem:[#allocation2 + $0x198] sm:$0x3] %vm1227_vm12, %v2568_v30  ;;  %2669 = vmatpush1.msra.mxu0 %v2586_v32  ;;  %v2597_v54 = vld [vmem:[#allocation2 + $0x180] sm:$0xff] }
 0xd74   :  { %2670 = vmatprep.subr.mxu0 %v9145_v19 }
 0xd75   :  { %2671 = vmatpush1.msra.mxu0 %v2585_v46 }
 0xd76   :  { %v2372_v34 = vpop.permute.xlu1 %2371  ;;  %2672 = vmatprep.subr.mxu0 %v9145_v19  ;;  %v2584_v35 = vld [vmem:[#allocation2 + $0x48] sm:$0xff] }
 0xd77   :  { %v9168_v23 = vld [vmem:[#allocation3 + $0x10] sm:$0xff]  ;;  %2376 = vst.msk [vmem:[#allocation3 + $0x18] sm:$0x3] %vm1325_vm1, %v2372_v34  ;;  %2673 = vmatpush1.msra.mxu0 %v2584_v35  ;;  %vm5710_vm1 = vcmask 105504  }
 0xd78   :  { %2387 = vst.msk [vmem:[#allocation2 + $0x1b0] sm:$0xff] %vm1223_vm13, %v9168_v23  ;;  %2674 = vmatprep.subr.mxu0 %v9145_v19 }
 0xd79   :  { %2675 = vmatpush1.msra.mxu0 %v2583_v36 }
 0xd7a   :  { %2676 = vmatprep.subr.mxu0 %v9145_v19  ;;  %v2598_v48 = vld [vmem:[#allocation2 + $0x198] sm:$0xff] }
 0xd7b   :  { %2677 = vmatpush1.msra.mxu0 %v2582_v38  ;;  %v9269_v3 = vpop.permute.xlu0 %2634 }
 0xd7c   :  { %2678 = vmatprep.subr.mxu0 %v9145_v19 }
 0xd7d   :  { %2679 = vmatpush1.msra.mxu0 %v2581_v40 }
 0xd7e   :  { %2708 = vmatprep.subr.mxu0 %v9145_v19  ;;  %v2536_v42 = vld [vmem:[#allocation3 + $0x18] sm:$0x3] }
 0xd7f   :  { %v2512_v45 = vld [vmem:[#allocation3 + $0x18] sm:$0x3]  ;;  %2547 = vrot.lane.b32.xlu1 %v2536_v42, %s7976_s11  ;;  %2709 = vmatpush2.msra.mxu0 %v2598_v48 }
 0xd80   :  { %2523 = vrot.lane.b32.xlu0 %v2512_v45, %s7967_s28  ;;  %v2384_v53 = vld [vmem:[#allocation3 + $0x18] sm:$0x3]  ;;  %2710 = vmatprep.subr.mxu0 %v9145_v19 }
 0xd81   :  { %2388 = vst.msk [vmem:[#allocation2 + $0x1c8] sm:$0x3] %vm1227_vm12, %v2384_v53  ;;  %2711 = vmatpush2.msra.mxu0 %v2597_v54  ;;  %v2488_v57 = vld [vmem:[#allocation3 + $0x18] sm:$0x3]  ;;  %v2599_v53 = vld [vmem:[#allocation2 + $0x1b0] sm:$0xff] }
 0xd82   :  { %2713 = vmatmul.mubr.f32.vlgmr.msra.gmra.mxu0 %v9182_v51  ;;  %v2464_v63 = vld [vmem:[#allocation3 + $0x18] sm:$0x3]  ;;  %7731 = vmatprep.subr.msk.mxu0 %vm754_vm10, %v2631_v14 }
 0xd83   :  { %2545 = vrot.lane.b32.xlu1 %v9168_v23, %s7976_s11  ;;  %7377 = vmatprep.mubr.msk.f32.mxu0 %vm1564_vm2, %v9188_v0  ;;  %v2440_v4 = vld [vmem:[#allocation3 + $0x18] sm:$0x3]  ;;  %v9267_v29 = vpop.permute.xlu1 %2639 }
 0xd84   :  { %2499 = vrot.lane.b32.xlu0 %v2488_v57, %s7977_s19  ;;  %v2416_v31 = vld [vmem:[#allocation3 + $0x18] sm:$0x3]  ;;  %7732 = vmatpush3.msk.msra.mxu0 %vm754_vm10, %v2631_v14 }
 0xd85   :  { %v2392_v12 = vld [vmem:[#allocation3 + $0x18] sm:$0x3]  ;;  %7733 = vmatprep.subr.mxu0 %v2630_v2 }
 0xd86   :  { %2718 = vmatmul.mubr.f32.gmra.mxu0 %v9200_v62  ;;  %v2560_v28 = vld [vmem:[#allocation3 + $0x18] sm:$0x3] }
 0xd87   :  { %2521 = vrot.lane.b32.xlu1 %v9168_v23, %s7967_s28  ;;  %7734 = vmatpush3.msra.mxu0 %v2630_v2  ;;  %s7999_s28 = smov 124  }
 0xd88   :  { %2475 = vrot.lane.b32.xlu0 %v2464_v63, %s7978_s13  ;;  %7735 = vmatprep.subr.mxu0 %v2629_v26  ;;  %v2600_v48 = vld [vmem:[#allocation2 + $0x1c8] sm:$0xff] }
 0xd89   :  { %7736 = vmatpush3.msra.mxu0 %v2629_v26 }
 0xd8a   :  { %7737 = vmatprep.subr.mxu0 %v2628_v27 }
 0xd8b   :  { %2497 = vrot.lane.b32.xlu1 %v9168_v23, %s7977_s19  ;;  %7738 = vmatpush3.msra.mxu0 %v2628_v27 }
 0xd8c   :  { %2451 = vrot.lane.b32.xlu0 %v2440_v4, %s7979_s14  ;;  %7739 = vmatprep.subr.mxu0 %v2627_v39 }
 0xd8d   :  { %7740 = vmatpush3.msra.mxu0 %v2627_v39 }
 0xd8e   :  { %7741 = vmatprep.subr.mxu0 %v2626_v41 }
 0xd8f   :  { %2473 = vrot.lane.b32.xlu1 %v9168_v23, %s7978_s13  ;;  %7742 = vmatpush3.msra.mxu0 %v2626_v41  ;;  %s7988_s13 = smov 120  }
 0xd90   :  { %2427 = vrot.lane.b32.xlu0 %v2416_v31, %s7970_s21  ;;  %7743 = vmatprep.subr.mxu0 %v2625_v49 }
 0xd91   :  { %7744 = vmatpush3.msra.mxu0 %v2625_v49 }
 0xd92   :  { %7745 = vmatprep.subr.mxu0 %v2624_v50 }
 0xd93   :  { %2449 = vrot.lane.b32.xlu1 %v9168_v23, %s7979_s14  ;;  %7746 = vmatpush3.msra.mxu0 %v2624_v50 }
 0xd94   :  { %2403 = vrot.lane.b32.xlu0 %v2392_v12, %s7971_s30  ;;  %7747 = vmatprep.subr.mxu0 %v2623_v56 }
 0xd95   :  { %7748 = vmatpush3.msra.mxu0 %v2623_v56 }
 0xd96   :  { %7749 = vmatprep.subr.mxu0 %v2622_v33 }
 0xd97   :  { %2425 = vrot.lane.b32.xlu1 %v9168_v23, %s7970_s21  ;;  %7750 = vmatpush3.msra.mxu0 %v2622_v33 }
 0xd98   :  { %2571 = vrot.lane.b32.xlu0 %v2560_v28, %s7980_s15  ;;  %7751 = vmatprep.subr.mxu0 %v2621_v58 }
 0xd99   :  { %7752 = vmatpush3.msra.mxu0 %v2621_v58 }
 0xd9a   :  { %7753 = vmatprep.subr.mxu0 %v2620_v8 }
 0xd9b   :  { %2401 = vrot.lane.b32.xlu1 %v9168_v23, %s7971_s30  ;;  %7754 = vmatpush3.msra.mxu0 %v2620_v8 }
 0xd9c   :  { %7755 = vmatprep.subr.mxu0 %v2619_v37 }
 0xd9d   :  { %7756 = vmatpush3.msra.mxu0 %v2619_v37 }
 0xd9e   :  { %3220 = vmatprep.subr.mxu0 %v9145_v19 }
 0xd9f   :  { %2569 = vrot.lane.b32.xlu1 %v9168_v23, %s7980_s15 }
 0xdf1   :  { %v2548_v18 = vpop.permute.xlu1 %2547 }
 0xdf2   :  { %v2524_v6 = vpop.permute.xlu0 %2523  ;;  %2556 = vst.msk [vmem:[#allocation2 + $0x318] sm:$0x3] %vm1227_vm12, %v2548_v18 }
 0xdf3   :  { %2532 = vst.msk [vmem:[#allocation2 + $0x2e8] sm:$0x3] %vm1227_vm12, %v2524_v6 }
 0xdf5   :  { %v2546_v9 = vpop.permute.xlu1 %2545 }
 0xdf6   :  { %v2500_v7 = vpop.permute.xlu0 %2499  ;;  %2555 = vst.msk [vmem:[#allocation2 + $0x300] sm:$0xff] %vm1223_vm13, %v2546_v9 }
 0xdf7   :  { %2508 = vst.msk [vmem:[#allocation2 + $0x2b8] sm:$0x3] %vm1227_vm12, %v2500_v7 }
 0xdf9   :  { %v2522_v16 = vpop.permute.xlu1 %2521  ;;  %v2614_v24 = vld [vmem:[#allocation2 + $0x318] sm:$0xff] }
 0xdfa   :  { %v2476_v20 = vpop.permute.xlu0 %2475  ;;  %2531 = vst.msk [vmem:[#allocation2 + $0x2d0] sm:$0xff] %vm1223_vm13, %v2522_v16  ;;  %v2612_v30 = vld [vmem:[#allocation2 + $0x2e8] sm:$0xff] }
 0xdfb   :  { %2484 = vst.msk [vmem:[#allocation2 + $0x288] sm:$0x3] %vm1227_vm12, %v2476_v20 }
 0xdfd   :  { %v2498_v11 = vpop.permute.xlu1 %2497  ;;  %v2613_v25 = vld [vmem:[#allocation2 + $0x300] sm:$0xff] }
 0xdfe   :  { %v2452_v22 = vpop.permute.xlu0 %2451  ;;  %2507 = vst.msk [vmem:[#allocation2 + $0x2a0] sm:$0xff] %vm1223_vm13, %v2498_v11  ;;  %v2610_v46 = vld [vmem:[#allocation2 + $0x2b8] sm:$0xff] }
 0xdff   :  { %2460 = vst.msk [vmem:[#allocation2 + $0x258] sm:$0x3] %vm1227_vm12, %v2452_v22 }
 0xe01   :  { %v2474_v44 = vpop.permute.xlu1 %2473  ;;  %v2611_v32 = vld [vmem:[#allocation2 + $0x2d0] sm:$0xff] }
 0xe02   :  { %v2428_v43 = vpop.permute.xlu0 %2427  ;;  %2483 = vst.msk [vmem:[#allocation2 + $0x270] sm:$0xff] %vm1223_vm13, %v2474_v44 }
 0xe03   :  { %2436 = vst.msk [vmem:[#allocation2 + $0x228] sm:$0x3] %vm1227_vm12, %v2428_v43 }
 0xe05   :  { %v2450_v52 = vpop.permute.xlu1 %2449  ;;  %v2609_v34 = vld [vmem:[#allocation2 + $0x2a0] sm:$0xff] }
 0xe06   :  { %v2404_v47 = vpop.permute.xlu0 %2403  ;;  %2459 = vst.msk [vmem:[#allocation2 + $0x240] sm:$0xff] %vm1223_vm13, %v2450_v52  ;;  %v2606_v23 = vld [vmem:[#allocation2 + $0x258] sm:$0xff] }
 0xe07   :  { %2412 = vst.msk [vmem:[#allocation2 + $0x1f8] sm:$0x3] %vm1227_vm12, %v2404_v47 }
 0xe09   :  { %v2426_v60 = vpop.permute.xlu1 %2425  ;;  %v2607_v35 = vld [vmem:[#allocation2 + $0x270] sm:$0xff] }
 0xe0a   :  { %v2572_v55 = vpop.permute.xlu0 %2571  ;;  %2435 = vst.msk [vmem:[#allocation2 + $0x210] sm:$0xff] %vm1223_vm13, %v2426_v60  ;;  %v2604_v38 = vld [vmem:[#allocation2 + $0x228] sm:$0xff] }
 0xe0b   :  { %2580 = vst.msk [vmem:[#allocation2 + $0x348] sm:$0x3] %vm1227_vm12, %v2572_v55  ;;  %vm4344_vm12 = vcmask 171048  }
 0xe0d   :  { %v2402_v61 = vpop.permute.xlu1 %2401  ;;  %v2605_v36 = vld [vmem:[#allocation2 + $0x240] sm:$0xff] }
 0xe0e   :  { %2411 = vst.msk [vmem:[#allocation2 + $0x1e0] sm:$0xff] %vm1223_vm13, %v2402_v61  ;;  %v2602_v42 = vld [vmem:[#allocation2 + $0x1f8] sm:$0xff] }
 0xe11   :  { %v2570_v1 = vpop.permute.xlu1 %2569  ;;  %v2603_v40 = vld [vmem:[#allocation2 + $0x210] sm:$0xff] }
 0xe12   :  { %2579 = vst.msk [vmem:[#allocation2 + $0x330] sm:$0xff] %vm1223_vm13, %v2570_v1  ;;  %v2616_v54 = vld [vmem:[#allocation2 + $0x348] sm:$0xff] }
 0xe15   :  { %v2601_v45 = vld [vmem:[#allocation2 + $0x1e0] sm:$0xff] }
 0xe19   :  { %v2615_v57 = vld [vmem:[#allocation2 + $0x330] sm:$0xff] }
 0xe42   :  { %v2714_v5 = vpop.f32.mrf.mxu0 }
 0xe43   :  { %v2715_v10 = vadd.f32 %v2714_v5, %v9269_v3 }
 0xe44   :  { %v2716_v13 = vpop.f32.mrf.mxu0 }
 0xe45   :  { %7728 = vmatprep.mubr.msk.f32.mxu1 %vm1223_vm13, %v2715_v10 }
 0xe46   :  { %v2719_v15 = vpop.f32.mrf.mxu0 }
 0xe47   :  { %v2720_v17 = vadd.f32 %v2719_v15, %v9267_v29 }
 0xe48   :  { %v2721_v21 = vpop.f32.mrf.mxu0 }
 0xe49   :  { %7729 = vmatmul.mubr.msk.f32.vlgmr.msra.gmra.mxu1 %vm1223_vm13, %v2720_v17 }
 0xe4a   :  { %2808 = vmatpush1.msra.mxu1 %v2614_v24  ;;  %7381 = vmatprep.mubr.msk.f32.mxu1 %vm1564_vm2, %v9129_v59  ;;  %v2608_v59 = vld [vmem:[#allocation2 + $0x288] sm:$0xff] }
 0xe4b   :  { %2809 = vmatprep.subr.mxu1 %v9145_v19 }
 0xe4c   :  { %2810 = vmatpush1.msra.mxu1 %v2613_v25 }
 0xe4d   :  { %2811 = vmatprep.subr.mxu1 %v9145_v19 }
 0xe4e   :  { %2812 = vmatpush1.msra.mxu1 %v2612_v30 }
 0xe4f   :  { %2813 = vmatprep.subr.mxu1 %v9145_v19 }
 0xe50   :  { %2814 = vmatpush1.msra.mxu1 %v2611_v32 }
 0xe51   :  { %2815 = vmatprep.subr.mxu1 %v9145_v19 }
 0xe52   :  { %2816 = vmatpush1.msra.mxu1 %v2610_v46 }
 0xe53   :  { %2817 = vmatprep.subr.mxu1 %v9145_v19 }
 0xe54   :  { %2818 = vmatpush1.msra.mxu1 %v2609_v34 }
 0xe55   :  { %2819 = vmatprep.subr.mxu1 %v9145_v19 }
 0xe56   :  { %2820 = vmatpush1.msra.mxu1 %v2608_v59 }
 0xe57   :  { %2821 = vmatprep.subr.mxu1 %v9145_v19 }
 0xe58   :  { %2822 = vmatpush1.msra.mxu1 %v2607_v35 }
 0xe59   :  { %2823 = vmatprep.subr.mxu1 %v9145_v19 }
 0xe5a   :  { %2824 = vmatpush1.msra.mxu1 %v2606_v23 }
 0xe5b   :  { %2825 = vmatprep.subr.mxu1 %v9145_v19 }
 0xe5c   :  { %2826 = vmatpush1.msra.mxu1 %v2605_v36 }
 0xe5d   :  { %2827 = vmatprep.subr.mxu1 %v9145_v19 }
 0xe5e   :  { %2828 = vmatpush1.msra.mxu1 %v2604_v38 }
 0xe5f   :  { %2829 = vmatprep.subr.mxu1 %v9145_v19 }
 0xe60   :  { %2830 = vmatpush1.msra.mxu1 %v2603_v40 }
 0xe61   :  { %2831 = vmatprep.subr.mxu1 %v9145_v19 }
 0xe62   :  { %2832 = vmatpush1.msra.mxu1 %v2602_v42 }
 0xe63   :  { %2833 = vmatprep.subr.mxu1 %v9145_v19 }
 0xe64   :  { %2834 = vmatpush1.msra.mxu1 %v2601_v45 }
 0xe65   :  { %2835 = vmatprep.subr.mxu1 %v9145_v19 }
 0xe66   :  { %2836 = vmatpush1.msra.mxu1 %v2600_v48 }
 0xe67   :  { %2837 = vmatprep.subr.mxu1 %v9145_v19 }
 0xe68   :  { %2838 = vmatpush1.msra.mxu1 %v2599_v53 }
 0xe69   :  { %2867 = vmatprep.subr.mxu1 %v9145_v19 }
 0xe6a   :  { %2868 = vmatpush2.msra.mxu1 %v2616_v54 }
 0xe6b   :  { %2869 = vmatprep.subr.mxu1 %v9145_v19 }
 0xe6c   :  { %2870 = vmatpush2.msra.mxu1 %v2615_v57 }
 0xe6d   :  { %2872 = vmatmul.mubr.f32.vlgmr.msra.gmra.mxu1 %v9182_v51  ;;  %3313 = vmatprep.subr.mxu1 %v9145_v19 }
 0xe6e   :  { %7382 = vmatprep.mubr.msk.f32.mxu1 %vm1564_vm2, %v9188_v0 }
 0xe71   :  { %2877 = vmatmul.mubr.f32.gmra.mxu1 %v9200_v62 }
 0xf09   :  { %v9319_v63 = vpop.f32.mrf.mxu1 }
 0xf0a   :  { %2967 = vrot.lane.b32.xlu0 %v9319_v63, %s7986_s9 }
 0xf0b   :  { %v9323_v51 = vpop.f32.mrf.mxu1 }
 0xf0e   :  { %2965 = vrot.lane.b32.xlu0 %v9323_v51, %s7986_s9 }
 0xf2d   :  { %v2873_v0 = vpop.f32.mrf.mxu1 }
 0xf2e   :  { %v2874_v62 = vadd.f32 %v2873_v0, %v9269_v3 }
 0xf2f   :  { %v2875_v4 = vpop.f32.mrf.mxu1 }
 0xf30   :  { %7757 = vmatprep.mubr.msk.f32.mxu0 %vm1223_vm13, %v2874_v62 }
 0xf31   :  { %v2878_v31 = vpop.f32.mrf.mxu1 }
 0xf32   :  { %v2879_v12 = vadd.f32 %v2878_v31, %v9267_v29 }
 0xf33   :  { %v2880_v14 = vpop.f32.mrf.mxu1 }
 0xf34   :  { %7758 = vmatmul.mubr.msk.f32.vlgmr.msra.gmra.mxu0 %vm1223_vm13, %v2879_v12  ;;  %v2987_v12 = vld [vmem:[%s10719_s1 + $0xa8] sm:$0xff]  ;;  %v9414_v14 = vld [vmem:[%s10719_s1 + $0xa0] sm:$0xff]  ;;  %vm4372_vm13 = vcmask 123904  }
 0xf35   :  { %7386 = vmatprep.mubr.msk.f32.mxu0 %vm1564_vm2, %v2987_v12  ;;  %7388 = vmatprep.mubr.msk.f32.mxu1 %vm1564_vm2, %v2987_v12 }
 0xf7c   :  { %v2968_v2 = vpop.permute.xlu0 %2967 }
 0xf7d   :  { %2974 = vst.msk [vmem:[#allocation4 + $0x8] sm:$0x3] %vm2973_vm5, %v2968_v2  ;;  %v9423_v2 = vld [vmem:[%s10719_s1 + $0xb8] sm:$0x3] }
 0xf80   :  { %v2966_v26 = vpop.permute.xlu0 %2965 }
 0xf81   :  { %2972 = vst.msk [vmem:[#allocation4] sm:$0xff] %vm2971_vm6, %v2966_v26  ;;  %v9428_v26 = vld [vmem:[%s10719_s1 + $0xb0] sm:$0x3] }
 0xf84   :  { %v2995_v28 = vld [vmem:[#allocation4 + $0x8] sm:$0x3] }
 0xf85   :  { %v3149_v27 = vld [vmem:[#allocation4 + $0x8] sm:$0x3]  ;;  %3001 = vst.msk [vmem:[#allocation2 + $0x18] sm:$0x3] %vm3000_vm7, %v2995_v28 }
 0xf86   :  { %3158 = vrot.lane.b32.xlu0 %v3149_v27, %s7987_s12  ;;  %v3125_v41 = vld [vmem:[#allocation4 + $0x8] sm:$0x3] }
 0xf87   :  { %v3101_v49 = vld [vmem:[#allocation4 + $0x8] sm:$0x3] }
 0xf88   :  { %v2994_v39 = vld [vmem:[#allocation4] sm:$0xff]  ;;  %v3077_v50 = vld [vmem:[#allocation4 + $0x8] sm:$0x3] }
 0xf89   :  { %2999 = vst.msk [vmem:[#allocation2] sm:$0xff] %vm2998_vm8, %v2994_v39  ;;  %v3053_v56 = vld [vmem:[#allocation4 + $0x8] sm:$0x3] }
 0xf8a   :  { %3156 = vrot.lane.b32.xlu0 %v2994_v39, %s7987_s12  ;;  %v3029_v33 = vld [vmem:[#allocation4 + $0x8] sm:$0x3] }
 0xf8b   :  { %v3005_v58 = vld [vmem:[#allocation4 + $0x8] sm:$0x3] }
 0xf8c   :  { %v3173_v8 = vld [vmem:[#allocation4 + $0x8] sm:$0x3]  ;;  %v3197_v35 = vld [vmem:[#allocation2 + $0x18] sm:$0xff] }
 0xf8e   :  { %3134 = vrot.lane.b32.xlu0 %v3125_v41, %s7977_s19 }
 0xf90   :  { %v3196_v23 = vld [vmem:[#allocation2] sm:$0xff] }
 0xf92   :  { %3132 = vrot.lane.b32.xlu0 %v2994_v39, %s7977_s19 }
 0xf96   :  { %3110 = vrot.lane.b32.xlu0 %v3101_v49, %s7988_s13 }
 0xf9a   :  { %3108 = vrot.lane.b32.xlu0 %v2994_v39, %s7988_s13 }
 0xf9e   :  { %3086 = vrot.lane.b32.xlu0 %v3077_v50, %s7989_s16 }
 0xfa2   :  { %3084 = vrot.lane.b32.xlu0 %v2994_v39, %s7989_s16 }
 0xfa6   :  { %3062 = vrot.lane.b32.xlu0 %v3053_v56, %s7990_s17 }
 0xfaa   :  { %3060 = vrot.lane.b32.xlu0 %v2994_v39, %s7990_s17 }
 0xfae   :  { %3038 = vrot.lane.b32.xlu0 %v3029_v33, %s7970_s21 }
 0xfb2   :  { %3036 = vrot.lane.b32.xlu0 %v2994_v39, %s7970_s21 }
 0xfb6   :  { %3014 = vrot.lane.b32.xlu0 %v3005_v58, %s7971_s30 }
 0xfba   :  { %3012 = vrot.lane.b32.xlu0 %v2994_v39, %s7971_s30 }
 0xfbe   :  { %3182 = vrot.lane.b32.xlu0 %v3173_v8, %s7991_s27 }
 0xfc2   :  { %3180 = vrot.lane.b32.xlu0 %v2994_v39, %s7991_s27 }
 0xff4   :  { %v9351_v37 = vpop.f32.mrf.mxu0 }
 0xff5   :  { %2979 = vrot.lane.b32.xlu1 %v9351_v37, %s7986_s9 }
 0xff6   :  { %v9355_v3 = vpop.f32.mrf.mxu0 }
 0xff8   :  { %v3159_v29 = vpop.permute.xlu0 %3158 }
 0xff9   :  { %3169 = vst.msk [vmem:[#allocation2 + $0x168] sm:$0x3] %vm3000_vm7, %v3159_v29  ;;  %2977 = vrot.lane.b32.xlu1 %v9355_v3, %s7986_s9 }
 0xffc   :  { %v3157_v18 = vpop.permute.xlu0 %3156 }
 0xffd   :  { %3168 = vst.msk [vmem:[#allocation2 + $0x150] sm:$0xff] %vm2998_vm8, %v3157_v18 }
0x1000   :  { %v3135_v6 = vpop.permute.xlu0 %3134  ;;  %v3211_v7 = vld [vmem:[#allocation2 + $0x168] sm:$0xff] }
0x1001   :  { %3145 = vst.msk [vmem:[#allocation2 + $0x138] sm:$0x3] %vm3000_vm7, %v3135_v6  ;;  %3221 = vmatpush1.msra.mxu0 %v3211_v7 }
0x1002   :  { %3222 = vmatprep.subr.mxu0 %v9145_v19 }
0x1004   :  { %v3133_v9 = vpop.permute.xlu0 %3132  ;;  %v3210_v20 = vld [vmem:[#allocation2 + $0x150] sm:$0xff] }
0x1005   :  { %3144 = vst.msk [vmem:[#allocation2 + $0x120] sm:$0xff] %vm2998_vm8, %v3133_v9  ;;  %3223 = vmatpush1.msra.mxu0 %v3210_v20 }
0x1006   :  { %3224 = vmatprep.subr.mxu0 %v9145_v19 }
0x1008   :  { %v3111_v16 = vpop.permute.xlu0 %3110  ;;  %v3209_v22 = vld [vmem:[#allocation2 + $0x138] sm:$0xff] }
0x1009   :  { %3121 = vst.msk [vmem:[#allocation2 + $0x108] sm:$0x3] %vm3000_vm7, %v3111_v16  ;;  %3225 = vmatpush1.msra.mxu0 %v3209_v22 }
0x100a   :  { %3226 = vmatprep.subr.mxu0 %v9145_v19 }
0x100c   :  { %v3109_v11 = vpop.permute.xlu0 %3108  ;;  %v3208_v43 = vld [vmem:[#allocation2 + $0x120] sm:$0xff] }
0x100d   :  { %3120 = vst.msk [vmem:[#allocation2 + $0xf0] sm:$0xff] %vm2998_vm8, %v3109_v11  ;;  %3227 = vmatpush1.msra.mxu0 %v3208_v43 }
0x100e   :  { %3228 = vmatprep.subr.mxu0 %v9145_v19 }
0x1010   :  { %v3087_v44 = vpop.permute.xlu0 %3086  ;;  %v3207_v47 = vld [vmem:[#allocation2 + $0x108] sm:$0xff] }
0x1011   :  { %3097 = vst.msk [vmem:[#allocation2 + $0xd8] sm:$0x3] %vm3000_vm7, %v3087_v44  ;;  %3229 = vmatpush1.msra.mxu0 %v3207_v47 }
0x1012   :  { %3230 = vmatprep.subr.mxu0 %v9145_v19 }
0x1014   :  { %v3085_v52 = vpop.permute.xlu0 %3084  ;;  %v3206_v55 = vld [vmem:[#allocation2 + $0xf0] sm:$0xff] }
0x1015   :  { %3096 = vst.msk [vmem:[#allocation2 + $0xc0] sm:$0xff] %vm2998_vm8, %v3085_v52  ;;  %3231 = vmatpush1.msra.mxu0 %v3206_v55  ;;  %v9457_v52 = vld [vmem:[#allocation2 + $0xe0] sm:$0xff] }
0x1016   :  { %3232 = vmatprep.subr.mxu0 %v9145_v19 }
0x1018   :  { %v3063_v60 = vpop.permute.xlu0 %3062  ;;  %v3205_v61 = vld [vmem:[#allocation2 + $0xd8] sm:$0xff] }
0x1019   :  { %3073 = vst.msk [vmem:[#allocation2 + $0xa8] sm:$0x3] %vm3000_vm7, %v3063_v60  ;;  %3233 = vmatpush1.msra.mxu0 %v3205_v61 }
0x101a   :  { %3234 = vmatprep.subr.mxu0 %v9145_v19 }
0x101c   :  { %v3061_v1 = vpop.permute.xlu0 %3060  ;;  %v3204_v5 = vld [vmem:[#allocation2 + $0xc0] sm:$0xff] }
0x101d   :  { %3072 = vst.msk [vmem:[#allocation2 + $0x90] sm:$0xff] %vm2998_vm8, %v3061_v1  ;;  %3235 = vmatpush1.msra.mxu0 %v3204_v5 }
0x101e   :  { %3236 = vmatprep.subr.mxu0 %v9145_v19 }
0x1020   :  { %v3039_v10 = vpop.permute.xlu0 %3038  ;;  %v3203_v13 = vld [vmem:[#allocation2 + $0xa8] sm:$0xff] }
0x1021   :  { %3049 = vst.msk [vmem:[#allocation2 + $0x78] sm:$0x3] %vm3000_vm7, %v3039_v10  ;;  %3237 = vmatpush1.msra.mxu0 %v3203_v13 }
0x1022   :  { %3238 = vmatprep.subr.mxu0 %v9145_v19 }
0x1024   :  { %v3037_v15 = vpop.permute.xlu0 %3036  ;;  %v3202_v17 = vld [vmem:[#allocation2 + $0x90] sm:$0xff] }
0x1025   :  { %3048 = vst.msk [vmem:[#allocation2 + $0x60] sm:$0xff] %vm2998_vm8, %v3037_v15  ;;  %3239 = vmatpush1.msra.mxu0 %v3202_v17 }
0x1026   :  { %3240 = vmatprep.subr.mxu0 %v9145_v19 }
0x1028   :  { %v3015_v21 = vpop.permute.xlu0 %3014  ;;  %v3201_v24 = vld [vmem:[#allocation2 + $0x78] sm:$0xff] }
0x1029   :  { %3025 = vst.msk [vmem:[#allocation2 + $0x48] sm:$0x3] %vm3000_vm7, %v3015_v21  ;;  %3241 = vmatpush1.msra.mxu0 %v3201_v24 }
0x102a   :  { %3242 = vmatprep.subr.mxu0 %v9145_v19 }
0x102c   :  { %v3013_v25 = vpop.permute.xlu0 %3012  ;;  %v3200_v30 = vld [vmem:[#allocation2 + $0x60] sm:$0xff] }
0x102d   :  { %3024 = vst.msk [vmem:[#allocation2 + $0x30] sm:$0xff] %vm2998_vm8, %v3013_v25  ;;  %3243 = vmatpush1.msra.mxu0 %v3200_v30 }
0x102e   :  { %3244 = vmatprep.subr.mxu0 %v9145_v19 }
0x1030   :  { %v3183_v32 = vpop.permute.xlu0 %3182  ;;  %v3199_v46 = vld [vmem:[#allocation2 + $0x48] sm:$0xff] }
0x1031   :  { %3193 = vst.msk [vmem:[#allocation2 + $0x198] sm:$0x3] %vm3000_vm7, %v3183_v32  ;;  %3245 = vmatpush1.msra.mxu0 %v3199_v46  ;;  %v9480_v32 = vld [vmem:[%s10721_s3 + $0x1f9] ss:$0 sm:$0xff] }
0x1032   :  { %3246 = vmatprep.subr.mxu0 %v9145_v19 }
0x1034   :  { %v3181_v34 = vpop.permute.xlu0 %3180  ;;  %v3198_v59 = vld [vmem:[#allocation2 + $0x30] sm:$0xff] }
0x1035   :  { %3192 = vst.msk [vmem:[#allocation2 + $0x180] sm:$0xff] %vm2998_vm8, %v3181_v34  ;;  %3247 = vmatpush1.msra.mxu0 %v3198_v59 }
0x1036   :  { %3248 = vmatprep.subr.mxu0 %v9145_v19 }
0x1037   :  { %3249 = vmatpush1.msra.mxu0 %v3197_v35 }
0x1038   :  { %3250 = vmatprep.subr.mxu0 %v9145_v19  ;;  %v3213_v36 = vld [vmem:[#allocation2 + $0x198] sm:$0xff] }
0x1039   :  { %3251 = vmatpush1.msra.mxu0 %v3196_v23 }
0x103a   :  { %3280 = vmatprep.subr.mxu0 %v9145_v19 }
0x103b   :  { %3281 = vmatpush2.msra.mxu0 %v3213_v36 }
0x103c   :  { %3282 = vmatprep.subr.mxu0 %v9145_v19  ;;  %v3212_v38 = vld [vmem:[#allocation2 + $0x180] sm:$0xff] }
0x103d   :  { %3283 = vmatpush2.msra.mxu0 %v3212_v38 }
0x103e   :  { %3733 = vmatprep.subr.mxu0 %v9145_v19  ;;  %3285 = vmatmul.mubr.f32.vlgmr.msra.gmra.mxu0 %v9414_v14 }
0x103f   :  { %7387 = vmatprep.mubr.msk.f32.mxu0 %vm1564_vm2, %v9423_v2 }
0x1042   :  { %3290 = vmatmul.mubr.f32.gmra.mxu0 %v9428_v26 }
0x1067   :  { %v2980_v40 = vpop.permute.xlu1 %2979 }
0x1068   :  { %2985 = vst.msk [vmem:[#allocation4 + $0x18] sm:$0x3] %vm2973_vm5, %v2980_v40 }
0x106b   :  { %v2978_v42 = vpop.permute.xlu1 %2977 }
0x106c   :  { %2984 = vst.msk [vmem:[#allocation4 + $0x10] sm:$0xff] %vm2971_vm6, %v2978_v42 }
0x106f   :  { %v2997_v45 = vld [vmem:[#allocation4 + $0x18] sm:$0x3] }
0x1070   :  { %v3151_v48 = vld [vmem:[#allocation4 + $0x18] sm:$0x3]  ;;  %3003 = vst.msk [vmem:[#allocation2 + $0x1c8] sm:$0x3] %vm3000_vm7, %v2997_v45 }
0x1071   :  { %3162 = vrot.lane.b32.xlu1 %v3151_v48, %s7987_s12  ;;  %v3127_v54 = vld [vmem:[#allocation4 + $0x18] sm:$0x3] }
0x1072   :  { %v3103_v57 = vld [vmem:[#allocation4 + $0x18] sm:$0x3] }
0x1073   :  { %v2996_v53 = vld [vmem:[#allocation4 + $0x10] sm:$0xff]  ;;  %v3079_v0 = vld [vmem:[#allocation4 + $0x18] sm:$0x3] }
0x1074   :  { %3002 = vst.msk [vmem:[#allocation2 + $0x1b0] sm:$0xff] %vm2998_vm8, %v2996_v53  ;;  %v3055_v62 = vld [vmem:[#allocation4 + $0x18] sm:$0x3] }
0x1075   :  { %3138 = vrot.lane.b32.xlu1 %v3127_v54, %s7977_s19  ;;  %v3031_v4 = vld [vmem:[#allocation4 + $0x18] sm:$0x3] }
0x1076   :  { %v3007_v31 = vld [vmem:[#allocation4 + $0x18] sm:$0x3] }
0x1077   :  { %v3175_v28 = vld [vmem:[#allocation4 + $0x18] sm:$0x3]  ;;  %v3296_v17 = vld [vmem:[#allocation2 + $0x1c8] sm:$0xff] }
0x1079   :  { %3114 = vrot.lane.b32.xlu1 %v3103_v57, %s7988_s13 }
0x107b   :  { %v3295_v21 = vld [vmem:[#allocation2 + $0x1b0] sm:$0xff] }
0x107d   :  { %3090 = vrot.lane.b32.xlu1 %v3079_v0, %s7989_s16 }
0x1081   :  { %3066 = vrot.lane.b32.xlu1 %v3055_v62, %s7990_s17 }
0x1085   :  { %3042 = vrot.lane.b32.xlu1 %v3031_v4, %s7970_s21 }
0x1089   :  { %3018 = vrot.lane.b32.xlu1 %v3007_v31, %s7971_s30 }
0x108d   :  { %3160 = vrot.lane.b32.xlu1 %v2996_v53, %s7987_s12 }
0x1091   :  { %3136 = vrot.lane.b32.xlu1 %v2996_v53, %s7977_s19 }
0x1095   :  { %3112 = vrot.lane.b32.xlu1 %v2996_v53, %s7988_s13 }
0x1099   :  { %3088 = vrot.lane.b32.xlu1 %v2996_v53, %s7989_s16 }
0x109d   :  { %3064 = vrot.lane.b32.xlu1 %v2996_v53, %s7990_s17 }
0x10a1   :  { %3040 = vrot.lane.b32.xlu1 %v2996_v53, %s7970_s21 }
0x10a5   :  { %3016 = vrot.lane.b32.xlu1 %v2996_v53, %s7971_s30 }
0x10a9   :  { %3186 = vrot.lane.b32.xlu1 %v3175_v28, %s7991_s27 }
0x10ad   :  { %3184 = vrot.lane.b32.xlu1 %v2996_v53, %s7991_s27 }
0x10e3   :  { %v3163_v27 = vpop.permute.xlu1 %3162 }
0x10e4   :  { %3171 = vst.msk [vmem:[#allocation2 + $0x318] sm:$0x3] %vm3000_vm7, %v3163_v27 }
0x10e7   :  { %v3139_v39 = vpop.permute.xlu1 %3138 }
0x10e8   :  { %3147 = vst.msk [vmem:[#allocation2 + $0x2e8] sm:$0x3] %vm3000_vm7, %v3139_v39 }
0x10eb   :  { %v3115_v41 = vpop.permute.xlu1 %3114  ;;  %v3310_v49 = vld [vmem:[#allocation2 + $0x318] sm:$0xff] }
0x10ec   :  { %3123 = vst.msk [vmem:[#allocation2 + $0x2b8] sm:$0x3] %vm3000_vm7, %v3115_v41  ;;  %3314 = vmatpush1.msra.mxu1 %v3310_v49 }
0x10ed   :  { %3315 = vmatprep.subr.mxu1 %v9145_v19 }
0x10ef   :  { %v3091_v50 = vpop.permute.xlu1 %3090  ;;  %v3308_v7 = vld [vmem:[#allocation2 + $0x2e8] sm:$0xff] }
0x10f0   :  { %3099 = vst.msk [vmem:[#allocation2 + $0x288] sm:$0x3] %vm3000_vm7, %v3091_v50 }
0x10f3   :  { %v3067_v56 = vpop.permute.xlu1 %3066  ;;  %v3306_v16 = vld [vmem:[#allocation2 + $0x2b8] sm:$0xff] }
0x10f4   :  { %3075 = vst.msk [vmem:[#allocation2 + $0x258] sm:$0x3] %vm3000_vm7, %v3067_v56 }
0x10f7   :  { %v3043_v33 = vpop.permute.xlu1 %3042  ;;  %v3304_v43 = vld [vmem:[#allocation2 + $0x288] sm:$0xff] }
0x10f8   :  { %3051 = vst.msk [vmem:[#allocation2 + $0x228] sm:$0x3] %vm3000_vm7, %v3043_v33 }
0x10fb   :  { %v3019_v58 = vpop.permute.xlu1 %3018  ;;  %v3302_v55 = vld [vmem:[#allocation2 + $0x258] sm:$0xff] }
0x10fc   :  { %3027 = vst.msk [vmem:[#allocation2 + $0x1f8] sm:$0x3] %vm3000_vm7, %v3019_v58 }
0x10fe   :  { %v3286_v30 = vpop.f32.mrf.mxu0 }
0x10ff   :  { %v3161_v8 = vpop.permute.xlu1 %3160  ;;  %v3395_v36 = vmul.f32 %v9480_v32, %v3286_v30 }
0x1100   :  { %3170 = vst.msk [vmem:[#allocation2 + $0x300] sm:$0xff] %vm2998_vm8, %v3161_v8  ;;  %v3288_v46 = vpop.f32.mrf.mxu0 }
0x1101   :  { %v3397_v38 = vsel %vm2998_vm8, %v3395_v36, 0.0 }
0x1102   :  { %v3291_v34 = vpop.f32.mrf.mxu0 }
0x1103   :  { %v3137_v29 = vpop.permute.xlu1 %3136  ;;  %v3298_v10 = vld [vmem:[#allocation2 + $0x1f8] sm:$0xff]  ;;  %v3396_v59 = vmul.f32 %v9480_v32, %v3291_v34 }
0x1104   :  { %3146 = vst.msk [vmem:[#allocation2 + $0x2d0] sm:$0xff] %vm2998_vm8, %v3137_v29  ;;  %v3293_v35 = vpop.f32.mrf.mxu0 }
0x1105   :  { %v3400_v23 = vsel %vm3000_vm7, %v3396_v59, 0.0 }
0x1106   :  { %3401 = vadd.xlane.f32.xlu0 %v3400_v23 }
0x1107   :  { %v3113_v18 = vpop.permute.xlu1 %3112  ;;  %v3309_v6 = vld [vmem:[#allocation2 + $0x300] sm:$0xff] }
0x1108   :  { %3122 = vst.msk [vmem:[#allocation2 + $0x2a0] sm:$0xff] %vm2998_vm8, %v3113_v18  ;;  %3316 = vmatpush1.msra.mxu1 %v3309_v6 }
0x1109   :  { %3317 = vmatprep.subr.mxu1 %v9145_v19 }
0x110a   :  { %3318 = vmatpush1.msra.mxu1 %v3308_v7  ;;  %3398 = vadd.xlane.f32.xlu0 %v3397_v38 }
0x110b   :  { %3319 = vmatprep.subr.mxu1 %v9145_v19  ;;  %v3089_v9 = vpop.permute.xlu1 %3088  ;;  %v3307_v20 = vld [vmem:[#allocation2 + $0x2d0] sm:$0xff] }
0x110c   :  { %3098 = vst.msk [vmem:[#allocation2 + $0x270] sm:$0xff] %vm2998_vm8, %v3089_v9  ;;  %3320 = vmatpush1.msra.mxu1 %v3307_v20 }
0x110d   :  { %3321 = vmatprep.subr.mxu1 %v9145_v19 }
0x110e   :  { %3322 = vmatpush1.msra.mxu1 %v3306_v16 }
0x110f   :  { %3323 = vmatprep.subr.mxu1 %v9145_v19  ;;  %v3065_v22 = vpop.permute.xlu1 %3064  ;;  %v3305_v11 = vld [vmem:[#allocation2 + $0x2a0] sm:$0xff] }
0x1110   :  { %3074 = vst.msk [vmem:[#allocation2 + $0x240] sm:$0xff] %vm2998_vm8, %v3065_v22  ;;  %3324 = vmatpush1.msra.mxu1 %v3305_v11  ;;  %v3389_v22 = vld [vmem:[%s10720_s2 + $0x8] sm:$0x3]  ;;  %v7992_v11 = vmov 15  }
0x1111   :  { %3325 = vmatprep.subr.mxu1 %v9145_v19  ;;  %7877 = vset.pattern.permute.xlu1 %v7992_v11 }
0x1112   :  { %3326 = vmatpush1.msra.mxu1 %v3304_v43  ;;  %v7993_v43 = vmov 7  }
0x1113   :  { %3327 = vmatprep.subr.mxu1 %v9145_v19  ;;  %v3041_v44 = vpop.permute.xlu1 %3040  ;;  %v3303_v47 = vld [vmem:[#allocation2 + $0x270] sm:$0xff]  ;;  %v3300_v19 = vld [vmem:[#allocation2 + $0x228] sm:$0xff]  ;;  %7876 = vset.pattern.permute.xlu0 %v7993_v43 }
0x1114   :  { %3050 = vst.msk [vmem:[#allocation2 + $0x210] sm:$0xff] %vm2998_vm8, %v3041_v44  ;;  %3328 = vmatpush1.msra.mxu1 %v3303_v47 }
0x1115   :  { %3329 = vmatprep.subr.mxu1 %v9457_v52 }
0x1116   :  { %3330 = vmatpush1.msra.mxu1 %v3302_v55 }
0x1117   :  { %3331 = vmatprep.subr.mxu1 %v9457_v52  ;;  %v3017_v60 = vpop.permute.xlu1 %3016  ;;  %v3301_v61 = vld [vmem:[#allocation2 + $0x240] sm:$0xff] }
0x1118   :  { %3026 = vst.msk [vmem:[#allocation2 + $0x1e0] sm:$0xff] %vm2998_vm8, %v3017_v60  ;;  %3332 = vmatpush1.msra.mxu1 %v3301_v61 }
0x1119   :  { %3333 = vmatprep.subr.mxu1 %v9457_v52 }
0x111a   :  { %3334 = vmatpush1.msra.mxu1 %v3300_v19 }
0x111b   :  { %3335 = vmatprep.subr.mxu1 %v9457_v52  ;;  %v3187_v1 = vpop.permute.xlu1 %3186  ;;  %v3299_v5 = vld [vmem:[#allocation2 + $0x210] sm:$0xff] }
0x111c   :  { %3195 = vst.msk [vmem:[#allocation2 + $0x348] sm:$0x3] %vm3000_vm7, %v3187_v1  ;;  %3336 = vmatpush1.msra.mxu1 %v3299_v5 }
0x111d   :  { %3337 = vmatprep.subr.mxu1 %v9457_v52 }
0x111e   :  { %3338 = vmatpush1.msra.mxu1 %v3298_v10 }
0x111f   :  { %3339 = vmatprep.subr.mxu1 %v9457_v52  ;;  %v3185_v13 = vpop.permute.xlu1 %3184  ;;  %v3297_v15 = vld [vmem:[#allocation2 + $0x1e0] sm:$0xff] }
0x1120   :  { %3194 = vst.msk [vmem:[#allocation2 + $0x330] sm:$0xff] %vm2998_vm8, %v3185_v13  ;;  %3340 = vmatpush1.msra.mxu1 %v3297_v15 }
0x1121   :  { %3341 = vmatprep.subr.mxu1 %v9457_v52 }
0x1122   :  { %3342 = vmatpush1.msra.mxu1 %v3296_v17 }
0x1123   :  { %3343 = vmatprep.subr.mxu1 %v9457_v52  ;;  %v3312_v24 = vld [vmem:[#allocation2 + $0x348] sm:$0xff] }
0x1124   :  { %3344 = vmatpush1.msra.mxu1 %v3295_v21  ;;  %v9504_v21 = vld [vmem:[%s10720_s2] sm:$0xff] }
0x1125   :  { %3373 = vmatprep.subr.mxu1 %v9457_v52 }
0x1126   :  { %3374 = vmatpush2.msra.mxu1 %v3312_v24 }
0x1127   :  { %3375 = vmatprep.subr.mxu1 %v9457_v52  ;;  %v3311_v25 = vld [vmem:[#allocation2 + $0x330] sm:$0xff] }
0x1128   :  { %3376 = vmatpush2.msra.mxu1 %v3311_v25 }
0x1129   :  { %3378 = vmatmul.mubr.f32.vlgmr.msra.gmra.mxu1 %v9414_v14  ;;  %3826 = vmatprep.subr.mxu1 %v9457_v52 }
0x112a   :  { %7389 = vmatprep.mubr.msk.f32.mxu1 %vm1564_vm2, %v9423_v2 }
0x112d   :  { %3383 = vmatmul.mubr.f32.gmra.mxu1 %v9428_v26 }
0x118f   :  { %v3402_v62 = vpop.xlane.xlu0 %3401 }
0x1193   :  { %v3399_v4 = vpop.xlane.xlu0 %3398 }
0x11e9   :  { %v3379_v40 = vpop.f32.mrf.mxu1 }
0x11ea   :  { %v3405_v42 = vmul.f32 %v9480_v32, %v3379_v40 }
0x11eb   :  { %v3381_v45 = vpop.f32.mrf.mxu1 }
0x11ec   :  { %v3407_v48 = vsel %vm2998_vm8, %v3405_v42, 0.0 }
0x11ed   :  { %v3384_v53 = vpop.f32.mrf.mxu1  ;;  %3408 = vadd.xlane.f32.xlu0 %v3407_v48 }
0x11ee   :  { %v3406_v54 = vmul.f32 %v9480_v32, %v3384_v53 }
0x11ef   :  { %v3386_v57 = vpop.f32.mrf.mxu1 }
0x11f0   :  { %v3410_v0 = vsel %vm3000_vm7, %v3406_v54, 0.0 }
0x11f1   :  { %3411 = vadd.xlane.f32.xlu1 %v3410_v0 }
0x1276   :  { %v3409_v31 = vpop.xlane.xlu0 %3408 }
0x1277   :  { %v3413_v12 = vadd.f32 %v3409_v31, %v3399_v4 }
0x1279   :  { %v3415_v14 = vmul.f32 0.03125, %v3413_v12 }
0x127a   :  { %v3412_v2 = vpop.xlane.xlu1 %3411 }
0x127b   :  { %v3414_v26 = vadd.f32 %v3412_v2, %v3402_v62  ;;  %v3417_v28 = vsub.f32 %v3286_v30, %v3415_v14  ;;  %v3421_v27 = vsub.f32 %v3379_v40, %v3415_v14 }
0x127d   :  { %v3416_v39 = vmul.f32 0.03125, %v3414_v26  ;;  %v3423_v33 = vmul.f32 %v9480_v32, %v3421_v27  ;;  %v3419_v58 = vmul.f32 %v9480_v32, %v3417_v28 }
0x127f   :  { %v3418_v41 = vsub.f32 %v3291_v34, %v3416_v39  ;;  %v3422_v49 = vsub.f32 %v3384_v53, %v3416_v39  ;;  %v3435_v7 = vmul.f32 %v3423_v33, %v3423_v33  ;;  %v3425_v9 = vmul.f32 %v3419_v58, %v3419_v58 }
0x1281   :  { %v3424_v50 = vmul.f32 %v9480_v32, %v3422_v49  ;;  %v3420_v56 = vmul.f32 %v9480_v32, %v3418_v41  ;;  %v3437_v20 = vsel %vm2998_vm8, %v3435_v7, 0.0  ;;  %v3427_v16 = vsel %vm2998_vm8, %v3425_v9, 0.0 }
0x1283   :  { %v3436_v8 = vmul.f32 %v3424_v50, %v3424_v50  ;;  %v3426_v29 = vmul.f32 %v3420_v56, %v3420_v56 }
0x1285   :  { %v3440_v18 = vsel %vm3000_vm7, %v3436_v8, 0.0  ;;  %v3430_v6 = vsel %vm3000_vm7, %v3426_v29, 0.0 }
0x1286   :  { %3441 = vadd.xlane.f32.xlu0 %v3440_v18  ;;  %3431 = vadd.xlane.f32.xlu1 %v3430_v6 }
0x128a   :  { %3438 = vadd.xlane.f32.xlu0 %v3437_v20  ;;  %3428 = vadd.xlane.f32.xlu1 %v3427_v16 }
0x129b   :  { %3472 = vperm.xlu1 %7877, %v3389_v22  }
0x129f   :  { %7878 = vset.pattern.permute.xlu1 %v7993_v43 }
0x130f   :  { %v3432_v44 = vpop.xlane.xlu1 %3431  ;;  %v3442_v47 = vpop.xlane.xlu0 %3441 }
0x1310   :  { %v3444_v55 = vadd.f32 %v3442_v47, %v3432_v44  ;;  %v2991_v44 = vld [vmem:[%s10719_s1 + $0xc8] sm:$0xff] }
0x1311   :  { %7391 = vmatprep.mubr.msk.f32.mxu0 %vm1564_vm2, %v2991_v44  ;;  %7393 = vmatprep.mubr.msk.f32.mxu1 %vm1564_vm2, %v2991_v44 }
0x1312   :  { %v3446_v60 = vmul.f32 0.03125, %v3444_v55 }
0x1313   :  { %v3429_v61 = vpop.xlane.xlu1 %3428  ;;  %v3439_v19 = vpop.xlane.xlu0 %3438 }
0x1314   :  { %v3448_v1 = vadd.f32 1e-05, %v3446_v60  ;;  %v3443_v5 = vadd.f32 %v3439_v19, %v3429_v61 }
0x1316   :  { %7929 = vrsqrt.f32 %v3448_v1  ;;  %v3445_v10 = vmul.f32 0.03125, %v3443_v5 }
0x1317   :  { %v3473_v30 = vpop.permute.xlu1 %3472 }
0x1318   :  { %v3447_v13 = vadd.f32 1e-05, %v3445_v10 }
0x131a   :  { %7931 = vrsqrt.f32 %v3447_v13 }
0x1323   :  { %v7930_v15 = vpop.eup %7929 }
0x1324   :  { %v3452_v17 = vmul.f32 %v7930_v15, %v3389_v22 }
0x1326   :  { %3460 = vperm.xlu1 %7878, %v3452_v17  }
0x1327   :  { %v7932_v24 = vpop.eup %7931 }
0x1328   :  { %v3451_v25 = vmul.f32 %v7932_v24, %v9504_v21 }
0x132a   :  { %3455 = vperm.xlu0 %7876, %v3451_v25   ;;  %7879 = vset.pattern.permute.xlu1 %v7992_v11 }
0x132b   :  { %3467 = vperm.xlu1 %7879, %v9504_v21  }
0x13a1   :  { %v3461_v46 = vpop.permute.xlu1 %3460 }
0x13a2   :  { %v3464_v34 = vmul.f32 %v3461_v46, %v3420_v56  ;;  %v3482_v38 = vmul.f32 %v3461_v46, %v3424_v50 }
0x13a4   :  { %v3476_v36 = vadd.f32 %v3473_v30, %v3464_v34  ;;  %v3484_v48 = vadd.f32 %v3482_v38, %v3473_v30 }
0x13a5   :  { %v3456_v59 = vpop.permute.xlu0 %3455 }
0x13a6   :  { %v3463_v35 = vmul.f32 %v3456_v59, %v3419_v58  ;;  %v3468_v23 = vpop.permute.xlu1 %3467  ;;  %v3478_v45 = vmax.f32 %v3476_v36, 0.0  ;;  %v3481_v53 = vmul.f32 %v3456_v59, %v3423_v33  ;;  %v3486_v57 = vmax.f32 %v3484_v48, 0.0 }
0x13a8   :  { %v3475_v40 = vadd.f32 %v3468_v23, %v3463_v35  ;;  %v3483_v0 = vadd.f32 %v3481_v53, %v3468_v23  ;;  %v3480_v62 = vmul.f32 %v9480_v32, %v3478_v45  ;;  %v3488_v31 = vmul.f32 %v9480_v32, %v3486_v57 }
0x13aa   :  { %v3477_v42 = vmax.f32 %v3475_v40, 0.0  ;;  %v3485_v4 = vmax.f32 %v3483_v0, 0.0 }
0x13ac   :  { %v3479_v54 = vmul.f32 %v9480_v32, %v3477_v42  ;;  %v3487_v12 = vmul.f32 %v9480_v32, %v3485_v4 }
0x13ae   :  { %3491 = vrot.lane.b32.xlu1 %v3479_v54, %s7986_s9 }
0x13b2   :  { %3493 = vrot.lane.b32.xlu1 %v3480_v62, %s7986_s9 }
0x13b6   :  { %3503 = vrot.lane.b32.xlu1 %v3488_v31, %s7986_s9 }
0x13ba   :  { %3501 = vrot.lane.b32.xlu1 %v3487_v12, %s7986_s9 }
0x1420   :  { %v3492_v14 = vpop.permute.xlu1 %3491 }
0x1421   :  { %3497 = vst.msk [vmem:[#allocation4] sm:$0xff] %vm2971_vm6, %v3492_v14 }
0x1424   :  { %v3494_v2 = vpop.permute.xlu1 %3493 }
0x1425   :  { %3498 = vst.msk [vmem:[#allocation4 + $0x8] sm:$0x3] %vm2973_vm5, %v3494_v2 }
0x1428   :  { %v3504_v26 = vpop.permute.xlu1 %3503  ;;  %v3661_v28 = vld [vmem:[#allocation4] sm:$0xff] }
0x1429   :  { %3508 = vst.msk [vmem:[#allocation4 + $0x18] sm:$0x3] %vm2973_vm5, %v3504_v26  ;;  %3669 = vrot.lane.b32.xlu1 %v3661_v28, %s7987_s12 }
0x142a   :  { %3513 = vst.msk [vmem:[#allocation2] sm:$0xff] %vm2998_vm8, %v3661_v28 }
0x142c   :  { %v3502_v27 = vpop.permute.xlu1 %3501  ;;  %v3510_v39 = vld [vmem:[#allocation4 + $0x8] sm:$0x3] }
0x142d   :  { %3507 = vst.msk [vmem:[#allocation4 + $0x10] sm:$0xff] %vm2971_vm6, %v3502_v27  ;;  %3645 = vrot.lane.b32.xlu1 %v3661_v28, %s7977_s19  ;;  %v3662_v50 = vld [vmem:[#allocation4 + $0x8] sm:$0x3] }
0x142e   :  { %3514 = vst.msk [vmem:[#allocation2 + $0x18] sm:$0x3] %vm3000_vm7, %v3510_v39  ;;  %v3638_v56 = vld [vmem:[#allocation4 + $0x8] sm:$0x3] }
0x142f   :  { %v3614_v33 = vld [vmem:[#allocation4 + $0x8] sm:$0x3] }
0x1430   :  { %v3512_v41 = vld [vmem:[#allocation4 + $0x18] sm:$0x3]  ;;  %v3590_v58 = vld [vmem:[#allocation4 + $0x8] sm:$0x3] }
0x1431   :  { %3621 = vrot.lane.b32.xlu1 %v3661_v28, %s7988_s13  ;;  %3516 = vst.msk [vmem:[#allocation2 + $0x1c8] sm:$0x3] %vm3000_vm7, %v3512_v41  ;;  %v3664_v8 = vld [vmem:[#allocation4 + $0x18] sm:$0x3]  ;;  %v3566_v29 = vld [vmem:[#allocation4 + $0x8] sm:$0x3] }
0x1432   :  { %v3640_v18 = vld [vmem:[#allocation4 + $0x18] sm:$0x3]  ;;  %v3542_v6 = vld [vmem:[#allocation4 + $0x8] sm:$0x3]  ;;  %v3709_v44 = vld [vmem:[#allocation2] sm:$0xff] }
0x1433   :  { %v3616_v7 = vld [vmem:[#allocation4 + $0x18] sm:$0x3]  ;;  %v3518_v9 = vld [vmem:[#allocation4 + $0x8] sm:$0x3] }
0x1434   :  { %v3663_v49 = vld [vmem:[#allocation4 + $0x10] sm:$0xff]  ;;  %v3592_v20 = vld [vmem:[#allocation4 + $0x18] sm:$0x3]  ;;  %v3686_v22 = vld [vmem:[#allocation4 + $0x8] sm:$0x3] }
0x1435   :  { %3597 = vrot.lane.b32.xlu1 %v3661_v28, %s7989_s16  ;;  %3673 = vrot.lane.b32.xlu0 %v3663_v49, %s7987_s12  ;;  %3515 = vst.msk [vmem:[#allocation2 + $0x1b0] sm:$0xff] %vm2998_vm8, %v3663_v49  ;;  %v3568_v16 = vld [vmem:[#allocation4 + $0x18] sm:$0x3] }
0x1436   :  { %v3544_v11 = vld [vmem:[#allocation4 + $0x18] sm:$0x3] }
0x1437   :  { %v3520_v43 = vld [vmem:[#allocation4 + $0x18] sm:$0x3] }
0x1438   :  { %v3688_v47 = vld [vmem:[#allocation4 + $0x18] sm:$0x3] }
0x1439   :  { %3573 = vrot.lane.b32.xlu1 %v3661_v28, %s7990_s17  ;;  %3649 = vrot.lane.b32.xlu0 %v3663_v49, %s7977_s19 }
0x143d   :  { %3549 = vrot.lane.b32.xlu1 %v3661_v28, %s7970_s21  ;;  %3625 = vrot.lane.b32.xlu0 %v3663_v49, %s7988_s13 }
0x1441   :  { %3671 = vrot.lane.b32.xlu1 %v3662_v50, %s7987_s12  ;;  %3601 = vrot.lane.b32.xlu0 %v3663_v49, %s7989_s16 }
0x1445   :  { %3647 = vrot.lane.b32.xlu1 %v3638_v56, %s7977_s19  ;;  %3577 = vrot.lane.b32.xlu0 %v3663_v49, %s7990_s17 }
0x1449   :  { %3623 = vrot.lane.b32.xlu1 %v3614_v33, %s7988_s13  ;;  %3553 = vrot.lane.b32.xlu0 %v3663_v49, %s7970_s21 }
0x144d   :  { %3599 = vrot.lane.b32.xlu1 %v3590_v58, %s7989_s16  ;;  %3675 = vrot.lane.b32.xlu0 %v3664_v8, %s7987_s12 }
0x1451   :  { %3575 = vrot.lane.b32.xlu1 %v3566_v29, %s7990_s17  ;;  %3651 = vrot.lane.b32.xlu0 %v3640_v18, %s7977_s19 }
0x1455   :  { %3551 = vrot.lane.b32.xlu1 %v3542_v6, %s7970_s21  ;;  %3627 = vrot.lane.b32.xlu0 %v3616_v7, %s7988_s13 }
0x1459   :  { %3527 = vrot.lane.b32.xlu1 %v3518_v9, %s7971_s30  ;;  %3603 = vrot.lane.b32.xlu0 %v3592_v20, %s7989_s16 }
0x145d   :  { %3525 = vrot.lane.b32.xlu1 %v3661_v28, %s7971_s30  ;;  %3579 = vrot.lane.b32.xlu0 %v3568_v16, %s7990_s17 }
0x1461   :  { %3695 = vrot.lane.b32.xlu1 %v3686_v22, %s7991_s27  ;;  %3555 = vrot.lane.b32.xlu0 %v3544_v11, %s7970_s21  ;;  %v3710_v22 = vld [vmem:[#allocation2 + $0x18] sm:$0xff] }
0x1465   :  { %3693 = vrot.lane.b32.xlu1 %v3661_v28, %s7991_s27  ;;  %3531 = vrot.lane.b32.xlu0 %v3520_v43, %s7971_s30 }
0x1469   :  { %3529 = vrot.lane.b32.xlu0 %v3663_v49, %s7971_s30 }
0x146d   :  { %3699 = vrot.lane.b32.xlu0 %v3688_v47, %s7991_s27 }
0x1471   :  { %3697 = vrot.lane.b32.xlu0 %v3663_v49, %s7991_s27 }
0x149b   :  { %v3670_v55 = vpop.permute.xlu1 %3669 }
0x149c   :  { %3681 = vst.msk [vmem:[#allocation2 + $0x150] sm:$0xff] %vm2998_vm8, %v3670_v55 }
0x149f   :  { %v3646_v60 = vpop.permute.xlu1 %3645 }
0x14a0   :  { %3657 = vst.msk [vmem:[#allocation2 + $0x120] sm:$0xff] %vm2998_vm8, %v3646_v60 }
0x14a3   :  { %v3622_v61 = vpop.permute.xlu1 %3621  ;;  %v3723_v35 = vld [vmem:[#allocation2 + $0x150] sm:$0xff] }
0x14a4   :  { %3633 = vst.msk [vmem:[#allocation2 + $0xf0] sm:$0xff] %vm2998_vm8, %v3622_v61  ;;  %v2990_v61 = vld [vmem:[%s10719_s1 + $0xc0] sm:$0xff] }
0x14a7   :  { %v3674_v19 = vpop.permute.xlu0 %3673  ;;  %v3598_v1 = vpop.permute.xlu1 %3597  ;;  %v3721_v40 = vld [vmem:[#allocation2 + $0x120] sm:$0xff] }
0x14a8   :  { %3683 = vst.msk [vmem:[#allocation2 + $0x300] sm:$0xff] %vm2998_vm8, %v3674_v19  ;;  %3609 = vst.msk [vmem:[#allocation2 + $0xc0] sm:$0xff] %vm2998_vm8, %v3598_v1 }
0x14ab   :  { %v3650_v5 = vpop.permute.xlu0 %3649  ;;  %v3574_v10 = vpop.permute.xlu1 %3573  ;;  %v3719_v53 = vld [vmem:[#allocation2 + $0xf0] sm:$0xff] }
0x14ac   :  { %3659 = vst.msk [vmem:[#allocation2 + $0x2d0] sm:$0xff] %vm2998_vm8, %v3650_v5  ;;  %3585 = vst.msk [vmem:[#allocation2 + $0x90] sm:$0xff] %vm2998_vm8, %v3574_v10  ;;  %v2993_v10 = vld [vmem:[%s10719_s1 + $0xd8] sm:$0x3] }
0x14af   :  { %v3626_v13 = vpop.permute.xlu0 %3625  ;;  %v3550_v15 = vpop.permute.xlu1 %3549  ;;  %v3717_v4 = vld [vmem:[#allocation2 + $0xc0] sm:$0xff] }
0x14b0   :  { %3635 = vst.msk [vmem:[#allocation2 + $0x2a0] sm:$0xff] %vm2998_vm8, %v3626_v13  ;;  %3561 = vst.msk [vmem:[#allocation2 + $0x60] sm:$0xff] %vm2998_vm8, %v3550_v15  ;;  %v3822_v31 = vld [vmem:[#allocation2 + $0x300] sm:$0xff]  ;;  %v2992_v13 = vld [vmem:[%s10719_s1 + $0xd0] sm:$0x3] }
0x14b3   :  { %v3602_v17 = vpop.permute.xlu0 %3601  ;;  %v3672_v24 = vpop.permute.xlu1 %3671  ;;  %v3715_v28 = vld [vmem:[#allocation2 + $0x90] sm:$0xff] }
0x14b4   :  { %3611 = vst.msk [vmem:[#allocation2 + $0x270] sm:$0xff] %vm2998_vm8, %v3602_v17  ;;  %v3820_v27 = vld [vmem:[#allocation2 + $0x2d0] sm:$0xff] }
0x14b5   :  { %3682 = vst.msk [vmem:[#allocation2 + $0x168] sm:$0x3] %vm3000_vm7, %v3672_v24  ;;  %v3809_v24 = vld [vmem:[#allocation2 + $0x1c8] sm:$0xff] }
0x14b7   :  { %v3578_v25 = vpop.permute.xlu0 %3577  ;;  %v3648_v30 = vpop.permute.xlu1 %3647  ;;  %v3713_v56 = vld [vmem:[#allocation2 + $0x60] sm:$0xff] }
0x14b8   :  { %3587 = vst.msk [vmem:[#allocation2 + $0x240] sm:$0xff] %vm2998_vm8, %v3578_v25  ;;  %v3818_v33 = vld [vmem:[#allocation2 + $0x2a0] sm:$0xff]  ;;  %v3808_v25 = vld [vmem:[#allocation2 + $0x1b0] sm:$0xff] }
0x14b9   :  { %3658 = vst.msk [vmem:[#allocation2 + $0x138] sm:$0x3] %vm3000_vm7, %v3648_v30 }
0x14bb   :  { %v3554_v46 = vpop.permute.xlu0 %3553  ;;  %v3624_v34 = vpop.permute.xlu1 %3623  ;;  %v3816_v6 = vld [vmem:[#allocation2 + $0x270] sm:$0xff] }
0x14bc   :  { %v3724_v59 = vld [vmem:[#allocation2 + $0x168] sm:$0xff]  ;;  %3563 = vst.msk [vmem:[#allocation2 + $0x210] sm:$0xff] %vm2998_vm8, %v3554_v46 }
0x14bd   :  { %3634 = vst.msk [vmem:[#allocation2 + $0x108] sm:$0x3] %vm3000_vm7, %v3624_v34  ;;  %3734 = vmatpush1.msra.mxu0 %v3724_v59 }
0x14be   :  { %3735 = vmatprep.subr.mxu0 %v9457_v52 }
0x14bf   :  { %3736 = vmatpush1.msra.mxu0 %v3723_v35  ;;  %v3676_v23 = vpop.permute.xlu0 %3675  ;;  %v3600_v36 = vpop.permute.xlu1 %3599  ;;  %v3814_v11 = vld [vmem:[#allocation2 + $0x240] sm:$0xff] }
0x14c0   :  { %3737 = vmatprep.subr.mxu0 %v9457_v52  ;;  %v3722_v38 = vld [vmem:[#allocation2 + $0x138] sm:$0xff]  ;;  %3684 = vst.msk [vmem:[#allocation2 + $0x318] sm:$0x3] %vm3000_vm7, %v3676_v23  ;;  %3610 = vst.msk [vmem:[#allocation2 + $0xd8] sm:$0x3] %vm3000_vm7, %v3600_v36 }
0x14c1   :  { %3738 = vmatpush1.msra.mxu0 %v3722_v38 }
0x14c2   :  { %3739 = vmatprep.subr.mxu0 %v9457_v52 }
0x14c3   :  { %3740 = vmatpush1.msra.mxu0 %v3721_v40  ;;  %v3652_v42 = vpop.permute.xlu0 %3651  ;;  %v3576_v45 = vpop.permute.xlu1 %3575  ;;  %v3812_v60 = vld [vmem:[#allocation2 + $0x210] sm:$0xff] }
0x14c4   :  { %3741 = vmatprep.subr.mxu0 %v9457_v52  ;;  %v3720_v48 = vld [vmem:[#allocation2 + $0x108] sm:$0xff]  ;;  %3660 = vst.msk [vmem:[#allocation2 + $0x2e8] sm:$0x3] %vm3000_vm7, %v3652_v42  ;;  %3586 = vst.msk [vmem:[#allocation2 + $0xa8] sm:$0x3] %vm3000_vm7, %v3576_v45 }
0x14c5   :  { %3742 = vmatpush1.msra.mxu0 %v3720_v48 }
0x14c6   :  { %3743 = vmatprep.subr.mxu0 %v9457_v52 }
0x14c7   :  { %3744 = vmatpush1.msra.mxu0 %v3719_v53  ;;  %v3628_v54 = vpop.permute.xlu0 %3627  ;;  %v3552_v57 = vpop.permute.xlu1 %3551  ;;  %v3718_v0 = vld [vmem:[#allocation2 + $0xd8] sm:$0xff] }
0x14c8   :  { %3745 = vmatprep.subr.mxu0 %v9457_v52  ;;  %v3823_v62 = vld [vmem:[#allocation2 + $0x318] sm:$0xff]  ;;  %3636 = vst.msk [vmem:[#allocation2 + $0x2b8] sm:$0x3] %vm3000_vm7, %v3628_v54  ;;  %3562 = vst.msk [vmem:[#allocation2 + $0x78] sm:$0x3] %vm3000_vm7, %v3552_v57 }
0x14c9   :  { %3746 = vmatpush1.msra.mxu0 %v3718_v0  ;;  %3827 = vmatpush1.msra.mxu1 %v3823_v62 }
0x14ca   :  { %3747 = vmatprep.subr.mxu0 %v9457_v52  ;;  %3828 = vmatprep.subr.mxu1 %v9457_v52 }
0x14cb   :  { %3748 = vmatpush1.msra.mxu0 %v3717_v4  ;;  %3829 = vmatpush1.msra.mxu1 %v3822_v31  ;;  %v3604_v12 = vpop.permute.xlu0 %3603  ;;  %v3528_v14 = vpop.permute.xlu1 %3527  ;;  %v3716_v2 = vld [vmem:[#allocation2 + $0xa8] sm:$0xff] }
0x14cc   :  { %3830 = vmatprep.subr.mxu1 %v9457_v52  ;;  %3749 = vmatprep.subr.mxu0 %v9457_v52  ;;  %v3821_v26 = vld [vmem:[#allocation2 + $0x2e8] sm:$0xff]  ;;  %3612 = vst.msk [vmem:[#allocation2 + $0x288] sm:$0x3] %vm3000_vm7, %v3604_v12  ;;  %3538 = vst.msk [vmem:[#allocation2 + $0x48] sm:$0x3] %vm3000_vm7, %v3528_v14 }
0x14cd   :  { %3750 = vmatpush1.msra.mxu0 %v3716_v2  ;;  %3831 = vmatpush1.msra.mxu1 %v3821_v26 }
0x14ce   :  { %3751 = vmatprep.subr.mxu0 %v9457_v52  ;;  %3832 = vmatprep.subr.mxu1 %v9457_v52 }
0x14cf   :  { %3752 = vmatpush1.msra.mxu0 %v3715_v28  ;;  %3833 = vmatpush1.msra.mxu1 %v3820_v27  ;;  %v3580_v39 = vpop.permute.xlu0 %3579  ;;  %v3526_v41 = vpop.permute.xlu1 %3525  ;;  %v3714_v49 = vld [vmem:[#allocation2 + $0x78] sm:$0xff] }
0x14d0   :  { %3834 = vmatprep.subr.mxu1 %v9457_v52  ;;  %3753 = vmatprep.subr.mxu0 %v9457_v52  ;;  %v3819_v50 = vld [vmem:[#allocation2 + $0x2b8] sm:$0xff]  ;;  %3588 = vst.msk [vmem:[#allocation2 + $0x258] sm:$0x3] %vm3000_vm7, %v3580_v39 }
0x14d1   :  { %3537 = vst.msk [vmem:[#allocation2 + $0x30] sm:$0xff] %vm2998_vm8, %v3526_v41  ;;  %3754 = vmatpush1.msra.mxu0 %v3714_v49  ;;  %3835 = vmatpush1.msra.mxu1 %v3819_v50 }
0x14d2   :  { %3755 = vmatprep.subr.mxu0 %v9457_v52  ;;  %3836 = vmatprep.subr.mxu1 %v9457_v52 }
0x14d3   :  { %3756 = vmatpush1.msra.mxu0 %v3713_v56  ;;  %3837 = vmatpush1.msra.mxu1 %v3818_v33  ;;  %v3556_v58 = vpop.permute.xlu0 %3555  ;;  %v3696_v8 = vpop.permute.xlu1 %3695  ;;  %v3712_v29 = vld [vmem:[#allocation2 + $0x48] sm:$0xff] }
0x14d4   :  { %3838 = vmatprep.subr.mxu1 %v9457_v52  ;;  %3757 = vmatprep.subr.mxu0 %v9457_v52  ;;  %v3817_v18 = vld [vmem:[#allocation2 + $0x288] sm:$0xff]  ;;  %3564 = vst.msk [vmem:[#allocation2 + $0x228] sm:$0x3] %vm3000_vm7, %v3556_v58  ;;  %3706 = vst.msk [vmem:[#allocation2 + $0x198] sm:$0x3] %vm3000_vm7, %v3696_v8 }
0x14d5   :  { %3758 = vmatpush1.msra.mxu0 %v3712_v29  ;;  %3839 = vmatpush1.msra.mxu1 %v3817_v18 }
0x14d6   :  { %3840 = vmatprep.subr.mxu1 %v9457_v52  ;;  %3759 = vmatprep.subr.mxu0 %v9457_v52 }
0x14d7   :  { %3841 = vmatpush1.msra.mxu1 %v3816_v6  ;;  %v3532_v7 = vpop.permute.xlu0 %3531  ;;  %v3694_v9 = vpop.permute.xlu1 %3693  ;;  %v3815_v16 = vld [vmem:[#allocation2 + $0x258] sm:$0xff] }
0x14d8   :  { %3842 = vmatprep.subr.mxu1 %v9457_v52  ;;  %v3711_v20 = vld [vmem:[#allocation2 + $0x30] sm:$0xff]  ;;  %3540 = vst.msk [vmem:[#allocation2 + $0x1f8] sm:$0x3] %vm3000_vm7, %v3532_v7 }
0x14d9   :  { %3705 = vst.msk [vmem:[#allocation2 + $0x180] sm:$0xff] %vm2998_vm8, %v3694_v9  ;;  %3760 = vmatpush1.msra.mxu0 %v3711_v20  ;;  %3843 = vmatpush1.msra.mxu1 %v3815_v16 }
0x14da   :  { %3761 = vmatprep.subr.mxu0 %v9457_v52  ;;  %3844 = vmatprep.subr.mxu1 %v9457_v52 }
0x14db   :  { %3762 = vmatpush1.msra.mxu0 %v3710_v22  ;;  %3845 = vmatpush1.msra.mxu1 %v3814_v11  ;;  %v3530_v43 = vpop.permute.xlu0 %3529  ;;  %v3813_v47 = vld [vmem:[#allocation2 + $0x228] sm:$0xff]  ;;  %v3726_v55 = vld [vmem:[#allocation2 + $0x198] sm:$0xff]  ;;  %v7994_v11 = vmov 16  }
0x14dc   :  { %3846 = vmatprep.subr.mxu1 %v9457_v52  ;;  %3763 = vmatprep.subr.mxu0 %v9457_v52  ;;  %3539 = vst.msk [vmem:[#allocation2 + $0x1e0] sm:$0xff] %vm2998_vm8, %v3530_v43  ;;  %v7995_v43 = vmov 8  }
0x14dd   :  { %3764 = vmatpush1.msra.mxu0 %v3709_v44  ;;  %3847 = vmatpush1.msra.mxu1 %v3813_v47 }
0x14de   :  { %3793 = vmatprep.subr.mxu0 %v9457_v52  ;;  %3848 = vmatprep.subr.mxu1 %v9457_v52 }
0x14df   :  { %3794 = vmatpush2.msra.mxu0 %v3726_v55  ;;  %3849 = vmatpush1.msra.mxu1 %v3812_v60  ;;  %v3700_v19 = vpop.permute.xlu0 %3699  ;;  %v3811_v5 = vld [vmem:[#allocation2 + $0x1f8] sm:$0xff] }
0x14e0   :  { %3850 = vmatprep.subr.mxu1 %v9457_v52  ;;  %3795 = vmatprep.subr.mxu0 %v9457_v52  ;;  %v3725_v1 = vld [vmem:[#allocation2 + $0x180] sm:$0xff]  ;;  %3708 = vst.msk [vmem:[#allocation2 + $0x348] sm:$0x3] %vm3000_vm7, %v3700_v19 }
0x14e1   :  { %3796 = vmatpush2.msra.mxu0 %v3725_v1  ;;  %3851 = vmatpush1.msra.mxu1 %v3811_v5 }
0x14e2   :  { %3852 = vmatprep.subr.mxu1 %v9457_v52  ;;  %3798 = vmatmul.mubr.f32.vlgmr.msra.gmra.mxu0 %v2990_v61 }
0x14e3   :  { %7392 = vmatprep.mubr.msk.f32.mxu0 %vm1564_vm2, %v2993_v10  ;;  %v3698_v15 = vpop.permute.xlu0 %3697  ;;  %v3810_v17 = vld [vmem:[#allocation2 + $0x1e0] sm:$0xff]  ;;  %7881 = vset.pattern.permute.xlu1 %v7994_v11 }
0x14e4   :  { %3707 = vst.msk [vmem:[#allocation2 + $0x330] sm:$0xff] %vm2998_vm8, %v3698_v15  ;;  %3853 = vmatpush1.msra.mxu1 %v3810_v17  ;;  %7880 = vset.pattern.permute.xlu0 %v7995_v43 }
0x14e5   :  { %3854 = vmatprep.subr.mxu1 %v9457_v52 }
0x14e6   :  { %3803 = vmatmul.mubr.f32.gmra.mxu0 %v2992_v13  ;;  %3855 = vmatpush1.msra.mxu1 %v3809_v24  ;;  %v3902_v24 = vld [vmem:[%s10720_s2 + $0x8] sm:$0x3] }
0x14e7   :  { %3856 = vmatprep.subr.mxu1 %v9457_v52  ;;  %v3825_v30 = vld [vmem:[#allocation2 + $0x348] sm:$0xff] }
0x14e8   :  { %3857 = vmatpush1.msra.mxu1 %v3808_v25 }
0x14e9   :  { %3886 = vmatprep.subr.mxu1 %v9457_v52 }
0x14ea   :  { %3887 = vmatpush2.msra.mxu1 %v3825_v30 }
0x14eb   :  { %3888 = vmatprep.subr.mxu1 %v9457_v52  ;;  %v3824_v46 = vld [vmem:[#allocation2 + $0x330] sm:$0xff] }
0x14ec   :  { %3889 = vmatpush2.msra.mxu1 %v3824_v46 }
0x14ed   :  { %3891 = vmatmul.mubr.f32.vlgmr.msra.gmra.mxu1 %v2990_v61 }
0x14ee   :  { %7394 = vmatprep.mubr.msk.f32.mxu1 %vm1564_vm2, %v2993_v10 }
0x14f1   :  { %3896 = vmatmul.mubr.f32.gmra.mxu1 %v2992_v13 }
0x15a2   :  { %v3799_v34 = vpop.f32.mrf.mxu0 }
0x15a3   :  { %v3908_v59 = vmul.f32 %v9480_v32, %v3799_v34 }
0x15a4   :  { %v3801_v35 = vpop.f32.mrf.mxu0 }
0x15a5   :  { %v3910_v23 = vsel %vm2998_vm8, %v3908_v59, 0.0 }
0x15a6   :  { %3911 = vadd.xlane.f32.xlu1 %v3910_v23  ;;  %v3804_v36 = vpop.f32.mrf.mxu0 }
0x15a7   :  { %v3909_v52 = vmul.f32 %v9480_v32, %v3804_v36 }
0x15a8   :  { %v3806_v38 = vpop.f32.mrf.mxu0 }
0x15a9   :  { %v3913_v57 = vsel %vm3000_vm7, %v3909_v52, 0.0 }
0x15ad   :  { %v3892_v40 = vpop.f32.mrf.mxu1 }
0x15ae   :  { %v3918_v42 = vmul.f32 %v9480_v32, %v3892_v40 }
0x15af   :  { %v3894_v45 = vpop.f32.mrf.mxu1 }
0x15b0   :  { %v3920_v48 = vsel %vm2998_vm8, %v3918_v42, 0.0 }
0x15b1   :  { %3921 = vadd.xlane.f32.xlu0 %v3920_v48  ;;  %v3897_v53 = vpop.f32.mrf.mxu1 }
0x15b2   :  { %v3919_v54 = vmul.f32 %v9480_v32, %v3897_v53 }
0x15b3   :  { %v3899_v0 = vpop.f32.mrf.mxu1 }
0x15b4   :  { %v3923_v62 = vsel %vm3000_vm7, %v3919_v54, 0.0 }
0x15b5   :  { %3924 = vadd.xlane.f32.xlu1 %v3923_v62  ;;  %3914 = vadd.xlane.f32.xlu0 %v3913_v57 }
0x162f   :  { %v3912_v4 = vpop.xlane.xlu1 %3911 }
0x163a   :  { %v3922_v31 = vpop.xlane.xlu0 %3921 }
0x163b   :  { %v3926_v12 = vadd.f32 %v3922_v31, %v3912_v4 }
0x163d   :  { %v3928_v14 = vmul.f32 0.03125, %v3926_v12 }
0x163e   :  { %v3925_v2 = vpop.xlane.xlu1 %3924  ;;  %v3915_v26 = vpop.xlane.xlu0 %3914 }
0x163f   :  { %v3930_v28 = vsub.f32 %v3799_v34, %v3928_v14  ;;  %v3934_v27 = vsub.f32 %v3892_v40, %v3928_v14  ;;  %v3927_v39 = vadd.f32 %v3925_v2, %v3915_v26 }
0x1641   :  { %v3929_v41 = vmul.f32 0.03125, %v3927_v39  ;;  %v3936_v49 = vmul.f32 %v9480_v32, %v3934_v27  ;;  %v3932_v50 = vmul.f32 %v9480_v32, %v3930_v28 }
0x1643   :  { %v3931_v56 = vsub.f32 %v3804_v36, %v3929_v41  ;;  %v3935_v33 = vsub.f32 %v3897_v53, %v3929_v41  ;;  %v3948_v58 = vmul.f32 %v3936_v49, %v3936_v49  ;;  %v3938_v8 = vmul.f32 %v3932_v50, %v3932_v50  ;;  %v4170_v41 = vld [vmem:[%s10721_s3 + $0x1d0] sm:$0xf] }
0x1644   :  { %7760 = vmatprep.subr.msk.mxu0 %vm754_vm10, %v4170_v41  ;;  %7773 = vmatprep.subr.msk.mxu1 %vm754_vm10, %v4170_v41 }
0x1645   :  { %v3950_v29 = vsel %vm2998_vm8, %v3948_v58, 0.0  ;;  %v3940_v18 = vsel %vm2998_vm8, %v3938_v8, 0.0  ;;  %v3937_v6 = vmul.f32 %v9480_v32, %v3935_v33  ;;  %v3933_v7 = vmul.f32 %v9480_v32, %v3931_v56  ;;  %7761 = vmatpush3.msk.msra.mxu0 %vm754_vm10, %v4170_v41  ;;  %7774 = vmatpush3.msk.msra.mxu1 %vm754_vm10, %v4170_v41  ;;  %v4167_v56 = vld [vmem:[%s10721_s3 + $0x1b8] sm:$0xff]  ;;  %v4166_v33 = vld [vmem:[%s10721_s3 + $0x1b0] sm:$0xff]  ;;  %v9756_v58 = vld [vmem:[#allocation2 + $0xe0] sm:$0xff] }
0x1646   :  { %3951 = vadd.xlane.f32.xlu1 %v3950_v29  ;;  %3941 = vadd.xlane.f32.xlu0 %v3940_v18  ;;  %141 = vst.msk [vmem:[#allocation5 + $0x8] sm:$0x3] %vm140_vm9, %v9756_v58  ;;  %143 = vst.msk [vmem:[#allocation5 + $0x18] sm:$0x3] %vm140_vm9, %v9756_v58  ;;  %vm138_vm10 = vcmask 211968  }
0x1647   :  { %v3949_v9 = vmul.f32 %v3937_v6, %v3937_v6  ;;  %v3939_v20 = vmul.f32 %v3933_v7, %v3933_v7  ;;  %139 = vst.msk [vmem:[#allocation5] sm:$0xff] %vm138_vm10, %v9756_v58  ;;  %142 = vst.msk [vmem:[#allocation5 + $0x10] sm:$0xff] %vm138_vm10, %v9756_v58 }
0x1649   :  { %v3953_v16 = vsel %vm3000_vm7, %v3949_v9, 0.0  ;;  %v3943_v22 = vsel %vm3000_vm7, %v3939_v20, 0.0 }
0x164a   :  { %3954 = vadd.xlane.f32.xlu1 %v3953_v16  ;;  %3944 = vadd.xlane.f32.xlu0 %v3943_v22 }
0x165b   :  { %3980 = vperm.xlu1 %7881, %v9504_v21  }
0x165f   :  { %7882 = vset.pattern.permute.xlu1 %v7995_v43 }
0x16cf   :  { %v3952_v44 = vpop.xlane.xlu1 %3951  ;;  %v3942_v47 = vpop.xlane.xlu0 %3941 }
0x16d0   :  { %v3956_v55 = vadd.f32 %v3952_v44, %v3942_v47 }
0x16d2   :  { %v3958_v60 = vmul.f32 0.03125, %v3956_v55 }
0x16d3   :  { %v3955_v61 = vpop.xlane.xlu1 %3954  ;;  %v3945_v19 = vpop.xlane.xlu0 %3944 }
0x16d4   :  { %v3960_v1 = vadd.f32 1e-05, %v3958_v60  ;;  %v3957_v5 = vadd.f32 %v3955_v61, %v3945_v19 }
0x16d6   :  { %7933 = vrsqrt.f32 %v3960_v1  ;;  %v3959_v10 = vmul.f32 0.03125, %v3957_v5 }
0x16d7   :  { %v3981_v46 = vpop.permute.xlu1 %3980 }
0x16d8   :  { %v3961_v13 = vadd.f32 1e-05, %v3959_v10 }
0x16da   :  { %7935 = vrsqrt.f32 %v3961_v13 }
0x16e3   :  { %v7934_v15 = vpop.eup %7933 }
0x16e4   :  { %v3964_v17 = vmul.f32 %v7934_v15, %v9504_v21 }
0x16e6   :  { %3968 = vperm.xlu0 %7880, %v3964_v17  }
0x16e7   :  { %v7936_v25 = vpop.eup %7935 }
0x16e8   :  { %v3965_v30 = vmul.f32 %v7936_v25, %v3902_v24 }
0x16ea   :  { %3973 = vperm.xlu1 %7882, %v3965_v30  }
0x16ee   :  { %7883 = vset.pattern.permute.xlu1 %v7994_v11 }
0x16ef   :  { %3985 = vperm.xlu1 %7883, %v3902_v24  }
0x1761   :  { %v3969_v34 = vpop.permute.xlu0 %3968 }
0x1762   :  { %v3976_v59 = vmul.f32 %v3969_v34, %v3932_v50  ;;  %v3992_v35 = vmul.f32 %v3969_v34, %v3936_v49  ;;  %v4169_v49 = vld [vmem:[%s10721_s3 + $0x1c8] sm:$0xff]  ;;  %v4168_v50 = vld [vmem:[%s10721_s3 + $0x1c0] sm:$0xff] }
0x1763   :  { %7762 = vmatprep.subr.mxu0 %v4169_v49  ;;  %7775 = vmatprep.subr.mxu1 %v4169_v49 }
0x1764   :  { %v3988_v23 = vadd.f32 %v3981_v46, %v3976_v59  ;;  %v3994_v36 = vadd.f32 %v3992_v35, %v3981_v46  ;;  %7763 = vmatpush3.msra.mxu0 %v4169_v49  ;;  %7776 = vmatpush3.msra.mxu1 %v4169_v49 }
0x1765   :  { %v3974_v38 = vpop.permute.xlu1 %3973  ;;  %7764 = vmatprep.subr.mxu0 %v4168_v50  ;;  %7777 = vmatprep.subr.mxu1 %v4168_v50 }
0x1766   :  { %v3990_v40 = vmul.f32 %v9480_v32, %v3988_v23  ;;  %v3996_v21 = vmul.f32 %v9480_v32, %v3994_v36  ;;  %v3977_v52 = vmul.f32 %v3974_v38, %v3933_v7  ;;  %v3993_v45 = vmul.f32 %v3974_v38, %v3937_v6  ;;  %7765 = vmatpush3.msra.mxu0 %v4168_v50 }
0x1767   :  { %7778 = vmatpush3.msra.mxu1 %v4168_v50  ;;  %7766 = vmatprep.subr.mxu0 %v4167_v56 }
0x1768   :  { %v3998_v42 = vadd.f32 %v3990_v40, %v9323_v51  ;;  %v4002_v54 = vadd.f32 %v3996_v21, %v9355_v3  ;;  %7779 = vmatprep.subr.mxu1 %v4167_v56  ;;  %7767 = vmatpush3.msra.mxu0 %v4167_v56 }
0x1769   :  { %7780 = vmatpush3.msra.mxu1 %v4167_v56  ;;  %7768 = vmatprep.subr.mxu0 %v4166_v33 }
0x176a   :  { %v3986_v48 = vpop.permute.xlu1 %3985  ;;  %v4000_v53 = vmax.f32 %v3998_v42, 0.0  ;;  %v4004_v31 = vmax.f32 %v4002_v54, 0.0  ;;  %7781 = vmatprep.subr.mxu1 %v4166_v33  ;;  %7769 = vmatpush3.msra.mxu0 %v4166_v33 }
0x176b   :  { %v3989_v57 = vadd.f32 %v3986_v48, %v3977_v52  ;;  %v3995_v0 = vadd.f32 %v3993_v45, %v3986_v48  ;;  %7782 = vmatpush3.msra.mxu1 %v4166_v33  ;;  %4592 = vmatprep.subr.mxu0 %v9756_v58 }
0x176c   :  { %4008 = vrot.lane.b32.xlu1 %v4000_v53, %s7986_s9  ;;  %4685 = vmatprep.subr.mxu1 %v9756_v58 }
0x176d   :  { %v3991_v62 = vmul.f32 %v9480_v32, %v3989_v57  ;;  %v3997_v4 = vmul.f32 %v9480_v32, %v3995_v0 }
0x176f   :  { %v3999_v12 = vadd.f32 %v9319_v63, %v3991_v62  ;;  %v4003_v14 = vadd.f32 %v9351_v37, %v3997_v4 }
0x1770   :  { %4018 = vrot.lane.b32.xlu1 %v4004_v31, %s7986_s9 }
0x1771   :  { %v4001_v51 = vmax.f32 %v3999_v12, 0.0  ;;  %v4005_v2 = vmax.f32 %v4003_v14, 0.0 }
0x1774   :  { %4010 = vrot.lane.b32.xlu1 %v4001_v51, %s7986_s9 }
0x1778   :  { %4020 = vrot.lane.b32.xlu1 %v4005_v2, %s7986_s9 }
0x17de   :  { %v4009_v3 = vpop.permute.xlu1 %4008 }
0x17df   :  { %4014 = vst.msk [vmem:[#allocation4] sm:$0xff] %vm2971_vm6, %v4009_v3 }
0x17e2   :  { %v4019_v26 = vpop.permute.xlu1 %4018 }
0x17e3   :  { %4024 = vst.msk [vmem:[#allocation4 + $0x10] sm:$0xff] %vm2971_vm6, %v4019_v26  ;;  %vm7341_vm6 = vcmask 7168  }
0x17e6   :  { %v4011_v32 = vpop.permute.xlu1 %4010  ;;  %v9673_v28 = vld [vmem:[#allocation4] sm:$0xff] }
0x17e7   :  { %4015 = vst.msk [vmem:[#allocation4 + $0x8] sm:$0x3] %vm2973_vm5, %v4011_v32  ;;  %4034 = vrot.lane.b32.xlu1 %v9673_v28, %s7971_s30 }
0x17ea   :  { %v4021_v63 = vpop.permute.xlu1 %4020  ;;  %v9678_v37 = vld [vmem:[#allocation4 + $0x10] sm:$0xff] }
0x17eb   :  { %4025 = vst.msk [vmem:[#allocation4 + $0x18] sm:$0x3] %vm2973_vm5, %v4021_v63  ;;  %4050 = vrot.lane.b32.xlu1 %v9673_v28, %s7970_s21  ;;  %4038 = vrot.lane.b32.xlu0 %v9678_v37, %s7971_s30  ;;  %vm7106_vm5 = vcmask 1040384  }
0x17ee   :  { %v9709_v27 = vld [vmem:[#allocation4 + $0x8] sm:$0x3] }
0x17ef   :  { %4066 = vrot.lane.b32.xlu1 %v9673_v28, %s7990_s17  ;;  %4054 = vrot.lane.b32.xlu0 %v9678_v37, %s7970_s21 }
0x17f2   :  { %v9715_v39 = vld [vmem:[#allocation4 + $0x18] sm:$0x3] }
0x17f3   :  { %4082 = vrot.lane.b32.xlu1 %v9673_v28, %s7989_s16  ;;  %4070 = vrot.lane.b32.xlu0 %v9678_v37, %s7990_s17 }
0x17f7   :  { %4098 = vrot.lane.b32.xlu1 %v9673_v28, %s7988_s13  ;;  %4086 = vrot.lane.b32.xlu0 %v9678_v37, %s7989_s16 }
0x17fb   :  { %4114 = vrot.lane.b32.xlu1 %v9673_v28, %s7977_s19  ;;  %4102 = vrot.lane.b32.xlu0 %v9678_v37, %s7988_s13 }
0x17ff   :  { %4130 = vrot.lane.b32.xlu1 %v9673_v28, %s7987_s12  ;;  %4118 = vrot.lane.b32.xlu0 %v9678_v37, %s7977_s19 }
0x1803   :  { %4146 = vrot.lane.b32.xlu1 %v9673_v28, %s7991_s27  ;;  %4134 = vrot.lane.b32.xlu0 %v9678_v37, %s7987_s12 }
0x1807   :  { %4150 = vrot.lane.b32.xlu0 %v9678_v37, %s7991_s27  ;;  %4036 = vrot.lane.b32.xlu1 %v9709_v27, %s7971_s30 }
0x180b   :  { %4052 = vrot.lane.b32.xlu1 %v9709_v27, %s7970_s21  ;;  %4040 = vrot.lane.b32.xlu0 %v9715_v39, %s7971_s30 }
0x180f   :  { %4068 = vrot.lane.b32.xlu1 %v9709_v27, %s7990_s17  ;;  %4056 = vrot.lane.b32.xlu0 %v9715_v39, %s7970_s21 }
0x1813   :  { %4084 = vrot.lane.b32.xlu1 %v9709_v27, %s7989_s16  ;;  %4072 = vrot.lane.b32.xlu0 %v9715_v39, %s7990_s17 }
0x1817   :  { %4100 = vrot.lane.b32.xlu1 %v9709_v27, %s7988_s13  ;;  %4088 = vrot.lane.b32.xlu0 %v9715_v39, %s7989_s16 }
0x181b   :  { %4116 = vrot.lane.b32.xlu1 %v9709_v27, %s7977_s19  ;;  %4104 = vrot.lane.b32.xlu0 %v9715_v39, %s7988_s13 }
0x181f   :  { %4132 = vrot.lane.b32.xlu1 %v9709_v27, %s7987_s12  ;;  %4120 = vrot.lane.b32.xlu0 %v9715_v39, %s7977_s19  ;;  %s7996_s19 = smov 5  }
0x1823   :  { %4148 = vrot.lane.b32.xlu1 %v9709_v27, %s7991_s27  ;;  %4136 = vrot.lane.b32.xlu0 %v9715_v39, %s7987_s12  ;;  %s7997_s12 = smov 119  }
0x1827   :  { %4152 = vrot.lane.b32.xlu0 %v9715_v39, %s7991_s27  ;;  %s7998_s27 = smov 123  }
0x1859   :  { %v4035_v8 = vpop.permute.xlu1 %4034 }
0x185a   :  { %v4046_v16 = vadd.f32 %v4035_v8, %v9673_v28 }
0x185d   :  { %v4039_v29 = vpop.permute.xlu0 %4038  ;;  %v4051_v18 = vpop.permute.xlu1 %4050 }
0x185e   :  { %v4062_v43 = vadd.f32 %v4051_v18, %v4046_v16  ;;  %v4048_v44 = vadd.f32 %v4039_v29, %v9678_v37 }
0x1861   :  { %v4055_v6 = vpop.permute.xlu0 %4054  ;;  %v4067_v7 = vpop.permute.xlu1 %4066 }
0x1862   :  { %v4078_v47 = vadd.f32 %v4067_v7, %v4062_v43  ;;  %v4064_v61 = vadd.f32 %v4055_v6, %v4048_v44 }
0x1865   :  { %v4071_v9 = vpop.permute.xlu0 %4070  ;;  %v4083_v20 = vpop.permute.xlu1 %4082 }
0x1866   :  { %v4094_v19 = vadd.f32 %v4083_v20, %v4078_v47  ;;  %v4080_v1 = vadd.f32 %v4071_v9, %v4064_v61 }
0x1869   :  { %v4087_v22 = vpop.permute.xlu0 %4086  ;;  %v4099_v11 = vpop.permute.xlu1 %4098 }
0x186a   :  { %v4110_v5 = vadd.f32 %v4099_v11, %v4094_v19  ;;  %v4096_v15 = vadd.f32 %v4087_v22, %v4080_v1 }
0x186d   :  { %v4103_v55 = vpop.permute.xlu0 %4102  ;;  %v4115_v60 = vpop.permute.xlu1 %4114 }
0x186e   :  { %v4126_v17 = vadd.f32 %v4115_v60, %v4110_v5  ;;  %v4112_v24 = vadd.f32 %v4103_v55, %v4096_v15 }
0x1871   :  { %v4119_v10 = vpop.permute.xlu0 %4118  ;;  %v4131_v13 = vpop.permute.xlu1 %4130 }
0x1872   :  { %v4142_v25 = vadd.f32 %v4131_v13, %v4126_v17  ;;  %v4128_v34 = vadd.f32 %v4119_v10, %v4112_v24 }
0x1875   :  { %v4135_v30 = vpop.permute.xlu0 %4134  ;;  %v4147_v46 = vpop.permute.xlu1 %4146 }
0x1876   :  { %v4158_v59 = vadd.f32 %v4147_v46, %v4142_v25  ;;  %v4144_v35 = vadd.f32 %v4135_v30, %v4128_v34 }
0x1878   :  { %v4162_v23 = vmul.f32 0.11111111, %v4158_v59 }
0x1879   :  { %v4151_v36 = vpop.permute.xlu0 %4150  ;;  %v4037_v38 = vpop.permute.xlu1 %4036 }
0x187a   :  { %v4160_v40 = vadd.f32 %v4151_v36, %v4144_v35  ;;  %7770 = vmatprep.mubr.msk.f32.mxu0 %vm2998_vm8, %v4162_v23  ;;  %v4047_v57 = vadd.f32 %v4037_v38, %v9709_v27  ;;  %v4360_v38 = vld [vmem:[%s10719_s1 + $0xe8] sm:$0xff] }
0x187c   :  { %v4164_v21 = vmul.f32 0.11111111, %v4160_v40 }
0x187d   :  { %v4041_v42 = vpop.permute.xlu0 %4040  ;;  %v4053_v52 = vpop.permute.xlu1 %4052 }
0x187e   :  { %7783 = vmatprep.mubr.msk.f32.mxu1 %vm2998_vm8, %v4164_v21  ;;  %v4063_v4 = vadd.f32 %v4053_v52, %v4047_v57  ;;  %v4049_v31 = vadd.f32 %v4041_v42, %v9715_v39 }
0x1881   :  { %v4057_v45 = vpop.permute.xlu0 %4056  ;;  %v4069_v48 = vpop.permute.xlu1 %4068 }
0x1882   :  { %v4079_v12 = vadd.f32 %v4069_v48, %v4063_v4  ;;  %v4065_v2 = vadd.f32 %v4057_v45, %v4049_v31 }
0x1885   :  { %v4073_v53 = vpop.permute.xlu0 %4072  ;;  %v4085_v54 = vpop.permute.xlu1 %4084 }
0x1886   :  { %v4095_v3 = vadd.f32 %v4085_v54, %v4079_v12  ;;  %v4081_v26 = vadd.f32 %v4073_v53, %v4065_v2 }
0x1889   :  { %v4089_v0 = vpop.permute.xlu0 %4088  ;;  %v4101_v62 = vpop.permute.xlu1 %4100 }
0x188a   :  { %v4111_v32 = vadd.f32 %v4101_v62, %v4095_v3  ;;  %v4097_v37 = vadd.f32 %v4089_v0, %v4081_v26 }
0x188d   :  { %v4105_v51 = vpop.permute.xlu0 %4104  ;;  %v4117_v14 = vpop.permute.xlu1 %4116 }
0x188e   :  { %v4127_v41 = vadd.f32 %v4117_v14, %v4111_v32  ;;  %v4113_v49 = vadd.f32 %v4105_v51, %v4097_v37 }
0x1891   :  { %v4121_v28 = vpop.permute.xlu0 %4120  ;;  %v4133_v63 = vpop.permute.xlu1 %4132 }
0x1892   :  { %v4143_v50 = vadd.f32 %v4133_v63, %v4127_v41  ;;  %v4129_v33 = vadd.f32 %v4121_v28, %v4113_v49 }
0x1895   :  { %v4137_v56 = vpop.permute.xlu0 %4136  ;;  %v4149_v27 = vpop.permute.xlu1 %4148 }
0x1896   :  { %v4159_v8 = vadd.f32 %v4149_v27, %v4143_v50  ;;  %v4145_v29 = vadd.f32 %v4137_v56, %v4129_v33 }
0x1898   :  { %v4163_v18 = vmul.f32 0.11111111, %v4159_v8 }
0x1899   :  { %v4153_v39 = vpop.permute.xlu0 %4152 }
0x189a   :  { %v4161_v6 = vadd.f32 %v4153_v39, %v4145_v29  ;;  %7771 = vmatmul.mubr.msk.f32.vlgmr.msra.gmra.mxu0 %vm2998_vm8, %v4163_v18 }
0x189b   :  { %7402 = vmatprep.mubr.msk.f32.mxu0 %vm1564_vm2, %v4360_v38 }
0x189c   :  { %v4165_v7 = vmul.f32 0.11111111, %v4161_v6 }
0x189e   :  { %7784 = vmatmul.mubr.msk.f32.vlgmr.msra.gmra.mxu1 %vm2998_vm8, %v4165_v7 }
0x189f   :  { %7404 = vmatprep.mubr.msk.f32.mxu1 %vm1564_vm2, %v4360_v38 }
0x195a   :  { %v9782_v9 = vpop.f32.mrf.mxu0 }
0x195b   :  { %4340 = vrot.lane.b32.xlu1 %v9782_v9, %s7996_s19 }
0x195c   :  { %v9786_v20 = vpop.f32.mrf.mxu0 }
0x195e   :  { %v9788_v16 = vpop.f32.mrf.mxu1 }
0x195f   :  { %4352 = vrot.lane.b32.xlu0 %v9788_v16, %s7996_s19  ;;  %4338 = vrot.lane.b32.xlu1 %v9786_v20, %s7996_s19 }
0x1960   :  { %v9794_v22 = vpop.f32.mrf.mxu1 }
0x1963   :  { %4350 = vrot.lane.b32.xlu0 %v9794_v22, %s7996_s19 }
0x19cd   :  { %v4341_v11 = vpop.permute.xlu1 %4340 }
0x19ce   :  { %4347 = vst.msk [vmem:[#allocation5 + $0x8] sm:$0x3] %vm4346_vm11, %v4341_v11 }
0x19d1   :  { %v4353_v43 = vpop.permute.xlu0 %4352  ;;  %v4339_v44 = vpop.permute.xlu1 %4338 }
0x19d2   :  { %4358 = vst.msk [vmem:[#allocation5 + $0x18] sm:$0x3] %vm4346_vm11, %v4353_v43 }
0x19d3   :  { %4345 = vst.msk [vmem:[#allocation5] sm:$0xff] %vm4344_vm12, %v4339_v44 }
0x19d5   :  { %v4368_v47 = vld [vmem:[#allocation5 + $0x8] sm:$0x3]  ;;  %v4351_v55 = vpop.permute.xlu0 %4350 }
0x19d6   :  { %v4521_v60 = vld [vmem:[#allocation5 + $0x8] sm:$0x3]  ;;  %4357 = vst.msk [vmem:[#allocation5 + $0x10] sm:$0xff] %vm4344_vm12, %v4351_v55 }
0x19d7   :  { %4530 = vrot.lane.b32.xlu1 %v4521_v60, %s7997_s12  ;;  %4373 = vst.msk [vmem:[#allocation2 + $0x18] sm:$0x3] %vm4372_vm13, %v4368_v47  ;;  %v4497_v61 = vld [vmem:[#allocation5 + $0x8] sm:$0x3] }
0x19d8   :  { %v4473_v15 = vld [vmem:[#allocation5 + $0x8] sm:$0x3] }
0x19d9   :  { %v4370_v19 = vld [vmem:[#allocation5 + $0x18] sm:$0x3]  ;;  %v4449_v24 = vld [vmem:[#allocation5 + $0x8] sm:$0x3] }
0x19da   :  { %v4367_v1 = vld [vmem:[#allocation5] sm:$0xff]  ;;  %v4523_v5 = vld [vmem:[#allocation5 + $0x18] sm:$0x3]  ;;  %4375 = vst.msk [vmem:[#allocation2 + $0x1c8] sm:$0x3] %vm4372_vm13, %v4370_v19 }
0x19db   :  { %4371 = vst.msk [vmem:[#allocation2] sm:$0xff] %vm1564_vm2, %v4367_v1  ;;  %4534 = vrot.lane.b32.xlu0 %v4523_v5, %s7997_s12  ;;  %4506 = vrot.lane.b32.xlu1 %v4497_v61, %s7988_s13  ;;  %v4499_v13 = vld [vmem:[#allocation5 + $0x18] sm:$0x3]  ;;  %v4425_v30 = vld [vmem:[#allocation5 + $0x8] sm:$0x3] }
0x19dc   :  { %v4475_v17 = vld [vmem:[#allocation5 + $0x18] sm:$0x3]  ;;  %v4401_v34 = vld [vmem:[#allocation5 + $0x8] sm:$0x3] }
0x19dd   :  { %v4369_v10 = vld [vmem:[#allocation5 + $0x10] sm:$0xff]  ;;  %v4451_v25 = vld [vmem:[#allocation5 + $0x18] sm:$0x3]  ;;  %v4377_v35 = vld [vmem:[#allocation5 + $0x8] sm:$0x3] }
0x19de   :  { %4374 = vst.msk [vmem:[#allocation2 + $0x1b0] sm:$0xff] %vm1564_vm2, %v4369_v10  ;;  %v4427_v46 = vld [vmem:[#allocation5 + $0x18] sm:$0x3]  ;;  %v4545_v36 = vld [vmem:[#allocation5 + $0x8] sm:$0x3] }
0x19df   :  { %4510 = vrot.lane.b32.xlu0 %v4499_v13, %s7988_s13  ;;  %4482 = vrot.lane.b32.xlu1 %v4473_v15, %s7990_s17  ;;  %v4403_v59 = vld [vmem:[#allocation5 + $0x18] sm:$0x3] }
0x19e0   :  { %v4379_v23 = vld [vmem:[#allocation5 + $0x18] sm:$0x3] }
0x19e1   :  { %v4547_v40 = vld [vmem:[#allocation5 + $0x18] sm:$0x3] }
0x19e2   :  { %v4569_v38 = vld [vmem:[#allocation2 + $0x18] sm:$0xff] }
0x19e3   :  { %4486 = vrot.lane.b32.xlu0 %v4475_v17, %s7990_s17  ;;  %4458 = vrot.lane.b32.xlu1 %v4449_v24, %s7998_s27 }
0x19e7   :  { %4462 = vrot.lane.b32.xlu0 %v4451_v25, %s7998_s27  ;;  %4434 = vrot.lane.b32.xlu1 %v4425_v30, %s7999_s28 }
0x19eb   :  { %4438 = vrot.lane.b32.xlu0 %v4427_v46, %s7999_s28  ;;  %4410 = vrot.lane.b32.xlu1 %v4401_v34, %s7970_s21 }
0x19ef   :  { %4414 = vrot.lane.b32.xlu0 %v4403_v59, %s7970_s21  ;;  %4386 = vrot.lane.b32.xlu1 %v4377_v35, %s7971_s30 }
0x19f3   :  { %4390 = vrot.lane.b32.xlu0 %v4379_v23, %s7971_s30  ;;  %4528 = vrot.lane.b32.xlu1 %v4367_v1, %s7997_s12 }
0x19f7   :  { %4532 = vrot.lane.b32.xlu0 %v4369_v10, %s7997_s12  ;;  %4504 = vrot.lane.b32.xlu1 %v4367_v1, %s7988_s13 }
0x19fb   :  { %4508 = vrot.lane.b32.xlu0 %v4369_v10, %s7988_s13  ;;  %4480 = vrot.lane.b32.xlu1 %v4367_v1, %s7990_s17 }
0x19ff   :  { %4484 = vrot.lane.b32.xlu0 %v4369_v10, %s7990_s17  ;;  %4456 = vrot.lane.b32.xlu1 %v4367_v1, %s7998_s27 }
0x1a03   :  { %4460 = vrot.lane.b32.xlu0 %v4369_v10, %s7998_s27  ;;  %4432 = vrot.lane.b32.xlu1 %v4367_v1, %s7999_s28 }
0x1a07   :  { %4436 = vrot.lane.b32.xlu0 %v4369_v10, %s7999_s28  ;;  %4408 = vrot.lane.b32.xlu1 %v4367_v1, %s7970_s21 }
0x1a0b   :  { %4412 = vrot.lane.b32.xlu0 %v4369_v10, %s7970_s21  ;;  %4384 = vrot.lane.b32.xlu1 %v4367_v1, %s7971_s30 }
0x1a0f   :  { %4388 = vrot.lane.b32.xlu0 %v4369_v10, %s7971_s30  ;;  %4554 = vrot.lane.b32.xlu1 %v4545_v36, %s7979_s14 }
0x1a13   :  { %4558 = vrot.lane.b32.xlu0 %v4547_v40, %s7979_s14  ;;  %4552 = vrot.lane.b32.xlu1 %v4367_v1, %s7979_s14 }
0x1a17   :  { %4556 = vrot.lane.b32.xlu0 %v4369_v10, %s7979_s14 }
0x1a49   :  { %v4531_v21 = vpop.permute.xlu1 %4530 }
0x1a4a   :  { %4541 = vst.msk [vmem:[#allocation2 + $0x168] sm:$0x3] %vm4372_vm13, %v4531_v21 }
0x1a4d   :  { %v4535_v42 = vpop.permute.xlu0 %4534  ;;  %v4507_v52 = vpop.permute.xlu1 %4506 }
0x1a4e   :  { %4543 = vst.msk [vmem:[#allocation2 + $0x318] sm:$0x3] %vm4372_vm13, %v4535_v42  ;;  %4517 = vst.msk [vmem:[#allocation2 + $0x138] sm:$0x3] %vm4372_vm13, %v4507_v52  ;;  %v4568_v42 = vld [vmem:[#allocation2] sm:$0xff] }
0x1a51   :  { %v4511_v45 = vpop.permute.xlu0 %4510  ;;  %v4483_v48 = vpop.permute.xlu1 %4482  ;;  %v4583_v53 = vld [vmem:[#allocation2 + $0x168] sm:$0xff] }
0x1a52   :  { %4519 = vst.msk [vmem:[#allocation2 + $0x2e8] sm:$0x3] %vm4372_vm13, %v4511_v45  ;;  %4493 = vst.msk [vmem:[#allocation2 + $0x108] sm:$0x3] %vm4372_vm13, %v4483_v48  ;;  %4593 = vmatpush1.msra.mxu0 %v4583_v53  ;;  %v4668_v48 = vld [vmem:[#allocation2 + $0x1c8] sm:$0xff]  ;;  %v4359_v53 = vld [vmem:[%s10719_s1 + $0xe0] sm:$0xff] }
0x1a53   :  { %4594 = vmatprep.subr.mxu0 %v9756_v58 }
0x1a55   :  { %v4487_v54 = vpop.permute.xlu0 %4486  ;;  %v4459_v57 = vpop.permute.xlu1 %4458  ;;  %v4682_v0 = vld [vmem:[#allocation2 + $0x318] sm:$0xff] }
0x1a56   :  { %4495 = vst.msk [vmem:[#allocation2 + $0x2b8] sm:$0x3] %vm4372_vm13, %v4487_v54  ;;  %4469 = vst.msk [vmem:[#allocation2 + $0xd8] sm:$0x3] %vm4372_vm13, %v4459_v57  ;;  %4686 = vmatpush1.msra.mxu1 %v4682_v0  ;;  %v4581_v41 = vld [vmem:[#allocation2 + $0x138] sm:$0xff]  ;;  %v4667_v57 = vld [vmem:[#allocation2 + $0x1b0] sm:$0xff] }
0x1a57   :  { %4687 = vmatprep.subr.mxu1 %v9756_v58  ;;  %v4362_v0 = vld [vmem:[%s10719_s1 + $0xf8] sm:$0x3] }
0x1a59   :  { %v4463_v62 = vpop.permute.xlu0 %4462  ;;  %v4435_v4 = vpop.permute.xlu1 %4434  ;;  %v4579_v33 = vld [vmem:[#allocation2 + $0x108] sm:$0xff] }
0x1a5a   :  { %4471 = vst.msk [vmem:[#allocation2 + $0x288] sm:$0x3] %vm4372_vm13, %v4463_v62  ;;  %4445 = vst.msk [vmem:[#allocation2 + $0xa8] sm:$0x3] %vm4372_vm13, %v4435_v4  ;;  %v4680_v8 = vld [vmem:[#allocation2 + $0x2e8] sm:$0xff] }
0x1a5b   :  { %v4361_v4 = vld [vmem:[%s10719_s1 + $0xf0] sm:$0x3] }
0x1a5d   :  { %v4439_v31 = vpop.permute.xlu0 %4438  ;;  %v4411_v12 = vpop.permute.xlu1 %4410  ;;  %v4577_v7 = vld [vmem:[#allocation2 + $0xd8] sm:$0xff] }
0x1a5e   :  { %4447 = vst.msk [vmem:[#allocation2 + $0x258] sm:$0x3] %vm4372_vm13, %v4439_v31  ;;  %4421 = vst.msk [vmem:[#allocation2 + $0x78] sm:$0x3] %vm4372_vm13, %v4411_v12  ;;  %v4678_v11 = vld [vmem:[#allocation2 + $0x2b8] sm:$0xff] }
0x1a61   :  { %v4415_v51 = vpop.permute.xlu0 %4414  ;;  %v4387_v14 = vpop.permute.xlu1 %4386  ;;  %v4575_v60 = vld [vmem:[#allocation2 + $0xa8] sm:$0xff] }
0x1a62   :  { %4423 = vst.msk [vmem:[#allocation2 + $0x228] sm:$0x3] %vm4372_vm13, %v4415_v51  ;;  %4397 = vst.msk [vmem:[#allocation2 + $0x48] sm:$0x3] %vm4372_vm13, %v4387_v14  ;;  %v4676_v61 = vld [vmem:[#allocation2 + $0x288] sm:$0xff] }
0x1a63   :  { %v9925_v51 = vld [vmem:[%s10721_s3 + $0x1fa] ss:$0 sm:$0xff] }
0x1a65   :  { %v4391_v2 = vpop.permute.xlu0 %4390  ;;  %v4529_v3 = vpop.permute.xlu1 %4528  ;;  %v4573_v13 = vld [vmem:[#allocation2 + $0x78] sm:$0xff] }
0x1a66   :  { %4399 = vst.msk [vmem:[#allocation2 + $0x1f8] sm:$0x3] %vm4372_vm13, %v4391_v2  ;;  %v4674_v15 = vld [vmem:[#allocation2 + $0x258] sm:$0xff] }
0x1a67   :  { %4540 = vst.msk [vmem:[#allocation2 + $0x150] sm:$0xff] %vm1564_vm2, %v4529_v3 }
0x1a69   :  { %v4533_v26 = vpop.permute.xlu0 %4532  ;;  %v4505_v32 = vpop.permute.xlu1 %4504  ;;  %v4571_v46 = vld [vmem:[#allocation2 + $0x48] sm:$0xff] }
0x1a6a   :  { %4542 = vst.msk [vmem:[#allocation2 + $0x300] sm:$0xff] %vm1564_vm2, %v4533_v26  ;;  %4516 = vst.msk [vmem:[#allocation2 + $0x120] sm:$0xff] %vm1564_vm2, %v4505_v32  ;;  %v4672_v34 = vld [vmem:[#allocation2 + $0x228] sm:$0xff] }
0x1a6d   :  { %v4509_v28 = vpop.permute.xlu0 %4508  ;;  %v4481_v63 = vpop.permute.xlu1 %4480  ;;  %v4670_v40 = vld [vmem:[#allocation2 + $0x1f8] sm:$0xff] }
0x1a6e   :  { %v4582_v37 = vld [vmem:[#allocation2 + $0x150] sm:$0xff]  ;;  %4518 = vst.msk [vmem:[#allocation2 + $0x2d0] sm:$0xff] %vm1564_vm2, %v4509_v28  ;;  %4492 = vst.msk [vmem:[#allocation2 + $0xf0] sm:$0xff] %vm1564_vm2, %v4481_v63 }
0x1a6f   :  { %4595 = vmatpush1.msra.mxu0 %v4582_v37 }
0x1a70   :  { %4596 = vmatprep.subr.mxu0 %v9756_v58 }
0x1a71   :  { %4597 = vmatpush1.msra.mxu0 %v4581_v41  ;;  %v4485_v49 = vpop.permute.xlu0 %4484  ;;  %v4457_v50 = vpop.permute.xlu1 %4456  ;;  %v4580_v56 = vld [vmem:[#allocation2 + $0x120] sm:$0xff] }
0x1a72   :  { %4598 = vmatprep.subr.mxu0 %v9756_v58  ;;  %v4681_v27 = vld [vmem:[#allocation2 + $0x300] sm:$0xff]  ;;  %4494 = vst.msk [vmem:[#allocation2 + $0x2a0] sm:$0xff] %vm1564_vm2, %v4485_v49  ;;  %4468 = vst.msk [vmem:[#allocation2 + $0xc0] sm:$0xff] %vm1564_vm2, %v4457_v50 }
0x1a73   :  { %4599 = vmatpush1.msra.mxu0 %v4580_v56  ;;  %4688 = vmatpush1.msra.mxu1 %v4681_v27 }
0x1a74   :  { %4600 = vmatprep.subr.mxu0 %v9756_v58  ;;  %4689 = vmatprep.subr.mxu1 %v9756_v58 }
0x1a75   :  { %4601 = vmatpush1.msra.mxu0 %v4579_v33  ;;  %4690 = vmatpush1.msra.mxu1 %v4680_v8  ;;  %v4461_v29 = vpop.permute.xlu0 %4460  ;;  %v4433_v18 = vpop.permute.xlu1 %4432  ;;  %v4578_v39 = vld [vmem:[#allocation2 + $0xf0] sm:$0xff] }
0x1a76   :  { %4691 = vmatprep.subr.mxu1 %v9756_v58  ;;  %4602 = vmatprep.subr.mxu0 %v9756_v58  ;;  %v4679_v6 = vld [vmem:[#allocation2 + $0x2d0] sm:$0xff]  ;;  %4470 = vst.msk [vmem:[#allocation2 + $0x270] sm:$0xff] %vm1564_vm2, %v4461_v29  ;;  %4444 = vst.msk [vmem:[#allocation2 + $0x90] sm:$0xff] %vm1564_vm2, %v4433_v18 }
0x1a77   :  { %4603 = vmatpush1.msra.mxu0 %v4578_v39  ;;  %4692 = vmatpush1.msra.mxu1 %v4679_v6 }
0x1a78   :  { %4604 = vmatprep.subr.mxu0 %v9756_v58  ;;  %4693 = vmatprep.subr.mxu1 %v9756_v58 }
0x1a79   :  { %4605 = vmatpush1.msra.mxu0 %v4577_v7  ;;  %4694 = vmatpush1.msra.mxu1 %v4678_v11  ;;  %v4437_v43 = vpop.permute.xlu0 %4436  ;;  %v4409_v44 = vpop.permute.xlu1 %4408  ;;  %v4576_v47 = vld [vmem:[#allocation2 + $0xc0] sm:$0xff] }
0x1a7a   :  { %4695 = vmatprep.subr.mxu1 %v9756_v58  ;;  %4606 = vmatprep.subr.mxu0 %v9756_v58  ;;  %v4677_v55 = vld [vmem:[#allocation2 + $0x2a0] sm:$0xff]  ;;  %4446 = vst.msk [vmem:[#allocation2 + $0x240] sm:$0xff] %vm1564_vm2, %v4437_v43  ;;  %4420 = vst.msk [vmem:[#allocation2 + $0x60] sm:$0xff] %vm1564_vm2, %v4409_v44 }
0x1a7b   :  { %4607 = vmatpush1.msra.mxu0 %v4576_v47  ;;  %4696 = vmatpush1.msra.mxu1 %v4677_v55 }
0x1a7c   :  { %4608 = vmatprep.subr.mxu0 %v9756_v58  ;;  %4697 = vmatprep.subr.mxu1 %v9756_v58 }
0x1a7d   :  { %4609 = vmatpush1.msra.mxu0 %v4575_v60  ;;  %4698 = vmatpush1.msra.mxu1 %v4676_v61  ;;  %v4413_v19 = vpop.permute.xlu0 %4412  ;;  %v4385_v1 = vpop.permute.xlu1 %4384  ;;  %v4574_v5 = vld [vmem:[#allocation2 + $0x90] sm:$0xff] }
0x1a7e   :  { %4699 = vmatprep.subr.mxu1 %v9756_v58  ;;  %4610 = vmatprep.subr.mxu0 %v9756_v58  ;;  %v4675_v10 = vld [vmem:[#allocation2 + $0x270] sm:$0xff]  ;;  %4422 = vst.msk [vmem:[#allocation2 + $0x210] sm:$0xff] %vm1564_vm2, %v4413_v19  ;;  %4396 = vst.msk [vmem:[#allocation2 + $0x30] sm:$0xff] %vm1564_vm2, %v4385_v1 }
0x1a7f   :  { %4611 = vmatpush1.msra.mxu0 %v4574_v5  ;;  %4700 = vmatpush1.msra.mxu1 %v4675_v10 }
0x1a80   :  { %4612 = vmatprep.subr.mxu0 %v9756_v58  ;;  %4701 = vmatprep.subr.mxu1 %v9756_v58 }
0x1a81   :  { %4613 = vmatpush1.msra.mxu0 %v4573_v13  ;;  %4702 = vmatpush1.msra.mxu1 %v4674_v15  ;;  %v4389_v17 = vpop.permute.xlu0 %4388  ;;  %v4555_v24 = vpop.permute.xlu1 %4554  ;;  %v4572_v25 = vld [vmem:[#allocation2 + $0x60] sm:$0xff] }
0x1a82   :  { %4703 = vmatprep.subr.mxu1 %v9756_v58  ;;  %4614 = vmatprep.subr.mxu0 %v9756_v58  ;;  %v4673_v30 = vld [vmem:[#allocation2 + $0x240] sm:$0xff]  ;;  %4398 = vst.msk [vmem:[#allocation2 + $0x1e0] sm:$0xff] %vm1564_vm2, %v4389_v17 }
0x1a83   :  { %4565 = vst.msk [vmem:[#allocation2 + $0x198] sm:$0x3] %vm4372_vm13, %v4555_v24  ;;  %4615 = vmatpush1.msra.mxu0 %v4572_v25  ;;  %4704 = vmatpush1.msra.mxu1 %v4673_v30 }
0x1a84   :  { %4616 = vmatprep.subr.mxu0 %v9756_v58  ;;  %4705 = vmatprep.subr.mxu1 %v9756_v58 }
0x1a85   :  { %4617 = vmatpush1.msra.mxu0 %v4571_v46  ;;  %4706 = vmatpush1.msra.mxu1 %v4672_v34  ;;  %v4559_v59 = vpop.permute.xlu0 %4558  ;;  %v4553_v35 = vpop.permute.xlu1 %4552  ;;  %v4570_v23 = vld [vmem:[#allocation2 + $0x30] sm:$0xff]  ;;  %v8000_v34 = vmov 9  }
0x1a86   :  { %4707 = vmatprep.subr.mxu1 %v9756_v58  ;;  %4618 = vmatprep.subr.mxu0 %v9756_v58  ;;  %v4671_v36 = vld [vmem:[#allocation2 + $0x210] sm:$0xff]  ;;  %4567 = vst.msk [vmem:[#allocation2 + $0x348] sm:$0x3] %vm4372_vm13, %v4559_v59 }
0x1a87   :  { %4564 = vst.msk [vmem:[#allocation2 + $0x180] sm:$0xff] %vm1564_vm2, %v4553_v35  ;;  %4619 = vmatpush1.msra.mxu0 %v4570_v23  ;;  %4708 = vmatpush1.msra.mxu1 %v4671_v36 }
0x1a88   :  { %4620 = vmatprep.subr.mxu0 %v9756_v58  ;;  %4709 = vmatprep.subr.mxu1 %v9756_v58 }
0x1a89   :  { %4621 = vmatpush1.msra.mxu0 %v4569_v38  ;;  %4710 = vmatpush1.msra.mxu1 %v4670_v40  ;;  %v4557_v21 = vpop.permute.xlu0 %4556  ;;  %v4669_v52 = vld [vmem:[#allocation2 + $0x1e0] sm:$0xff] }
0x1a8a   :  { %4711 = vmatprep.subr.mxu1 %v9756_v58  ;;  %4622 = vmatprep.subr.mxu0 %v9756_v58  ;;  %4566 = vst.msk [vmem:[#allocation2 + $0x330] sm:$0xff] %vm1564_vm2, %v4557_v21  ;;  %v4585_v45 = vld [vmem:[#allocation2 + $0x198] sm:$0xff] }
0x1a8b   :  { %4623 = vmatpush1.msra.mxu0 %v4568_v42  ;;  %4712 = vmatpush1.msra.mxu1 %v4669_v52 }
0x1a8c   :  { %4652 = vmatprep.subr.mxu0 %v9756_v58  ;;  %4713 = vmatprep.subr.mxu1 %v9756_v58 }
0x1a8d   :  { %4653 = vmatpush2.msra.mxu0 %v4585_v45  ;;  %4714 = vmatpush1.msra.mxu1 %v4668_v48  ;;  %v4684_v62 = vld [vmem:[#allocation2 + $0x348] sm:$0xff] }
0x1a8e   :  { %4654 = vmatprep.subr.mxu0 %v9756_v58  ;;  %4715 = vmatprep.subr.mxu1 %v9756_v58  ;;  %v4584_v54 = vld [vmem:[#allocation2 + $0x180] sm:$0xff]  ;;  %v4761_v48 = vld [vmem:[%s10720_s2 + $0x8] sm:$0x3] }
0x1a8f   :  { %4655 = vmatpush2.msra.mxu0 %v4584_v54  ;;  %4716 = vmatpush1.msra.mxu1 %v4667_v57  ;;  %v9949_v57 = vld [vmem:[%s10720_s2] sm:$0xff] }
0x1a90   :  { %4657 = vmatmul.mubr.f32.vlgmr.msra.gmra.mxu0 %v4359_v53  ;;  %4745 = vmatprep.subr.mxu1 %v9756_v58 }
0x1a91   :  { %4746 = vmatpush2.msra.mxu1 %v4684_v62  ;;  %7403 = vmatprep.mubr.msk.f32.mxu0 %vm1564_vm2, %v4362_v0  ;;  %v4683_v31 = vld [vmem:[#allocation2 + $0x330] sm:$0xff] }
0x1a92   :  { %4747 = vmatprep.subr.mxu1 %v9756_v58  ;;  %5105 = vmatprep.subr.mxu0 %v9756_v58 }
0x1a93   :  { %4748 = vmatpush2.msra.mxu1 %v4683_v31  ;;  %7884 = vset.pattern.permute.xlu0 %v8000_v34 }
0x1a94   :  { %4662 = vmatmul.mubr.f32.gmra.mxu0 %v4361_v4  ;;  %4750 = vmatmul.mubr.f32.vlgmr.msra.gmra.mxu1 %v4359_v53 }
0x1a95   :  { %7405 = vmatprep.mubr.msk.f32.mxu1 %vm1564_vm2, %v4362_v0  ;;  %5198 = vmatprep.subr.mxu1 %v9756_v58 }
0x1a96   :  { %7885 = vset.pattern.permute.xlu1 %v8000_v34 }
0x1a98   :  { %4755 = vmatmul.mubr.f32.gmra.mxu1 %v4361_v4  ;;  %v8001_v4 = vmov 17  }
0x1b50   :  { %v4658_v12 = vpop.f32.mrf.mxu0 }
0x1b51   :  { %v4767_v50 = vmul.f32 %v9925_v51, %v4658_v12 }
0x1b52   :  { %v4660_v14 = vpop.f32.mrf.mxu0 }
0x1b53   :  { %v4769_v33 = vsel %vm1564_vm2, %v4767_v50, 0.0 }
0x1b54   :  { %v4663_v2 = vpop.f32.mrf.mxu0  ;;  %v4751_v3 = vpop.f32.mrf.mxu1 }
0x1b55   :  { %v4768_v26 = vmul.f32 %v9925_v51, %v4663_v2  ;;  %v4777_v63 = vmul.f32 %v9925_v51, %v4751_v3 }
0x1b56   :  { %v4753_v32 = vpop.f32.mrf.mxu1  ;;  %v4665_v28 = vpop.f32.mrf.mxu0 }
0x1b57   :  { %v4772_v37 = vsel %vm4372_vm13, %v4768_v26, 0.0  ;;  %v4779_v27 = vsel %vm1564_vm2, %v4777_v63, 0.0 }
0x1b58   :  { %v4756_v41 = vpop.f32.mrf.mxu1  ;;  %4773 = vadd.xlane.f32.xlu1 %v4772_v37 }
0x1b59   :  { %v4778_v58 = vmul.f32 %v9925_v51, %v4756_v41 }
0x1b5a   :  { %v4758_v49 = vpop.f32.mrf.mxu1 }
0x1b5b   :  { %v4782_v56 = vsel %vm4372_vm13, %v4778_v58, 0.0 }
0x1b5c   :  { %4783 = vadd.xlane.f32.xlu0 %v4782_v56  ;;  %4780 = vadd.xlane.f32.xlu1 %v4779_v27 }
0x1b60   :  { %4770 = vadd.xlane.f32.xlu0 %v4769_v33 }
0x1be1   :  { %v4774_v8 = vpop.xlane.xlu1 %4773 }
0x1be5   :  { %v4784_v29 = vpop.xlane.xlu0 %4783  ;;  %v4781_v6 = vpop.xlane.xlu1 %4780 }
0x1be6   :  { %v4786_v18 = vadd.f32 %v4784_v29, %v4774_v8 }
0x1be8   :  { %v4788_v39 = vmul.f32 0.125, %v4786_v18 }
0x1be9   :  { %v4771_v7 = vpop.xlane.xlu0 %4770 }
0x1bea   :  { %v4790_v11 = vsub.f32 %v4663_v2, %v4788_v39  ;;  %v4794_v43 = vsub.f32 %v4756_v41, %v4788_v39  ;;  %v4785_v44 = vadd.f32 %v4781_v6, %v4771_v7 }
0x1bec   :  { %v4787_v47 = vmul.f32 0.125, %v4785_v44  ;;  %v4796_v55 = vmul.f32 %v9925_v51, %v4794_v43  ;;  %v4792_v60 = vmul.f32 %v9925_v51, %v4790_v11 }
0x1bee   :  { %v4789_v61 = vsub.f32 %v4658_v12, %v4787_v47  ;;  %v4793_v19 = vsub.f32 %v4751_v3, %v4787_v47  ;;  %v4808_v1 = vmul.f32 %v4796_v55, %v4796_v55  ;;  %v4798_v5 = vmul.f32 %v4792_v60, %v4792_v60 }
0x1bf0   :  { %v4812_v10 = vsel %vm4372_vm13, %v4808_v1, 0.0  ;;  %v4802_v13 = vsel %vm4372_vm13, %v4798_v5, 0.0  ;;  %v4795_v15 = vmul.f32 %v9925_v51, %v4793_v19  ;;  %v4791_v17 = vmul.f32 %v9925_v51, %v4789_v61 }
0x1bf1   :  { %4813 = vadd.xlane.f32.xlu1 %v4812_v10  ;;  %4803 = vadd.xlane.f32.xlu0 %v4802_v13 }
0x1bf2   :  { %v4807_v24 = vmul.f32 %v4795_v15, %v4795_v15  ;;  %v4797_v25 = vmul.f32 %v4791_v17, %v4791_v17 }
0x1bf4   :  { %v4809_v30 = vsel %vm1564_vm2, %v4807_v24, 0.0  ;;  %v4799_v46 = vsel %vm1564_vm2, %v4797_v25, 0.0 }
0x1bf5   :  { %4810 = vadd.xlane.f32.xlu1 %v4809_v30  ;;  %4800 = vadd.xlane.f32.xlu0 %v4799_v46 }
0x1c7a   :  { %v4804_v59 = vpop.xlane.xlu0 %4803  ;;  %v4814_v35 = vpop.xlane.xlu1 %4813 }
0x1c7b   :  { %v4816_v23 = vadd.f32 %v4814_v35, %v4804_v59  ;;  %v4364_v35 = vld [vmem:[%s10719_s1 + $0x108] sm:$0xff] }
0x1c7c   :  { %7407 = vmatprep.mubr.msk.f32.mxu0 %vm1564_vm2, %v4364_v35  ;;  %7409 = vmatprep.mubr.msk.f32.mxu1 %vm1564_vm2, %v4364_v35 }
0x1c7d   :  { %v4818_v36 = vmul.f32 0.125, %v4816_v23 }
0x1c7e   :  { %v4801_v38 = vpop.xlane.xlu0 %4800  ;;  %v4811_v40 = vpop.xlane.xlu1 %4810 }
0x1c7f   :  { %v4820_v21 = vadd.f32 1e-05, %v4818_v36  ;;  %v4815_v42 = vadd.f32 %v4811_v40, %v4801_v38 }
0x1c81   :  { %7937 = vrsqrt.f32 %v4820_v21  ;;  %v4817_v52 = vmul.f32 0.125, %v4815_v42 }
0x1c83   :  { %v4819_v45 = vadd.f32 1e-05, %v4817_v52 }
0x1c85   :  { %7939 = vrsqrt.f32 %v4819_v45 }
0x1c8e   :  { %v7938_v53 = vpop.eup %7937 }
0x1c8f   :  { %v4824_v54 = vmul.f32 %v7938_v53, %v4761_v48 }
0x1c91   :  { %4832 = vperm.xlu0 %7884, %v4824_v54  }
0x1c92   :  { %v7940_v0 = vpop.eup %7939 }
0x1c93   :  { %v4823_v62 = vmul.f32 %v7940_v0, %v9949_v57 }
0x1c95   :  { %4827 = vperm.xlu1 %7885, %v4823_v62  }
0x1c99   :  { %7886 = vset.pattern.permute.xlu1 %v8001_v4 }
0x1c9a   :  { %4844 = vperm.xlu1 %7886, %v4761_v48  }
0x1c9e   :  { %4839 = vperm.xlu1 %7886, %v9949_v57  }
0x1d0c   :  { %v4833_v12 = vpop.permute.xlu0 %4832 }
0x1d0d   :  { %v4836_v2 = vmul.f32 %v4833_v12, %v4792_v60  ;;  %v4854_v63 = vmul.f32 %v4833_v12, %v4796_v55 }
0x1d10   :  { %v4828_v31 = vpop.permute.xlu1 %4827 }
0x1d11   :  { %v4835_v3 = vmul.f32 %v4828_v31, %v4791_v17  ;;  %v4853_v50 = vmul.f32 %v4828_v31, %v4795_v15 }
0x1d15   :  { %v4845_v14 = vpop.permute.xlu1 %4844 }
0x1d16   :  { %v4848_v32 = vadd.f32 %v4845_v14, %v4836_v2  ;;  %v4856_v58 = vadd.f32 %v4854_v63, %v4845_v14  ;;  %v10021_v2 = vld [vmem:[#allocation2 + $0xe0] sm:$0xff] }
0x1d17   :  { %147 = vst.msk [vmem:[#allocation6 + $0x8] sm:$0x3] %vm146_vm14, %v10021_v2  ;;  %149 = vst.msk [vmem:[#allocation6 + $0x18] sm:$0x3] %vm146_vm14, %v10021_v2 }
0x1d18   :  { %v4850_v41 = vmax.f32 %v4848_v32, 0.0  ;;  %v4858_v27 = vmax.f32 %v4856_v58, 0.0  ;;  %145 = vst.msk [vmem:[#allocation6] sm:$0xff] %vm144_vm15, %v10021_v2  ;;  %148 = vst.msk [vmem:[#allocation6 + $0x10] sm:$0xff] %vm144_vm15, %v10021_v2 }
0x1d19   :  { %v4840_v26 = vpop.permute.xlu1 %4839 }
0x1d1a   :  { %v4847_v28 = vadd.f32 %v4840_v26, %v4835_v3  ;;  %v4852_v56 = vmul.f32 %v9925_v51, %v4850_v41  ;;  %v4855_v33 = vadd.f32 %v4853_v50, %v4840_v26  ;;  %v4860_v8 = vmul.f32 %v9925_v51, %v4858_v27 }
0x1d1c   :  { %v4849_v37 = vmax.f32 %v4847_v28, 0.0  ;;  %v4857_v29 = vmax.f32 %v4855_v33, 0.0 }
0x1d1e   :  { %v4851_v49 = vmul.f32 %v9925_v51, %v4849_v37  ;;  %v4859_v18 = vmul.f32 %v9925_v51, %v4857_v29 }
0x1d20   :  { %4863 = vrot.lane.b32.xlu1 %v4851_v49, %s7996_s19 }
0x1d24   :  { %4865 = vrot.lane.b32.xlu1 %v4852_v56, %s7996_s19 }
0x1d28   :  { %4875 = vrot.lane.b32.xlu1 %v4860_v8, %s7996_s19 }
0x1d2c   :  { %4873 = vrot.lane.b32.xlu1 %v4859_v18, %s7996_s19 }
0x1d92   :  { %v4864_v39 = vpop.permute.xlu1 %4863 }
0x1d93   :  { %4869 = vst.msk [vmem:[#allocation5] sm:$0xff] %vm4344_vm12, %v4864_v39 }
0x1d96   :  { %v4866_v6 = vpop.permute.xlu1 %4865 }
0x1d97   :  { %4870 = vst.msk [vmem:[#allocation5 + $0x8] sm:$0x3] %vm4346_vm11, %v4866_v6 }
0x1d9a   :  { %v4876_v7 = vpop.permute.xlu1 %4875  ;;  %v5033_v11 = vld [vmem:[#allocation5] sm:$0xff] }
0x1d9b   :  { %4880 = vst.msk [vmem:[#allocation5 + $0x18] sm:$0x3] %vm4346_vm11, %v4876_v7  ;;  %5041 = vrot.lane.b32.xlu0 %v5033_v11, %s7997_s12 }
0x1d9c   :  { %4885 = vst.msk [vmem:[#allocation2] sm:$0xff] %vm1564_vm2, %v5033_v11 }
0x1d9e   :  { %v4874_v43 = vpop.permute.xlu1 %4873  ;;  %v4882_v44 = vld [vmem:[#allocation5 + $0x8] sm:$0x3] }
0x1d9f   :  { %4879 = vst.msk [vmem:[#allocation5 + $0x10] sm:$0xff] %vm4344_vm12, %v4874_v43  ;;  %5017 = vrot.lane.b32.xlu0 %v5033_v11, %s7988_s13  ;;  %v5034_v60 = vld [vmem:[#allocation5 + $0x8] sm:$0x3] }
0x1da0   :  { %4886 = vst.msk [vmem:[#allocation2 + $0x18] sm:$0x3] %vm4372_vm13, %v4882_v44  ;;  %v5010_v61 = vld [vmem:[#allocation5 + $0x8] sm:$0x3] }
0x1da1   :  { %v4986_v19 = vld [vmem:[#allocation5 + $0x8] sm:$0x3] }
0x1da2   :  { %v4884_v47 = vld [vmem:[#allocation5 + $0x18] sm:$0x3]  ;;  %v4962_v1 = vld [vmem:[#allocation5 + $0x8] sm:$0x3] }
0x1da3   :  { %4993 = vrot.lane.b32.xlu0 %v5033_v11, %s7990_s17  ;;  %4888 = vst.msk [vmem:[#allocation2 + $0x1c8] sm:$0x3] %vm4372_vm13, %v4884_v47  ;;  %v5036_v5 = vld [vmem:[#allocation5 + $0x18] sm:$0x3]  ;;  %v4938_v10 = vld [vmem:[#allocation5 + $0x8] sm:$0x3] }
0x1da4   :  { %v5012_v13 = vld [vmem:[#allocation5 + $0x18] sm:$0x3]  ;;  %v4914_v15 = vld [vmem:[#allocation5 + $0x8] sm:$0x3]  ;;  %v5081_v35 = vld [vmem:[#allocation2] sm:$0xff] }
0x1da5   :  { %v4988_v17 = vld [vmem:[#allocation5 + $0x18] sm:$0x3]  ;;  %v4890_v24 = vld [vmem:[#allocation5 + $0x8] sm:$0x3] }
0x1da6   :  { %v5035_v55 = vld [vmem:[#allocation5 + $0x10] sm:$0xff]  ;;  %v4964_v25 = vld [vmem:[#allocation5 + $0x18] sm:$0x3]  ;;  %v5058_v46 = vld [vmem:[#allocation5 + $0x8] sm:$0x3] }
0x1da7   :  { %4969 = vrot.lane.b32.xlu0 %v5033_v11, %s7998_s27  ;;  %5045 = vrot.lane.b32.xlu1 %v5035_v55, %s7997_s12  ;;  %4887 = vst.msk [vmem:[#allocation2 + $0x1b0] sm:$0xff] %vm1564_vm2, %v5035_v55  ;;  %v4940_v30 = vld [vmem:[#allocation5 + $0x18] sm:$0x3] }
0x1da8   :  { %v4916_v34 = vld [vmem:[#allocation5 + $0x18] sm:$0x3] }
0x1da9   :  { %v4892_v59 = vld [vmem:[#allocation5 + $0x18] sm:$0x3] }
0x1daa   :  { %v5060_v23 = vld [vmem:[#allocation5 + $0x18] sm:$0x3] }
0x1dab   :  { %4945 = vrot.lane.b32.xlu0 %v5033_v11, %s7999_s28  ;;  %5021 = vrot.lane.b32.xlu1 %v5035_v55, %s7988_s13 }
0x1daf   :  { %4921 = vrot.lane.b32.xlu0 %v5033_v11, %s7970_s21  ;;  %4997 = vrot.lane.b32.xlu1 %v5035_v55, %s7990_s17 }
0x1db3   :  { %5043 = vrot.lane.b32.xlu0 %v5034_v60, %s7997_s12  ;;  %4973 = vrot.lane.b32.xlu1 %v5035_v55, %s7998_s27 }
0x1db7   :  { %5019 = vrot.lane.b32.xlu0 %v5010_v61, %s7988_s13  ;;  %4949 = vrot.lane.b32.xlu1 %v5035_v55, %s7999_s28 }
0x1dbb   :  { %4995 = vrot.lane.b32.xlu0 %v4986_v19, %s7990_s17  ;;  %4925 = vrot.lane.b32.xlu1 %v5035_v55, %s7970_s21 }
0x1dbf   :  { %4971 = vrot.lane.b32.xlu0 %v4962_v1, %s7998_s27  ;;  %5047 = vrot.lane.b32.xlu1 %v5036_v5, %s7997_s12 }
0x1dc3   :  { %4947 = vrot.lane.b32.xlu0 %v4938_v10, %s7999_s28  ;;  %5023 = vrot.lane.b32.xlu1 %v5012_v13, %s7988_s13 }
0x1dc7   :  { %4923 = vrot.lane.b32.xlu0 %v4914_v15, %s7970_s21  ;;  %4999 = vrot.lane.b32.xlu1 %v4988_v17, %s7990_s17 }
0x1dcb   :  { %4899 = vrot.lane.b32.xlu0 %v4890_v24, %s7971_s30  ;;  %4975 = vrot.lane.b32.xlu1 %v4964_v25, %s7998_s27 }
0x1dcf   :  { %4897 = vrot.lane.b32.xlu0 %v5033_v11, %s7971_s30  ;;  %4951 = vrot.lane.b32.xlu1 %v4940_v30, %s7999_s28 }
0x1dd3   :  { %5067 = vrot.lane.b32.xlu0 %v5058_v46, %s7979_s14  ;;  %4927 = vrot.lane.b32.xlu1 %v4916_v34, %s7970_s21  ;;  %v5082_v46 = vld [vmem:[#allocation2 + $0x18] sm:$0xff] }
0x1dd7   :  { %5065 = vrot.lane.b32.xlu0 %v5033_v11, %s7979_s14  ;;  %4903 = vrot.lane.b32.xlu1 %v4892_v59, %s7971_s30 }
0x1ddb   :  { %4901 = vrot.lane.b32.xlu1 %v5035_v55, %s7971_s30 }
0x1ddf   :  { %5071 = vrot.lane.b32.xlu1 %v5060_v23, %s7979_s14 }
0x1de3   :  { %5069 = vrot.lane.b32.xlu1 %v5035_v55, %s7979_s14 }
0x1e0d   :  { %v5042_v36 = vpop.permute.xlu0 %5041 }
0x1e0e   :  { %5053 = vst.msk [vmem:[#allocation2 + $0x150] sm:$0xff] %vm1564_vm2, %v5042_v36 }
0x1e11   :  { %v5018_v38 = vpop.permute.xlu0 %5017 }
0x1e12   :  { %5029 = vst.msk [vmem:[#allocation2 + $0x120] sm:$0xff] %vm1564_vm2, %v5018_v38 }
0x1e15   :  { %v4994_v40 = vpop.permute.xlu0 %4993  ;;  %v5095_v3 = vld [vmem:[#allocation2 + $0x150] sm:$0xff] }
0x1e16   :  { %5005 = vst.msk [vmem:[#allocation2 + $0xf0] sm:$0xff] %vm1564_vm2, %v4994_v40  ;;  %v4363_v40 = vld [vmem:[%s10719_s1 + $0x100] sm:$0xff] }
0x1e19   :  { %v4970_v21 = vpop.permute.xlu0 %4969  ;;  %v5046_v42 = vpop.permute.xlu1 %5045  ;;  %v5093_v63 = vld [vmem:[#allocation2 + $0x120] sm:$0xff] }
0x1e1a   :  { %4981 = vst.msk [vmem:[#allocation2 + $0xc0] sm:$0xff] %vm1564_vm2, %v4970_v21  ;;  %5055 = vst.msk [vmem:[#allocation2 + $0x300] sm:$0xff] %vm1564_vm2, %v5046_v42 }
0x1e1d   :  { %v4946_v52 = vpop.permute.xlu0 %4945  ;;  %v5022_v45 = vpop.permute.xlu1 %5021  ;;  %v5091_v49 = vld [vmem:[#allocation2 + $0xf0] sm:$0xff] }
0x1e1e   :  { %4957 = vst.msk [vmem:[#allocation2 + $0x90] sm:$0xff] %vm1564_vm2, %v4946_v52  ;;  %5031 = vst.msk [vmem:[#allocation2 + $0x2d0] sm:$0xff] %vm1564_vm2, %v5022_v45  ;;  %v4366_v45 = vld [vmem:[%s10719_s1 + $0x118] sm:$0x3] }
0x1e21   :  { %v4922_v48 = vpop.permute.xlu0 %4921  ;;  %v4998_v53 = vpop.permute.xlu1 %4997  ;;  %v5089_v8 = vld [vmem:[#allocation2 + $0xc0] sm:$0xff] }
0x1e22   :  { %4933 = vst.msk [vmem:[#allocation2 + $0x60] sm:$0xff] %vm1564_vm2, %v4922_v48  ;;  %5007 = vst.msk [vmem:[#allocation2 + $0x2a0] sm:$0xff] %vm1564_vm2, %v4998_v53  ;;  %v5194_v29 = vld [vmem:[#allocation2 + $0x300] sm:$0xff]  ;;  %v4365_v48 = vld [vmem:[%s10719_s1 + $0x110] sm:$0x3] }
0x1e25   :  { %v5044_v54 = vpop.permute.xlu0 %5043  ;;  %v4974_v0 = vpop.permute.xlu1 %4973  ;;  %v5087_v11 = vld [vmem:[#allocation2 + $0x90] sm:$0xff] }
0x1e26   :  { %5054 = vst.msk [vmem:[#allocation2 + $0x168] sm:$0x3] %vm4372_vm13, %v5044_v54  ;;  %v5192_v43 = vld [vmem:[#allocation2 + $0x2d0] sm:$0xff] }
0x1e27   :  { %4983 = vst.msk [vmem:[#allocation2 + $0x270] sm:$0xff] %vm1564_vm2, %v4974_v0  ;;  %v5181_v0 = vld [vmem:[#allocation2 + $0x1c8] sm:$0xff] }
0x1e29   :  { %v5020_v62 = vpop.permute.xlu0 %5019  ;;  %v4950_v4 = vpop.permute.xlu1 %4949  ;;  %v5085_v61 = vld [vmem:[#allocation2 + $0x60] sm:$0xff] }
0x1e2a   :  { %5030 = vst.msk [vmem:[#allocation2 + $0x138] sm:$0x3] %vm4372_vm13, %v5020_v62  ;;  %v5190_v19 = vld [vmem:[#allocation2 + $0x2a0] sm:$0xff]  ;;  %v5180_v62 = vld [vmem:[#allocation2 + $0x1b0] sm:$0xff] }
0x1e2b   :  { %4959 = vst.msk [vmem:[#allocation2 + $0x240] sm:$0xff] %vm1564_vm2, %v4950_v4 }
0x1e2d   :  { %v4996_v31 = vpop.permute.xlu0 %4995  ;;  %v4926_v12 = vpop.permute.xlu1 %4925  ;;  %v5096_v14 = vld [vmem:[#allocation2 + $0x168] sm:$0xff] }
0x1e2e   :  { %5006 = vst.msk [vmem:[#allocation2 + $0x108] sm:$0x3] %vm4372_vm13, %v4996_v31  ;;  %5106 = vmatpush1.msra.mxu0 %v5096_v14  ;;  %v5188_v15 = vld [vmem:[#allocation2 + $0x270] sm:$0xff] }
0x1e2f   :  { %4935 = vst.msk [vmem:[#allocation2 + $0x210] sm:$0xff] %vm1564_vm2, %v4926_v12  ;;  %5107 = vmatprep.subr.mxu0 %v10021_v2 }
0x1e30   :  { %5108 = vmatpush1.msra.mxu0 %v5095_v3 }
0x1e31   :  { %5109 = vmatprep.subr.mxu0 %v10021_v2  ;;  %v4972_v26 = vpop.permute.xlu0 %4971  ;;  %v5048_v32 = vpop.permute.xlu1 %5047  ;;  %v5094_v28 = vld [vmem:[#allocation2 + $0x138] sm:$0xff] }
0x1e32   :  { %4982 = vst.msk [vmem:[#allocation2 + $0xd8] sm:$0x3] %vm4372_vm13, %v4972_v26  ;;  %5056 = vst.msk [vmem:[#allocation2 + $0x318] sm:$0x3] %vm4372_vm13, %v5048_v32  ;;  %5110 = vmatpush1.msra.mxu0 %v5094_v28  ;;  %v5186_v34 = vld [vmem:[#allocation2 + $0x240] sm:$0xff] }
0x1e33   :  { %5111 = vmatprep.subr.mxu0 %v10021_v2 }
0x1e34   :  { %5112 = vmatpush1.msra.mxu0 %v5093_v63 }
0x1e35   :  { %5113 = vmatprep.subr.mxu0 %v10021_v2  ;;  %v4948_v37 = vpop.permute.xlu0 %4947  ;;  %v5024_v41 = vpop.permute.xlu1 %5023  ;;  %v5092_v58 = vld [vmem:[#allocation2 + $0x108] sm:$0xff] }
0x1e36   :  { %4958 = vst.msk [vmem:[#allocation2 + $0xa8] sm:$0x3] %vm4372_vm13, %v4948_v37  ;;  %5032 = vst.msk [vmem:[#allocation2 + $0x2e8] sm:$0x3] %vm4372_vm13, %v5024_v41  ;;  %5114 = vmatpush1.msra.mxu0 %v5092_v58  ;;  %v5184_v38 = vld [vmem:[#allocation2 + $0x210] sm:$0xff] }
0x1e37   :  { %5115 = vmatprep.subr.mxu0 %v10021_v2 }
0x1e38   :  { %5116 = vmatpush1.msra.mxu0 %v5091_v49 }
0x1e39   :  { %5117 = vmatprep.subr.mxu0 %v10021_v2  ;;  %v4924_v50 = vpop.permute.xlu0 %4923  ;;  %v5000_v56 = vpop.permute.xlu1 %4999  ;;  %v5090_v27 = vld [vmem:[#allocation2 + $0xd8] sm:$0xff] }
0x1e3a   :  { %v5195_v33 = vld [vmem:[#allocation2 + $0x318] sm:$0xff]  ;;  %4934 = vst.msk [vmem:[#allocation2 + $0x78] sm:$0x3] %vm4372_vm13, %v4924_v50  ;;  %5008 = vst.msk [vmem:[#allocation2 + $0x2b8] sm:$0x3] %vm4372_vm13, %v5000_v56  ;;  %5118 = vmatpush1.msra.mxu0 %v5090_v27 }
0x1e3b   :  { %5199 = vmatpush1.msra.mxu1 %v5195_v33  ;;  %5119 = vmatprep.subr.mxu0 %v10021_v2 }
0x1e3c   :  { %5200 = vmatprep.subr.mxu1 %v10021_v2  ;;  %5120 = vmatpush1.msra.mxu0 %v5089_v8 }
0x1e3d   :  { %5201 = vmatpush1.msra.mxu1 %v5194_v29  ;;  %5121 = vmatprep.subr.mxu0 %v10021_v2  ;;  %v4900_v18 = vpop.permute.xlu0 %4899  ;;  %v4976_v39 = vpop.permute.xlu1 %4975  ;;  %v5088_v6 = vld [vmem:[#allocation2 + $0xa8] sm:$0xff] }
0x1e3e   :  { %5202 = vmatprep.subr.mxu1 %v10021_v2  ;;  %v5193_v7 = vld [vmem:[#allocation2 + $0x2e8] sm:$0xff]  ;;  %4910 = vst.msk [vmem:[#allocation2 + $0x48] sm:$0x3] %vm4372_vm13, %v4900_v18  ;;  %4984 = vst.msk [vmem:[#allocation2 + $0x288] sm:$0x3] %vm4372_vm13, %v4976_v39  ;;  %5122 = vmatpush1.msra.mxu0 %v5088_v6 }
0x1e3f   :  { %5203 = vmatpush1.msra.mxu1 %v5193_v7  ;;  %5123 = vmatprep.subr.mxu0 %v10021_v2 }
0x1e40   :  { %5204 = vmatprep.subr.mxu1 %v10021_v2  ;;  %5124 = vmatpush1.msra.mxu0 %v5087_v11 }
0x1e41   :  { %5205 = vmatpush1.msra.mxu1 %v5192_v43  ;;  %5125 = vmatprep.subr.mxu0 %v10021_v2  ;;  %v4898_v44 = vpop.permute.xlu0 %4897  ;;  %v4952_v47 = vpop.permute.xlu1 %4951  ;;  %v5086_v55 = vld [vmem:[#allocation2 + $0x78] sm:$0xff] }
0x1e42   :  { %5206 = vmatprep.subr.mxu1 %v10021_v2  ;;  %v5191_v60 = vld [vmem:[#allocation2 + $0x2b8] sm:$0xff]  ;;  %4909 = vst.msk [vmem:[#allocation2 + $0x30] sm:$0xff] %vm1564_vm2, %v4898_v44  ;;  %5126 = vmatpush1.msra.mxu0 %v5086_v55 }
0x1e43   :  { %4960 = vst.msk [vmem:[#allocation2 + $0x258] sm:$0x3] %vm4372_vm13, %v4952_v47  ;;  %5207 = vmatpush1.msra.mxu1 %v5191_v60  ;;  %5127 = vmatprep.subr.mxu0 %v10021_v2 }
0x1e44   :  { %5208 = vmatprep.subr.mxu1 %v10021_v2  ;;  %5128 = vmatpush1.msra.mxu0 %v5085_v61 }
0x1e45   :  { %5209 = vmatpush1.msra.mxu1 %v5190_v19  ;;  %5129 = vmatprep.subr.mxu0 %v10021_v2  ;;  %v5068_v1 = vpop.permute.xlu0 %5067  ;;  %v4928_v5 = vpop.permute.xlu1 %4927  ;;  %v5084_v10 = vld [vmem:[#allocation2 + $0x48] sm:$0xff] }
0x1e46   :  { %5210 = vmatprep.subr.mxu1 %v10021_v2  ;;  %v5189_v13 = vld [vmem:[#allocation2 + $0x288] sm:$0xff]  ;;  %5078 = vst.msk [vmem:[#allocation2 + $0x198] sm:$0x3] %vm4372_vm13, %v5068_v1  ;;  %4936 = vst.msk [vmem:[#allocation2 + $0x228] sm:$0x3] %vm4372_vm13, %v4928_v5  ;;  %5130 = vmatpush1.msra.mxu0 %v5084_v10 }
0x1e47   :  { %5211 = vmatpush1.msra.mxu1 %v5189_v13  ;;  %5131 = vmatprep.subr.mxu0 %v10021_v2 }
0x1e48   :  { %5212 = vmatprep.subr.mxu1 %v10021_v2 }
0x1e49   :  { %5213 = vmatpush1.msra.mxu1 %v5188_v15  ;;  %v5066_v17 = vpop.permute.xlu0 %5065  ;;  %v4904_v24 = vpop.permute.xlu1 %4903  ;;  %v5083_v25 = vld [vmem:[#allocation2 + $0x30] sm:$0xff] }
0x1e4a   :  { %5214 = vmatprep.subr.mxu1 %v10021_v2  ;;  %v5187_v30 = vld [vmem:[#allocation2 + $0x258] sm:$0xff]  ;;  %5077 = vst.msk [vmem:[#allocation2 + $0x180] sm:$0xff] %vm1564_vm2, %v5066_v17  ;;  %5132 = vmatpush1.msra.mxu0 %v5083_v25 }
0x1e4b   :  { %4912 = vst.msk [vmem:[#allocation2 + $0x1f8] sm:$0x3] %vm4372_vm13, %v4904_v24  ;;  %5215 = vmatpush1.msra.mxu1 %v5187_v30  ;;  %5133 = vmatprep.subr.mxu0 %v10021_v2 }
0x1e4c   :  { %5216 = vmatprep.subr.mxu1 %v10021_v2  ;;  %5134 = vmatpush1.msra.mxu0 %v5082_v46 }
0x1e4d   :  { %5217 = vmatpush1.msra.mxu1 %v5186_v34  ;;  %5135 = vmatprep.subr.mxu0 %v10021_v2  ;;  %v4902_v59 = vpop.permute.xlu1 %4901  ;;  %v5185_v23 = vld [vmem:[#allocation2 + $0x228] sm:$0xff]  ;;  %v5098_v36 = vld [vmem:[#allocation2 + $0x198] sm:$0xff] }
0x1e4e   :  { %5218 = vmatprep.subr.mxu1 %v10021_v2  ;;  %4911 = vst.msk [vmem:[#allocation2 + $0x1e0] sm:$0xff] %vm1564_vm2, %v4902_v59  ;;  %5136 = vmatpush1.msra.mxu0 %v5081_v35  ;;  %v8002_v59 = vmov 10  }
0x1e4f   :  { %5219 = vmatpush1.msra.mxu1 %v5185_v23  ;;  %5165 = vmatprep.subr.mxu0 %v10021_v2 }
0x1e50   :  { %5220 = vmatprep.subr.mxu1 %v10021_v2  ;;  %5166 = vmatpush2.msra.mxu0 %v5098_v36 }
0x1e51   :  { %5221 = vmatpush1.msra.mxu1 %v5184_v38  ;;  %5167 = vmatprep.subr.mxu0 %v10021_v2  ;;  %v5072_v21 = vpop.permute.xlu1 %5071  ;;  %v5097_v42 = vld [vmem:[#allocation2 + $0x180] sm:$0xff] }
0x1e52   :  { %5222 = vmatprep.subr.mxu1 %v10021_v2  ;;  %v5183_v52 = vld [vmem:[#allocation2 + $0x1f8] sm:$0xff]  ;;  %5080 = vst.msk [vmem:[#allocation2 + $0x348] sm:$0x3] %vm4372_vm13, %v5072_v21  ;;  %5168 = vmatpush2.msra.mxu0 %v5097_v42 }
0x1e53   :  { %5223 = vmatpush1.msra.mxu1 %v5183_v52  ;;  %5170 = vmatmul.mubr.f32.vlgmr.msra.gmra.mxu0 %v4363_v40 }
0x1e54   :  { %5224 = vmatprep.subr.mxu1 %v10021_v2  ;;  %7408 = vmatprep.mubr.msk.f32.mxu0 %vm1564_vm2, %v4366_v45 }
0x1e55   :  { %v5070_v53 = vpop.permute.xlu1 %5069  ;;  %v5182_v54 = vld [vmem:[#allocation2 + $0x1e0] sm:$0xff]  ;;  %7887 = vset.pattern.permute.xlu1 %v8002_v59  ;;  %7888 = vset.pattern.permute.xlu0 %v8002_v59 }
0x1e56   :  { %5079 = vst.msk [vmem:[#allocation2 + $0x330] sm:$0xff] %vm1564_vm2, %v5070_v53  ;;  %5225 = vmatpush1.msra.mxu1 %v5182_v54 }
0x1e57   :  { %5226 = vmatprep.subr.mxu1 %v10021_v2  ;;  %5175 = vmatmul.mubr.f32.gmra.mxu0 %v4365_v48 }
0x1e58   :  { %5227 = vmatpush1.msra.mxu1 %v5181_v0  ;;  %v5274_v0 = vld [vmem:[%s10720_s2 + $0x8] sm:$0x3] }
0x1e59   :  { %5228 = vmatprep.subr.mxu1 %v10021_v2  ;;  %v5197_v4 = vld [vmem:[#allocation2 + $0x348] sm:$0xff] }
0x1e5a   :  { %5229 = vmatpush1.msra.mxu1 %v5180_v62 }
0x1e5b   :  { %5258 = vmatprep.subr.mxu1 %v10021_v2 }
0x1e5c   :  { %5259 = vmatpush2.msra.mxu1 %v5197_v4 }
0x1e5d   :  { %5260 = vmatprep.subr.mxu1 %v10021_v2  ;;  %v5196_v31 = vld [vmem:[#allocation2 + $0x330] sm:$0xff] }
0x1e5e   :  { %5261 = vmatpush2.msra.mxu1 %v5196_v31  ;;  %v8003_v31 = vmov 18  }
0x1e5f   :  { %5263 = vmatmul.mubr.f32.vlgmr.msra.gmra.mxu1 %v4363_v40 }
0x1e60   :  { %7410 = vmatprep.mubr.msk.f32.mxu1 %vm1564_vm2, %v4366_v45 }
0x1e63   :  { %5268 = vmatmul.mubr.f32.gmra.mxu1 %v4365_v48 }
0x1f13   :  { %v5171_v12 = vpop.f32.mrf.mxu0 }
0x1f14   :  { %v5280_v14 = vmul.f32 %v9925_v51, %v5171_v12 }
0x1f15   :  { %v5173_v3 = vpop.f32.mrf.mxu0 }
0x1f16   :  { %v5282_v26 = vsel %vm1564_vm2, %v5280_v14, 0.0 }
0x1f17   :  { %5283 = vadd.xlane.f32.xlu0 %v5282_v26  ;;  %v5176_v32 = vpop.f32.mrf.mxu0 }
0x1f18   :  { %v5281_v28 = vmul.f32 %v9925_v51, %v5176_v32 }
0x1f19   :  { %v5178_v63 = vpop.f32.mrf.mxu0 }
0x1f1a   :  { %v5285_v37 = vsel %vm4372_vm13, %v5281_v28, 0.0 }
0x1f1b   :  { %5286 = vadd.xlane.f32.xlu0 %v5285_v37 }
0x1f1f   :  { %v5264_v41 = vpop.f32.mrf.mxu1 }
0x1f20   :  { %v5290_v58 = vmul.f32 %v9925_v51, %v5264_v41 }
0x1f21   :  { %v5266_v49 = vpop.f32.mrf.mxu1 }
0x1f22   :  { %v5292_v50 = vsel %vm1564_vm2, %v5290_v58, 0.0 }
0x1f23   :  { %5293 = vadd.xlane.f32.xlu1 %v5292_v50  ;;  %v5269_v56 = vpop.f32.mrf.mxu1 }
0x1f24   :  { %v5291_v27 = vmul.f32 %v9925_v51, %v5269_v56 }
0x1f25   :  { %v5271_v33 = vpop.f32.mrf.mxu1 }
0x1f26   :  { %v5295_v8 = vsel %vm4372_vm13, %v5291_v27, 0.0 }
0x1f27   :  { %5296 = vadd.xlane.f32.xlu0 %v5295_v8 }
0x1fa0   :  { %v5284_v29 = vpop.xlane.xlu0 %5283 }
0x1fa4   :  { %v5287_v18 = vpop.xlane.xlu0 %5286 }
0x1fac   :  { %v5294_v39 = vpop.xlane.xlu1 %5293 }
0x1fad   :  { %v5298_v6 = vadd.f32 %v5294_v39, %v5284_v29 }
0x1faf   :  { %v5300_v7 = vmul.f32 0.125, %v5298_v6 }
0x1fb0   :  { %v5297_v11 = vpop.xlane.xlu0 %5296 }
0x1fb1   :  { %v5302_v43 = vsub.f32 %v5171_v12, %v5300_v7  ;;  %v5306_v44 = vsub.f32 %v5264_v41, %v5300_v7  ;;  %v5299_v47 = vadd.f32 %v5297_v11, %v5287_v18 }
0x1fb3   :  { %v5301_v55 = vmul.f32 0.125, %v5299_v47  ;;  %v5304_v60 = vmul.f32 %v9925_v51, %v5302_v43  ;;  %v5308_v61 = vmul.f32 %v9925_v51, %v5306_v44 }
0x1fb5   :  { %v5303_v19 = vsub.f32 %v5176_v32, %v5301_v55  ;;  %v5307_v1 = vsub.f32 %v5269_v56, %v5301_v55  ;;  %v5310_v5 = vmul.f32 %v5304_v60, %v5304_v60  ;;  %v5320_v10 = vmul.f32 %v5308_v61, %v5308_v61 }
0x1fb7   :  { %v5312_v13 = vsel %vm1564_vm2, %v5310_v5, 0.0  ;;  %v5322_v15 = vsel %vm1564_vm2, %v5320_v10, 0.0  ;;  %v5309_v17 = vmul.f32 %v9925_v51, %v5307_v1  ;;  %v5305_v24 = vmul.f32 %v9925_v51, %v5303_v19 }
0x1fb8   :  { %5313 = vadd.xlane.f32.xlu1 %v5312_v13  ;;  %5323 = vadd.xlane.f32.xlu0 %v5322_v15 }
0x1fb9   :  { %v5321_v25 = vmul.f32 %v5309_v17, %v5309_v17  ;;  %v5311_v30 = vmul.f32 %v5305_v24, %v5305_v24 }
0x1fbb   :  { %v5325_v46 = vsel %vm4372_vm13, %v5321_v25, 0.0  ;;  %v5315_v34 = vsel %vm4372_vm13, %v5311_v30, 0.0 }
0x1fbc   :  { %5326 = vadd.xlane.f32.xlu0 %v5325_v46  ;;  %5316 = vadd.xlane.f32.xlu1 %v5315_v34 }
0x2041   :  { %v5314_v35 = vpop.xlane.xlu1 %5313  ;;  %v5324_v23 = vpop.xlane.xlu0 %5323 }
0x2042   :  { %v5328_v36 = vadd.f32 %v5324_v23, %v5314_v35 }
0x2044   :  { %v5330_v38 = vmul.f32 0.125, %v5328_v36 }
0x2045   :  { %v5317_v40 = vpop.xlane.xlu1 %5316  ;;  %v5327_v21 = vpop.xlane.xlu0 %5326 }
0x2046   :  { %v5332_v42 = vadd.f32 1e-05, %v5330_v38  ;;  %v5329_v52 = vadd.f32 %v5327_v21, %v5317_v40 }
0x2048   :  { %7941 = vrsqrt.f32 %v5332_v42  ;;  %v5331_v45 = vmul.f32 0.125, %v5329_v52 }
0x204a   :  { %v5333_v48 = vadd.f32 1e-05, %v5331_v45 }
0x204c   :  { %7943 = vrsqrt.f32 %v5333_v48 }
0x2055   :  { %v7942_v53 = vpop.eup %7941 }
0x2056   :  { %v5336_v54 = vmul.f32 %v7942_v53, %v9949_v57 }
0x2058   :  { %5340 = vperm.xlu1 %7887, %v5336_v54  }
0x2059   :  { %v7944_v62 = vpop.eup %7943 }
0x205a   :  { %v5337_v4 = vmul.f32 %v7944_v62, %v5274_v0 }
0x205c   :  { %7889 = vset.pattern.permute.xlu1 %v8003_v31  ;;  %5345 = vperm.xlu0 %7888, %v5337_v4  }
0x205d   :  { %5352 = vperm.xlu1 %7889, %v9949_v57  }
0x2061   :  { %5357 = vperm.xlu1 %7889, %v5274_v0  }
0x20d3   :  { %v5341_v12 = vpop.permute.xlu1 %5340 }
0x20d4   :  { %v5348_v14 = vmul.f32 %v5341_v12, %v5304_v60  ;;  %v5364_v3 = vmul.f32 %v5341_v12, %v5308_v61  ;;  %v5539_v60 = vld [vmem:[%s10721_s3 + $0x1e0] sm:$0xff]  ;;  %v5538_v61 = vld [vmem:[%s10721_s3 + $0x1d8] sm:$0xff] }
0x20d5   :  { %7786 = vmatprep.subr.mxu0 %v5539_v60  ;;  %7793 = vmatprep.subr.mxu1 %v5539_v60 }
0x20d6   :  { %7787 = vmatpush3.msra.mxu0 %v5539_v60  ;;  %7794 = vmatpush3.msra.mxu1 %v5539_v60 }
0x20d7   :  { %v5346_v26 = vpop.permute.xlu0 %5345  ;;  %7788 = vmatprep.subr.mxu0 %v5538_v61  ;;  %7795 = vmatprep.subr.mxu1 %v5538_v61 }
0x20d8   :  { %v5353_v32 = vpop.permute.xlu1 %5352  ;;  %v5349_v37 = vmul.f32 %v5346_v26, %v5305_v24  ;;  %v5365_v50 = vmul.f32 %v5346_v26, %v5309_v17  ;;  %7789 = vmatpush3.msra.mxu0 %v5538_v61  ;;  %7796 = vmatpush3.msra.mxu1 %v5538_v61 }
0x20d9   :  { %v5360_v28 = vadd.f32 %v5353_v32, %v5348_v14  ;;  %v5366_v63 = vadd.f32 %v5364_v3, %v5353_v32  ;;  %5959 = vmatprep.subr.mxu0 %v10021_v2  ;;  %6052 = vmatprep.subr.mxu1 %v10021_v2 }
0x20db   :  { %v5362_v41 = vmul.f32 %v9925_v51, %v5360_v28  ;;  %v5368_v58 = vmul.f32 %v9925_v51, %v5366_v63 }
0x20dc   :  { %v5358_v49 = vpop.permute.xlu1 %5357 }
0x20dd   :  { %v5370_v56 = vadd.f32 %v5362_v41, %v9786_v20  ;;  %v5361_v27 = vadd.f32 %v5358_v49, %v5349_v37  ;;  %v5374_v57 = vadd.f32 %v5368_v58, %v9794_v22  ;;  %v5367_v8 = vadd.f32 %v5365_v50, %v5358_v49 }
0x20df   :  { %v5363_v33 = vmul.f32 %v9925_v51, %v5361_v27  ;;  %v5372_v29 = vmax.f32 %v5370_v56, 0.0  ;;  %v5369_v18 = vmul.f32 %v9925_v51, %v5367_v8  ;;  %v5376_v6 = vmax.f32 %v5374_v57, 0.0 }
0x20e1   :  { %5380 = vrot.lane.b32.xlu1 %v5372_v29, %s7996_s19  ;;  %v5371_v39 = vadd.f32 %v9782_v9, %v5363_v33  ;;  %v5375_v7 = vadd.f32 %v9788_v16, %v5369_v18 }
0x20e3   :  { %v5373_v11 = vmax.f32 %v5371_v39, 0.0  ;;  %v5377_v20 = vmax.f32 %v5375_v7, 0.0 }
0x20e5   :  { %5390 = vrot.lane.b32.xlu1 %v5376_v6, %s7996_s19 }
0x20e9   :  { %5382 = vrot.lane.b32.xlu1 %v5373_v11, %s7996_s19 }
0x20ed   :  { %5392 = vrot.lane.b32.xlu1 %v5377_v20, %s7996_s19 }
0x2153   :  { %v5381_v22 = vpop.permute.xlu1 %5380 }
0x2154   :  { %5386 = vst.msk [vmem:[#allocation5] sm:$0xff] %vm4344_vm12, %v5381_v22 }
0x2157   :  { %v5391_v43 = vpop.permute.xlu1 %5390 }
0x2158   :  { %5396 = vst.msk [vmem:[#allocation5 + $0x10] sm:$0xff] %vm4344_vm12, %v5391_v43 }
0x215b   :  { %v5383_v51 = vpop.permute.xlu1 %5382  ;;  %v5398_v44 = vld [vmem:[#allocation5] sm:$0xff] }
0x215c   :  { %5387 = vst.msk [vmem:[#allocation5 + $0x8] sm:$0x3] %vm4346_vm11, %v5383_v51  ;;  %5422 = vrot.lane.b32.xlu0 %v5398_v44, %s7970_s21  ;;  %5406 = vrot.lane.b32.xlu1 %v5398_v44, %s7971_s30 }
0x215f   :  { %v5393_v9 = vpop.permute.xlu1 %5392  ;;  %v5400_v16 = vld [vmem:[#allocation5 + $0x10] sm:$0xff] }
0x2160   :  { %5397 = vst.msk [vmem:[#allocation5 + $0x18] sm:$0x3] %vm4346_vm11, %v5393_v9  ;;  %5438 = vrot.lane.b32.xlu0 %v5398_v44, %s7999_s28  ;;  %5410 = vrot.lane.b32.xlu1 %v5400_v16, %s7971_s30 }
0x2163   :  { %v10136_v47 = vld [vmem:[#allocation5 + $0x8] sm:$0x3] }
0x2164   :  { %5454 = vrot.lane.b32.xlu0 %v5398_v44, %s7998_s27  ;;  %5426 = vrot.lane.b32.xlu1 %v5400_v16, %s7970_s21 }
0x2167   :  { %v10144_v55 = vld [vmem:[#allocation5 + $0x18] sm:$0x3] }
0x2168   :  { %5470 = vrot.lane.b32.xlu0 %v5398_v44, %s7990_s17  ;;  %5442 = vrot.lane.b32.xlu1 %v5400_v16, %s7999_s28 }
0x216c   :  { %5486 = vrot.lane.b32.xlu0 %v5398_v44, %s7988_s13  ;;  %5458 = vrot.lane.b32.xlu1 %v5400_v16, %s7998_s27 }
0x2170   :  { %5502 = vrot.lane.b32.xlu0 %v5398_v44, %s7997_s12  ;;  %5474 = vrot.lane.b32.xlu1 %v5400_v16, %s7990_s17 }
0x2174   :  { %5518 = vrot.lane.b32.xlu0 %v5398_v44, %s7979_s14  ;;  %5490 = vrot.lane.b32.xlu1 %v5400_v16, %s7988_s13 }
0x2178   :  { %5506 = vrot.lane.b32.xlu1 %v5400_v16, %s7997_s12  ;;  %5408 = vrot.lane.b32.xlu0 %v10136_v47, %s7971_s30 }
0x217c   :  { %5522 = vrot.lane.b32.xlu1 %v5400_v16, %s7979_s14  ;;  %5424 = vrot.lane.b32.xlu0 %v10136_v47, %s7970_s21 }
0x2180   :  { %5440 = vrot.lane.b32.xlu0 %v10136_v47, %s7999_s28  ;;  %5412 = vrot.lane.b32.xlu1 %v10144_v55, %s7971_s30 }
0x2184   :  { %5456 = vrot.lane.b32.xlu0 %v10136_v47, %s7998_s27  ;;  %5428 = vrot.lane.b32.xlu1 %v10144_v55, %s7970_s21 }
0x2188   :  { %5472 = vrot.lane.b32.xlu0 %v10136_v47, %s7990_s17  ;;  %5444 = vrot.lane.b32.xlu1 %v10144_v55, %s7999_s28 }
0x218c   :  { %5488 = vrot.lane.b32.xlu0 %v10136_v47, %s7988_s13  ;;  %5460 = vrot.lane.b32.xlu1 %v10144_v55, %s7998_s27 }
0x2190   :  { %5504 = vrot.lane.b32.xlu0 %v10136_v47, %s7997_s12  ;;  %5476 = vrot.lane.b32.xlu1 %v10144_v55, %s7990_s17 }
0x2194   :  { %5520 = vrot.lane.b32.xlu0 %v10136_v47, %s7979_s14  ;;  %5492 = vrot.lane.b32.xlu1 %v10144_v55, %s7988_s13 }
0x2198   :  { %5508 = vrot.lane.b32.xlu1 %v10144_v55, %s7997_s12  ;;  %s8005_s12 = smov 125  }
0x219c   :  { %5524 = vrot.lane.b32.xlu1 %v10144_v55, %s7979_s14  ;;  %s8004_s14 = smov 4  }
0x21ce   :  { %v5407_v19 = vpop.permute.xlu1 %5406  ;;  %v5423_v1 = vpop.permute.xlu0 %5422 }
0x21cf   :  { %v5418_v13 = vadd.f32 %v5407_v19, %v5398_v44 }
0x21d1   :  { %v5434_v24 = vadd.f32 %v5423_v1, %v5418_v13 }
0x21d2   :  { %v5411_v5 = vpop.permute.xlu1 %5410  ;;  %v5439_v10 = vpop.permute.xlu0 %5438 }
0x21d3   :  { %v5450_v46 = vadd.f32 %v5439_v10, %v5434_v24  ;;  %v5420_v23 = vadd.f32 %v5411_v5, %v5400_v16 }
0x21d6   :  { %v5427_v15 = vpop.permute.xlu1 %5426  ;;  %v5455_v17 = vpop.permute.xlu0 %5454 }
0x21d7   :  { %v5466_v35 = vadd.f32 %v5455_v17, %v5450_v46  ;;  %v5436_v21 = vadd.f32 %v5427_v15, %v5420_v23 }
0x21da   :  { %v5443_v25 = vpop.permute.xlu1 %5442  ;;  %v5471_v30 = vpop.permute.xlu0 %5470 }
0x21db   :  { %v5482_v36 = vadd.f32 %v5471_v30, %v5466_v35  ;;  %v5452_v52 = vadd.f32 %v5443_v25, %v5436_v21 }
0x21de   :  { %v5459_v34 = vpop.permute.xlu1 %5458  ;;  %v5487_v59 = vpop.permute.xlu0 %5486 }
0x21df   :  { %v5498_v42 = vadd.f32 %v5487_v59, %v5482_v36  ;;  %v5468_v54 = vadd.f32 %v5459_v34, %v5452_v52 }
0x21e2   :  { %v5475_v38 = vpop.permute.xlu1 %5474  ;;  %v5503_v40 = vpop.permute.xlu0 %5502 }
0x21e3   :  { %v5514_v45 = vadd.f32 %v5503_v40, %v5498_v42  ;;  %v5484_v62 = vadd.f32 %v5475_v38, %v5468_v54 }
0x21e6   :  { %v5491_v48 = vpop.permute.xlu1 %5490  ;;  %v5519_v53 = vpop.permute.xlu0 %5518 }
0x21e7   :  { %v5530_v0 = vadd.f32 %v5519_v53, %v5514_v45  ;;  %v5500_v14 = vadd.f32 %v5491_v48, %v5484_v62 }
0x21e9   :  { %v5534_v4 = vmul.f32 0.11111111, %v5530_v0 }
0x21ea   :  { %v5507_v31 = vpop.permute.xlu1 %5506  ;;  %v5409_v12 = vpop.permute.xlu0 %5408 }
0x21eb   :  { %7790 = vmatprep.mubr.msk.f32.mxu0 %vm1564_vm2, %v5534_v4  ;;  %v5516_v3 = vadd.f32 %v5507_v31, %v5500_v14  ;;  %v5419_v50 = vadd.f32 %v5409_v12, %v10136_v47 }
0x21ee   :  { %v5523_v26 = vpop.permute.xlu1 %5522  ;;  %v5425_v32 = vpop.permute.xlu0 %5424 }
0x21ef   :  { %v5532_v28 = vadd.f32 %v5523_v26, %v5516_v3  ;;  %v5435_v57 = vadd.f32 %v5425_v32, %v5419_v50  ;;  %v5726_v26 = vld [vmem:[%s10719_s1 + $0x128] sm:$0xff] }
0x21f1   :  { %v5536_v63 = vmul.f32 0.11111111, %v5532_v28 }
0x21f2   :  { %v5413_v37 = vpop.permute.xlu1 %5412  ;;  %v5441_v41 = vpop.permute.xlu0 %5440 }
0x21f3   :  { %7797 = vmatprep.mubr.msk.f32.mxu1 %vm1564_vm2, %v5536_v63  ;;  %v5451_v33 = vadd.f32 %v5441_v41, %v5435_v57  ;;  %v5421_v39 = vadd.f32 %v5413_v37, %v10144_v55 }
0x21f6   :  { %v5429_v58 = vpop.permute.xlu1 %5428  ;;  %v5457_v49 = vpop.permute.xlu0 %5456 }
0x21f7   :  { %v5467_v18 = vadd.f32 %v5457_v49, %v5451_v33  ;;  %v5437_v20 = vadd.f32 %v5429_v58, %v5421_v39 }
0x21fa   :  { %v5445_v56 = vpop.permute.xlu1 %5444  ;;  %v5473_v27 = vpop.permute.xlu0 %5472 }
0x21fb   :  { %v5483_v6 = vadd.f32 %v5473_v27, %v5467_v18  ;;  %v5453_v43 = vadd.f32 %v5445_v56, %v5437_v20 }
0x21fe   :  { %v5461_v8 = vpop.permute.xlu1 %5460  ;;  %v5489_v29 = vpop.permute.xlu0 %5488 }
0x21ff   :  { %v5499_v22 = vadd.f32 %v5489_v29, %v5483_v6  ;;  %v5469_v16 = vadd.f32 %v5461_v8, %v5453_v43 }
0x2202   :  { %v5477_v7 = vpop.permute.xlu1 %5476  ;;  %v5505_v11 = vpop.permute.xlu0 %5504 }
0x2203   :  { %v5515_v51 = vadd.f32 %v5505_v11, %v5499_v22  ;;  %v5485_v60 = vadd.f32 %v5477_v7, %v5469_v16 }
0x2206   :  { %v5493_v44 = vpop.permute.xlu1 %5492  ;;  %v5521_v9 = vpop.permute.xlu0 %5520 }
0x2207   :  { %v5531_v47 = vadd.f32 %v5521_v9, %v5515_v51  ;;  %v5501_v1 = vadd.f32 %v5493_v44, %v5485_v60  ;;  %v10274_v9 = vld [vmem:[#allocation2 + $0xe0] sm:$0xff] }
0x2209   :  { %v5535_v61 = vmul.f32 0.11111111, %v5531_v47 }
0x220a   :  { %v5509_v19 = vpop.permute.xlu1 %5508 }
0x220b   :  { %7791 = vmatmul.mubr.msk.f32.vlgmr.msra.gmra.mxu0 %vm1564_vm2, %v5535_v61  ;;  %v5517_v5 = vadd.f32 %v5509_v19, %v5501_v1 }
0x220c   :  { %7416 = vmatprep.mubr.msk.f32.mxu0 %vm1564_vm2, %v5726_v26 }
0x220e   :  { %v5525_v10 = vpop.permute.xlu1 %5524 }
0x220f   :  { %v5533_v55 = vadd.f32 %v5525_v10, %v5517_v5 }
0x2211   :  { %v5537_v13 = vmul.f32 0.11111111, %v5533_v55 }
0x2213   :  { %7798 = vmatmul.mubr.msk.f32.vlgmr.msra.gmra.mxu1 %vm1564_vm2, %v5537_v13 }
0x2214   :  { %7418 = vmatprep.mubr.msk.f32.mxu1 %vm1564_vm2, %v5726_v26 }
0x22cb   :  { %v10192_v15 = vpop.f32.mrf.mxu0 }
0x22cc   :  { %5706 = vrot.lane.b32.xlu0 %v10192_v15, %s8004_s14 }
0x22cd   :  { %v10196_v17 = vpop.f32.mrf.mxu0 }
0x22d0   :  { %5704 = vrot.lane.b32.xlu0 %v10196_v17, %s8004_s14 }
0x22d3   :  { %v10200_v24 = vpop.f32.mrf.mxu1 }
0x22d4   :  { %5718 = vrot.lane.b32.xlu1 %v10200_v24, %s8004_s14 }
0x22d5   :  { %v10204_v25 = vpop.f32.mrf.mxu1 }
0x22d8   :  { %5716 = vrot.lane.b32.xlu1 %v10204_v25, %s8004_s14 }
0x233e   :  { %v5707_v30 = vpop.permute.xlu0 %5706 }
0x233f   :  { %5713 = vst.msk [vmem:[#allocation6 + $0x8] sm:$0x3] %vm5712_vm0, %v5707_v30 }
0x2342   :  { %v5705_v46 = vpop.permute.xlu0 %5704 }
0x2343   :  { %5711 = vst.msk [vmem:[#allocation6] sm:$0xff] %vm5710_vm1, %v5705_v46 }
0x2346   :  { %v5734_v34 = vld [vmem:[#allocation6 + $0x8] sm:$0x3]  ;;  %v5719_v59 = vpop.permute.xlu1 %5718 }
0x2347   :  { %v5888_v35 = vld [vmem:[#allocation6 + $0x8] sm:$0x3]  ;;  %5724 = vst.msk [vmem:[#allocation6 + $0x18] sm:$0x3] %vm5712_vm0, %v5719_v59 }
0x2348   :  { %5897 = vrot.lane.b32.xlu0 %v5888_v35, %s7989_s16  ;;  %5740 = vst.msk [vmem:[#allocation2 + $0x18] sm:$0x3] %vm5739_vm3, %v5734_v34  ;;  %v5864_v38 = vld [vmem:[#allocation6 + $0x8] sm:$0x3] }
0x2349   :  { %v5840_v42 = vld [vmem:[#allocation6 + $0x8] sm:$0x3] }
0x234a   :  { %v5733_v23 = vld [vmem:[#allocation6] sm:$0xff]  ;;  %v5717_v36 = vpop.permute.xlu1 %5716  ;;  %v5816_v48 = vld [vmem:[#allocation6 + $0x8] sm:$0x3] }
0x234b   :  { %5723 = vst.msk [vmem:[#allocation6 + $0x10] sm:$0xff] %vm5710_vm1, %v5717_v36  ;;  %v5792_v54 = vld [vmem:[#allocation6 + $0x8] sm:$0x3] }
0x234c   :  { %5873 = vrot.lane.b32.xlu0 %v5864_v38, %s7990_s17  ;;  %5738 = vst.msk [vmem:[#allocation2] sm:$0xff] %vm5737_vm4, %v5733_v23  ;;  %v5768_v62 = vld [vmem:[#allocation6 + $0x8] sm:$0x3] }
0x234d   :  { %v5744_v31 = vld [vmem:[#allocation6 + $0x8] sm:$0x3] }
0x234e   :  { %v5736_v40 = vld [vmem:[#allocation6 + $0x18] sm:$0x3]  ;;  %v5912_v3 = vld [vmem:[#allocation6 + $0x8] sm:$0x3] }
0x234f   :  { %v5890_v21 = vld [vmem:[#allocation6 + $0x18] sm:$0x3]  ;;  %5742 = vst.msk [vmem:[#allocation2 + $0x1c8] sm:$0x3] %vm5739_vm3, %v5736_v40 }
0x2350   :  { %5901 = vrot.lane.b32.xlu1 %v5890_v21, %s7989_s16  ;;  %5849 = vrot.lane.b32.xlu0 %v5840_v42, %s7998_s27  ;;  %v5866_v45 = vld [vmem:[#allocation6 + $0x18] sm:$0x3] }
0x2351   :  { %v5842_v53 = vld [vmem:[#allocation6 + $0x18] sm:$0x3] }
0x2352   :  { %v5735_v52 = vld [vmem:[#allocation6 + $0x10] sm:$0xff]  ;;  %v5818_v0 = vld [vmem:[#allocation6 + $0x18] sm:$0x3] }
0x2353   :  { %5741 = vst.msk [vmem:[#allocation2 + $0x1b0] sm:$0xff] %vm5737_vm4, %v5735_v52  ;;  %v5794_v4 = vld [vmem:[#allocation6 + $0x18] sm:$0x3]  ;;  %v5935_v26 = vld [vmem:[#allocation2] sm:$0xff] }
0x2354   :  { %5877 = vrot.lane.b32.xlu1 %v5866_v45, %s7990_s17  ;;  %5825 = vrot.lane.b32.xlu0 %v5816_v48, %s7999_s28  ;;  %v5770_v12 = vld [vmem:[#allocation6 + $0x18] sm:$0x3] }
0x2355   :  { %v5746_v14 = vld [vmem:[#allocation6 + $0x18] sm:$0x3] }
0x2356   :  { %v5914_v32 = vld [vmem:[#allocation6 + $0x18] sm:$0x3] }
0x2358   :  { %5853 = vrot.lane.b32.xlu1 %v5842_v53, %s7998_s27  ;;  %5801 = vrot.lane.b32.xlu0 %v5792_v54, %s8005_s12 }
0x235c   :  { %5829 = vrot.lane.b32.xlu1 %v5818_v0, %s7999_s28  ;;  %5777 = vrot.lane.b32.xlu0 %v5768_v62, %s7970_s21 }
0x2360   :  { %5805 = vrot.lane.b32.xlu1 %v5794_v4, %s8005_s12  ;;  %5753 = vrot.lane.b32.xlu0 %v5744_v31, %s7971_s30 }
0x2364   :  { %5781 = vrot.lane.b32.xlu1 %v5770_v12, %s7970_s21  ;;  %5895 = vrot.lane.b32.xlu0 %v5733_v23, %s7989_s16  ;;  %v5936_v12 = vld [vmem:[#allocation2 + $0x18] sm:$0xff] }
0x2368   :  { %5757 = vrot.lane.b32.xlu1 %v5746_v14, %s7971_s30  ;;  %5871 = vrot.lane.b32.xlu0 %v5733_v23, %s7990_s17 }
0x236c   :  { %5899 = vrot.lane.b32.xlu1 %v5735_v52, %s7989_s16  ;;  %5847 = vrot.lane.b32.xlu0 %v5733_v23, %s7998_s27 }
0x2370   :  { %5875 = vrot.lane.b32.xlu1 %v5735_v52, %s7990_s17  ;;  %5823 = vrot.lane.b32.xlu0 %v5733_v23, %s7999_s28 }
0x2374   :  { %5851 = vrot.lane.b32.xlu1 %v5735_v52, %s7998_s27  ;;  %5799 = vrot.lane.b32.xlu0 %v5733_v23, %s8005_s12 }
0x2378   :  { %5827 = vrot.lane.b32.xlu1 %v5735_v52, %s7999_s28  ;;  %5775 = vrot.lane.b32.xlu0 %v5733_v23, %s7970_s21 }
0x237c   :  { %5803 = vrot.lane.b32.xlu1 %v5735_v52, %s8005_s12  ;;  %5751 = vrot.lane.b32.xlu0 %v5733_v23, %s7971_s30 }
0x2380   :  { %5779 = vrot.lane.b32.xlu1 %v5735_v52, %s7970_s21  ;;  %5921 = vrot.lane.b32.xlu0 %v5912_v3, %s7988_s13 }
0x2384   :  { %5755 = vrot.lane.b32.xlu1 %v5735_v52, %s7971_s30  ;;  %5919 = vrot.lane.b32.xlu0 %v5733_v23, %s7988_s13 }
0x2388   :  { %5925 = vrot.lane.b32.xlu1 %v5914_v32, %s7988_s13 }
0x238c   :  { %5923 = vrot.lane.b32.xlu1 %v5735_v52, %s7988_s13 }
0x23ba   :  { %v5898_v28 = vpop.permute.xlu0 %5897 }
0x23bb   :  { %5908 = vst.msk [vmem:[#allocation2 + $0x168] sm:$0x3] %vm5739_vm3, %v5898_v28 }
0x23be   :  { %v5874_v63 = vpop.permute.xlu0 %5873 }
0x23bf   :  { %5884 = vst.msk [vmem:[#allocation2 + $0x138] sm:$0x3] %vm5739_vm3, %v5874_v63 }
0x23c2   :  { %v5902_v37 = vpop.permute.xlu1 %5901  ;;  %v5850_v41 = vpop.permute.xlu0 %5849  ;;  %v5950_v58 = vld [vmem:[#allocation2 + $0x168] sm:$0xff] }
0x23c3   :  { %5910 = vst.msk [vmem:[#allocation2 + $0x318] sm:$0x3] %vm5739_vm3, %v5902_v37  ;;  %5860 = vst.msk [vmem:[#allocation2 + $0x108] sm:$0x3] %vm5739_vm3, %v5850_v41  ;;  %5960 = vmatpush1.msra.mxu0 %v5950_v58  ;;  %v5725_v37 = vld [vmem:[%s10719_s1 + $0x120] sm:$0xff] }
0x23c4   :  { %5961 = vmatprep.subr.mxu0 %v10021_v2 }
0x23c6   :  { %v5878_v49 = vpop.permute.xlu1 %5877  ;;  %v5826_v50 = vpop.permute.xlu0 %5825  ;;  %v5948_v51 = vld [vmem:[#allocation2 + $0x138] sm:$0xff] }
0x23c7   :  { %5886 = vst.msk [vmem:[#allocation2 + $0x2e8] sm:$0x3] %vm5739_vm3, %v5878_v49  ;;  %5836 = vst.msk [vmem:[#allocation2 + $0xd8] sm:$0x3] %vm5739_vm3, %v5826_v50  ;;  %v5728_v50 = vld [vmem:[%s10719_s1 + $0x138] sm:$0x3] }
0x23ca   :  { %v5854_v56 = vpop.permute.xlu1 %5853  ;;  %v5802_v27 = vpop.permute.xlu0 %5801  ;;  %v6049_v57 = vld [vmem:[#allocation2 + $0x318] sm:$0xff]  ;;  %v5946_v60 = vld [vmem:[#allocation2 + $0x108] sm:$0xff] }
0x23cb   :  { %5862 = vst.msk [vmem:[#allocation2 + $0x2b8] sm:$0x3] %vm5739_vm3, %v5854_v56  ;;  %5812 = vst.msk [vmem:[#allocation2 + $0xa8] sm:$0x3] %vm5739_vm3, %v5802_v27  ;;  %6053 = vmatpush1.msra.mxu1 %v6049_v57  ;;  %v6035_v56 = vld [vmem:[#allocation2 + $0x1c8] sm:$0xff]  ;;  %v6034_v57 = vld [vmem:[#allocation2 + $0x1b0] sm:$0xff] }
0x23cc   :  { %6054 = vmatprep.subr.mxu1 %v10021_v2  ;;  %v5727_v27 = vld [vmem:[%s10719_s1 + $0x130] sm:$0x3] }
0x23ce   :  { %v5830_v33 = vpop.permute.xlu1 %5829  ;;  %v5778_v8 = vpop.permute.xlu0 %5777  ;;  %v5944_v5 = vld [vmem:[#allocation2 + $0xd8] sm:$0xff]  ;;  %v6047_v10 = vld [vmem:[#allocation2 + $0x2e8] sm:$0xff] }
0x23cf   :  { %5838 = vst.msk [vmem:[#allocation2 + $0x288] sm:$0x3] %vm5739_vm3, %v5830_v33  ;;  %5788 = vst.msk [vmem:[#allocation2 + $0x78] sm:$0x3] %vm5739_vm3, %v5778_v8 }
0x23d2   :  { %v5806_v29 = vpop.permute.xlu1 %5805  ;;  %v5754_v18 = vpop.permute.xlu0 %5753  ;;  %v5942_v34 = vld [vmem:[#allocation2 + $0xa8] sm:$0xff]  ;;  %v6045_v59 = vld [vmem:[#allocation2 + $0x2b8] sm:$0xff] }
0x23d3   :  { %5814 = vst.msk [vmem:[#allocation2 + $0x258] sm:$0x3] %vm5739_vm3, %v5806_v29  ;;  %5764 = vst.msk [vmem:[#allocation2 + $0x48] sm:$0x3] %vm5739_vm3, %v5754_v18  ;;  %v10337_v18 = vld [vmem:[%s10721_s3 + $0x1fb] ss:$0 sm:$0xff] }
0x23d6   :  { %v5782_v39 = vpop.permute.xlu1 %5781  ;;  %v5896_v6 = vpop.permute.xlu0 %5895  ;;  %v5940_v40 = vld [vmem:[#allocation2 + $0x78] sm:$0xff]  ;;  %v6043_v21 = vld [vmem:[#allocation2 + $0x288] sm:$0xff] }
0x23d7   :  { %5790 = vst.msk [vmem:[#allocation2 + $0x228] sm:$0x3] %vm5739_vm3, %v5782_v39 }
0x23d8   :  { %5907 = vst.msk [vmem:[#allocation2 + $0x150] sm:$0xff] %vm5737_vm4, %v5896_v6 }
0x23da   :  { %v5758_v7 = vpop.permute.xlu1 %5757  ;;  %v5872_v11 = vpop.permute.xlu0 %5871  ;;  %v5938_v53 = vld [vmem:[#allocation2 + $0x48] sm:$0xff]  ;;  %v6041_v54 = vld [vmem:[#allocation2 + $0x258] sm:$0xff] }
0x23db   :  { %5766 = vst.msk [vmem:[#allocation2 + $0x1f8] sm:$0x3] %vm5739_vm3, %v5758_v7 }
0x23dc   :  { %5883 = vst.msk [vmem:[#allocation2 + $0x120] sm:$0xff] %vm5737_vm4, %v5872_v11 }
0x23de   :  { %v5900_v20 = vpop.permute.xlu1 %5899  ;;  %v5848_v22 = vpop.permute.xlu0 %5847  ;;  %v6039_v14 = vld [vmem:[#allocation2 + $0x228] sm:$0xff] }
0x23df   :  { %v5949_v43 = vld [vmem:[#allocation2 + $0x150] sm:$0xff]  ;;  %5909 = vst.msk [vmem:[#allocation2 + $0x300] sm:$0xff] %vm5737_vm4, %v5900_v20  ;;  %5859 = vst.msk [vmem:[#allocation2 + $0xf0] sm:$0xff] %vm5737_vm4, %v5848_v22 }
0x23e0   :  { %5962 = vmatpush1.msra.mxu0 %v5949_v43 }
0x23e1   :  { %5963 = vmatprep.subr.mxu0 %v10021_v2 }
0x23e2   :  { %5964 = vmatpush1.msra.mxu0 %v5948_v51  ;;  %v5876_v44 = vpop.permute.xlu1 %5875  ;;  %v5824_v16 = vpop.permute.xlu0 %5823  ;;  %v6037_v63 = vld [vmem:[#allocation2 + $0x1f8] sm:$0xff] }
0x23e3   :  { %5965 = vmatprep.subr.mxu0 %v10274_v9  ;;  %v5947_v47 = vld [vmem:[#allocation2 + $0x120] sm:$0xff]  ;;  %5885 = vst.msk [vmem:[#allocation2 + $0x2d0] sm:$0xff] %vm5737_vm4, %v5876_v44  ;;  %5835 = vst.msk [vmem:[#allocation2 + $0xc0] sm:$0xff] %vm5737_vm4, %v5824_v16 }
0x23e4   :  { %5966 = vmatpush1.msra.mxu0 %v5947_v47 }
0x23e5   :  { %5967 = vmatprep.subr.mxu0 %v10274_v9 }
0x23e6   :  { %5968 = vmatpush1.msra.mxu0 %v5946_v60  ;;  %v5852_v61 = vpop.permute.xlu1 %5851  ;;  %v5800_v2 = vpop.permute.xlu0 %5799  ;;  %v5945_v19 = vld [vmem:[#allocation2 + $0xf0] sm:$0xff]  ;;  %v6048_v1 = vld [vmem:[#allocation2 + $0x300] sm:$0xff] }
0x23e7   :  { %5969 = vmatprep.subr.mxu0 %v10274_v9  ;;  %5861 = vst.msk [vmem:[#allocation2 + $0x2a0] sm:$0xff] %vm5737_vm4, %v5852_v61  ;;  %5811 = vst.msk [vmem:[#allocation2 + $0x90] sm:$0xff] %vm5737_vm4, %v5800_v2  ;;  %6055 = vmatpush1.msra.mxu1 %v6048_v1 }
0x23e8   :  { %5970 = vmatpush1.msra.mxu0 %v5945_v19  ;;  %6056 = vmatprep.subr.mxu1 %v10274_v9 }
0x23e9   :  { %5971 = vmatprep.subr.mxu0 %v10274_v9  ;;  %6057 = vmatpush1.msra.mxu1 %v6047_v10 }
0x23ea   :  { %5972 = vmatpush1.msra.mxu0 %v5944_v5  ;;  %6058 = vmatprep.subr.mxu1 %v10274_v9  ;;  %v5828_v55 = vpop.permute.xlu1 %5827  ;;  %v5776_v13 = vpop.permute.xlu0 %5775  ;;  %v5943_v30 = vld [vmem:[#allocation2 + $0xc0] sm:$0xff]  ;;  %v6046_v46 = vld [vmem:[#allocation2 + $0x2d0] sm:$0xff] }
0x23eb   :  { %5973 = vmatprep.subr.mxu0 %v10274_v9  ;;  %5837 = vst.msk [vmem:[#allocation2 + $0x270] sm:$0xff] %vm5737_vm4, %v5828_v55  ;;  %5787 = vst.msk [vmem:[#allocation2 + $0x60] sm:$0xff] %vm5737_vm4, %v5776_v13  ;;  %6059 = vmatpush1.msra.mxu1 %v6046_v46 }
0x23ec   :  { %5974 = vmatpush1.msra.mxu0 %v5943_v30  ;;  %6060 = vmatprep.subr.mxu1 %v10274_v9 }
0x23ed   :  { %5975 = vmatprep.subr.mxu0 %v10274_v9  ;;  %6061 = vmatpush1.msra.mxu1 %v6045_v59 }
0x23ee   :  { %5976 = vmatpush1.msra.mxu0 %v5942_v34  ;;  %6062 = vmatprep.subr.mxu1 %v10274_v9  ;;  %v5804_v35 = vpop.permute.xlu1 %5803  ;;  %v5752_v23 = vpop.permute.xlu0 %5751  ;;  %v5941_v36 = vld [vmem:[#allocation2 + $0x90] sm:$0xff]  ;;  %v6044_v38 = vld [vmem:[#allocation2 + $0x2a0] sm:$0xff] }
0x23ef   :  { %5977 = vmatprep.subr.mxu0 %v10274_v9  ;;  %5813 = vst.msk [vmem:[#allocation2 + $0x240] sm:$0xff] %vm5737_vm4, %v5804_v35  ;;  %5763 = vst.msk [vmem:[#allocation2 + $0x30] sm:$0xff] %vm5737_vm4, %v5752_v23  ;;  %6063 = vmatpush1.msra.mxu1 %v6044_v38 }
0x23f0   :  { %5978 = vmatpush1.msra.mxu0 %v5941_v36  ;;  %6064 = vmatprep.subr.mxu1 %v10274_v9 }
0x23f1   :  { %5979 = vmatprep.subr.mxu0 %v10274_v9  ;;  %6065 = vmatpush1.msra.mxu1 %v6043_v21 }
0x23f2   :  { %5980 = vmatpush1.msra.mxu0 %v5940_v40  ;;  %6066 = vmatprep.subr.mxu1 %v10274_v9  ;;  %v5780_v42 = vpop.permute.xlu1 %5779  ;;  %v5922_v52 = vpop.permute.xlu0 %5921  ;;  %v5939_v45 = vld [vmem:[#allocation2 + $0x60] sm:$0xff]  ;;  %v6042_v48 = vld [vmem:[#allocation2 + $0x270] sm:$0xff] }
0x23f3   :  { %5981 = vmatprep.subr.mxu0 %v10274_v9  ;;  %5789 = vst.msk [vmem:[#allocation2 + $0x210] sm:$0xff] %vm5737_vm4, %v5780_v42  ;;  %6067 = vmatpush1.msra.mxu1 %v6042_v48 }
0x23f4   :  { %5932 = vst.msk [vmem:[#allocation2 + $0x198] sm:$0x3] %vm5739_vm3, %v5922_v52  ;;  %5982 = vmatpush1.msra.mxu0 %v5939_v45  ;;  %6068 = vmatprep.subr.mxu1 %v10274_v9 }
0x23f5   :  { %5983 = vmatprep.subr.mxu0 %v10274_v9  ;;  %6069 = vmatpush1.msra.mxu1 %v6041_v54 }
0x23f6   :  { %5984 = vmatpush1.msra.mxu0 %v5938_v53  ;;  %6070 = vmatprep.subr.mxu1 %v10274_v9  ;;  %v5756_v0 = vpop.permute.xlu1 %5755  ;;  %v5920_v62 = vpop.permute.xlu0 %5919  ;;  %v5937_v4 = vld [vmem:[#allocation2 + $0x30] sm:$0xff]  ;;  %v6040_v31 = vld [vmem:[#allocation2 + $0x240] sm:$0xff] }
0x23f7   :  { %5985 = vmatprep.subr.mxu0 %v10274_v9  ;;  %5765 = vst.msk [vmem:[#allocation2 + $0x1e0] sm:$0xff] %vm5737_vm4, %v5756_v0  ;;  %5931 = vst.msk [vmem:[#allocation2 + $0x180] sm:$0xff] %vm5737_vm4, %v5920_v62  ;;  %6071 = vmatpush1.msra.mxu1 %v6040_v31  ;;  %v6128_v31 = vld [vmem:[%s10720_s2 + $0x8] sm:$0x3] }
0x23f8   :  { %5986 = vmatpush1.msra.mxu0 %v5937_v4  ;;  %6072 = vmatprep.subr.mxu1 %v10274_v9 }
0x23f9   :  { %5987 = vmatprep.subr.mxu0 %v10274_v9  ;;  %6073 = vmatpush1.msra.mxu1 %v6039_v14  ;;  %v8007_v14 = vmov 11  }
0x23fa   :  { %5988 = vmatpush1.msra.mxu0 %v5936_v12  ;;  %6074 = vmatprep.subr.mxu1 %v10274_v9  ;;  %v5926_v3 = vpop.permute.xlu1 %5925  ;;  %v6038_v32 = vld [vmem:[#allocation2 + $0x210] sm:$0xff]  ;;  %v8006_v12 = vmov 19  }
0x23fb   :  { %5989 = vmatprep.subr.mxu0 %v10274_v9  ;;  %5934 = vst.msk [vmem:[#allocation2 + $0x348] sm:$0x3] %vm5739_vm3, %v5926_v3  ;;  %6075 = vmatpush1.msra.mxu1 %v6038_v32  ;;  %v5952_v28 = vld [vmem:[#allocation2 + $0x198] sm:$0xff] }
0x23fc   :  { %5990 = vmatpush1.msra.mxu0 %v5935_v26  ;;  %6076 = vmatprep.subr.mxu1 %v10274_v9 }
0x23fd   :  { %6019 = vmatprep.subr.mxu0 %v10274_v9  ;;  %6077 = vmatpush1.msra.mxu1 %v6037_v63 }
0x23fe   :  { %6020 = vmatpush2.msra.mxu0 %v5952_v28  ;;  %6078 = vmatprep.subr.mxu1 %v10274_v9  ;;  %v5924_v41 = vpop.permute.xlu1 %5923  ;;  %v5951_v58 = vld [vmem:[#allocation2 + $0x180] sm:$0xff] }
0x23ff   :  { %6021 = vmatprep.subr.mxu0 %v10274_v9  ;;  %v6036_v49 = vld [vmem:[#allocation2 + $0x1e0] sm:$0xff]  ;;  %5933 = vst.msk [vmem:[#allocation2 + $0x330] sm:$0xff] %vm5737_vm4, %v5924_v41  ;;  %7891 = vset.pattern.permute.xlu1 %v8006_v12 }
0x2400   :  { %6022 = vmatpush2.msra.mxu0 %v5951_v58  ;;  %6079 = vmatpush1.msra.mxu1 %v6036_v49 }
0x2401   :  { %6024 = vmatmul.mubr.f32.vlgmr.msra.gmra.mxu0 %v5725_v37  ;;  %6080 = vmatprep.subr.mxu1 %v10274_v9 }
0x2402   :  { %6081 = vmatpush1.msra.mxu1 %v6035_v56  ;;  %7417 = vmatprep.mubr.msk.f32.mxu0 %vm1564_vm2, %v5728_v50  ;;  %v6051_v33 = vld [vmem:[#allocation2 + $0x348] sm:$0xff] }
0x2403   :  { %6082 = vmatprep.subr.mxu1 %v10274_v9  ;;  %6472 = vmatprep.subr.mxu0 %v10274_v9 }
0x2404   :  { %6083 = vmatpush1.msra.mxu1 %v6034_v57  ;;  %7890 = vset.pattern.permute.xlu0 %v8007_v14  ;;  %v10361_v57 = vld [vmem:[%s10720_s2] sm:$0xff] }
0x2405   :  { %6029 = vmatmul.mubr.f32.gmra.mxu0 %v5727_v27  ;;  %6112 = vmatprep.subr.mxu1 %v10274_v9 }
0x2406   :  { %6113 = vmatpush2.msra.mxu1 %v6051_v33  ;;  %v6050_v8 = vld [vmem:[#allocation2 + $0x330] sm:$0xff] }
0x2407   :  { %6114 = vmatprep.subr.mxu1 %v10274_v9 }
0x2408   :  { %6115 = vmatpush2.msra.mxu1 %v6050_v8 }
0x2409   :  { %6117 = vmatmul.mubr.f32.vlgmr.msra.gmra.mxu1 %v5725_v37  ;;  %6565 = vmatprep.subr.mxu1 %v10274_v9 }
0x240a   :  { %7419 = vmatprep.mubr.msk.f32.mxu1 %vm1564_vm2, %v5728_v50 }
0x240d   :  { %6122 = vmatmul.mubr.f32.gmra.mxu1 %v5727_v27 }
0x24c1   :  { %v6025_v29 = vpop.f32.mrf.mxu0 }
0x24c2   :  { %v6134_v20 = vmul.f32 %v10337_v18, %v6025_v29 }
0x24c3   :  { %v6027_v39 = vpop.f32.mrf.mxu0 }
0x24c4   :  { %v6136_v16 = vsel %vm5737_vm4, %v6134_v20, 0.0 }
0x24c5   :  { %v6030_v6 = vpop.f32.mrf.mxu0 }
0x24c6   :  { %v6135_v7 = vmul.f32 %v10337_v18, %v6030_v6 }
0x24c7   :  { %v6032_v11 = vpop.f32.mrf.mxu0 }
0x24c8   :  { %v6139_v22 = vsel %vm5739_vm3, %v6135_v7, 0.0 }
0x24c9   :  { %v6118_v43 = vpop.f32.mrf.mxu1  ;;  %6140 = vadd.xlane.f32.xlu0 %v6139_v22 }
0x24ca   :  { %v6144_v44 = vmul.f32 %v10337_v18, %v6118_v43 }
0x24cb   :  { %v6120_v51 = vpop.f32.mrf.mxu1 }
0x24cc   :  { %v6146_v19 = vsel %vm5737_vm4, %v6144_v44, 0.0 }
0x24cd   :  { %v6123_v47 = vpop.f32.mrf.mxu1  ;;  %6137 = vadd.xlane.f32.xlu0 %v6136_v16 }
0x24ce   :  { %v6145_v60 = vmul.f32 %v10337_v18, %v6123_v47 }
0x24cf   :  { %v6125_v61 = vpop.f32.mrf.mxu1 }
0x24d0   :  { %v6149_v2 = vsel %vm5739_vm3, %v6145_v60, 0.0 }
0x24d1   :  { %6150 = vadd.xlane.f32.xlu1 %v6149_v2  ;;  %6147 = vadd.xlane.f32.xlu0 %v6146_v19 }
0x2552   :  { %v6141_v1 = vpop.xlane.xlu0 %6140 }
0x2556   :  { %v6138_v5 = vpop.xlane.xlu0 %6137 }
0x255a   :  { %v6151_v10 = vpop.xlane.xlu1 %6150  ;;  %v6148_v55 = vpop.xlane.xlu0 %6147 }
0x255b   :  { %v6153_v13 = vadd.f32 %v6151_v10, %v6141_v1  ;;  %v6152_v30 = vadd.f32 %v6148_v55, %v6138_v5 }
0x255d   :  { %v6155_v46 = vmul.f32 0.5, %v6153_v13  ;;  %v6154_v34 = vmul.f32 0.5, %v6152_v30 }
0x255f   :  { %v6157_v59 = vsub.f32 %v6030_v6, %v6155_v46  ;;  %v6161_v35 = vsub.f32 %v6123_v47, %v6155_v46  ;;  %v6156_v23 = vsub.f32 %v6025_v29, %v6154_v34  ;;  %v6160_v36 = vsub.f32 %v6118_v43, %v6154_v34 }
0x2561   :  { %v6158_v38 = vmul.f32 %v10337_v18, %v6156_v23  ;;  %v6162_v40 = vmul.f32 %v10337_v18, %v6160_v36  ;;  %v6163_v21 = vmul.f32 %v10337_v18, %v6161_v35  ;;  %v6159_v42 = vmul.f32 %v10337_v18, %v6157_v59 }
0x2563   :  { %v6175_v52 = vmul.f32 %v6163_v21, %v6163_v21  ;;  %v6165_v45 = vmul.f32 %v6159_v42, %v6159_v42  ;;  %v6174_v54 = vmul.f32 %v6162_v40, %v6162_v40  ;;  %v6164_v0 = vmul.f32 %v6158_v38, %v6158_v38 }
0x2565   :  { %v6179_v48 = vsel %vm5739_vm3, %v6175_v52, 0.0  ;;  %v6169_v53 = vsel %vm5739_vm3, %v6165_v45, 0.0  ;;  %v6176_v62 = vsel %vm5737_vm4, %v6174_v54, 0.0  ;;  %v6166_v4 = vsel %vm5737_vm4, %v6164_v0, 0.0 }
0x2566   :  { %6180 = vadd.xlane.f32.xlu0 %v6179_v48  ;;  %6170 = vadd.xlane.f32.xlu1 %v6169_v53 }
0x256a   :  { %6177 = vadd.xlane.f32.xlu0 %v6176_v62  ;;  %6167 = vadd.xlane.f32.xlu1 %v6166_v4 }
0x257b   :  { %6211 = vperm.xlu1 %7891, %v6128_v31  }
0x257f   :  { %7892 = vset.pattern.permute.xlu1 %v8007_v14 }
0x25ef   :  { %v6171_v3 = vpop.xlane.xlu1 %6170  ;;  %v6181_v26 = vpop.xlane.xlu0 %6180 }
0x25f0   :  { %v6183_v32 = vadd.f32 %v6181_v26, %v6171_v3  ;;  %v5730_v3 = vld [vmem:[%s10719_s1 + $0x148] sm:$0xff] }
0x25f1   :  { %7421 = vmatprep.mubr.msk.f32.mxu0 %vm1564_vm2, %v5730_v3  ;;  %7423 = vmatprep.mubr.msk.f32.mxu1 %vm1564_vm2, %v5730_v3 }
0x25f2   :  { %v6185_v28 = vmul.f32 0.5, %v6183_v32 }
0x25f3   :  { %v6168_v63 = vpop.xlane.xlu1 %6167  ;;  %v6178_v37 = vpop.xlane.xlu0 %6177 }
0x25f4   :  { %v6187_v41 = vadd.f32 1e-05, %v6185_v28  ;;  %v6182_v58 = vadd.f32 %v6178_v37, %v6168_v63 }
0x25f6   :  { %7945 = vrsqrt.f32 %v6187_v41  ;;  %v6184_v49 = vmul.f32 0.5, %v6182_v58 }
0x25f7   :  { %v6212_v29 = vpop.permute.xlu1 %6211 }
0x25f8   :  { %v6186_v50 = vadd.f32 1e-05, %v6184_v49 }
0x25fa   :  { %7947 = vrsqrt.f32 %v6186_v50 }
0x2603   :  { %v7946_v56 = vpop.eup %7945 }
0x2604   :  { %v6191_v27 = vmul.f32 %v7946_v56, %v6128_v31 }
0x2606   :  { %6199 = vperm.xlu1 %7892, %v6191_v27  }
0x2607   :  { %v7948_v33 = vpop.eup %7947 }
0x2608   :  { %v6190_v8 = vmul.f32 %v7948_v33, %v10361_v57 }
0x260a   :  { %6194 = vperm.xlu0 %7890, %v6190_v8   ;;  %7893 = vset.pattern.permute.xlu1 %v8006_v12 }
0x260b   :  { %6206 = vperm.xlu1 %7893, %v10361_v57  }
0x2681   :  { %v6200_v39 = vpop.permute.xlu1 %6199 }
0x2682   :  { %v6203_v6 = vmul.f32 %v6200_v39, %v6159_v42  ;;  %v6221_v43 = vmul.f32 %v6200_v39, %v6163_v21 }
0x2684   :  { %v6215_v22 = vadd.f32 %v6212_v29, %v6203_v6  ;;  %v6223_v47 = vadd.f32 %v6221_v43, %v6212_v29 }
0x2685   :  { %v6195_v7 = vpop.permute.xlu0 %6194 }
0x2686   :  { %v6202_v11 = vmul.f32 %v6195_v7, %v6158_v38  ;;  %v6207_v20 = vpop.permute.xlu1 %6206  ;;  %v6217_v16 = vmax.f32 %v6215_v22, 0.0  ;;  %v6220_v60 = vmul.f32 %v6195_v7, %v6162_v40  ;;  %v6225_v2 = vmax.f32 %v6223_v47, 0.0 }
0x2688   :  { %v6214_v51 = vadd.f32 %v6207_v20, %v6202_v11  ;;  %v6222_v19 = vadd.f32 %v6220_v60, %v6207_v20  ;;  %v6219_v1 = vmul.f32 %v10337_v18, %v6217_v16  ;;  %v6227_v10 = vmul.f32 %v10337_v18, %v6225_v2 }
0x268a   :  { %v6216_v44 = vmax.f32 %v6214_v51, 0.0  ;;  %v6224_v5 = vmax.f32 %v6222_v19, 0.0 }
0x268c   :  { %v6218_v61 = vmul.f32 %v10337_v18, %v6216_v44  ;;  %v6226_v55 = vmul.f32 %v10337_v18, %v6224_v5 }
0x268e   :  { %6230 = vrot.lane.b32.xlu1 %v6218_v61, %s8004_s14 }
0x2692   :  { %6232 = vrot.lane.b32.xlu1 %v6219_v1, %s8004_s14 }
0x2696   :  { %6242 = vrot.lane.b32.xlu1 %v6227_v10, %s8004_s14 }
0x269a   :  { %6240 = vrot.lane.b32.xlu1 %v6226_v55, %s8004_s14 }
0x2700   :  { %v6231_v13 = vpop.permute.xlu1 %6230 }
0x2701   :  { %6236 = vst.msk [vmem:[#allocation6] sm:$0xff] %vm5710_vm1, %v6231_v13 }
0x2704   :  { %v6233_v30 = vpop.permute.xlu1 %6232 }
0x2705   :  { %6237 = vst.msk [vmem:[#allocation6 + $0x8] sm:$0x3] %vm5712_vm0, %v6233_v30 }
0x2708   :  { %v6243_v46 = vpop.permute.xlu1 %6242  ;;  %v6400_v34 = vld [vmem:[#allocation6] sm:$0xff] }
0x2709   :  { %6247 = vst.msk [vmem:[#allocation6 + $0x18] sm:$0x3] %vm5712_vm0, %v6243_v46  ;;  %6408 = vrot.lane.b32.xlu1 %v6400_v34, %s7989_s16 }
0x270a   :  { %6252 = vst.msk [vmem:[#allocation2] sm:$0xff] %vm5737_vm4, %v6400_v34 }
0x270c   :  { %v6241_v59 = vpop.permute.xlu1 %6240  ;;  %v6249_v35 = vld [vmem:[#allocation6 + $0x8] sm:$0x3] }
0x270d   :  { %6246 = vst.msk [vmem:[#allocation6 + $0x10] sm:$0xff] %vm5710_vm1, %v6241_v59  ;;  %6384 = vrot.lane.b32.xlu1 %v6400_v34, %s7990_s17  ;;  %v6401_v38 = vld [vmem:[#allocation6 + $0x8] sm:$0x3] }
0x270e   :  { %6253 = vst.msk [vmem:[#allocation2 + $0x18] sm:$0x3] %vm5739_vm3, %v6249_v35  ;;  %v6377_v40 = vld [vmem:[#allocation6 + $0x8] sm:$0x3] }
0x270f   :  { %v6353_v21 = vld [vmem:[#allocation6 + $0x8] sm:$0x3] }
0x2710   :  { %v6251_v23 = vld [vmem:[#allocation6 + $0x18] sm:$0x3]  ;;  %v6329_v42 = vld [vmem:[#allocation6 + $0x8] sm:$0x3] }
0x2711   :  { %6360 = vrot.lane.b32.xlu1 %v6400_v34, %s7998_s27  ;;  %6255 = vst.msk [vmem:[#allocation2 + $0x1c8] sm:$0x3] %vm5739_vm3, %v6251_v23  ;;  %v6403_v52 = vld [vmem:[#allocation6 + $0x18] sm:$0x3]  ;;  %v6305_v45 = vld [vmem:[#allocation6 + $0x8] sm:$0x3] }
0x2712   :  { %v6379_v48 = vld [vmem:[#allocation6 + $0x18] sm:$0x3]  ;;  %v6281_v53 = vld [vmem:[#allocation6 + $0x8] sm:$0x3]  ;;  %v6448_v3 = vld [vmem:[#allocation2] sm:$0xff] }
0x2713   :  { %v6355_v54 = vld [vmem:[#allocation6 + $0x18] sm:$0x3]  ;;  %v6257_v0 = vld [vmem:[#allocation6 + $0x8] sm:$0x3] }
0x2714   :  { %v6402_v36 = vld [vmem:[#allocation6 + $0x10] sm:$0xff]  ;;  %v6331_v62 = vld [vmem:[#allocation6 + $0x18] sm:$0x3]  ;;  %v6425_v31 = vld [vmem:[#allocation6 + $0x8] sm:$0x3] }
0x2715   :  { %6336 = vrot.lane.b32.xlu1 %v6400_v34, %s7999_s28  ;;  %6412 = vrot.lane.b32.xlu0 %v6402_v36, %s7989_s16  ;;  %6254 = vst.msk [vmem:[#allocation2 + $0x1b0] sm:$0xff] %vm5737_vm4, %v6402_v36  ;;  %v6307_v4 = vld [vmem:[#allocation6 + $0x18] sm:$0x3] }
0x2716   :  { %v6283_v12 = vld [vmem:[#allocation6 + $0x18] sm:$0x3] }
0x2717   :  { %v6259_v14 = vld [vmem:[#allocation6 + $0x18] sm:$0x3] }
0x2718   :  { %v6427_v26 = vld [vmem:[#allocation6 + $0x18] sm:$0x3] }
0x2719   :  { %6312 = vrot.lane.b32.xlu1 %v6400_v34, %s8005_s12  ;;  %6388 = vrot.lane.b32.xlu0 %v6402_v36, %s7990_s17 }
0x271d   :  { %6288 = vrot.lane.b32.xlu1 %v6400_v34, %s7970_s21  ;;  %6364 = vrot.lane.b32.xlu0 %v6402_v36, %s7998_s27 }
0x2721   :  { %6410 = vrot.lane.b32.xlu1 %v6401_v38, %s7989_s16  ;;  %6340 = vrot.lane.b32.xlu0 %v6402_v36, %s7999_s28 }
0x2725   :  { %6386 = vrot.lane.b32.xlu1 %v6377_v40, %s7990_s17  ;;  %6316 = vrot.lane.b32.xlu0 %v6402_v36, %s8005_s12 }
0x2729   :  { %6362 = vrot.lane.b32.xlu1 %v6353_v21, %s7998_s27  ;;  %6292 = vrot.lane.b32.xlu0 %v6402_v36, %s7970_s21 }
0x272d   :  { %6338 = vrot.lane.b32.xlu1 %v6329_v42, %s7999_s28  ;;  %6414 = vrot.lane.b32.xlu0 %v6403_v52, %s7989_s16 }
0x2731   :  { %6314 = vrot.lane.b32.xlu1 %v6305_v45, %s8005_s12  ;;  %6390 = vrot.lane.b32.xlu0 %v6379_v48, %s7990_s17 }
0x2735   :  { %6290 = vrot.lane.b32.xlu1 %v6281_v53, %s7970_s21  ;;  %6366 = vrot.lane.b32.xlu0 %v6355_v54, %s7998_s27 }
0x2739   :  { %6266 = vrot.lane.b32.xlu1 %v6257_v0, %s7971_s30  ;;  %6342 = vrot.lane.b32.xlu0 %v6331_v62, %s7999_s28 }
0x273d   :  { %6264 = vrot.lane.b32.xlu1 %v6400_v34, %s7971_s30  ;;  %6318 = vrot.lane.b32.xlu0 %v6307_v4, %s8005_s12 }
0x2741   :  { %6434 = vrot.lane.b32.xlu1 %v6425_v31, %s7988_s13  ;;  %6294 = vrot.lane.b32.xlu0 %v6283_v12, %s7970_s21  ;;  %v6449_v31 = vld [vmem:[#allocation2 + $0x18] sm:$0xff] }
0x2745   :  { %6432 = vrot.lane.b32.xlu1 %v6400_v34, %s7988_s13  ;;  %6270 = vrot.lane.b32.xlu0 %v6259_v14, %s7971_s30 }
0x2749   :  { %6268 = vrot.lane.b32.xlu0 %v6402_v36, %s7971_s30 }
0x274d   :  { %6438 = vrot.lane.b32.xlu0 %v6427_v26, %s7988_s13 }
0x2751   :  { %6436 = vrot.lane.b32.xlu0 %v6402_v36, %s7988_s13 }
0x277b   :  { %v6409_v32 = vpop.permute.xlu1 %6408 }
0x277c   :  { %6420 = vst.msk [vmem:[#allocation2 + $0x150] sm:$0xff] %vm5737_vm4, %v6409_v32 }
0x277f   :  { %v6385_v28 = vpop.permute.xlu1 %6384 }
0x2780   :  { %6396 = vst.msk [vmem:[#allocation2 + $0x120] sm:$0xff] %vm5737_vm4, %v6385_v28 }
0x2783   :  { %v6361_v63 = vpop.permute.xlu1 %6360  ;;  %v6462_v11 = vld [vmem:[#allocation2 + $0x150] sm:$0xff] }
0x2784   :  { %6372 = vst.msk [vmem:[#allocation2 + $0xf0] sm:$0xff] %vm5737_vm4, %v6361_v63  ;;  %v5729_v63 = vld [vmem:[%s10719_s1 + $0x140] sm:$0xff] }
0x2787   :  { %v6413_v37 = vpop.permute.xlu0 %6412  ;;  %v6337_v41 = vpop.permute.xlu1 %6336  ;;  %v6460_v51 = vld [vmem:[#allocation2 + $0x120] sm:$0xff] }
0x2788   :  { %6422 = vst.msk [vmem:[#allocation2 + $0x300] sm:$0xff] %vm5737_vm4, %v6413_v37  ;;  %6348 = vst.msk [vmem:[#allocation2 + $0xc0] sm:$0xff] %vm5737_vm4, %v6337_v41 }
0x278b   :  { %v6389_v58 = vpop.permute.xlu0 %6388  ;;  %v6313_v49 = vpop.permute.xlu1 %6312  ;;  %v6458_v60 = vld [vmem:[#allocation2 + $0xf0] sm:$0xff] }
0x278c   :  { %6398 = vst.msk [vmem:[#allocation2 + $0x2d0] sm:$0xff] %vm5737_vm4, %v6389_v58  ;;  %6324 = vst.msk [vmem:[#allocation2 + $0x90] sm:$0xff] %vm5737_vm4, %v6313_v49  ;;  %v5732_v49 = vld [vmem:[%s10719_s1 + $0x158] sm:$0x3] }
0x278f   :  { %v6365_v50 = vpop.permute.xlu0 %6364  ;;  %v6289_v56 = vpop.permute.xlu1 %6288  ;;  %v6456_v5 = vld [vmem:[#allocation2 + $0xc0] sm:$0xff] }
0x2790   :  { %6374 = vst.msk [vmem:[#allocation2 + $0x2a0] sm:$0xff] %vm5737_vm4, %v6365_v50  ;;  %6300 = vst.msk [vmem:[#allocation2 + $0x60] sm:$0xff] %vm5737_vm4, %v6289_v56  ;;  %v6561_v10 = vld [vmem:[#allocation2 + $0x300] sm:$0xff]  ;;  %v5731_v50 = vld [vmem:[%s10719_s1 + $0x150] sm:$0x3] }
0x2793   :  { %v6341_v27 = vpop.permute.xlu0 %6340  ;;  %v6411_v33 = vpop.permute.xlu1 %6410  ;;  %v6454_v34 = vld [vmem:[#allocation2 + $0x90] sm:$0xff] }
0x2794   :  { %6350 = vst.msk [vmem:[#allocation2 + $0x270] sm:$0xff] %vm5737_vm4, %v6341_v27  ;;  %v6559_v59 = vld [vmem:[#allocation2 + $0x2d0] sm:$0xff] }
0x2795   :  { %6421 = vst.msk [vmem:[#allocation2 + $0x168] sm:$0x3] %vm5739_vm3, %v6411_v33  ;;  %v6548_v33 = vld [vmem:[#allocation2 + $0x1c8] sm:$0xff] }
0x2797   :  { %v6317_v8 = vpop.permute.xlu0 %6316  ;;  %v6387_v29 = vpop.permute.xlu1 %6386  ;;  %v6452_v40 = vld [vmem:[#allocation2 + $0x60] sm:$0xff] }
0x2798   :  { %6326 = vst.msk [vmem:[#allocation2 + $0x240] sm:$0xff] %vm5737_vm4, %v6317_v8  ;;  %v6557_v21 = vld [vmem:[#allocation2 + $0x2a0] sm:$0xff]  ;;  %v6547_v8 = vld [vmem:[#allocation2 + $0x1b0] sm:$0xff] }
0x2799   :  { %6397 = vst.msk [vmem:[#allocation2 + $0x138] sm:$0x3] %vm5739_vm3, %v6387_v29 }
0x279b   :  { %v6293_v39 = vpop.permute.xlu0 %6292  ;;  %v6363_v6 = vpop.permute.xlu1 %6362  ;;  %v6555_v53 = vld [vmem:[#allocation2 + $0x270] sm:$0xff] }
0x279c   :  { %v6463_v7 = vld [vmem:[#allocation2 + $0x168] sm:$0xff]  ;;  %6302 = vst.msk [vmem:[#allocation2 + $0x210] sm:$0xff] %vm5737_vm4, %v6293_v39 }
0x279d   :  { %6373 = vst.msk [vmem:[#allocation2 + $0x108] sm:$0x3] %vm5739_vm3, %v6363_v6  ;;  %6473 = vmatpush1.msra.mxu0 %v6463_v7 }
0x279e   :  { %6474 = vmatprep.subr.mxu0 %v10274_v9 }
0x279f   :  { %6475 = vmatpush1.msra.mxu0 %v6462_v11  ;;  %v6415_v20 = vpop.permute.xlu0 %6414  ;;  %v6339_v22 = vpop.permute.xlu1 %6338  ;;  %v6553_v12 = vld [vmem:[#allocation2 + $0x240] sm:$0xff] }
0x27a0   :  { %6476 = vmatprep.subr.mxu0 %v10274_v9  ;;  %v6461_v43 = vld [vmem:[#allocation2 + $0x138] sm:$0xff]  ;;  %6423 = vst.msk [vmem:[#allocation2 + $0x318] sm:$0x3] %vm5739_vm3, %v6415_v20  ;;  %6349 = vst.msk [vmem:[#allocation2 + $0xd8] sm:$0x3] %vm5739_vm3, %v6339_v22 }
0x27a1   :  { %6477 = vmatpush1.msra.mxu0 %v6461_v43 }
0x27a2   :  { %6478 = vmatprep.subr.mxu0 %v10274_v9 }
0x27a3   :  { %6479 = vmatpush1.msra.mxu0 %v6460_v51  ;;  %v6391_v44 = vpop.permute.xlu0 %6390  ;;  %v6315_v16 = vpop.permute.xlu1 %6314  ;;  %v6551_v28 = vld [vmem:[#allocation2 + $0x210] sm:$0xff] }
0x27a4   :  { %6480 = vmatprep.subr.mxu0 %v10274_v9  ;;  %v6459_v47 = vld [vmem:[#allocation2 + $0x108] sm:$0xff]  ;;  %6399 = vst.msk [vmem:[#allocation2 + $0x2e8] sm:$0x3] %vm5739_vm3, %v6391_v44  ;;  %6325 = vst.msk [vmem:[#allocation2 + $0xa8] sm:$0x3] %vm5739_vm3, %v6315_v16 }
0x27a5   :  { %6481 = vmatpush1.msra.mxu0 %v6459_v47 }
0x27a6   :  { %6482 = vmatprep.subr.mxu0 %v10274_v9 }
0x27a7   :  { %6483 = vmatpush1.msra.mxu0 %v6458_v60  ;;  %v6367_v61 = vpop.permute.xlu0 %6366  ;;  %v6291_v2 = vpop.permute.xlu1 %6290  ;;  %v6457_v19 = vld [vmem:[#allocation2 + $0xd8] sm:$0xff] }
0x27a8   :  { %6484 = vmatprep.subr.mxu0 %v10274_v9  ;;  %v6562_v1 = vld [vmem:[#allocation2 + $0x318] sm:$0xff]  ;;  %6375 = vst.msk [vmem:[#allocation2 + $0x2b8] sm:$0x3] %vm5739_vm3, %v6367_v61  ;;  %6301 = vst.msk [vmem:[#allocation2 + $0x78] sm:$0x3] %vm5739_vm3, %v6291_v2 }
0x27a9   :  { %6485 = vmatpush1.msra.mxu0 %v6457_v19  ;;  %6566 = vmatpush1.msra.mxu1 %v6562_v1 }
0x27aa   :  { %6486 = vmatprep.subr.mxu0 %v10274_v9  ;;  %6567 = vmatprep.subr.mxu1 %v10274_v9 }
0x27ab   :  { %6487 = vmatpush1.msra.mxu0 %v6456_v5  ;;  %6568 = vmatpush1.msra.mxu1 %v6561_v10  ;;  %v6343_v55 = vpop.permute.xlu0 %6342  ;;  %v6267_v13 = vpop.permute.xlu1 %6266  ;;  %v6455_v30 = vld [vmem:[#allocation2 + $0xa8] sm:$0xff] }
0x27ac   :  { %6569 = vmatprep.subr.mxu1 %v10274_v9  ;;  %6488 = vmatprep.subr.mxu0 %v10274_v9  ;;  %v6560_v46 = vld [vmem:[#allocation2 + $0x2e8] sm:$0xff]  ;;  %6351 = vst.msk [vmem:[#allocation2 + $0x288] sm:$0x3] %vm5739_vm3, %v6343_v55  ;;  %6277 = vst.msk [vmem:[#allocation2 + $0x48] sm:$0x3] %vm5739_vm3, %v6267_v13 }
0x27ad   :  { %6489 = vmatpush1.msra.mxu0 %v6455_v30  ;;  %6570 = vmatpush1.msra.mxu1 %v6560_v46 }
0x27ae   :  { %6490 = vmatprep.subr.mxu0 %v10274_v9  ;;  %6571 = vmatprep.subr.mxu1 %v10274_v9 }
0x27af   :  { %6491 = vmatpush1.msra.mxu0 %v6454_v34  ;;  %6572 = vmatpush1.msra.mxu1 %v6559_v59  ;;  %v6319_v35 = vpop.permute.xlu0 %6318  ;;  %v6265_v23 = vpop.permute.xlu1 %6264  ;;  %v6453_v36 = vld [vmem:[#allocation2 + $0x78] sm:$0xff] }
0x27b0   :  { %6573 = vmatprep.subr.mxu1 %v10274_v9  ;;  %6492 = vmatprep.subr.mxu0 %v10274_v9  ;;  %v6558_v38 = vld [vmem:[#allocation2 + $0x2b8] sm:$0xff]  ;;  %6327 = vst.msk [vmem:[#allocation2 + $0x258] sm:$0x3] %vm5739_vm3, %v6319_v35 }
0x27b1   :  { %6276 = vst.msk [vmem:[#allocation2 + $0x30] sm:$0xff] %vm5737_vm4, %v6265_v23  ;;  %6493 = vmatpush1.msra.mxu0 %v6453_v36  ;;  %6574 = vmatpush1.msra.mxu1 %v6558_v38 }
0x27b2   :  { %6494 = vmatprep.subr.mxu0 %v10274_v9  ;;  %6575 = vmatprep.subr.mxu1 %v10274_v9 }
0x27b3   :  { %6495 = vmatpush1.msra.mxu0 %v6452_v40  ;;  %6576 = vmatpush1.msra.mxu1 %v6557_v21  ;;  %v6295_v42 = vpop.permute.xlu0 %6294  ;;  %v6435_v52 = vpop.permute.xlu1 %6434  ;;  %v6451_v45 = vld [vmem:[#allocation2 + $0x48] sm:$0xff] }
0x27b4   :  { %6577 = vmatprep.subr.mxu1 %v10274_v9  ;;  %6496 = vmatprep.subr.mxu0 %v10274_v9  ;;  %v6556_v48 = vld [vmem:[#allocation2 + $0x288] sm:$0xff]  ;;  %6303 = vst.msk [vmem:[#allocation2 + $0x228] sm:$0x3] %vm5739_vm3, %v6295_v42  ;;  %6445 = vst.msk [vmem:[#allocation2 + $0x198] sm:$0x3] %vm5739_vm3, %v6435_v52 }
0x27b5   :  { %6497 = vmatpush1.msra.mxu0 %v6451_v45  ;;  %6578 = vmatpush1.msra.mxu1 %v6556_v48 }
0x27b6   :  { %6579 = vmatprep.subr.mxu1 %v10274_v9  ;;  %6498 = vmatprep.subr.mxu0 %v10274_v9 }
0x27b7   :  { %6580 = vmatpush1.msra.mxu1 %v6555_v53  ;;  %v6271_v54 = vpop.permute.xlu0 %6270  ;;  %v6433_v0 = vpop.permute.xlu1 %6432  ;;  %v6554_v4 = vld [vmem:[#allocation2 + $0x258] sm:$0xff] }
0x27b8   :  { %6581 = vmatprep.subr.mxu1 %v10274_v9  ;;  %v6450_v62 = vld [vmem:[#allocation2 + $0x30] sm:$0xff]  ;;  %6279 = vst.msk [vmem:[#allocation2 + $0x1f8] sm:$0x3] %vm5739_vm3, %v6271_v54 }
0x27b9   :  { %6444 = vst.msk [vmem:[#allocation2 + $0x180] sm:$0xff] %vm5737_vm4, %v6433_v0  ;;  %6499 = vmatpush1.msra.mxu0 %v6450_v62  ;;  %6582 = vmatpush1.msra.mxu1 %v6554_v4 }
0x27ba   :  { %6500 = vmatprep.subr.mxu0 %v10274_v9  ;;  %6583 = vmatprep.subr.mxu1 %v10274_v9 }
0x27bb   :  { %6501 = vmatpush1.msra.mxu0 %v6449_v31  ;;  %6584 = vmatpush1.msra.mxu1 %v6553_v12  ;;  %v6269_v14 = vpop.permute.xlu0 %6268  ;;  %v6552_v26 = vld [vmem:[#allocation2 + $0x228] sm:$0xff]  ;;  %v6465_v32 = vld [vmem:[#allocation2 + $0x198] sm:$0xff]  ;;  %v8008_v12 = vmov 12  }
0x27bc   :  { %6585 = vmatprep.subr.mxu1 %v10274_v9  ;;  %6502 = vmatprep.subr.mxu0 %v10274_v9  ;;  %6278 = vst.msk [vmem:[#allocation2 + $0x1e0] sm:$0xff] %vm5737_vm4, %v6269_v14 }
0x27bd   :  { %6503 = vmatpush1.msra.mxu0 %v6448_v3  ;;  %6586 = vmatpush1.msra.mxu1 %v6552_v26 }
0x27be   :  { %6532 = vmatprep.subr.mxu0 %v10274_v9  ;;  %6587 = vmatprep.subr.mxu1 %v10274_v9 }
0x27bf   :  { %6533 = vmatpush2.msra.mxu0 %v6465_v32  ;;  %6588 = vmatpush1.msra.mxu1 %v6551_v28  ;;  %v6439_v37 = vpop.permute.xlu0 %6438  ;;  %v6550_v58 = vld [vmem:[#allocation2 + $0x1f8] sm:$0xff] }
0x27c0   :  { %6589 = vmatprep.subr.mxu1 %v10274_v9  ;;  %6534 = vmatprep.subr.mxu0 %v10274_v9  ;;  %v6464_v41 = vld [vmem:[#allocation2 + $0x180] sm:$0xff]  ;;  %6447 = vst.msk [vmem:[#allocation2 + $0x348] sm:$0x3] %vm5739_vm3, %v6439_v37 }
0x27c1   :  { %6535 = vmatpush2.msra.mxu0 %v6464_v41  ;;  %6590 = vmatpush1.msra.mxu1 %v6550_v58 }
0x27c2   :  { %6591 = vmatprep.subr.mxu1 %v10274_v9  ;;  %6537 = vmatmul.mubr.f32.vlgmr.msra.gmra.mxu0 %v5729_v63 }
0x27c3   :  { %7422 = vmatprep.mubr.msk.f32.mxu0 %vm1564_vm2, %v5732_v49  ;;  %7025 = vmatprep.subr.mxu0 %v10274_v9  ;;  %v6437_v56 = vpop.permute.xlu0 %6436  ;;  %v6549_v27 = vld [vmem:[#allocation2 + $0x1e0] sm:$0xff] }
0x27c4   :  { %6446 = vst.msk [vmem:[#allocation2 + $0x330] sm:$0xff] %vm5737_vm4, %v6437_v56  ;;  %6592 = vmatpush1.msra.mxu1 %v6549_v27  ;;  %7894 = vset.pattern.permute.xlu0 %v8008_v12 }
0x27c5   :  { %6593 = vmatprep.subr.mxu1 %v10274_v9  ;;  %7895 = vset.pattern.permute.xlu1 %v8008_v12 }
0x27c6   :  { %6542 = vmatmul.mubr.f32.gmra.mxu0 %v5731_v50  ;;  %6594 = vmatpush1.msra.mxu1 %v6548_v33 }
0x27c7   :  { %6595 = vmatprep.subr.mxu1 %v10274_v9  ;;  %v6564_v29 = vld [vmem:[#allocation2 + $0x348] sm:$0xff] }
0x27c8   :  { %6596 = vmatpush1.msra.mxu1 %v6547_v8 }
0x27c9   :  { %6625 = vmatprep.subr.mxu1 %v10274_v9 }
0x27ca   :  { %6626 = vmatpush2.msra.mxu1 %v6564_v29  ;;  %v8009_v29 = vmov 20  }
0x27cb   :  { %6627 = vmatprep.subr.mxu1 %v10274_v9  ;;  %v6563_v39 = vld [vmem:[#allocation2 + $0x330] sm:$0xff] }
0x27cc   :  { %6628 = vmatpush2.msra.mxu1 %v6563_v39 }
0x27cd   :  { %6630 = vmatmul.mubr.f32.vlgmr.msra.gmra.mxu1 %v5729_v63 }
0x27ce   :  { %7424 = vmatprep.mubr.msk.f32.mxu1 %vm1564_vm2, %v5732_v49 }
0x27d1   :  { %6635 = vmatmul.mubr.f32.gmra.mxu1 %v5731_v50  ;;  %v6641_v50 = vld [vmem:[%s10720_s2 + $0x8] sm:$0x3] }
0x2882   :  { %v6538_v6 = vpop.f32.mrf.mxu0 }
0x2883   :  { %v6647_v2 = vmul.f32 %v10337_v18, %v6538_v6 }
0x2884   :  { %v6540_v7 = vpop.f32.mrf.mxu0 }
0x2885   :  { %v6649_v1 = vsel %vm5737_vm4, %v6647_v2, 0.0 }
0x2886   :  { %v6543_v11 = vpop.f32.mrf.mxu0 }
0x2887   :  { %v6648_v20 = vmul.f32 %v10337_v18, %v6543_v11 }
0x2888   :  { %v6545_v22 = vpop.f32.mrf.mxu0 }
0x2889   :  { %v6652_v43 = vsel %vm5739_vm3, %v6648_v20, 0.0 }
0x288a   :  { %6653 = vadd.xlane.f32.xlu1 %v6652_v43 }
0x288d   :  { %v6631_v51 = vpop.f32.mrf.mxu1 }
0x288e   :  { %v6657_v44 = vmul.f32 %v10337_v18, %v6631_v51 }
0x288f   :  { %v6633_v16 = vpop.f32.mrf.mxu1 }
0x2890   :  { %v6659_v9 = vsel %vm5737_vm4, %v6657_v44, 0.0 }
0x2891   :  { %v6636_v47 = vpop.f32.mrf.mxu1  ;;  %6660 = vadd.xlane.f32.xlu1 %v6659_v9 }
0x2892   :  { %v6658_v60 = vmul.f32 %v10337_v18, %v6636_v47 }
0x2893   :  { %v6638_v61 = vpop.f32.mrf.mxu1 }
0x2894   :  { %v6662_v19 = vsel %vm5739_vm3, %v6658_v60, 0.0 }
0x2895   :  { %6663 = vadd.xlane.f32.xlu0 %v6662_v19 }
0x2899   :  { %6650 = vadd.xlane.f32.xlu0 %v6649_v1 }
0x2913   :  { %v6654_v5 = vpop.xlane.xlu1 %6653 }
0x291a   :  { %v6661_v30 = vpop.xlane.xlu1 %6660 }
0x291e   :  { %v6664_v10 = vpop.xlane.xlu0 %6663 }
0x291f   :  { %v6666_v55 = vadd.f32 %v6664_v10, %v6654_v5 }
0x2921   :  { %v6668_v13 = vmul.f32 0.5, %v6666_v55 }
0x2922   :  { %v6651_v46 = vpop.xlane.xlu0 %6650 }
0x2923   :  { %v6670_v34 = vsub.f32 %v6543_v11, %v6668_v13  ;;  %v6674_v59 = vsub.f32 %v6636_v47, %v6668_v13  ;;  %v6665_v35 = vadd.f32 %v6661_v30, %v6651_v46  ;;  %v8010_v46 = vmov 4  }
0x2925   :  { %v6672_v23 = vmul.f32 %v10337_v18, %v6670_v34  ;;  %v10506_v36 = vmul.f32 %v10337_v18, %v6674_v59  ;;  %v6667_v38 = vmul.f32 0.5, %v6665_v35 }
0x2927   :  { %v6669_v40 = vsub.f32 %v6538_v6, %v6667_v38  ;;  %v6673_v21 = vsub.f32 %v6631_v51, %v6667_v38  ;;  %v6688_v42 = vmul.f32 %v10506_v36, %v10506_v36  ;;  %v6678_v52 = vmul.f32 %v6672_v23, %v6672_v23 }
0x2929   :  { %v6671_v45 = vmul.f32 %v10337_v18, %v6669_v40  ;;  %v10512_v48 = vmul.f32 %v10337_v18, %v6673_v21  ;;  %v6692_v53 = vsel %vm5739_vm3, %v6688_v42, 0.0  ;;  %v6682_v54 = vsel %vm5739_vm3, %v6678_v52, 0.0 }
0x292a   :  { %6693 = vadd.xlane.f32.xlu1 %v6692_v53  ;;  %6683 = vadd.xlane.f32.xlu0 %v6682_v54 }
0x292b   :  { %v6687_v0 = vmul.f32 %v10512_v48, %v10512_v48  ;;  %v6677_v62 = vmul.f32 %v6671_v45, %v6671_v45 }
0x292d   :  { %v6689_v4 = vsel %vm5737_vm4, %v6687_v0, 0.0  ;;  %v6679_v31 = vsel %vm5737_vm4, %v6677_v62, 0.0 }
0x292e   :  { %6690 = vadd.xlane.f32.xlu1 %v6689_v4  ;;  %6680 = vadd.xlane.f32.xlu0 %v6679_v31 }
0x29b3   :  { %v6684_v14 = vpop.xlane.xlu0 %6683  ;;  %v6694_v3 = vpop.xlane.xlu1 %6693 }
0x29b4   :  { %v6696_v26 = vadd.f32 %v6694_v3, %v6684_v14  ;;  %v10578_v14 = vld [vmem:[#allocation2 + $0xe0] sm:$0xff] }
0x29b6   :  { %v6698_v32 = vmul.f32 0.5, %v6696_v26 }
0x29b7   :  { %v6681_v28 = vpop.xlane.xlu0 %6680  ;;  %v6691_v63 = vpop.xlane.xlu1 %6690 }
0x29b8   :  { %v6700_v37 = vadd.f32 1e-05, %v6698_v32  ;;  %v6695_v41 = vadd.f32 %v6691_v63, %v6681_v28 }
0x29ba   :  { %7949 = vrsqrt.f32 %v6700_v37  ;;  %v6697_v58 = vmul.f32 0.5, %v6695_v41 }
0x29bc   :  { %v6699_v49 = vadd.f32 1e-05, %v6697_v58 }
0x29be   :  { %7951 = vrsqrt.f32 %v6699_v49 }
0x29c7   :  { %v7950_v56 = vpop.eup %7949 }
0x29c8   :  { %v6704_v27 = vmul.f32 %v7950_v56, %v6641_v50 }
0x29ca   :  { %6712 = vperm.xlu0 %7894, %v6704_v27  }
0x29cb   :  { %v7952_v33 = vpop.eup %7951 }
0x29cc   :  { %v6703_v8 = vmul.f32 %v7952_v33, %v10361_v57 }
0x29ce   :  { %6707 = vperm.xlu1 %7895, %v6703_v8   ;;  %7897 = vset.pattern.permute.xlu0 %v8010_v46 }
0x29d2   :  { %7896 = vset.pattern.permute.xlu1 %v8009_v29 }
0x29d3   :  { %6724 = vperm.xlu1 %7896, %v6641_v50  }
0x29d7   :  { %6719 = vperm.xlu1 %7896, %v10361_v57  }
0x29db   :  { %7898 = vset.pattern.permute.xlu1 %v8010_v46  ;;  %v7008_v46 = vld [vmem:[%s10721_s3 + $0x1f0] sm:$0x1] }
0x29dc   :  { %7800 = vmatprep.subr.msk.mxu1 %vm7106_vm5, %v7008_v46 }
0x29dd   :  { %7801 = vmatpush3.msk.msra.mxu1 %vm7106_vm5, %v7008_v46 }
0x2a45   :  { %v6713_v6 = vpop.permute.xlu0 %6712 }
0x2a46   :  { %v6716_v7 = vmul.f32 %v6713_v6, %v6672_v23  ;;  %v6732_v35 = vmul.f32 %v6713_v6, %v10506_v36 }
0x2a49   :  { %v6708_v39 = vpop.permute.xlu1 %6707 }
0x2a4a   :  { %v6715_v22 = vmul.f32 %v6708_v39, %v6671_v45  ;;  %v6731_v55 = vmul.f32 %v6708_v39, %v10512_v48  ;;  %v10562_v48 = vld [vmem:[%s10719_s1 + $0x48] sm:$0xff] }
0x2a4b   :  { %7426 = vmatprep.mubr.msk.f32.mxu0 %vm1564_vm2, %v10562_v48 }
0x2a4e   :  { %v6725_v11 = vpop.permute.xlu1 %6724 }
0x2a4f   :  { %v6728_v20 = vadd.f32 %v6725_v11, %v6716_v7  ;;  %v6734_v23 = vadd.f32 %v6732_v35, %v6725_v11 }
0x2a51   :  { %v6730_v43 = vmul.f32 %v10337_v18, %v6728_v20  ;;  %v6736_v21 = vmul.f32 %v10337_v18, %v6734_v23 }
0x2a52   :  { %v6720_v51 = vpop.permute.xlu1 %6719 }
0x2a53   :  { %v6738_v44 = vadd.f32 %v10192_v15, %v6730_v43  ;;  %v6727_v16 = vadd.f32 %v6720_v51, %v6715_v22  ;;  %v6733_v13 = vadd.f32 %v6731_v55, %v6720_v51  ;;  %v6742_v36 = vadd.f32 %v10200_v24, %v6736_v21  ;;  %v7006_v24 = vld [vmem:[%s10720_s2 + $0x8] sm:$0xff] }
0x2a55   :  { %v6740_v9 = vmax.f32 %v6738_v44, 0.0  ;;  %v6729_v47 = vmul.f32 %v10337_v18, %v6727_v16  ;;  %v6735_v34 = vmul.f32 %v10337_v18, %v6733_v13 }
0x2a57   :  { %v6737_v60 = vadd.f32 %v6729_v47, %v10196_v17  ;;  %6749 = vrot.lane.b32.xlu1 %v6740_v9, %s8004_s14  ;;  %v6741_v38 = vadd.f32 %v6735_v34, %v10204_v25  ;;  %v6744_v25 = vmax.f32 %v6742_v36, 0.0 }
0x2a59   :  { %v6739_v61 = vmax.f32 %v6737_v60, 0.0  ;;  %v6743_v42 = vmax.f32 %v6741_v38, 0.0 }
0x2a5b   :  { %6747 = vrot.lane.b32.xlu1 %v6739_v61, %s8004_s14 }
0x2ac9   :  { %v6750_v2 = vpop.permute.xlu1 %6749 }
0x2aca   :  { %6754 = vst.msk [vmem:[#allocation6 + $0x8] sm:$0x3] %vm5712_vm0, %v6750_v2  ;;  %v10612_v2 = vld [vmem:[%s10719_s1 + $0x40] sm:$0xff] }
0x2acd   :  { %v6748_v19 = vpop.permute.xlu1 %6747 }
0x2ace   :  { %6753 = vst.msk [vmem:[#allocation6] sm:$0xff] %vm5710_vm1, %v6748_v19 }
0x2ad1   :  { %v6770_v1 = vld [vmem:[#allocation6 + $0x8] sm:$0x3] }
0x2ad2   :  { %6774 = vst.msk [vmem:[#allocation2 + $0x18] sm:$0x3] %vm5739_vm3, %v6770_v1  ;;  %v6922_v17 = vld [vmem:[#allocation6 + $0x8] sm:$0x3] }
0x2ad3   :  { %v6898_v5 = vld [vmem:[#allocation6 + $0x8] sm:$0x3] }
0x2ad4   :  { %v6874_v10 = vld [vmem:[#allocation6 + $0x8] sm:$0x3] }
0x2ad5   :  { %v6921_v15 = vld [vmem:[#allocation6] sm:$0xff]  ;;  %v6850_v30 = vld [vmem:[#allocation6 + $0x8] sm:$0x3] }
0x2ad6   :  { %6929 = vrot.lane.b32.xlu1 %v6921_v15, %s7989_s16  ;;  %6905 = vrot.lane.b32.xlu0 %v6921_v15, %s7990_s17  ;;  %6773 = vst.msk [vmem:[#allocation2] sm:$0xff] %vm5737_vm4, %v6921_v15  ;;  %v6826_v59 = vld [vmem:[#allocation6 + $0x8] sm:$0x3] }
0x2ad7   :  { %v6802_v40 = vld [vmem:[#allocation6 + $0x8] sm:$0x3] }
0x2ad8   :  { %v6778_v52 = vld [vmem:[#allocation6 + $0x8] sm:$0x3] }
0x2ad9   :  { %v6946_v45 = vld [vmem:[#allocation6 + $0x8] sm:$0x3]  ;;  %v6970_v16 = vld [vmem:[#allocation2 + $0x18] sm:$0xff] }
0x2ada   :  { %6931 = vrot.lane.b32.xlu1 %v6922_v17, %s7989_s16  ;;  %6881 = vrot.lane.b32.xlu0 %v6921_v15, %s7998_s27 }
0x2add   :  { %v6969_v9 = vld [vmem:[#allocation2] sm:$0xff] }
0x2ade   :  { %6907 = vrot.lane.b32.xlu1 %v6898_v5, %s7990_s17  ;;  %6857 = vrot.lane.b32.xlu0 %v6921_v15, %s7999_s28  ;;  %v10629_v5 = vld [vmem:[%s10719_s1 + $0x50] sm:$0xff] }
0x2ae2   :  { %6883 = vrot.lane.b32.xlu1 %v6874_v10, %s7998_s27  ;;  %6833 = vrot.lane.b32.xlu0 %v6921_v15, %s8005_s12 }
0x2ae6   :  { %6859 = vrot.lane.b32.xlu1 %v6850_v30, %s7999_s28  ;;  %6809 = vrot.lane.b32.xlu0 %v6921_v15, %s7970_s21 }
0x2aea   :  { %6835 = vrot.lane.b32.xlu1 %v6826_v59, %s8005_s12  ;;  %6785 = vrot.lane.b32.xlu0 %v6921_v15, %s7971_s30  ;;  %v7007_v59 = vld [vmem:[%s10721_s3 + $0x1e8] sm:$0xff] }
0x2aeb   :  { %7802 = vmatprep.subr.mxu1 %v7007_v59 }
0x2aec   :  { %7803 = vmatpush3.msra.mxu1 %v7007_v59 }
0x2aed   :  { %7185 = vmatprep.subr.mxu1 %v10578_v14 }
0x2aee   :  { %6811 = vrot.lane.b32.xlu1 %v6802_v40, %s7970_s21  ;;  %6953 = vrot.lane.b32.xlu0 %v6921_v15, %s7988_s13  ;;  %v10618_v15 = vld [vmem:[%s10719_s1 + $0x58] sm:$0xff] }
0x2af2   :  { %6787 = vrot.lane.b32.xlu1 %v6778_v52, %s7971_s30  ;;  %6757 = vrot.lane.b32.xlu0 %v6743_v42, %s8004_s14 }
0x2af6   :  { %6955 = vrot.lane.b32.xlu1 %v6946_v45, %s7988_s13  ;;  %7011 = vperm.xlu0 %7897, %v10361_v57  }
0x2afa   :  { %6759 = vrot.lane.b32.xlu1 %v6744_v25, %s8004_s14 }
0x2afe   :  { %7016 = vperm.xlu1 %7898, %v7006_v24  }
0x2b48   :  { %v6930_v18 = vpop.permute.xlu1 %6929  ;;  %v6906_v53 = vpop.permute.xlu0 %6905 }
0x2b49   :  { %6941 = vst.msk [vmem:[#allocation2 + $0x150] sm:$0xff] %vm5737_vm4, %v6930_v18  ;;  %6917 = vst.msk [vmem:[#allocation2 + $0x120] sm:$0xff] %vm5737_vm4, %v6906_v53 }
0x2b4c   :  { %v6932_v57 = vpop.permute.xlu1 %6931  ;;  %v6882_v54 = vpop.permute.xlu0 %6881 }
0x2b4d   :  { %6942 = vst.msk [vmem:[#allocation2 + $0x168] sm:$0x3] %vm5739_vm3, %v6932_v57 }
0x2b4e   :  { %6893 = vst.msk [vmem:[#allocation2 + $0xf0] sm:$0xff] %vm5737_vm4, %v6882_v54 }
0x2b50   :  { %v6908_v0 = vpop.permute.xlu1 %6907  ;;  %v6858_v62 = vpop.permute.xlu0 %6857  ;;  %v6983_v3 = vld [vmem:[#allocation2 + $0x150] sm:$0xff]  ;;  %v6981_v63 = vld [vmem:[#allocation2 + $0x120] sm:$0xff] }
0x2b51   :  { %6918 = vst.msk [vmem:[#allocation2 + $0x138] sm:$0x3] %vm5739_vm3, %v6908_v0 }
0x2b52   :  { %6869 = vst.msk [vmem:[#allocation2 + $0xc0] sm:$0xff] %vm5737_vm4, %v6858_v62 }
0x2b54   :  { %v6884_v4 = vpop.permute.xlu1 %6883  ;;  %v6834_v31 = vpop.permute.xlu0 %6833  ;;  %v6984_v12 = vld [vmem:[#allocation2 + $0x168] sm:$0xff] }
0x2b55   :  { %6894 = vst.msk [vmem:[#allocation2 + $0x108] sm:$0x3] %vm5739_vm3, %v6884_v4  ;;  %7026 = vmatpush1.msra.mxu0 %v6984_v12  ;;  %v6979_v49 = vld [vmem:[#allocation2 + $0xf0] sm:$0xff] }
0x2b56   :  { %6845 = vst.msk [vmem:[#allocation2 + $0x90] sm:$0xff] %vm5737_vm4, %v6834_v31  ;;  %7027 = vmatprep.subr.mxu0 %v10578_v14 }
0x2b57   :  { %7028 = vmatpush1.msra.mxu0 %v6983_v3 }
0x2b58   :  { %7029 = vmatprep.subr.mxu0 %v10578_v14  ;;  %v6860_v26 = vpop.permute.xlu1 %6859  ;;  %v6810_v32 = vpop.permute.xlu0 %6809  ;;  %v6982_v28 = vld [vmem:[#allocation2 + $0x138] sm:$0xff] }
0x2b59   :  { %6870 = vst.msk [vmem:[#allocation2 + $0xd8] sm:$0x3] %vm5739_vm3, %v6860_v26  ;;  %7030 = vmatpush1.msra.mxu0 %v6982_v28  ;;  %v6977_v33 = vld [vmem:[#allocation2 + $0xc0] sm:$0xff] }
0x2b5a   :  { %6821 = vst.msk [vmem:[#allocation2 + $0x60] sm:$0xff] %vm5737_vm4, %v6810_v32  ;;  %7031 = vmatprep.subr.mxu0 %v10578_v14 }
0x2b5b   :  { %7032 = vmatpush1.msra.mxu0 %v6981_v63 }
0x2b5c   :  { %v6836_v37 = vpop.permute.xlu1 %6835  ;;  %7033 = vmatprep.subr.mxu0 %v10578_v14  ;;  %v6786_v41 = vpop.permute.xlu0 %6785  ;;  %v6980_v58 = vld [vmem:[#allocation2 + $0x108] sm:$0xff] }
0x2b5d   :  { %6846 = vst.msk [vmem:[#allocation2 + $0xa8] sm:$0x3] %vm5739_vm3, %v6836_v37  ;;  %7034 = vmatpush1.msra.mxu0 %v6980_v58  ;;  %v6975_v6 = vld [vmem:[#allocation2 + $0x90] sm:$0xff] }
0x2b5e   :  { %6797 = vst.msk [vmem:[#allocation2 + $0x30] sm:$0xff] %vm5737_vm4, %v6786_v41  ;;  %7035 = vmatprep.subr.mxu0 %v10578_v14 }
0x2b5f   :  { %7036 = vmatpush1.msra.mxu0 %v6979_v49 }
0x2b60   :  { %v6812_v50 = vpop.permute.xlu1 %6811  ;;  %7037 = vmatprep.subr.mxu0 %v10578_v14  ;;  %v6954_v56 = vpop.permute.xlu0 %6953  ;;  %v6978_v27 = vld [vmem:[#allocation2 + $0xd8] sm:$0xff] }
0x2b61   :  { %6822 = vst.msk [vmem:[#allocation2 + $0x78] sm:$0x3] %vm5739_vm3, %v6812_v50  ;;  %7038 = vmatpush1.msra.mxu0 %v6978_v27  ;;  %v6973_v20 = vld [vmem:[#allocation2 + $0x60] sm:$0xff] }
0x2b62   :  { %6965 = vst.msk [vmem:[#allocation2 + $0x180] sm:$0xff] %vm5737_vm4, %v6954_v56  ;;  %7039 = vmatprep.subr.mxu0 %v10578_v14 }
0x2b63   :  { %7040 = vmatpush1.msra.mxu0 %v6977_v33 }
0x2b64   :  { %v6788_v8 = vpop.permute.xlu1 %6787  ;;  %7041 = vmatprep.subr.mxu0 %v10578_v14  ;;  %v6758_v29 = vpop.permute.xlu0 %6757  ;;  %v6976_v39 = vld [vmem:[#allocation2 + $0xa8] sm:$0xff] }
0x2b65   :  { %6798 = vst.msk [vmem:[#allocation2 + $0x48] sm:$0x3] %vm5739_vm3, %v6788_v8  ;;  %7042 = vmatpush1.msra.mxu0 %v6976_v39  ;;  %v6971_v44 = vld [vmem:[#allocation2 + $0x30] sm:$0xff] }
0x2b66   :  { %6763 = vst.msk [vmem:[#allocation6 + $0x10] sm:$0xff] %vm5710_vm1, %v6758_v29  ;;  %7043 = vmatprep.subr.mxu0 %v10578_v14 }
0x2b67   :  { %7044 = vmatpush1.msra.mxu0 %v6975_v6 }
0x2b68   :  { %v6956_v7 = vpop.permute.xlu1 %6955  ;;  %7045 = vmatprep.subr.mxu0 %v10578_v14  ;;  %v6974_v11 = vld [vmem:[#allocation2 + $0x78] sm:$0xff] }
0x2b69   :  { %6966 = vst.msk [vmem:[#allocation2 + $0x198] sm:$0x3] %vm5739_vm3, %v6956_v7  ;;  %7046 = vmatpush1.msra.mxu0 %v6974_v11  ;;  %v6985_v1 = vld [vmem:[#allocation2 + $0x180] sm:$0xff] }
0x2b6a   :  { %7047 = vmatprep.subr.mxu0 %v10578_v14 }
0x2b6b   :  { %7048 = vmatpush1.msra.mxu0 %v6973_v20 }
0x2b6c   :  { %v6760_v22 = vpop.permute.xlu1 %6759  ;;  %7049 = vmatprep.subr.mxu0 %v10578_v14  ;;  %v6972_v43 = vld [vmem:[#allocation2 + $0x48] sm:$0xff] }
0x2b6d   :  { %v6923_v51 = vld [vmem:[#allocation6 + $0x10] sm:$0xff]  ;;  %6764 = vst.msk [vmem:[#allocation6 + $0x18] sm:$0x3] %vm5712_vm0, %v6760_v22  ;;  %7050 = vmatpush1.msra.mxu0 %v6972_v43 }
0x2b6e   :  { %6775 = vst.msk [vmem:[#allocation2 + $0x1b0] sm:$0xff] %vm5737_vm4, %v6923_v51  ;;  %7051 = vmatprep.subr.mxu0 %v10578_v14 }
0x2b6f   :  { %7052 = vmatpush1.msra.mxu0 %v6971_v44 }
0x2b70   :  { %7053 = vmatprep.subr.mxu0 %v10578_v14  ;;  %v6986_v61 = vld [vmem:[#allocation2 + $0x198] sm:$0xff] }
0x2b71   :  { %7054 = vmatpush1.msra.mxu0 %v6970_v16  ;;  %v10653_v23 = vpop.permute.xlu0 %7011 }
0x2b72   :  { %7055 = vmatprep.subr.mxu0 %v10578_v14 }
0x2b73   :  { %7056 = vmatpush1.msra.mxu0 %v6969_v9 }
0x2b74   :  { %7085 = vmatprep.subr.mxu0 %v10578_v14  ;;  %v6924_v47 = vld [vmem:[#allocation6 + $0x18] sm:$0x3] }
0x2b75   :  { %v6900_v60 = vld [vmem:[#allocation6 + $0x18] sm:$0x3]  ;;  %6935 = vrot.lane.b32.xlu1 %v6924_v47, %s7989_s16  ;;  %7086 = vmatpush2.msra.mxu0 %v6986_v61  ;;  %v6987_v11 = vld [vmem:[#allocation2 + $0x1b0] sm:$0xff] }
0x2b76   :  { %6911 = vrot.lane.b32.xlu0 %v6900_v60, %s7990_s17  ;;  %v6772_v19 = vld [vmem:[#allocation6 + $0x18] sm:$0x3]  ;;  %7087 = vmatprep.subr.mxu0 %v10578_v14 }
0x2b77   :  { %6776 = vst.msk [vmem:[#allocation2 + $0x1c8] sm:$0x3] %vm5739_vm3, %v6772_v19  ;;  %7088 = vmatpush2.msra.mxu0 %v6985_v1  ;;  %v6876_v17 = vld [vmem:[#allocation6 + $0x18] sm:$0x3] }
0x2b78   :  { %7090 = vmatmul.mubr.f32.vlgmr.msra.gmra.mxu0 %v10612_v2  ;;  %v6852_v10 = vld [vmem:[#allocation6 + $0x18] sm:$0x3]  ;;  %7807 = vmatprep.subr.msk.mxu0 %vm7106_vm5, %v7008_v46 }
0x2b79   :  { %6933 = vrot.lane.b32.xlu1 %v6923_v51, %s7989_s16  ;;  %7427 = vmatprep.mubr.msk.f32.mxu0 %vm1564_vm2, %v10618_v15  ;;  %v6828_v55 = vld [vmem:[#allocation6 + $0x18] sm:$0x3]  ;;  %v10651_v35 = vpop.permute.xlu1 %7016 }
0x2b7a   :  { %6887 = vrot.lane.b32.xlu0 %v6876_v17, %s7998_s27  ;;  %v6804_v13 = vld [vmem:[#allocation6 + $0x18] sm:$0x3]  ;;  %7808 = vmatpush3.msk.msra.mxu0 %vm7106_vm5, %v7008_v46 }
0x2b7b   :  { %v6780_v30 = vld [vmem:[#allocation6 + $0x18] sm:$0x3]  ;;  %7809 = vmatprep.subr.mxu0 %v7007_v59 }
0x2b7c   :  { %7095 = vmatmul.mubr.f32.gmra.mxu0 %v10629_v5  ;;  %v6948_v34 = vld [vmem:[#allocation6 + $0x18] sm:$0x3] }
0x2b7d   :  { %6909 = vrot.lane.b32.xlu1 %v6923_v51, %s7990_s17  ;;  %7810 = vmatpush3.msra.mxu0 %v7007_v59 }
0x2b7e   :  { %6863 = vrot.lane.b32.xlu0 %v6852_v10, %s7999_s28  ;;  %v6988_v7 = vld [vmem:[#allocation2 + $0x1c8] sm:$0xff] }
0x2b81   :  { %6885 = vrot.lane.b32.xlu1 %v6923_v51, %s7998_s27 }
0x2b82   :  { %6839 = vrot.lane.b32.xlu0 %v6828_v55, %s8005_s12 }
0x2b85   :  { %6861 = vrot.lane.b32.xlu1 %v6923_v51, %s7999_s28 }
0x2b86   :  { %6815 = vrot.lane.b32.xlu0 %v6804_v13, %s7970_s21 }
0x2b89   :  { %6837 = vrot.lane.b32.xlu1 %v6923_v51, %s8005_s12 }
0x2b8a   :  { %6791 = vrot.lane.b32.xlu0 %v6780_v30, %s7971_s30 }
0x2b8d   :  { %6813 = vrot.lane.b32.xlu1 %v6923_v51, %s7970_s21 }
0x2b8e   :  { %6959 = vrot.lane.b32.xlu0 %v6948_v34, %s7988_s13 }
0x2b91   :  { %6789 = vrot.lane.b32.xlu1 %v6923_v51, %s7971_s30 }
0x2b95   :  { %6957 = vrot.lane.b32.xlu1 %v6923_v51, %s7988_s13 }
0x2be7   :  { %v6936_v38 = vpop.permute.xlu1 %6935 }
0x2be8   :  { %v6912_v40 = vpop.permute.xlu0 %6911  ;;  %6944 = vst.msk [vmem:[#allocation2 + $0x318] sm:$0x3] %vm5739_vm3, %v6936_v38 }
0x2be9   :  { %6920 = vst.msk [vmem:[#allocation2 + $0x2e8] sm:$0x3] %vm5739_vm3, %v6912_v40 }
0x2beb   :  { %v6934_v42 = vpop.permute.xlu1 %6933 }
0x2bec   :  { %v6888_v21 = vpop.permute.xlu0 %6887  ;;  %6943 = vst.msk [vmem:[#allocation2 + $0x300] sm:$0xff] %vm5737_vm4, %v6934_v42 }
0x2bed   :  { %6896 = vst.msk [vmem:[#allocation2 + $0x2b8] sm:$0x3] %vm5739_vm3, %v6888_v21 }
0x2bef   :  { %v6910_v36 = vpop.permute.xlu1 %6909  ;;  %v7002_v63 = vld [vmem:[#allocation2 + $0x318] sm:$0xff] }
0x2bf0   :  { %v6864_v52 = vpop.permute.xlu0 %6863  ;;  %6919 = vst.msk [vmem:[#allocation2 + $0x2d0] sm:$0xff] %vm5737_vm4, %v6910_v36  ;;  %v7000_v41 = vld [vmem:[#allocation2 + $0x2e8] sm:$0xff] }
0x2bf1   :  { %6872 = vst.msk [vmem:[#allocation2 + $0x288] sm:$0x3] %vm5739_vm3, %v6864_v52 }
0x2bf3   :  { %v6886_v25 = vpop.permute.xlu1 %6885  ;;  %v7001_v37 = vld [vmem:[#allocation2 + $0x300] sm:$0xff] }
0x2bf4   :  { %v6840_v45 = vpop.permute.xlu0 %6839  ;;  %6895 = vst.msk [vmem:[#allocation2 + $0x2a0] sm:$0xff] %vm5737_vm4, %v6886_v25  ;;  %v6998_v49 = vld [vmem:[#allocation2 + $0x2b8] sm:$0xff] }
0x2bf5   :  { %6848 = vst.msk [vmem:[#allocation2 + $0x258] sm:$0x3] %vm5739_vm3, %v6840_v45 }
0x2bf7   :  { %v6862_v18 = vpop.permute.xlu1 %6861  ;;  %v6999_v58 = vld [vmem:[#allocation2 + $0x2d0] sm:$0xff] }
0x2bf8   :  { %v6816_v24 = vpop.permute.xlu0 %6815  ;;  %6871 = vst.msk [vmem:[#allocation2 + $0x270] sm:$0xff] %vm5737_vm4, %v6862_v18 }
0x2bf9   :  { %6824 = vst.msk [vmem:[#allocation2 + $0x228] sm:$0x3] %vm5739_vm3, %v6816_v24 }
0x2bfb   :  { %v6838_v57 = vpop.permute.xlu1 %6837  ;;  %v6997_v50 = vld [vmem:[#allocation2 + $0x2a0] sm:$0xff] }
0x2bfc   :  { %v6792_v53 = vpop.permute.xlu0 %6791  ;;  %6847 = vst.msk [vmem:[#allocation2 + $0x240] sm:$0xff] %vm5737_vm4, %v6838_v57  ;;  %v6994_v27 = vld [vmem:[#allocation2 + $0x258] sm:$0xff] }
0x2bfd   :  { %6800 = vst.msk [vmem:[#allocation2 + $0x1f8] sm:$0x3] %vm5739_vm3, %v6792_v53 }
0x2bff   :  { %v6814_v0 = vpop.permute.xlu1 %6813  ;;  %v6995_v56 = vld [vmem:[#allocation2 + $0x270] sm:$0xff] }
0x2c00   :  { %v6960_v54 = vpop.permute.xlu0 %6959  ;;  %6823 = vst.msk [vmem:[#allocation2 + $0x210] sm:$0xff] %vm5737_vm4, %v6814_v0  ;;  %v6992_v8 = vld [vmem:[#allocation2 + $0x228] sm:$0xff] }
0x2c01   :  { %6968 = vst.msk [vmem:[#allocation2 + $0x348] sm:$0x3] %vm5739_vm3, %v6960_v54 }
0x2c03   :  { %v6790_v62 = vpop.permute.xlu1 %6789  ;;  %v6993_v33 = vld [vmem:[#allocation2 + $0x240] sm:$0xff] }
0x2c04   :  { %6799 = vst.msk [vmem:[#allocation2 + $0x1e0] sm:$0xff] %vm5737_vm4, %v6790_v62  ;;  %v6990_v39 = vld [vmem:[#allocation2 + $0x1f8] sm:$0xff] }
0x2c07   :  { %v6958_v4 = vpop.permute.xlu1 %6957  ;;  %v6991_v29 = vld [vmem:[#allocation2 + $0x210] sm:$0xff] }
0x2c08   :  { %6967 = vst.msk [vmem:[#allocation2 + $0x330] sm:$0xff] %vm5737_vm4, %v6958_v4  ;;  %v7004_v20 = vld [vmem:[#allocation2 + $0x348] sm:$0xff] }
0x2c0b   :  { %v6989_v6 = vld [vmem:[#allocation2 + $0x1e0] sm:$0xff] }
0x2c0f   :  { %v7003_v22 = vld [vmem:[#allocation2 + $0x330] sm:$0xff] }
0x2c38   :  { %v7091_v31 = vpop.f32.mrf.mxu0 }
0x2c39   :  { %v7092_v12 = vadd.f32 %v7091_v31, %v10653_v23 }
0x2c3a   :  { %v7093_v3 = vpop.f32.mrf.mxu0 }
0x2c3b   :  { %7804 = vmatprep.mubr.msk.f32.mxu1 %vm5737_vm4, %v7092_v12 }
0x2c3c   :  { %v7096_v26 = vpop.f32.mrf.mxu0 }
0x2c3d   :  { %v7097_v32 = vadd.f32 %v7096_v26, %v10651_v35 }
0x2c3e   :  { %v7098_v28 = vpop.f32.mrf.mxu0 }
0x2c3f   :  { %7805 = vmatmul.mubr.msk.f32.vlgmr.msra.gmra.mxu1 %vm5737_vm4, %v7097_v32 }
0x2c40   :  { %7186 = vmatpush1.msra.mxu1 %v7002_v63  ;;  %7431 = vmatprep.mubr.msk.f32.mxu1 %vm1564_vm2, %v10562_v48  ;;  %v6996_v48 = vld [vmem:[#allocation2 + $0x288] sm:$0xff] }
0x2c41   :  { %7187 = vmatprep.subr.mxu1 %v10578_v14 }
0x2c42   :  { %7188 = vmatpush1.msra.mxu1 %v7001_v37 }
0x2c43   :  { %7189 = vmatprep.subr.mxu1 %v10578_v14 }
0x2c44   :  { %7190 = vmatpush1.msra.mxu1 %v7000_v41 }
0x2c45   :  { %7191 = vmatprep.subr.mxu1 %v10578_v14 }
0x2c46   :  { %7192 = vmatpush1.msra.mxu1 %v6999_v58 }
0x2c47   :  { %7193 = vmatprep.subr.mxu1 %v10578_v14 }
0x2c48   :  { %7194 = vmatpush1.msra.mxu1 %v6998_v49 }
0x2c49   :  { %7195 = vmatprep.subr.mxu1 %v10578_v14 }
0x2c4a   :  { %7196 = vmatpush1.msra.mxu1 %v6997_v50 }
0x2c4b   :  { %7197 = vmatprep.subr.mxu1 %v10578_v14 }
0x2c4c   :  { %7198 = vmatpush1.msra.mxu1 %v6996_v48 }
0x2c4d   :  { %7199 = vmatprep.subr.mxu1 %v10578_v14 }
0x2c4e   :  { %7200 = vmatpush1.msra.mxu1 %v6995_v56 }
0x2c4f   :  { %7201 = vmatprep.subr.mxu1 %v10578_v14 }
0x2c50   :  { %7202 = vmatpush1.msra.mxu1 %v6994_v27 }
0x2c51   :  { %7203 = vmatprep.subr.mxu1 %v10578_v14 }
0x2c52   :  { %7204 = vmatpush1.msra.mxu1 %v6993_v33 }
0x2c53   :  { %7205 = vmatprep.subr.mxu1 %v10578_v14 }
0x2c54   :  { %7206 = vmatpush1.msra.mxu1 %v6992_v8 }
0x2c55   :  { %7207 = vmatprep.subr.mxu1 %v10578_v14 }
0x2c56   :  { %7208 = vmatpush1.msra.mxu1 %v6991_v29 }
0x2c57   :  { %7209 = vmatprep.subr.mxu1 %v10578_v14 }
0x2c58   :  { %7210 = vmatpush1.msra.mxu1 %v6990_v39 }
0x2c59   :  { %7211 = vmatprep.subr.mxu1 %v10578_v14 }
0x2c5a   :  { %7212 = vmatpush1.msra.mxu1 %v6989_v6 }
0x2c5b   :  { %7213 = vmatprep.subr.mxu1 %v10578_v14 }
0x2c5c   :  { %7214 = vmatpush1.msra.mxu1 %v6988_v7 }
0x2c5d   :  { %7215 = vmatprep.subr.mxu1 %v10578_v14 }
0x2c5e   :  { %7216 = vmatpush1.msra.mxu1 %v6987_v11 }
0x2c5f   :  { %7245 = vmatprep.subr.mxu1 %v10578_v14 }
0x2c60   :  { %7246 = vmatpush2.msra.mxu1 %v7004_v20 }
0x2c61   :  { %7247 = vmatprep.subr.mxu1 %v10578_v14 }
0x2c62   :  { %7248 = vmatpush2.msra.mxu1 %v7003_v22 }
0x2c63   :  { %7250 = vmatmul.mubr.f32.vlgmr.msra.gmra.mxu1 %v10612_v2 }
0x2c64   :  { %7432 = vmatprep.mubr.msk.f32.mxu1 %vm1564_vm2, %v10618_v15 }
0x2c67   :  { %7255 = vmatmul.mubr.f32.gmra.mxu1 %v10629_v5 }
0x2cff   :  { %v7806_v43 = vpop.f32.mrf.mxu1 }
0x2d00   :  { %7343 = vst.msk [vmem:[%s10722_s4 + $0x8] sm:$0xff] %vm7341_vm6, %v7806_v43 }
0x2d01   :  { %v7176_v51 = vpop.f32.mrf.mxu1 }
0x2d02   :  { %7342 = vst.msk [vmem:[%s10722_s4] sm:$0xff] %vm7341_vm6, %v7176_v51 }
0x2d23   :  { %v7251_v14 = vpop.f32.mrf.mxu1 }
0x2d24   :  { %v7252_v44 = vadd.f32 %v7251_v14, %v10653_v23 }
0x2d25   :  { %v7253_v16 = vpop.f32.mrf.mxu1 }
0x2d26   :  { %7811 = vmatprep.mubr.msk.f32.mxu0 %vm5737_vm4, %v7252_v44 }
0x2d27   :  { %v7256_v9 = vpop.f32.mrf.mxu1 }
0x2d28   :  { %v7257_v47 = vadd.f32 %v7256_v9, %v10651_v35 }
0x2d29   :  { %v7258_v60 = vpop.f32.mrf.mxu1 }
0x2d2a   :  { %7812 = vmatmul.mubr.msk.f32.vlgmr.msra.gmra.mxu0 %vm5737_vm4, %v7257_v47 }
0x2dea   :  { %v7813_v61 = vpop.f32.mrf.mxu0 }
0x2deb   :  { %7437 = vst.msk [vmem:[%s10722_s4 + $0x18] sm:$0xff] %vm7341_vm6, %v7813_v61 }
0x2dec   :  { %v7332_v2 = vpop.f32.mrf.mxu0 }
0x2ded   :  { %7436 = vst.msk [vmem:[%s10722_s4 + $0x10] sm:$0xff] %vm7341_vm6, %v7332_v2 }

</bundles_post_ra>
